<compile_context>
chip_gen: v6e
topology: v6e:2x2x1
jax: 0.10.0
libtpu: 0.0.40
codegen_flags: <defaults>
</compile_context>

<pallas_src>
import functools

import jax
import jax.numpy as jnp
from jax import lax
from jax.experimental import pallas as pl
from jax.experimental.pallas import tpu as pltpu


def _round_up(x, m):
    return -(-x // m) * m


# ---------------------------------------------------------------------------
# Fused, time-chunked Pallas kernel
# ---------------------------------------------------------------------------

def _fused_rvc_kernel(*refs, CHUNK, ROWS, HP, num_layers):
    """One grid step = one (batch-shard, time-chunk) tile of the full forward.

    refs layout:
      [0]                x_ref   (CHUNK*ROWS, IN)     input chunk
      [1 .. 3L]          per layer: wihT (K_l, 4HP), whhT (HP, 4HP), bias (1, 4HP)
      [3L+1, 3L+2]       wfcT (HP, OP), bfc (1, OP)
      [3L+3]             out_ref (CHUNK*ROWS, OP)
      scratch:
      [3L+4]             pg_scr  (CHUNK*ROWS, 4HP)    pre-gate projections
      [3L+5] [3L+6]      act_a / act_b (CHUNK*ROWS, HP)  ping-pong activations
      [3L+7] [3L+8]      h_scr / c_scr (L, ROWS, HP)  recurrent state carry
    """
    L = num_layers
    x_ref = refs[0]
    layer_refs = refs[1:1 + 3 * L]
    wfc_ref = refs[1 + 3 * L]
    bfc_ref = refs[2 + 3 * L]
    out_ref = refs[3 + 3 * L]
    pg_scr = refs[4 + 3 * L]
    act_a = refs[5 + 3 * L]
    act_b = refs[6 + 3 * L]
    h_scr = refs[7 + 3 * L]
    c_scr = refs[8 + 3 * L]

    tc = pl.program_id(1)  # time-chunk index ("arbitrary" axis)

    # Reset the recurrent state at the start of every batch-shard's time sweep.
    @pl.when(tc == 0)
    def _():
        h_scr[...] = jnp.zeros_like(h_scr)
        c_scr[...] = jnp.zeros_like(c_scr)

    unroll = min(CHUNK, 8)   # fixed partial unroll: LLO visibility without vreg blowup
    bufs = (act_a, act_b)

    def sigm(x):  # 1 EUP op (tanh) instead of exp + reciprocal
        return 0.5 * jnp.tanh(0.5 * x) + 0.5

    for l in range(L):
        wih_ref, whh_ref, b_ref = layer_refs[3 * l:3 * l + 3]
        in_val = x_ref[...] if l == 0 else bufs[(l - 1) % 2][...]
        out_buf = bufs[l % 2]       # ping-pong: never read and rewrite the same slab

        # Input projection for ALL steps in the chunk (one MXU slab matmul, hoisted off
        # the serial recurrence path); combined bias broadcast once per layer.
        pg_scr[...] = (
            jnp.dot(in_val, wih_ref[...], preferred_element_type=jnp.float32)
            + b_ref[...]
        )
        whh = whh_ref[...]          # (HP, 4HP), loop-invariant hoist

        def step(t, carry, out_buf=out_buf, whh=whh):
            h, c = carry
            row = pl.multiple_of(t * ROWS, ROWS)          # 8-aligned sublane offset
            gates = pg_scr[pl.ds(row, ROWS), :] + jnp.dot(
                h, whh, preferred_element_type=jnp.float32)         # (ROWS, 4HP)
            # Gate blocks are 128-lane aligned (HP is a multiple of 128).
            i_g = sigm(gates[:, 0 * HP:1 * HP])
            f_g = sigm(gates[:, 1 * HP:2 * HP])
            g_g = jnp.tanh(gates[:, 2 * HP:3 * HP])
            o_g = sigm(gates[:, 3 * HP:4 * HP])
            c_new = f_g * c + i_g * g_g
            h_new = o_g * jnp.tanh(c_new)
            out_buf[pl.ds(row, ROWS), :] = h_new
            return (h_new, c_new)

        h_f, c_f = lax.fori_loop(0, CHUNK, step, (h_scr[l], c_scr[l]), unroll=unroll)
        h_scr[l] = h_f
        c_scr[l] = c_f

    # Final Linear over the whole chunk: lane-dense (OUT padded to 128) MXU matmul+store.
    out_ref[...] = (
        jnp.dot(bufs[(L - 1) % 2][...], wfc_ref[...],
                preferred_element_type=jnp.float32)
        + bfc_ref[...]
    ).astype(out_ref.dtype)


# ---------------------------------------------------------------------------
# Wrappers
# ---------------------------------------------------------------------------

def _vmem_capacity_bytes():
    try:
        return int(pltpu.get_tpu_info().vmem_capacity_bytes)
    except Exception:
        return 64 * 1024 * 1024   # conservative fallback (v7x per-TC VMEM)


def _pick_chunk(T, ROWS, IN, HP, OP, L, budget_bytes, max_chunk):
    f32 = 4
    weights = (IN * 4 * HP + (L - 1) * HP * 4 * HP        # w_ih (layer0 + rest)
               + L * HP * 4 * HP + L * 4 * HP             # w_hh + bias
               + HP * OP + OP) * f32                      # fc
    state = 2 * L * ROWS * HP * f32                       # h/c carry
    # per-time-step chunk cost: pg_scr + two act buffers + double-buffered x/out chunks
    per_step = ROWS * (4 * HP + 2 * HP) * f32 + 2 * ROWS * (IN + OP) * f32
    avail = budget_bytes - weights - state
    chunk = max(1, avail // per_step)
    return int(max(1, min(chunk, T, max_chunk)))


def _fused_pallas_call(x_slab, prepped, *, num_shards, num_chunks, CHUNK, ROWS):
    lstm = prepped["lstm"]
    wfc, bfc = prepped["fc"]
    L = len(lstm)
    HP = lstm[0][1].shape[0]        # whhT is (HP, 4HP)
    OP = wfc.shape[1]
    IN = x_slab.shape[1]

    row_map = lambda b, c: (b * num_chunks + c, 0)
    full = lambda b, c: (0, 0)

    args = [x_slab]
    in_specs = [pl.BlockSpec((CHUNK * ROWS, IN), row_map)]
    for (wih, whh, b) in lstm:
        args += [wih, whh, b]
        in_specs += [pl.BlockSpec(tuple(wih.shape), full),
                     pl.BlockSpec(tuple(whh.shape), full),
                     pl.BlockSpec(tuple(b.shape), full)]
    args += [wfc, bfc]
    in_specs += [pl.BlockSpec(tuple(wfc.shape), full),
                 pl.BlockSpec(tuple(bfc.shape), full)]

    kernel = functools.partial(_fused_rvc_kernel, CHUNK=CHUNK, ROWS=ROWS, HP=HP,
                               num_layers=L)
    cap = _vmem_capacity_bytes()

    return pl.pallas_call(
        kernel,
        out_shape=jax.ShapeDtypeStruct(
            (num_shards * num_chunks * CHUNK * ROWS, OP), jnp.float32),
        grid=(num_shards, num_chunks),
        in_specs=in_specs,
        out_specs=pl.BlockSpec((CHUNK * ROWS, OP), row_map),
        scratch_shapes=[
            pltpu.VMEM((CHUNK * ROWS, 4 * HP), jnp.float32),   # pg_scr
            pltpu.VMEM((CHUNK * ROWS, HP), jnp.float32),       # act_a
            pltpu.VMEM((CHUNK * ROWS, HP), jnp.float32),       # act_b
            pltpu.VMEM((L, ROWS, HP), jnp.float32),            # h carry
            pltpu.VMEM((L, ROWS, HP), jnp.float32),            # c carry
        ],
        compiler_params=pltpu.CompilerParams(
            dimension_semantics=("parallel", "arbitrary"),
            vmem_limit_bytes=int(cap * 0.85),
        ),
    )(*args)


def rvc_forward_pallas(x_btf, prepped, *, out_features, max_chunk=512, num_shards=1):
    """Full RVCNetwork forward. x_btf: (B, T, input_size), batch_first like PyTorch."""
    B, T, IN = x_btf.shape
    lstm = prepped["lstm"]
    wfc, _ = prepped["fc"]
    L = len(lstm)
    HP = lstm[0][1].shape[0]
    OP = wfc.shape[1]

    NS = num_shards
    ROWS = _round_up(-(-B // NS), 8)                      # per-shard padded batch rows
    budget = int(_vmem_capacity_bytes() * 0.7)
    CHUNK = _pick_chunk(T, ROWS, IN, HP, OP, L, budget, max_chunk)
    num_chunks = -(-T // CHUNK)
    T_pad = num_chunks * CHUNK

    x = x_btf.astype(jnp.float32)
    x = jnp.pad(x, ((0, NS * ROWS - B), (0, T_pad - T), (0, 0)))   # (NS*ROWS, T_pad, IN)
    x = x.reshape(NS, ROWS, T_pad, IN).transpose(0, 2, 1, 3)       # (NS, T_pad, ROWS, IN)
    x_slab = x.reshape(NS * T_pad * ROWS, IN)

    out_slab = _fused_pallas_call(x_slab, prepped, num_shards=NS,
                                  num_chunks=num_chunks, CHUNK=CHUNK, ROWS=ROWS)
    out = out_slab.reshape(NS, T_pad, ROWS, OP).transpose(0, 2, 1, 3)
    out = out.reshape(NS * ROWS, T_pad, OP)[:B, :T, :out_features]
    return out                                                     # (B, T, OUT)


def prepare_params(params):
    """One-time prep: transpose weights, combine LSTM biases, lane-pad H / OUT to 128.

    Padded gate columns have all-zero weights and bias, so their pre-activation is 0,
    giving i=f=o=0.5, g=0, hence c_pad and h_pad remain exactly 0 for all time steps:
    the padding is bit-exact w.r.t. the unpadded math.
    """
    enc_dec = list(params["encoder"]) + list(params["decoder"])
    H = enc_dec[0][1].shape[1]          # w_hh: (4H, H)
    HP = _round_up(H, 128)

    def pad_gate_cols(w_t):             # (K, 4H) -> (K, 4HP), 128-aligned gate blocks
        K = w_t.shape[0]
        out = jnp.zeros((K, 4 * HP), jnp.float32)
        for g in range(4):
            out = out.at[:, g * HP:g * HP + H].set(w_t[:, g * H:(g + 1) * H])
        return out

    layers = []
    for idx, (w_ih, w_hh, b_ih, b_hh) in enumerate(enc_dec):
        in_real = w_ih.shape[1]
        k_pad = in_real if idx == 0 else HP          # layers > 0 take padded h as input
        wihT = jnp.zeros((k_pad, 4 * HP), jnp.float32)
        wihT = wihT.at[:in_real, :].set(pad_gate_cols(jnp.asarray(w_ih, jnp.float32).T))
        whhT = jnp.zeros((HP, 4 * HP), jnp.float32)
        whhT = whhT.at[:H, :].set(pad_gate_cols(jnp.asarray(w_hh, jnp.float32).T))
        bias = pad_gate_cols((b_ih + b_hh).astype(jnp.float32).reshape(1, -1))
        layers.append((wihT, whhT, bias))

    w_fc, b_fc = params["fc"]
    OUT = w_fc.shape[0]
    OP = _round_up(OUT, 128)                         # lane-dense output stores
    wfcT = jnp.zeros((HP, OP), jnp.float32).at[:H, :OUT].set(
        jnp.asarray(w_fc, jnp.float32).T)
    bfc = jnp.zeros((1, OP), jnp.float32).at[0, :OUT].set(
        jnp.asarray(b_fc, jnp.float32))
    return {"lstm": layers, "fc": (wfcT, bfc)}


# ---------------------------------------------------------------------------
# Pure-JAX reference (mirrors torch.nn.LSTM / nn.Linear semantics)
# ---------------------------------------------------------------------------

def lstm_layer_ref(x_tbf, w_ih, w_hh, b_ih, b_hh):
    H = w_hh.shape[1]
    B = x_tbf.shape[1]
    hi = lax.Precision.HIGHEST

    def step(carry, x_t):
        h, c = carry
        gates = (jnp.dot(x_t, w_ih.T, precision=hi) + b_ih
                 + jnp.dot(h, w_hh.T, precision=hi) + b_hh)
        i = jax.nn.sigmoid(gates[:, 0 * H:1 * H])
        f = jax.nn.sigmoid(gates[:, 1 * H:2 * H])
        g = jnp.tanh(gates[:, 2 * H:3 * H])
        o = jax.nn.sigmoid(gates[:, 3 * H:4 * H])
        c_new = f * c + i * g
        h_new = o * jnp.tanh(c_new)
        return (h_new, c_new), h_new

    init = (jnp.zeros((B, H), jnp.float32), jnp.zeros((B, H), jnp.float32))
    _, hs = lax.scan(step, init, x_tbf)
    return hs  # (T, B, H)


def rvc_forward_ref(x_btf, params):
    x = jnp.transpose(x_btf, (1, 0, 2)).astype(jnp.float32)
    for layer in params["encoder"]:
        x = lstm_layer_ref(x, *layer)
    for layer in params["decoder"]:
        x = lstm_layer_ref(x, *layer)
    w_fc, b_fc = params["fc"]
    y = jnp.dot(x, w_fc.T, precision=lax.Precision.HIGHEST) + b_fc
    return jnp.transpose(y, (1, 0, 2))


# ---------------------------------------------------------------------------
# Deterministic parameter init (PyTorch-style uniform(-1/sqrt(H), 1/sqrt(H)))
# ---------------------------------------------------------------------------

def init_params(key, input_size, hidden_size, num_layers):
    k = 1.0 / jnp.sqrt(hidden_size)

    def uni(key, shape):
        return jax.random.uniform(key, shape, jnp.float32, minval=-k, maxval=k)

    def make_lstm(key, first_in):
        layers = []
        for layer in range(num_layers):
            in_sz = first_in if layer == 0 else hidden_size
            key, k1, k2, k3, k4 = jax.random.split(key, 5)
            layers.append((
                uni(k1, (4 * hidden_size, in_sz)),        # w_ih
                uni(k2, (4 * hidden_size, hidden_size)),  # w_hh
                uni(k3, (4 * hidden_size,)),              # b_ih
                uni(k4, (4 * hidden_size,)),              # b_hh
            ))
        return key, layers

    key, enc = make_lstm(key, input_size)
    key, dec = make_lstm(key, hidden_size)
    key, kf1, kf2 = jax.random.split(key, 3)
    fc = (uni(kf1, (input_size, hidden_size)), uni(kf2, (input_size,)))
    return {"encoder": enc, "decoder": dec, "fc": fc}


# ---------------------------------------------------------------------------

if __name__ == "__main__":
    # Small shapes consistent with the module's forward: (batch, seq, input_size)
    batch, seq = 2, 8
    input_size, hidden_size, num_layers = 16, 32, 2

    key = jax.random.PRNGKey(0)
    key, kx = jax.random.split(key)
    x = jax.random.normal(kx, (batch, seq, input_size), jnp.float32)

    raw_params = init_params(key, input_size, hidden_size, num_layers)
    prepped = prepare_params(raw_params)   # one-time transpose / bias combine / lane-pad

    # max_chunk=4 forces two time chunks on the seq=8 toy, exercising the chunked grid
    # and the cross-chunk (h, c) carry path.
    fwd = jax.jit(functools.partial(
        rvc_forward_pallas, out_features=input_size, max_chunk=4, num_shards=1))
    out = jax.block_until_ready(fwd(x, prepped))

    ref = rvc_forward_ref(x, raw_params)
    assert out.shape == (batch, seq, input_size), out.shape
    max_err = float(jnp.max(jnp.abs(out - ref)))
    assert jnp.allclose(out, ref, atol=2e-4, rtol=2e-4), max_err

    print("KERNEL_OK")
</pallas_src>

<mosaic_0001>
module attributes {stable_mosaic.version = 11 : i64} {
  func.func @_fused_rvc_kernel(%arg0: i32, %arg1: i32, %arg2: memref<32x16xf32, #tpu.memory_space<vmem>>, %arg3: memref<16x512xf32, #tpu.memory_space<vmem>>, %arg4: memref<128x512xf32, #tpu.memory_space<vmem>>, %arg5: memref<1x512xf32, #tpu.memory_space<vmem>>, %arg6: memref<128x512xf32, #tpu.memory_space<vmem>>, %arg7: memref<128x512xf32, #tpu.memory_space<vmem>>, %arg8: memref<1x512xf32, #tpu.memory_space<vmem>>, %arg9: memref<128x512xf32, #tpu.memory_space<vmem>>, %arg10: memref<128x512xf32, #tpu.memory_space<vmem>>, %arg11: memref<1x512xf32, #tpu.memory_space<vmem>>, %arg12: memref<128x512xf32, #tpu.memory_space<vmem>>, %arg13: memref<128x512xf32, #tpu.memory_space<vmem>>, %arg14: memref<1x512xf32, #tpu.memory_space<vmem>>, %arg15: memref<128x128xf32, #tpu.memory_space<vmem>>, %arg16: memref<1x128xf32, #tpu.memory_space<vmem>>, %arg17: memref<32x128xf32, #tpu.memory_space<vmem>>, %arg18: memref<32x512xf32, #tpu.memory_space<vmem>>, %arg19: memref<32x128xf32, #tpu.memory_space<vmem>>, %arg20: memref<32x128xf32, #tpu.memory_space<vmem>>, %arg21: memref<4x8x128xf32, #tpu.memory_space<vmem>>, %arg22: memref<4x8x128xf32, #tpu.memory_space<vmem>>) attributes {dimension_semantics = [#tpu.dimension_semantics<parallel>, #tpu.dimension_semantics<arbitrary>], iteration_bounds = array<i64: 1, 2>, scalar_prefetch = 0 : i64, scratch_operands = 5 : i64, tpu.core_type = #tpu.core_type<tc>, window_params = [{transform_indices = @transform_0, window_bounds = array<i64: 32, 16>}, {pipeline_mode = #tpu.pipeline_mode<synchronous>, transform_indices = @transform_1, window_bounds = array<i64: 16, 512>}, {pipeline_mode = #tpu.pipeline_mode<synchronous>, transform_indices = @transform_2, window_bounds = array<i64: 128, 512>}, {pipeline_mode = #tpu.pipeline_mode<synchronous>, transform_indices = @transform_3, window_bounds = array<i64: 1, 512>}, {pipeline_mode = #tpu.pipeline_mode<synchronous>, transform_indices = @transform_4, window_bounds = array<i64: 128, 512>}, {pipeline_mode = #tpu.pipeline_mode<synchronous>, transform_indices = @transform_5, window_bounds = array<i64: 128, 512>}, {pipeline_mode = #tpu.pipeline_mode<synchronous>, transform_indices = @transform_6, window_bounds = array<i64: 1, 512>}, {pipeline_mode = #tpu.pipeline_mode<synchronous>, transform_indices = @transform_7, window_bounds = array<i64: 128, 512>}, {pipeline_mode = #tpu.pipeline_mode<synchronous>, transform_indices = @transform_8, window_bounds = array<i64: 128, 512>}, {pipeline_mode = #tpu.pipeline_mode<synchronous>, transform_indices = @transform_9, window_bounds = array<i64: 1, 512>}, {pipeline_mode = #tpu.pipeline_mode<synchronous>, transform_indices = @transform_10, window_bounds = array<i64: 128, 512>}, {pipeline_mode = #tpu.pipeline_mode<synchronous>, transform_indices = @transform_11, window_bounds = array<i64: 128, 512>}, {pipeline_mode = #tpu.pipeline_mode<synchronous>, transform_indices = @transform_12, window_bounds = array<i64: 1, 512>}, {pipeline_mode = #tpu.pipeline_mode<synchronous>, transform_indices = @transform_13, window_bounds = array<i64: 128, 128>}, {pipeline_mode = #tpu.pipeline_mode<synchronous>, transform_indices = @transform_14, window_bounds = array<i64: 1, 128>}, {transform_indices = @transform_15, window_bounds = array<i64: 32, 128>}]} {
    %c0_i32 = arith.constant 0 : i32
    %0 = arith.cmpi eq, %arg1, %c0_i32 : i32
    %1 = arith.extui %0 : i1 to i32
    %c0_i32_0 = arith.constant 0 : i32
    %2 = arith.cmpi ne, %1, %c0_i32_0 : i32
    scf.if %2 {
      %cst_320 = arith.constant 0.000000e+00 : f32
      %706 = vector.broadcast %cst_320 : f32 to vector<4x8x128xf32>
      %c0_321 = arith.constant 0 : index
      %c0_322 = arith.constant 0 : index
      %c0_323 = arith.constant 0 : index
      %707 = vector.load %arg21[%c0_321, %c0_322, %c0_323] : memref<4x8x128xf32, #tpu.memory_space<vmem>>, vector<4x8x128xf32>
      tpu.vector_store %arg21[%c0_321, %c0_322, %c0_323], %706 {strides = array<i32>} : memref<4x8x128xf32, #tpu.memory_space<vmem>>, vector<4x8x128xf32>,
      %cst_324 = arith.constant 0.000000e+00 : f32
      %708 = vector.broadcast %cst_324 : f32 to vector<4x8x128xf32>
      %c0_325 = arith.constant 0 : index
      %c0_326 = arith.constant 0 : index
      %c0_327 = arith.constant 0 : index
      %709 = vector.load %arg22[%c0_325, %c0_326, %c0_327] : memref<4x8x128xf32, #tpu.memory_space<vmem>>, vector<4x8x128xf32>
      tpu.vector_store %arg22[%c0_325, %c0_326, %c0_327], %708 {strides = array<i32>} : memref<4x8x128xf32, #tpu.memory_space<vmem>>, vector<4x8x128xf32>,
    } else {
    }
    %c0 = arith.constant 0 : index
    %c0_1 = arith.constant 0 : index
    %3 = vector.load %arg2[%c0, %c0_1] : memref<32x16xf32, #tpu.memory_space<vmem>>, vector<32x16xf32>
    %c0_2 = arith.constant 0 : index
    %c0_3 = arith.constant 0 : index
    %4 = vector.load %arg3[%c0_2, %c0_3] : memref<16x512xf32, #tpu.memory_space<vmem>>, vector<16x512xf32>
    %cst = arith.constant dense<0.000000e+00> : vector<32x512xf32>
    %5 = tpu.matmul %3, %4, %cst {dimension_numbers = #tpu.dot_dimension_numbers<[1], [0], [0], [1], [0, 0, 1, 1], [], []>} : vector<32x16xf32>, vector<16x512xf32>, vector<32x512xf32> -> vector<32x512xf32>
    %c0_4 = arith.constant 0 : index
    %c0_5 = arith.constant 0 : index
    %6 = vector.load %arg5[%c0_4, %c0_5] : memref<1x512xf32, #tpu.memory_space<vmem>>, vector<1x512xf32>
    %7 = vector.broadcast %6 : vector<1x512xf32> to vector<32x512xf32>
    %8 = arith.addf %5, %7 : vector<32x512xf32>
    %c0_6 = arith.constant 0 : index
    %c0_7 = arith.constant 0 : index
    %9 = vector.load %arg18[%c0_6, %c0_7] : memref<32x512xf32, #tpu.memory_space<vmem>>, vector<32x512xf32>
    tpu.vector_store %arg18[%c0_6, %c0_7], %8 {strides = array<i32>} : memref<32x512xf32, #tpu.memory_space<vmem>>, vector<32x512xf32>,
    %c0_8 = arith.constant 0 : index
    %c0_9 = arith.constant 0 : index
    %10 = vector.load %arg4[%c0_8, %c0_9] : memref<128x512xf32, #tpu.memory_space<vmem>>, vector<128x512xf32>
    %c0_10 = arith.constant 0 : index
    %c0_11 = arith.constant 0 : index
    %c0_12 = arith.constant 0 : index
    %11 = vector.load %arg21[%c0_10, %c0_11, %c0_12] : memref<4x8x128xf32, #tpu.memory_space<vmem>>, vector<1x8x128xf32>
    %12 = vector.shape_cast %11 : vector<1x8x128xf32> to vector<8x128xf32>
    %c0_13 = arith.constant 0 : index
    %c0_14 = arith.constant 0 : index
    %c0_15 = arith.constant 0 : index
    %13 = vector.load %arg22[%c0_13, %c0_14, %c0_15] : memref<4x8x128xf32, #tpu.memory_space<vmem>>, vector<1x8x128xf32>
    %14 = vector.shape_cast %13 : vector<1x8x128xf32> to vector<8x128xf32>
    %c0_i32_16 = arith.constant 0 : i32
    %c8_i32 = arith.constant 8 : i32
    %15 = arith.muli %c0_i32_16, %c8_i32 : i32
    %16 = tpu.assume_multiple %15, 8 : i32
    %17 = arith.index_cast %16 : i32 to index
    %c0_17 = arith.constant 0 : index
    %18 = vector.load %arg18[%17, %c0_17] : memref<32x512xf32, #tpu.memory_space<vmem>>, vector<8x512xf32>
    %cst_18 = arith.constant dense<0.000000e+00> : vector<8x512xf32>
    %19 = tpu.matmul %12, %10, %cst_18 {dimension_numbers = #tpu.dot_dimension_numbers<[1], [0], [0], [1], [0, 0, 1, 1], [], []>} : vector<8x128xf32>, vector<128x512xf32>, vector<8x512xf32> -> vector<8x512xf32>
    %20 = arith.addf %18, %19 : vector<8x512xf32>
    %21 = vector.extract_strided_slice %20 {offsets = [0, 0], sizes = [8, 128], strides = [1, 1]} : vector<8x512xf32> to vector<8x128xf32>
    %cst_19 = arith.constant 5.000000e-01 : f32
    %22 = vector.broadcast %cst_19 : f32 to vector<8x128xf32>
    %23 = arith.mulf %22, %21 : vector<8x128xf32>
    %24 = math.tanh %23 : vector<8x128xf32>
    %cst_20 = arith.constant 5.000000e-01 : f32
    %25 = vector.broadcast %cst_20 : f32 to vector<8x128xf32>
    %26 = arith.mulf %25, %24 : vector<8x128xf32>
    %cst_21 = arith.constant 5.000000e-01 : f32
    %27 = vector.broadcast %cst_21 : f32 to vector<8x128xf32>
    %28 = arith.addf %26, %27 : vector<8x128xf32>
    %29 = vector.extract_strided_slice %20 {offsets = [0, 128], sizes = [8, 128], strides = [1, 1]} : vector<8x512xf32> to vector<8x128xf32>
    %cst_22 = arith.constant 5.000000e-01 : f32
    %30 = vector.broadcast %cst_22 : f32 to vector<8x128xf32>
    %31 = arith.mulf %30, %29 : vector<8x128xf32>
    %32 = math.tanh %31 : vector<8x128xf32>
    %cst_23 = arith.constant 5.000000e-01 : f32
    %33 = vector.broadcast %cst_23 : f32 to vector<8x128xf32>
    %34 = arith.mulf %33, %32 : vector<8x128xf32>
    %cst_24 = arith.constant 5.000000e-01 : f32
    %35 = vector.broadcast %cst_24 : f32 to vector<8x128xf32>
    %36 = arith.addf %34, %35 : vector<8x128xf32>
    %37 = vector.extract_strided_slice %20 {offsets = [0, 256], sizes = [8, 128], strides = [1, 1]} : vector<8x512xf32> to vector<8x128xf32>
    %38 = math.tanh %37 : vector<8x128xf32>
    %39 = vector.extract_strided_slice %20 {offsets = [0, 384], sizes = [8, 128], strides = [1, 1]} : vector<8x512xf32> to vector<8x128xf32>
    %cst_25 = arith.constant 5.000000e-01 : f32
    %40 = vector.broadcast %cst_25 : f32 to vector<8x128xf32>
    %41 = arith.mulf %40, %39 : vector<8x128xf32>
    %42 = math.tanh %41 : vector<8x128xf32>
    %cst_26 = arith.constant 5.000000e-01 : f32
    %43 = vector.broadcast %cst_26 : f32 to vector<8x128xf32>
    %44 = arith.mulf %43, %42 : vector<8x128xf32>
    %cst_27 = arith.constant 5.000000e-01 : f32
    %45 = vector.broadcast %cst_27 : f32 to vector<8x128xf32>
    %46 = arith.addf %44, %45 : vector<8x128xf32>
    %47 = arith.mulf %36, %14 : vector<8x128xf32>
    %48 = arith.mulf %28, %38 : vector<8x128xf32>
    %49 = arith.addf %47, %48 : vector<8x128xf32>
    %50 = math.tanh %49 : vector<8x128xf32>
    %51 = arith.mulf %46, %50 : vector<8x128xf32>
    %52 = arith.index_cast %16 : i32 to index
    %c0_28 = arith.constant 0 : index
    %53 = vector.load %arg19[%52, %c0_28] : memref<32x128xf32, #tpu.memory_space<vmem>>, vector<8x128xf32>
    tpu.vector_store %arg19[%52, %c0_28], %51 {strides = array<i32>} : memref<32x128xf32, #tpu.memory_space<vmem>>, vector<8x128xf32>,
    %c1_i32 = arith.constant 1 : i32
    %c8_i32_29 = arith.constant 8 : i32
    %54 = arith.muli %c1_i32, %c8_i32_29 : i32
    %55 = tpu.assume_multiple %54, 8 : i32
    %56 = arith.index_cast %55 : i32 to index
    %c0_30 = arith.constant 0 : index
    %57 = vector.load %arg18[%56, %c0_30] : memref<32x512xf32, #tpu.memory_space<vmem>>, vector<8x512xf32>
    %cst_31 = arith.constant dense<0.000000e+00> : vector<8x512xf32>
    %58 = tpu.matmul %51, %10, %cst_31 {dimension_numbers = #tpu.dot_dimension_numbers<[1], [0], [0], [1], [0, 0, 1, 1], [], []>} : vector<8x128xf32>, vector<128x512xf32>, vector<8x512xf32> -> vector<8x512xf32>
    %59 = arith.addf %57, %58 : vector<8x512xf32>
    %60 = vector.extract_strided_slice %59 {offsets = [0, 0], sizes = [8, 128], strides = [1, 1]} : vector<8x512xf32> to vector<8x128xf32>
    %cst_32 = arith.constant 5.000000e-01 : f32
    %61 = vector.broadcast %cst_32 : f32 to vector<8x128xf32>
    %62 = arith.mulf %61, %60 : vector<8x128xf32>
    %63 = math.tanh %62 : vector<8x128xf32>
    %cst_33 = arith.constant 5.000000e-01 : f32
    %64 = vector.broadcast %cst_33 : f32 to vector<8x128xf32>
    %65 = arith.mulf %64, %63 : vector<8x128xf32>
    %cst_34 = arith.constant 5.000000e-01 : f32
    %66 = vector.broadcast %cst_34 : f32 to vector<8x128xf32>
    %67 = arith.addf %65, %66 : vector<8x128xf32>
    %68 = vector.extract_strided_slice %59 {offsets = [0, 128], sizes = [8, 128], strides = [1, 1]} : vector<8x512xf32> to vector<8x128xf32>
    %cst_35 = arith.constant 5.000000e-01 : f32
    %69 = vector.broadcast %cst_35 : f32 to vector<8x128xf32>
    %70 = arith.mulf %69, %68 : vector<8x128xf32>
    %71 = math.tanh %70 : vector<8x128xf32>
    %cst_36 = arith.constant 5.000000e-01 : f32
    %72 = vector.broadcast %cst_36 : f32 to vector<8x128xf32>
    %73 = arith.mulf %72, %71 : vector<8x128xf32>
    %cst_37 = arith.constant 5.000000e-01 : f32
    %74 = vector.broadcast %cst_37 : f32 to vector<8x128xf32>
    %75 = arith.addf %73, %74 : vector<8x128xf32>
    %76 = vector.extract_strided_slice %59 {offsets = [0, 256], sizes = [8, 128], strides = [1, 1]} : vector<8x512xf32> to vector<8x128xf32>
    %77 = math.tanh %76 : vector<8x128xf32>
    %78 = vector.extract_strided_slice %59 {offsets = [0, 384], sizes = [8, 128], strides = [1, 1]} : vector<8x512xf32> to vector<8x128xf32>
    %cst_38 = arith.constant 5.000000e-01 : f32
    %79 = vector.broadcast %cst_38 : f32 to vector<8x128xf32>
    %80 = arith.mulf %79, %78 : vector<8x128xf32>
    %81 = math.tanh %80 : vector<8x128xf32>
    %cst_39 = arith.constant 5.000000e-01 : f32
    %82 = vector.broadcast %cst_39 : f32 to vector<8x128xf32>
    %83 = arith.mulf %82, %81 : vector<8x128xf32>
    %cst_40 = arith.constant 5.000000e-01 : f32
    %84 = vector.broadcast %cst_40 : f32 to vector<8x128xf32>
    %85 = arith.addf %83, %84 : vector<8x128xf32>
    %86 = arith.mulf %75, %49 : vector<8x128xf32>
    %87 = arith.mulf %67, %77 : vector<8x128xf32>
    %88 = arith.addf %86, %87 : vector<8x128xf32>
    %89 = math.tanh %88 : vector<8x128xf32>
    %90 = arith.mulf %85, %89 : vector<8x128xf32>
    %91 = arith.index_cast %55 : i32 to index
    %c0_41 = arith.constant 0 : index
    %92 = vector.load %arg19[%91, %c0_41] : memref<32x128xf32, #tpu.memory_space<vmem>>, vector<8x128xf32>
    tpu.vector_store %arg19[%91, %c0_41], %90 {strides = array<i32>} : memref<32x128xf32, #tpu.memory_space<vmem>>, vector<8x128xf32>,
    %c2_i32 = arith.constant 2 : i32
    %c8_i32_42 = arith.constant 8 : i32
    %93 = arith.muli %c2_i32, %c8_i32_42 : i32
    %94 = tpu.assume_multiple %93, 8 : i32
    %95 = arith.index_cast %94 : i32 to index
    %c0_43 = arith.constant 0 : index
    %96 = vector.load %arg18[%95, %c0_43] : memref<32x512xf32, #tpu.memory_space<vmem>>, vector<8x512xf32>
    %cst_44 = arith.constant dense<0.000000e+00> : vector<8x512xf32>
    %97 = tpu.matmul %90, %10, %cst_44 {dimension_numbers = #tpu.dot_dimension_numbers<[1], [0], [0], [1], [0, 0, 1, 1], [], []>} : vector<8x128xf32>, vector<128x512xf32>, vector<8x512xf32> -> vector<8x512xf32>
    %98 = arith.addf %96, %97 : vector<8x512xf32>
    %99 = vector.extract_strided_slice %98 {offsets = [0, 0], sizes = [8, 128], strides = [1, 1]} : vector<8x512xf32> to vector<8x128xf32>
    %cst_45 = arith.constant 5.000000e-01 : f32
    %100 = vector.broadcast %cst_45 : f32 to vector<8x128xf32>
    %101 = arith.mulf %100, %99 : vector<8x128xf32>
    %102 = math.tanh %101 : vector<8x128xf32>
    %cst_46 = arith.constant 5.000000e-01 : f32
    %103 = vector.broadcast %cst_46 : f32 to vector<8x128xf32>
    %104 = arith.mulf %103, %102 : vector<8x128xf32>
    %cst_47 = arith.constant 5.000000e-01 : f32
    %105 = vector.broadcast %cst_47 : f32 to vector<8x128xf32>
    %106 = arith.addf %104, %105 : vector<8x128xf32>
    %107 = vector.extract_strided_slice %98 {offsets = [0, 128], sizes = [8, 128], strides = [1, 1]} : vector<8x512xf32> to vector<8x128xf32>
    %cst_48 = arith.constant 5.000000e-01 : f32
    %108 = vector.broadcast %cst_48 : f32 to vector<8x128xf32>
    %109 = arith.mulf %108, %107 : vector<8x128xf32>
    %110 = math.tanh %109 : vector<8x128xf32>
    %cst_49 = arith.constant 5.000000e-01 : f32
    %111 = vector.broadcast %cst_49 : f32 to vector<8x128xf32>
    %112 = arith.mulf %111, %110 : vector<8x128xf32>
    %cst_50 = arith.constant 5.000000e-01 : f32
    %113 = vector.broadcast %cst_50 : f32 to vector<8x128xf32>
    %114 = arith.addf %112, %113 : vector<8x128xf32>
    %115 = vector.extract_strided_slice %98 {offsets = [0, 256], sizes = [8, 128], strides = [1, 1]} : vector<8x512xf32> to vector<8x128xf32>
    %116 = math.tanh %115 : vector<8x128xf32>
    %117 = vector.extract_strided_slice %98 {offsets = [0, 384], sizes = [8, 128], strides = [1, 1]} : vector<8x512xf32> to vector<8x128xf32>
    %cst_51 = arith.constant 5.000000e-01 : f32
    %118 = vector.broadcast %cst_51 : f32 to vector<8x128xf32>
    %119 = arith.mulf %118, %117 : vector<8x128xf32>
    %120 = math.tanh %119 : vector<8x128xf32>
    %cst_52 = arith.constant 5.000000e-01 : f32
    %121 = vector.broadcast %cst_52 : f32 to vector<8x128xf32>
    %122 = arith.mulf %121, %120 : vector<8x128xf32>
    %cst_53 = arith.constant 5.000000e-01 : f32
    %123 = vector.broadcast %cst_53 : f32 to vector<8x128xf32>
    %124 = arith.addf %122, %123 : vector<8x128xf32>
    %125 = arith.mulf %114, %88 : vector<8x128xf32>
    %126 = arith.mulf %106, %116 : vector<8x128xf32>
    %127 = arith.addf %125, %126 : vector<8x128xf32>
    %128 = math.tanh %127 : vector<8x128xf32>
    %129 = arith.mulf %124, %128 : vector<8x128xf32>
    %130 = arith.index_cast %94 : i32 to index
    %c0_54 = arith.constant 0 : index
    %131 = vector.load %arg19[%130, %c0_54] : memref<32x128xf32, #tpu.memory_space<vmem>>, vector<8x128xf32>
    tpu.vector_store %arg19[%130, %c0_54], %129 {strides = array<i32>} : memref<32x128xf32, #tpu.memory_space<vmem>>, vector<8x128xf32>,
    %c3_i32 = arith.constant 3 : i32
    %c8_i32_55 = arith.constant 8 : i32
    %132 = arith.muli %c3_i32, %c8_i32_55 : i32
    %133 = tpu.assume_multiple %132, 8 : i32
    %134 = arith.index_cast %133 : i32 to index
    %c0_56 = arith.constant 0 : index
    %135 = vector.load %arg18[%134, %c0_56] : memref<32x512xf32, #tpu.memory_space<vmem>>, vector<8x512xf32>
    %cst_57 = arith.constant dense<0.000000e+00> : vector<8x512xf32>
    %136 = tpu.matmul %129, %10, %cst_57 {dimension_numbers = #tpu.dot_dimension_numbers<[1], [0], [0], [1], [0, 0, 1, 1], [], []>} : vector<8x128xf32>, vector<128x512xf32>, vector<8x512xf32> -> vector<8x512xf32>
    %137 = arith.addf %135, %136 : vector<8x512xf32>
    %138 = vector.extract_strided_slice %137 {offsets = [0, 0], sizes = [8, 128], strides = [1, 1]} : vector<8x512xf32> to vector<8x128xf32>
    %cst_58 = arith.constant 5.000000e-01 : f32
    %139 = vector.broadcast %cst_58 : f32 to vector<8x128xf32>
    %140 = arith.mulf %139, %138 : vector<8x128xf32>
    %141 = math.tanh %140 : vector<8x128xf32>
    %cst_59 = arith.constant 5.000000e-01 : f32
    %142 = vector.broadcast %cst_59 : f32 to vector<8x128xf32>
    %143 = arith.mulf %142, %141 : vector<8x128xf32>
    %cst_60 = arith.constant 5.000000e-01 : f32
    %144 = vector.broadcast %cst_60 : f32 to vector<8x128xf32>
    %145 = arith.addf %143, %144 : vector<8x128xf32>
    %146 = vector.extract_strided_slice %137 {offsets = [0, 128], sizes = [8, 128], strides = [1, 1]} : vector<8x512xf32> to vector<8x128xf32>
    %cst_61 = arith.constant 5.000000e-01 : f32
    %147 = vector.broadcast %cst_61 : f32 to vector<8x128xf32>
    %148 = arith.mulf %147, %146 : vector<8x128xf32>
    %149 = math.tanh %148 : vector<8x128xf32>
    %cst_62 = arith.constant 5.000000e-01 : f32
    %150 = vector.broadcast %cst_62 : f32 to vector<8x128xf32>
    %151 = arith.mulf %150, %149 : vector<8x128xf32>
    %cst_63 = arith.constant 5.000000e-01 : f32
    %152 = vector.broadcast %cst_63 : f32 to vector<8x128xf32>
    %153 = arith.addf %151, %152 : vector<8x128xf32>
    %154 = vector.extract_strided_slice %137 {offsets = [0, 256], sizes = [8, 128], strides = [1, 1]} : vector<8x512xf32> to vector<8x128xf32>
    %155 = math.tanh %154 : vector<8x128xf32>
    %156 = vector.extract_strided_slice %137 {offsets = [0, 384], sizes = [8, 128], strides = [1, 1]} : vector<8x512xf32> to vector<8x128xf32>
    %cst_64 = arith.constant 5.000000e-01 : f32
    %157 = vector.broadcast %cst_64 : f32 to vector<8x128xf32>
    %158 = arith.mulf %157, %156 : vector<8x128xf32>
    %159 = math.tanh %158 : vector<8x128xf32>
    %cst_65 = arith.constant 5.000000e-01 : f32
    %160 = vector.broadcast %cst_65 : f32 to vector<8x128xf32>
    %161 = arith.mulf %160, %159 : vector<8x128xf32>
    %cst_66 = arith.constant 5.000000e-01 : f32
    %162 = vector.broadcast %cst_66 : f32 to vector<8x128xf32>
    %163 = arith.addf %161, %162 : vector<8x128xf32>
    %164 = arith.mulf %153, %127 : vector<8x128xf32>
    %165 = arith.mulf %145, %155 : vector<8x128xf32>
    %166 = arith.addf %164, %165 : vector<8x128xf32>
    %167 = math.tanh %166 : vector<8x128xf32>
    %168 = arith.mulf %163, %167 : vector<8x128xf32>
    %169 = arith.index_cast %133 : i32 to index
    %c0_67 = arith.constant 0 : index
    %170 = vector.load %arg19[%169, %c0_67] : memref<32x128xf32, #tpu.memory_space<vmem>>, vector<8x128xf32>
    tpu.vector_store %arg19[%169, %c0_67], %168 {strides = array<i32>} : memref<32x128xf32, #tpu.memory_space<vmem>>, vector<8x128xf32>,
    %c4_i32 = arith.constant 4 : i32
    %c0_68 = arith.constant 0 : index
    %c0_69 = arith.constant 0 : index
    %c0_70 = arith.constant 0 : index
    %171 = vector.load %arg21[%c0_68, %c0_69, %c0_70] : memref<4x8x128xf32, #tpu.memory_space<vmem>>, vector<1x8x128xf32>
    %172 = vector.shape_cast %171 : vector<1x8x128xf32> to vector<8x128xf32>
    %173 = vector.shape_cast %168 : vector<8x128xf32> to vector<1x8x128xf32>
    tpu.vector_store %arg21[%c0_68, %c0_69, %c0_70], %173 {strides = array<i32>} : memref<4x8x128xf32, #tpu.memory_space<vmem>>, vector<1x8x128xf32>,
    %c0_71 = arith.constant 0 : index
    %c0_72 = arith.constant 0 : index
    %c0_73 = arith.constant 0 : index
    %174 = vector.load %arg22[%c0_71, %c0_72, %c0_73] : memref<4x8x128xf32, #tpu.memory_space<vmem>>, vector<1x8x128xf32>
    %175 = vector.shape_cast %174 : vector<1x8x128xf32> to vector<8x128xf32>
    %176 = vector.shape_cast %166 : vector<8x128xf32> to vector<1x8x128xf32>
    tpu.vector_store %arg22[%c0_71, %c0_72, %c0_73], %176 {strides = array<i32>} : memref<4x8x128xf32, #tpu.memory_space<vmem>>, vector<1x8x128xf32>,
    %c0_74 = arith.constant 0 : index
    %c0_75 = arith.constant 0 : index
    %177 = vector.load %arg19[%c0_74, %c0_75] : memref<32x128xf32, #tpu.memory_space<vmem>>, vector<32x128xf32>
    %c0_76 = arith.constant 0 : index
    %c0_77 = arith.constant 0 : index
    %178 = vector.load %arg6[%c0_76, %c0_77] : memref<128x512xf32, #tpu.memory_space<vmem>>, vector<128x512xf32>
    %cst_78 = arith.constant dense<0.000000e+00> : vector<32x512xf32>
    %179 = tpu.matmul %177, %178, %cst_78 {dimension_numbers = #tpu.dot_dimension_numbers<[1], [0], [0], [1], [0, 0, 1, 1], [], []>} : vector<32x128xf32>, vector<128x512xf32>, vector<32x512xf32> -> vector<32x512xf32>
    %c0_79 = arith.constant 0 : index
    %c0_80 = arith.constant 0 : index
    %180 = vector.load %arg8[%c0_79, %c0_80] : memref<1x512xf32, #tpu.memory_space<vmem>>, vector<1x512xf32>
    %181 = vector.broadcast %180 : vector<1x512xf32> to vector<32x512xf32>
    %182 = arith.addf %179, %181 : vector<32x512xf32>
    %c0_81 = arith.constant 0 : index
    %c0_82 = arith.constant 0 : index
    %183 = vector.load %arg18[%c0_81, %c0_82] : memref<32x512xf32, #tpu.memory_space<vmem>>, vector<32x512xf32>
    tpu.vector_store %arg18[%c0_81, %c0_82], %182 {strides = array<i32>} : memref<32x512xf32, #tpu.memory_space<vmem>>, vector<32x512xf32>,
    %c0_83 = arith.constant 0 : index
    %c0_84 = arith.constant 0 : index
    %184 = vector.load %arg7[%c0_83, %c0_84] : memref<128x512xf32, #tpu.memory_space<vmem>>, vector<128x512xf32>
    %c1 = arith.constant 1 : index
    %c0_85 = arith.constant 0 : index
    %c0_86 = arith.constant 0 : index
    %185 = vector.load %arg21[%c1, %c0_85, %c0_86] : memref<4x8x128xf32, #tpu.memory_space<vmem>>, vector<1x8x128xf32>
    %186 = vector.shape_cast %185 : vector<1x8x128xf32> to vector<8x128xf32>
    %c1_87 = arith.constant 1 : index
    %c0_88 = arith.constant 0 : index
    %c0_89 = arith.constant 0 : index
    %187 = vector.load %arg22[%c1_87, %c0_88, %c0_89] : memref<4x8x128xf32, #tpu.memory_space<vmem>>, vector<1x8x128xf32>
    %188 = vector.shape_cast %187 : vector<1x8x128xf32> to vector<8x128xf32>
    %c0_i32_90 = arith.constant 0 : i32
    %c8_i32_91 = arith.constant 8 : i32
    %189 = arith.muli %c0_i32_90, %c8_i32_91 : i32
    %190 = tpu.assume_multiple %189, 8 : i32
    %191 = arith.index_cast %190 : i32 to index
    %c0_92 = arith.constant 0 : index
    %192 = vector.load %arg18[%191, %c0_92] : memref<32x512xf32, #tpu.memory_space<vmem>>, vector<8x512xf32>
    %cst_93 = arith.constant dense<0.000000e+00> : vector<8x512xf32>
    %193 = tpu.matmul %186, %184, %cst_93 {dimension_numbers = #tpu.dot_dimension_numbers<[1], [0], [0], [1], [0, 0, 1, 1], [], []>} : vector<8x128xf32>, vector<128x512xf32>, vector<8x512xf32> -> vector<8x512xf32>
    %194 = arith.addf %192, %193 : vector<8x512xf32>
    %195 = vector.extract_strided_slice %194 {offsets = [0, 0], sizes = [8, 128], strides = [1, 1]} : vector<8x512xf32> to vector<8x128xf32>
    %cst_94 = arith.constant 5.000000e-01 : f32
    %196 = vector.broadcast %cst_94 : f32 to vector<8x128xf32>
    %197 = arith.mulf %196, %195 : vector<8x128xf32>
    %198 = math.tanh %197 : vector<8x128xf32>
    %cst_95 = arith.constant 5.000000e-01 : f32
    %199 = vector.broadcast %cst_95 : f32 to vector<8x128xf32>
    %200 = arith.mulf %199, %198 : vector<8x128xf32>
    %cst_96 = arith.constant 5.000000e-01 : f32
    %201 = vector.broadcast %cst_96 : f32 to vector<8x128xf32>
    %202 = arith.addf %200, %201 : vector<8x128xf32>
    %203 = vector.extract_strided_slice %194 {offsets = [0, 128], sizes = [8, 128], strides = [1, 1]} : vector<8x512xf32> to vector<8x128xf32>
    %cst_97 = arith.constant 5.000000e-01 : f32
    %204 = vector.broadcast %cst_97 : f32 to vector<8x128xf32>
    %205 = arith.mulf %204, %203 : vector<8x128xf32>
    %206 = math.tanh %205 : vector<8x128xf32>
    %cst_98 = arith.constant 5.000000e-01 : f32
    %207 = vector.broadcast %cst_98 : f32 to vector<8x128xf32>
    %208 = arith.mulf %207, %206 : vector<8x128xf32>
    %cst_99 = arith.constant 5.000000e-01 : f32
    %209 = vector.broadcast %cst_99 : f32 to vector<8x128xf32>
    %210 = arith.addf %208, %209 : vector<8x128xf32>
    %211 = vector.extract_strided_slice %194 {offsets = [0, 256], sizes = [8, 128], strides = [1, 1]} : vector<8x512xf32> to vector<8x128xf32>
    %212 = math.tanh %211 : vector<8x128xf32>
    %213 = vector.extract_strided_slice %194 {offsets = [0, 384], sizes = [8, 128], strides = [1, 1]} : vector<8x512xf32> to vector<8x128xf32>
    %cst_100 = arith.constant 5.000000e-01 : f32
    %214 = vector.broadcast %cst_100 : f32 to vector<8x128xf32>
    %215 = arith.mulf %214, %213 : vector<8x128xf32>
    %216 = math.tanh %215 : vector<8x128xf32>
    %cst_101 = arith.constant 5.000000e-01 : f32
    %217 = vector.broadcast %cst_101 : f32 to vector<8x128xf32>
    %218 = arith.mulf %217, %216 : vector<8x128xf32>
    %cst_102 = arith.constant 5.000000e-01 : f32
    %219 = vector.broadcast %cst_102 : f32 to vector<8x128xf32>
    %220 = arith.addf %218, %219 : vector<8x128xf32>
    %221 = arith.mulf %210, %188 : vector<8x128xf32>
    %222 = arith.mulf %202, %212 : vector<8x128xf32>
    %223 = arith.addf %221, %222 : vector<8x128xf32>
    %224 = math.tanh %223 : vector<8x128xf32>
    %225 = arith.mulf %220, %224 : vector<8x128xf32>
    %226 = arith.index_cast %190 : i32 to index
    %c0_103 = arith.constant 0 : index
    %227 = vector.load %arg20[%226, %c0_103] : memref<32x128xf32, #tpu.memory_space<vmem>>, vector<8x128xf32>
    tpu.vector_store %arg20[%226, %c0_103], %225 {strides = array<i32>} : memref<32x128xf32, #tpu.memory_space<vmem>>, vector<8x128xf32>,
    %c1_i32_104 = arith.constant 1 : i32
    %c8_i32_105 = arith.constant 8 : i32
    %228 = arith.muli %c1_i32_104, %c8_i32_105 : i32
    %229 = tpu.assume_multiple %228, 8 : i32
    %230 = arith.index_cast %229 : i32 to index
    %c0_106 = arith.constant 0 : index
    %231 = vector.load %arg18[%230, %c0_106] : memref<32x512xf32, #tpu.memory_space<vmem>>, vector<8x512xf32>
    %cst_107 = arith.constant dense<0.000000e+00> : vector<8x512xf32>
    %232 = tpu.matmul %225, %184, %cst_107 {dimension_numbers = #tpu.dot_dimension_numbers<[1], [0], [0], [1], [0, 0, 1, 1], [], []>} : vector<8x128xf32>, vector<128x512xf32>, vector<8x512xf32> -> vector<8x512xf32>
    %233 = arith.addf %231, %232 : vector<8x512xf32>
    %234 = vector.extract_strided_slice %233 {offsets = [0, 0], sizes = [8, 128], strides = [1, 1]} : vector<8x512xf32> to vector<8x128xf32>
    %cst_108 = arith.constant 5.000000e-01 : f32
    %235 = vector.broadcast %cst_108 : f32 to vector<8x128xf32>
    %236 = arith.mulf %235, %234 : vector<8x128xf32>
    %237 = math.tanh %236 : vector<8x128xf32>
    %cst_109 = arith.constant 5.000000e-01 : f32
    %238 = vector.broadcast %cst_109 : f32 to vector<8x128xf32>
    %239 = arith.mulf %238, %237 : vector<8x128xf32>
    %cst_110 = arith.constant 5.000000e-01 : f32
    %240 = vector.broadcast %cst_110 : f32 to vector<8x128xf32>
    %241 = arith.addf %239, %240 : vector<8x128xf32>
    %242 = vector.extract_strided_slice %233 {offsets = [0, 128], sizes = [8, 128], strides = [1, 1]} : vector<8x512xf32> to vector<8x128xf32>
    %cst_111 = arith.constant 5.000000e-01 : f32
    %243 = vector.broadcast %cst_111 : f32 to vector<8x128xf32>
    %244 = arith.mulf %243, %242 : vector<8x128xf32>
    %245 = math.tanh %244 : vector<8x128xf32>
    %cst_112 = arith.constant 5.000000e-01 : f32
    %246 = vector.broadcast %cst_112 : f32 to vector<8x128xf32>
    %247 = arith.mulf %246, %245 : vector<8x128xf32>
    %cst_113 = arith.constant 5.000000e-01 : f32
    %248 = vector.broadcast %cst_113 : f32 to vector<8x128xf32>
    %249 = arith.addf %247, %248 : vector<8x128xf32>
    %250 = vector.extract_strided_slice %233 {offsets = [0, 256], sizes = [8, 128], strides = [1, 1]} : vector<8x512xf32> to vector<8x128xf32>
    %251 = math.tanh %250 : vector<8x128xf32>
    %252 = vector.extract_strided_slice %233 {offsets = [0, 384], sizes = [8, 128], strides = [1, 1]} : vector<8x512xf32> to vector<8x128xf32>
    %cst_114 = arith.constant 5.000000e-01 : f32
    %253 = vector.broadcast %cst_114 : f32 to vector<8x128xf32>
    %254 = arith.mulf %253, %252 : vector<8x128xf32>
    %255 = math.tanh %254 : vector<8x128xf32>
    %cst_115 = arith.constant 5.000000e-01 : f32
    %256 = vector.broadcast %cst_115 : f32 to vector<8x128xf32>
    %257 = arith.mulf %256, %255 : vector<8x128xf32>
    %cst_116 = arith.constant 5.000000e-01 : f32
    %258 = vector.broadcast %cst_116 : f32 to vector<8x128xf32>
    %259 = arith.addf %257, %258 : vector<8x128xf32>
    %260 = arith.mulf %249, %223 : vector<8x128xf32>
    %261 = arith.mulf %241, %251 : vector<8x128xf32>
    %262 = arith.addf %260, %261 : vector<8x128xf32>
    %263 = math.tanh %262 : vector<8x128xf32>
    %264 = arith.mulf %259, %263 : vector<8x128xf32>
    %265 = arith.index_cast %229 : i32 to index
    %c0_117 = arith.constant 0 : index
    %266 = vector.load %arg20[%265, %c0_117] : memref<32x128xf32, #tpu.memory_space<vmem>>, vector<8x128xf32>
    tpu.vector_store %arg20[%265, %c0_117], %264 {strides = array<i32>} : memref<32x128xf32, #tpu.memory_space<vmem>>, vector<8x128xf32>,
    %c2_i32_118 = arith.constant 2 : i32
    %c8_i32_119 = arith.constant 8 : i32
    %267 = arith.muli %c2_i32_118, %c8_i32_119 : i32
    %268 = tpu.assume_multiple %267, 8 : i32
    %269 = arith.index_cast %268 : i32 to index
    %c0_120 = arith.constant 0 : index
    %270 = vector.load %arg18[%269, %c0_120] : memref<32x512xf32, #tpu.memory_space<vmem>>, vector<8x512xf32>
    %cst_121 = arith.constant dense<0.000000e+00> : vector<8x512xf32>
    %271 = tpu.matmul %264, %184, %cst_121 {dimension_numbers = #tpu.dot_dimension_numbers<[1], [0], [0], [1], [0, 0, 1, 1], [], []>} : vector<8x128xf32>, vector<128x512xf32>, vector<8x512xf32> -> vector<8x512xf32>
    %272 = arith.addf %270, %271 : vector<8x512xf32>
    %273 = vector.extract_strided_slice %272 {offsets = [0, 0], sizes = [8, 128], strides = [1, 1]} : vector<8x512xf32> to vector<8x128xf32>
    %cst_122 = arith.constant 5.000000e-01 : f32
    %274 = vector.broadcast %cst_122 : f32 to vector<8x128xf32>
    %275 = arith.mulf %274, %273 : vector<8x128xf32>
    %276 = math.tanh %275 : vector<8x128xf32>
    %cst_123 = arith.constant 5.000000e-01 : f32
    %277 = vector.broadcast %cst_123 : f32 to vector<8x128xf32>
    %278 = arith.mulf %277, %276 : vector<8x128xf32>
    %cst_124 = arith.constant 5.000000e-01 : f32
    %279 = vector.broadcast %cst_124 : f32 to vector<8x128xf32>
    %280 = arith.addf %278, %279 : vector<8x128xf32>
    %281 = vector.extract_strided_slice %272 {offsets = [0, 128], sizes = [8, 128], strides = [1, 1]} : vector<8x512xf32> to vector<8x128xf32>
    %cst_125 = arith.constant 5.000000e-01 : f32
    %282 = vector.broadcast %cst_125 : f32 to vector<8x128xf32>
    %283 = arith.mulf %282, %281 : vector<8x128xf32>
    %284 = math.tanh %283 : vector<8x128xf32>
    %cst_126 = arith.constant 5.000000e-01 : f32
    %285 = vector.broadcast %cst_126 : f32 to vector<8x128xf32>
    %286 = arith.mulf %285, %284 : vector<8x128xf32>
    %cst_127 = arith.constant 5.000000e-01 : f32
    %287 = vector.broadcast %cst_127 : f32 to vector<8x128xf32>
    %288 = arith.addf %286, %287 : vector<8x128xf32>
    %289 = vector.extract_strided_slice %272 {offsets = [0, 256], sizes = [8, 128], strides = [1, 1]} : vector<8x512xf32> to vector<8x128xf32>
    %290 = math.tanh %289 : vector<8x128xf32>
    %291 = vector.extract_strided_slice %272 {offsets = [0, 384], sizes = [8, 128], strides = [1, 1]} : vector<8x512xf32> to vector<8x128xf32>
    %cst_128 = arith.constant 5.000000e-01 : f32
    %292 = vector.broadcast %cst_128 : f32 to vector<8x128xf32>
    %293 = arith.mulf %292, %291 : vector<8x128xf32>
    %294 = math.tanh %293 : vector<8x128xf32>
    %cst_129 = arith.constant 5.000000e-01 : f32
    %295 = vector.broadcast %cst_129 : f32 to vector<8x128xf32>
    %296 = arith.mulf %295, %294 : vector<8x128xf32>
    %cst_130 = arith.constant 5.000000e-01 : f32
    %297 = vector.broadcast %cst_130 : f32 to vector<8x128xf32>
    %298 = arith.addf %296, %297 : vector<8x128xf32>
    %299 = arith.mulf %288, %262 : vector<8x128xf32>
    %300 = arith.mulf %280, %290 : vector<8x128xf32>
    %301 = arith.addf %299, %300 : vector<8x128xf32>
    %302 = math.tanh %301 : vector<8x128xf32>
    %303 = arith.mulf %298, %302 : vector<8x128xf32>
    %304 = arith.index_cast %268 : i32 to index
    %c0_131 = arith.constant 0 : index
    %305 = vector.load %arg20[%304, %c0_131] : memref<32x128xf32, #tpu.memory_space<vmem>>, vector<8x128xf32>
    tpu.vector_store %arg20[%304, %c0_131], %303 {strides = array<i32>} : memref<32x128xf32, #tpu.memory_space<vmem>>, vector<8x128xf32>,
    %c3_i32_132 = arith.constant 3 : i32
    %c8_i32_133 = arith.constant 8 : i32
    %306 = arith.muli %c3_i32_132, %c8_i32_133 : i32
    %307 = tpu.assume_multiple %306, 8 : i32
    %308 = arith.index_cast %307 : i32 to index
    %c0_134 = arith.constant 0 : index
    %309 = vector.load %arg18[%308, %c0_134] : memref<32x512xf32, #tpu.memory_space<vmem>>, vector<8x512xf32>
    %cst_135 = arith.constant dense<0.000000e+00> : vector<8x512xf32>
    %310 = tpu.matmul %303, %184, %cst_135 {dimension_numbers = #tpu.dot_dimension_numbers<[1], [0], [0], [1], [0, 0, 1, 1], [], []>} : vector<8x128xf32>, vector<128x512xf32>, vector<8x512xf32> -> vector<8x512xf32>
    %311 = arith.addf %309, %310 : vector<8x512xf32>
    %312 = vector.extract_strided_slice %311 {offsets = [0, 0], sizes = [8, 128], strides = [1, 1]} : vector<8x512xf32> to vector<8x128xf32>
    %cst_136 = arith.constant 5.000000e-01 : f32
    %313 = vector.broadcast %cst_136 : f32 to vector<8x128xf32>
    %314 = arith.mulf %313, %312 : vector<8x128xf32>
    %315 = math.tanh %314 : vector<8x128xf32>
    %cst_137 = arith.constant 5.000000e-01 : f32
    %316 = vector.broadcast %cst_137 : f32 to vector<8x128xf32>
    %317 = arith.mulf %316, %315 : vector<8x128xf32>
    %cst_138 = arith.constant 5.000000e-01 : f32
    %318 = vector.broadcast %cst_138 : f32 to vector<8x128xf32>
    %319 = arith.addf %317, %318 : vector<8x128xf32>
    %320 = vector.extract_strided_slice %311 {offsets = [0, 128], sizes = [8, 128], strides = [1, 1]} : vector<8x512xf32> to vector<8x128xf32>
    %cst_139 = arith.constant 5.000000e-01 : f32
    %321 = vector.broadcast %cst_139 : f32 to vector<8x128xf32>
    %322 = arith.mulf %321, %320 : vector<8x128xf32>
    %323 = math.tanh %322 : vector<8x128xf32>
    %cst_140 = arith.constant 5.000000e-01 : f32
    %324 = vector.broadcast %cst_140 : f32 to vector<8x128xf32>
    %325 = arith.mulf %324, %323 : vector<8x128xf32>
    %cst_141 = arith.constant 5.000000e-01 : f32
    %326 = vector.broadcast %cst_141 : f32 to vector<8x128xf32>
    %327 = arith.addf %325, %326 : vector<8x128xf32>
    %328 = vector.extract_strided_slice %311 {offsets = [0, 256], sizes = [8, 128], strides = [1, 1]} : vector<8x512xf32> to vector<8x128xf32>
    %329 = math.tanh %328 : vector<8x128xf32>
    %330 = vector.extract_strided_slice %311 {offsets = [0, 384], sizes = [8, 128], strides = [1, 1]} : vector<8x512xf32> to vector<8x128xf32>
    %cst_142 = arith.constant 5.000000e-01 : f32
    %331 = vector.broadcast %cst_142 : f32 to vector<8x128xf32>
    %332 = arith.mulf %331, %330 : vector<8x128xf32>
    %333 = math.tanh %332 : vector<8x128xf32>
    %cst_143 = arith.constant 5.000000e-01 : f32
    %334 = vector.broadcast %cst_143 : f32 to vector<8x128xf32>
    %335 = arith.mulf %334, %333 : vector<8x128xf32>
    %cst_144 = arith.constant 5.000000e-01 : f32
    %336 = vector.broadcast %cst_144 : f32 to vector<8x128xf32>
    %337 = arith.addf %335, %336 : vector<8x128xf32>
    %338 = arith.mulf %327, %301 : vector<8x128xf32>
    %339 = arith.mulf %319, %329 : vector<8x128xf32>
    %340 = arith.addf %338, %339 : vector<8x128xf32>
    %341 = math.tanh %340 : vector<8x128xf32>
    %342 = arith.mulf %337, %341 : vector<8x128xf32>
    %343 = arith.index_cast %307 : i32 to index
    %c0_145 = arith.constant 0 : index
    %344 = vector.load %arg20[%343, %c0_145] : memref<32x128xf32, #tpu.memory_space<vmem>>, vector<8x128xf32>
    tpu.vector_store %arg20[%343, %c0_145], %342 {strides = array<i32>} : memref<32x128xf32, #tpu.memory_space<vmem>>, vector<8x128xf32>,
    %c4_i32_146 = arith.constant 4 : i32
    %c1_147 = arith.constant 1 : index
    %c0_148 = arith.constant 0 : index
    %c0_149 = arith.constant 0 : index
    %345 = vector.load %arg21[%c1_147, %c0_148, %c0_149] : memref<4x8x128xf32, #tpu.memory_space<vmem>>, vector<1x8x128xf32>
    %346 = vector.shape_cast %345 : vector<1x8x128xf32> to vector<8x128xf32>
    %347 = vector.shape_cast %342 : vector<8x128xf32> to vector<1x8x128xf32>
    tpu.vector_store %arg21[%c1_147, %c0_148, %c0_149], %347 {strides = array<i32>} : memref<4x8x128xf32, #tpu.memory_space<vmem>>, vector<1x8x128xf32>,
    %c1_150 = arith.constant 1 : index
    %c0_151 = arith.constant 0 : index
    %c0_152 = arith.constant 0 : index
    %348 = vector.load %arg22[%c1_150, %c0_151, %c0_152] : memref<4x8x128xf32, #tpu.memory_space<vmem>>, vector<1x8x128xf32>
    %349 = vector.shape_cast %348 : vector<1x8x128xf32> to vector<8x128xf32>
    %350 = vector.shape_cast %340 : vector<8x128xf32> to vector<1x8x128xf32>
    tpu.vector_store %arg22[%c1_150, %c0_151, %c0_152], %350 {strides = array<i32>} : memref<4x8x128xf32, #tpu.memory_space<vmem>>, vector<1x8x128xf32>,
    %c0_153 = arith.constant 0 : index
    %c0_154 = arith.constant 0 : index
    %351 = vector.load %arg20[%c0_153, %c0_154] : memref<32x128xf32, #tpu.memory_space<vmem>>, vector<32x128xf32>
    %c0_155 = arith.constant 0 : index
    %c0_156 = arith.constant 0 : index
    %352 = vector.load %arg9[%c0_155, %c0_156] : memref<128x512xf32, #tpu.memory_space<vmem>>, vector<128x512xf32>
    %cst_157 = arith.constant dense<0.000000e+00> : vector<32x512xf32>
    %353 = tpu.matmul %351, %352, %cst_157 {dimension_numbers = #tpu.dot_dimension_numbers<[1], [0], [0], [1], [0, 0, 1, 1], [], []>} : vector<32x128xf32>, vector<128x512xf32>, vector<32x512xf32> -> vector<32x512xf32>
    %c0_158 = arith.constant 0 : index
    %c0_159 = arith.constant 0 : index
    %354 = vector.load %arg11[%c0_158, %c0_159] : memref<1x512xf32, #tpu.memory_space<vmem>>, vector<1x512xf32>
    %355 = vector.broadcast %354 : vector<1x512xf32> to vector<32x512xf32>
    %356 = arith.addf %353, %355 : vector<32x512xf32>
    %c0_160 = arith.constant 0 : index
    %c0_161 = arith.constant 0 : index
    %357 = vector.load %arg18[%c0_160, %c0_161] : memref<32x512xf32, #tpu.memory_space<vmem>>, vector<32x512xf32>
    tpu.vector_store %arg18[%c0_160, %c0_161], %356 {strides = array<i32>} : memref<32x512xf32, #tpu.memory_space<vmem>>, vector<32x512xf32>,
    %c0_162 = arith.constant 0 : index
    %c0_163 = arith.constant 0 : index
    %358 = vector.load %arg10[%c0_162, %c0_163] : memref<128x512xf32, #tpu.memory_space<vmem>>, vector<128x512xf32>
    %c2 = arith.constant 2 : index
    %c0_164 = arith.constant 0 : index
    %c0_165 = arith.constant 0 : index
    %359 = vector.load %arg21[%c2, %c0_164, %c0_165] : memref<4x8x128xf32, #tpu.memory_space<vmem>>, vector<1x8x128xf32>
    %360 = vector.shape_cast %359 : vector<1x8x128xf32> to vector<8x128xf32>
    %c2_166 = arith.constant 2 : index
    %c0_167 = arith.constant 0 : index
    %c0_168 = arith.constant 0 : index
    %361 = vector.load %arg22[%c2_166, %c0_167, %c0_168] : memref<4x8x128xf32, #tpu.memory_space<vmem>>, vector<1x8x128xf32>
    %362 = vector.shape_cast %361 : vector<1x8x128xf32> to vector<8x128xf32>
    %c0_i32_169 = arith.constant 0 : i32
    %c8_i32_170 = arith.constant 8 : i32
    %363 = arith.muli %c0_i32_169, %c8_i32_170 : i32
    %364 = tpu.assume_multiple %363, 8 : i32
    %365 = arith.index_cast %364 : i32 to index
    %c0_171 = arith.constant 0 : index
    %366 = vector.load %arg18[%365, %c0_171] : memref<32x512xf32, #tpu.memory_space<vmem>>, vector<8x512xf32>
    %cst_172 = arith.constant dense<0.000000e+00> : vector<8x512xf32>
    %367 = tpu.matmul %360, %358, %cst_172 {dimension_numbers = #tpu.dot_dimension_numbers<[1], [0], [0], [1], [0, 0, 1, 1], [], []>} : vector<8x128xf32>, vector<128x512xf32>, vector<8x512xf32> -> vector<8x512xf32>
    %368 = arith.addf %366, %367 : vector<8x512xf32>
    %369 = vector.extract_strided_slice %368 {offsets = [0, 0], sizes = [8, 128], strides = [1, 1]} : vector<8x512xf32> to vector<8x128xf32>
    %cst_173 = arith.constant 5.000000e-01 : f32
    %370 = vector.broadcast %cst_173 : f32 to vector<8x128xf32>
    %371 = arith.mulf %370, %369 : vector<8x128xf32>
    %372 = math.tanh %371 : vector<8x128xf32>
    %cst_174 = arith.constant 5.000000e-01 : f32
    %373 = vector.broadcast %cst_174 : f32 to vector<8x128xf32>
    %374 = arith.mulf %373, %372 : vector<8x128xf32>
    %cst_175 = arith.constant 5.000000e-01 : f32
    %375 = vector.broadcast %cst_175 : f32 to vector<8x128xf32>
    %376 = arith.addf %374, %375 : vector<8x128xf32>
    %377 = vector.extract_strided_slice %368 {offsets = [0, 128], sizes = [8, 128], strides = [1, 1]} : vector<8x512xf32> to vector<8x128xf32>
    %cst_176 = arith.constant 5.000000e-01 : f32
    %378 = vector.broadcast %cst_176 : f32 to vector<8x128xf32>
    %379 = arith.mulf %378, %377 : vector<8x128xf32>
    %380 = math.tanh %379 : vector<8x128xf32>
    %cst_177 = arith.constant 5.000000e-01 : f32
    %381 = vector.broadcast %cst_177 : f32 to vector<8x128xf32>
    %382 = arith.mulf %381, %380 : vector<8x128xf32>
    %cst_178 = arith.constant 5.000000e-01 : f32
    %383 = vector.broadcast %cst_178 : f32 to vector<8x128xf32>
    %384 = arith.addf %382, %383 : vector<8x128xf32>
    %385 = vector.extract_strided_slice %368 {offsets = [0, 256], sizes = [8, 128], strides = [1, 1]} : vector<8x512xf32> to vector<8x128xf32>
    %386 = math.tanh %385 : vector<8x128xf32>
    %387 = vector.extract_strided_slice %368 {offsets = [0, 384], sizes = [8, 128], strides = [1, 1]} : vector<8x512xf32> to vector<8x128xf32>
    %cst_179 = arith.constant 5.000000e-01 : f32
    %388 = vector.broadcast %cst_179 : f32 to vector<8x128xf32>
    %389 = arith.mulf %388, %387 : vector<8x128xf32>
    %390 = math.tanh %389 : vector<8x128xf32>
    %cst_180 = arith.constant 5.000000e-01 : f32
    %391 = vector.broadcast %cst_180 : f32 to vector<8x128xf32>
    %392 = arith.mulf %391, %390 : vector<8x128xf32>
    %cst_181 = arith.constant 5.000000e-01 : f32
    %393 = vector.broadcast %cst_181 : f32 to vector<8x128xf32>
    %394 = arith.addf %392, %393 : vector<8x128xf32>
    %395 = arith.mulf %384, %362 : vector<8x128xf32>
    %396 = arith.mulf %376, %386 : vector<8x128xf32>
    %397 = arith.addf %395, %396 : vector<8x128xf32>
    %398 = math.tanh %397 : vector<8x128xf32>
    %399 = arith.mulf %394, %398 : vector<8x128xf32>
    %400 = arith.index_cast %364 : i32 to index
    %c0_182 = arith.constant 0 : index
    %401 = vector.load %arg19[%400, %c0_182] : memref<32x128xf32, #tpu.memory_space<vmem>>, vector<8x128xf32>
    tpu.vector_store %arg19[%400, %c0_182], %399 {strides = array<i32>} : memref<32x128xf32, #tpu.memory_space<vmem>>, vector<8x128xf32>,
    %c1_i32_183 = arith.constant 1 : i32
    %c8_i32_184 = arith.constant 8 : i32
    %402 = arith.muli %c1_i32_183, %c8_i32_184 : i32
    %403 = tpu.assume_multiple %402, 8 : i32
    %404 = arith.index_cast %403 : i32 to index
    %c0_185 = arith.constant 0 : index
    %405 = vector.load %arg18[%404, %c0_185] : memref<32x512xf32, #tpu.memory_space<vmem>>, vector<8x512xf32>
    %cst_186 = arith.constant dense<0.000000e+00> : vector<8x512xf32>
    %406 = tpu.matmul %399, %358, %cst_186 {dimension_numbers = #tpu.dot_dimension_numbers<[1], [0], [0], [1], [0, 0, 1, 1], [], []>} : vector<8x128xf32>, vector<128x512xf32>, vector<8x512xf32> -> vector<8x512xf32>
    %407 = arith.addf %405, %406 : vector<8x512xf32>
    %408 = vector.extract_strided_slice %407 {offsets = [0, 0], sizes = [8, 128], strides = [1, 1]} : vector<8x512xf32> to vector<8x128xf32>
    %cst_187 = arith.constant 5.000000e-01 : f32
    %409 = vector.broadcast %cst_187 : f32 to vector<8x128xf32>
    %410 = arith.mulf %409, %408 : vector<8x128xf32>
    %411 = math.tanh %410 : vector<8x128xf32>
    %cst_188 = arith.constant 5.000000e-01 : f32
    %412 = vector.broadcast %cst_188 : f32 to vector<8x128xf32>
    %413 = arith.mulf %412, %411 : vector<8x128xf32>
    %cst_189 = arith.constant 5.000000e-01 : f32
    %414 = vector.broadcast %cst_189 : f32 to vector<8x128xf32>
    %415 = arith.addf %413, %414 : vector<8x128xf32>
    %416 = vector.extract_strided_slice %407 {offsets = [0, 128], sizes = [8, 128], strides = [1, 1]} : vector<8x512xf32> to vector<8x128xf32>
    %cst_190 = arith.constant 5.000000e-01 : f32
    %417 = vector.broadcast %cst_190 : f32 to vector<8x128xf32>
    %418 = arith.mulf %417, %416 : vector<8x128xf32>
    %419 = math.tanh %418 : vector<8x128xf32>
    %cst_191 = arith.constant 5.000000e-01 : f32
    %420 = vector.broadcast %cst_191 : f32 to vector<8x128xf32>
    %421 = arith.mulf %420, %419 : vector<8x128xf32>
    %cst_192 = arith.constant 5.000000e-01 : f32
    %422 = vector.broadcast %cst_192 : f32 to vector<8x128xf32>
    %423 = arith.addf %421, %422 : vector<8x128xf32>
    %424 = vector.extract_strided_slice %407 {offsets = [0, 256], sizes = [8, 128], strides = [1, 1]} : vector<8x512xf32> to vector<8x128xf32>
    %425 = math.tanh %424 : vector<8x128xf32>
    %426 = vector.extract_strided_slice %407 {offsets = [0, 384], sizes = [8, 128], strides = [1, 1]} : vector<8x512xf32> to vector<8x128xf32>
    %cst_193 = arith.constant 5.000000e-01 : f32
    %427 = vector.broadcast %cst_193 : f32 to vector<8x128xf32>
    %428 = arith.mulf %427, %426 : vector<8x128xf32>
    %429 = math.tanh %428 : vector<8x128xf32>
    %cst_194 = arith.constant 5.000000e-01 : f32
    %430 = vector.broadcast %cst_194 : f32 to vector<8x128xf32>
    %431 = arith.mulf %430, %429 : vector<8x128xf32>
    %cst_195 = arith.constant 5.000000e-01 : f32
    %432 = vector.broadcast %cst_195 : f32 to vector<8x128xf32>
    %433 = arith.addf %431, %432 : vector<8x128xf32>
    %434 = arith.mulf %423, %397 : vector<8x128xf32>
    %435 = arith.mulf %415, %425 : vector<8x128xf32>
    %436 = arith.addf %434, %435 : vector<8x128xf32>
    %437 = math.tanh %436 : vector<8x128xf32>
    %438 = arith.mulf %433, %437 : vector<8x128xf32>
    %439 = arith.index_cast %403 : i32 to index
    %c0_196 = arith.constant 0 : index
    %440 = vector.load %arg19[%439, %c0_196] : memref<32x128xf32, #tpu.memory_space<vmem>>, vector<8x128xf32>
    tpu.vector_store %arg19[%439, %c0_196], %438 {strides = array<i32>} : memref<32x128xf32, #tpu.memory_space<vmem>>, vector<8x128xf32>,
    %c2_i32_197 = arith.constant 2 : i32
    %c8_i32_198 = arith.constant 8 : i32
    %441 = arith.muli %c2_i32_197, %c8_i32_198 : i32
    %442 = tpu.assume_multiple %441, 8 : i32
    %443 = arith.index_cast %442 : i32 to index
    %c0_199 = arith.constant 0 : index
    %444 = vector.load %arg18[%443, %c0_199] : memref<32x512xf32, #tpu.memory_space<vmem>>, vector<8x512xf32>
    %cst_200 = arith.constant dense<0.000000e+00> : vector<8x512xf32>
    %445 = tpu.matmul %438, %358, %cst_200 {dimension_numbers = #tpu.dot_dimension_numbers<[1], [0], [0], [1], [0, 0, 1, 1], [], []>} : vector<8x128xf32>, vector<128x512xf32>, vector<8x512xf32> -> vector<8x512xf32>
    %446 = arith.addf %444, %445 : vector<8x512xf32>
    %447 = vector.extract_strided_slice %446 {offsets = [0, 0], sizes = [8, 128], strides = [1, 1]} : vector<8x512xf32> to vector<8x128xf32>
    %cst_201 = arith.constant 5.000000e-01 : f32
    %448 = vector.broadcast %cst_201 : f32 to vector<8x128xf32>
    %449 = arith.mulf %448, %447 : vector<8x128xf32>
    %450 = math.tanh %449 : vector<8x128xf32>
    %cst_202 = arith.constant 5.000000e-01 : f32
    %451 = vector.broadcast %cst_202 : f32 to vector<8x128xf32>
    %452 = arith.mulf %451, %450 : vector<8x128xf32>
    %cst_203 = arith.constant 5.000000e-01 : f32
    %453 = vector.broadcast %cst_203 : f32 to vector<8x128xf32>
    %454 = arith.addf %452, %453 : vector<8x128xf32>
    %455 = vector.extract_strided_slice %446 {offsets = [0, 128], sizes = [8, 128], strides = [1, 1]} : vector<8x512xf32> to vector<8x128xf32>
    %cst_204 = arith.constant 5.000000e-01 : f32
    %456 = vector.broadcast %cst_204 : f32 to vector<8x128xf32>
    %457 = arith.mulf %456, %455 : vector<8x128xf32>
    %458 = math.tanh %457 : vector<8x128xf32>
    %cst_205 = arith.constant 5.000000e-01 : f32
    %459 = vector.broadcast %cst_205 : f32 to vector<8x128xf32>
    %460 = arith.mulf %459, %458 : vector<8x128xf32>
    %cst_206 = arith.constant 5.000000e-01 : f32
    %461 = vector.broadcast %cst_206 : f32 to vector<8x128xf32>
    %462 = arith.addf %460, %461 : vector<8x128xf32>
    %463 = vector.extract_strided_slice %446 {offsets = [0, 256], sizes = [8, 128], strides = [1, 1]} : vector<8x512xf32> to vector<8x128xf32>
    %464 = math.tanh %463 : vector<8x128xf32>
    %465 = vector.extract_strided_slice %446 {offsets = [0, 384], sizes = [8, 128], strides = [1, 1]} : vector<8x512xf32> to vector<8x128xf32>
    %cst_207 = arith.constant 5.000000e-01 : f32
    %466 = vector.broadcast %cst_207 : f32 to vector<8x128xf32>
    %467 = arith.mulf %466, %465 : vector<8x128xf32>
    %468 = math.tanh %467 : vector<8x128xf32>
    %cst_208 = arith.constant 5.000000e-01 : f32
    %469 = vector.broadcast %cst_208 : f32 to vector<8x128xf32>
    %470 = arith.mulf %469, %468 : vector<8x128xf32>
    %cst_209 = arith.constant 5.000000e-01 : f32
    %471 = vector.broadcast %cst_209 : f32 to vector<8x128xf32>
    %472 = arith.addf %470, %471 : vector<8x128xf32>
    %473 = arith.mulf %462, %436 : vector<8x128xf32>
    %474 = arith.mulf %454, %464 : vector<8x128xf32>
    %475 = arith.addf %473, %474 : vector<8x128xf32>
    %476 = math.tanh %475 : vector<8x128xf32>
    %477 = arith.mulf %472, %476 : vector<8x128xf32>
    %478 = arith.index_cast %442 : i32 to index
    %c0_210 = arith.constant 0 : index
    %479 = vector.load %arg19[%478, %c0_210] : memref<32x128xf32, #tpu.memory_space<vmem>>, vector<8x128xf32>
    tpu.vector_store %arg19[%478, %c0_210], %477 {strides = array<i32>} : memref<32x128xf32, #tpu.memory_space<vmem>>, vector<8x128xf32>,
    %c3_i32_211 = arith.constant 3 : i32
    %c8_i32_212 = arith.constant 8 : i32
    %480 = arith.muli %c3_i32_211, %c8_i32_212 : i32
    %481 = tpu.assume_multiple %480, 8 : i32
    %482 = arith.index_cast %481 : i32 to index
    %c0_213 = arith.constant 0 : index
    %483 = vector.load %arg18[%482, %c0_213] : memref<32x512xf32, #tpu.memory_space<vmem>>, vector<8x512xf32>
    %cst_214 = arith.constant dense<0.000000e+00> : vector<8x512xf32>
    %484 = tpu.matmul %477, %358, %cst_214 {dimension_numbers = #tpu.dot_dimension_numbers<[1], [0], [0], [1], [0, 0, 1, 1], [], []>} : vector<8x128xf32>, vector<128x512xf32>, vector<8x512xf32> -> vector<8x512xf32>
    %485 = arith.addf %483, %484 : vector<8x512xf32>
    %486 = vector.extract_strided_slice %485 {offsets = [0, 0], sizes = [8, 128], strides = [1, 1]} : vector<8x512xf32> to vector<8x128xf32>
    %cst_215 = arith.constant 5.000000e-01 : f32
    %487 = vector.broadcast %cst_215 : f32 to vector<8x128xf32>
    %488 = arith.mulf %487, %486 : vector<8x128xf32>
    %489 = math.tanh %488 : vector<8x128xf32>
    %cst_216 = arith.constant 5.000000e-01 : f32
    %490 = vector.broadcast %cst_216 : f32 to vector<8x128xf32>
    %491 = arith.mulf %490, %489 : vector<8x128xf32>
    %cst_217 = arith.constant 5.000000e-01 : f32
    %492 = vector.broadcast %cst_217 : f32 to vector<8x128xf32>
    %493 = arith.addf %491, %492 : vector<8x128xf32>
    %494 = vector.extract_strided_slice %485 {offsets = [0, 128], sizes = [8, 128], strides = [1, 1]} : vector<8x512xf32> to vector<8x128xf32>
    %cst_218 = arith.constant 5.000000e-01 : f32
    %495 = vector.broadcast %cst_218 : f32 to vector<8x128xf32>
    %496 = arith.mulf %495, %494 : vector<8x128xf32>
    %497 = math.tanh %496 : vector<8x128xf32>
    %cst_219 = arith.constant 5.000000e-01 : f32
    %498 = vector.broadcast %cst_219 : f32 to vector<8x128xf32>
    %499 = arith.mulf %498, %497 : vector<8x128xf32>
    %cst_220 = arith.constant 5.000000e-01 : f32
    %500 = vector.broadcast %cst_220 : f32 to vector<8x128xf32>
    %501 = arith.addf %499, %500 : vector<8x128xf32>
    %502 = vector.extract_strided_slice %485 {offsets = [0, 256], sizes = [8, 128], strides = [1, 1]} : vector<8x512xf32> to vector<8x128xf32>
    %503 = math.tanh %502 : vector<8x128xf32>
    %504 = vector.extract_strided_slice %485 {offsets = [0, 384], sizes = [8, 128], strides = [1, 1]} : vector<8x512xf32> to vector<8x128xf32>
    %cst_221 = arith.constant 5.000000e-01 : f32
    %505 = vector.broadcast %cst_221 : f32 to vector<8x128xf32>
    %506 = arith.mulf %505, %504 : vector<8x128xf32>
    %507 = math.tanh %506 : vector<8x128xf32>
    %cst_222 = arith.constant 5.000000e-01 : f32
    %508 = vector.broadcast %cst_222 : f32 to vector<8x128xf32>
    %509 = arith.mulf %508, %507 : vector<8x128xf32>
    %cst_223 = arith.constant 5.000000e-01 : f32
    %510 = vector.broadcast %cst_223 : f32 to vector<8x128xf32>
    %511 = arith.addf %509, %510 : vector<8x128xf32>
    %512 = arith.mulf %501, %475 : vector<8x128xf32>
    %513 = arith.mulf %493, %503 : vector<8x128xf32>
    %514 = arith.addf %512, %513 : vector<8x128xf32>
    %515 = math.tanh %514 : vector<8x128xf32>
    %516 = arith.mulf %511, %515 : vector<8x128xf32>
    %517 = arith.index_cast %481 : i32 to index
    %c0_224 = arith.constant 0 : index
    %518 = vector.load %arg19[%517, %c0_224] : memref<32x128xf32, #tpu.memory_space<vmem>>, vector<8x128xf32>
    tpu.vector_store %arg19[%517, %c0_224], %516 {strides = array<i32>} : memref<32x128xf32, #tpu.memory_space<vmem>>, vector<8x128xf32>,
    %c4_i32_225 = arith.constant 4 : i32
    %c2_226 = arith.constant 2 : index
    %c0_227 = arith.constant 0 : index
    %c0_228 = arith.constant 0 : index
    %519 = vector.load %arg21[%c2_226, %c0_227, %c0_228] : memref<4x8x128xf32, #tpu.memory_space<vmem>>, vector<1x8x128xf32>
    %520 = vector.shape_cast %519 : vector<1x8x128xf32> to vector<8x128xf32>
    %521 = vector.shape_cast %516 : vector<8x128xf32> to vector<1x8x128xf32>
    tpu.vector_store %arg21[%c2_226, %c0_227, %c0_228], %521 {strides = array<i32>} : memref<4x8x128xf32, #tpu.memory_space<vmem>>, vector<1x8x128xf32>,
    %c2_229 = arith.constant 2 : index
    %c0_230 = arith.constant 0 : index
    %c0_231 = arith.constant 0 : index
    %522 = vector.load %arg22[%c2_229, %c0_230, %c0_231] : memref<4x8x128xf32, #tpu.memory_space<vmem>>, vector<1x8x128xf32>
    %523 = vector.shape_cast %522 : vector<1x8x128xf32> to vector<8x128xf32>
    %524 = vector.shape_cast %514 : vector<8x128xf32> to vector<1x8x128xf32>
    tpu.vector_store %arg22[%c2_229, %c0_230, %c0_231], %524 {strides = array<i32>} : memref<4x8x128xf32, #tpu.memory_space<vmem>>, vector<1x8x128xf32>,
    %c0_232 = arith.constant 0 : index
    %c0_233 = arith.constant 0 : index
    %525 = vector.load %arg19[%c0_232, %c0_233] : memref<32x128xf32, #tpu.memory_space<vmem>>, vector<32x128xf32>
    %c0_234 = arith.constant 0 : index
    %c0_235 = arith.constant 0 : index
    %526 = vector.load %arg12[%c0_234, %c0_235] : memref<128x512xf32, #tpu.memory_space<vmem>>, vector<128x512xf32>
    %cst_236 = arith.constant dense<0.000000e+00> : vector<32x512xf32>
    %527 = tpu.matmul %525, %526, %cst_236 {dimension_numbers = #tpu.dot_dimension_numbers<[1], [0], [0], [1], [0, 0, 1, 1], [], []>} : vector<32x128xf32>, vector<128x512xf32>, vector<32x512xf32> -> vector<32x512xf32>
    %c0_237 = arith.constant 0 : index
    %c0_238 = arith.constant 0 : index
    %528 = vector.load %arg14[%c0_237, %c0_238] : memref<1x512xf32, #tpu.memory_space<vmem>>, vector<1x512xf32>
    %529 = vector.broadcast %528 : vector<1x512xf32> to vector<32x512xf32>
    %530 = arith.addf %527, %529 : vector<32x512xf32>
    %c0_239 = arith.constant 0 : index
    %c0_240 = arith.constant 0 : index
    %531 = vector.load %arg18[%c0_239, %c0_240] : memref<32x512xf32, #tpu.memory_space<vmem>>, vector<32x512xf32>
    tpu.vector_store %arg18[%c0_239, %c0_240], %530 {strides = array<i32>} : memref<32x512xf32, #tpu.memory_space<vmem>>, vector<32x512xf32>,
    %c0_241 = arith.constant 0 : index
    %c0_242 = arith.constant 0 : index
    %532 = vector.load %arg13[%c0_241, %c0_242] : memref<128x512xf32, #tpu.memory_space<vmem>>, vector<128x512xf32>
    %c3 = arith.constant 3 : index
    %c0_243 = arith.constant 0 : index
    %c0_244 = arith.constant 0 : index
    %533 = vector.load %arg21[%c3, %c0_243, %c0_244] : memref<4x8x128xf32, #tpu.memory_space<vmem>>, vector<1x8x128xf32>
    %534 = vector.shape_cast %533 : vector<1x8x128xf32> to vector<8x128xf32>
    %c3_245 = arith.constant 3 : index
    %c0_246 = arith.constant 0 : index
    %c0_247 = arith.constant 0 : index
    %535 = vector.load %arg22[%c3_245, %c0_246, %c0_247] : memref<4x8x128xf32, #tpu.memory_space<vmem>>, vector<1x8x128xf32>
    %536 = vector.shape_cast %535 : vector<1x8x128xf32> to vector<8x128xf32>
    %c0_i32_248 = arith.constant 0 : i32
    %c8_i32_249 = arith.constant 8 : i32
    %537 = arith.muli %c0_i32_248, %c8_i32_249 : i32
    %538 = tpu.assume_multiple %537, 8 : i32
    %539 = arith.index_cast %538 : i32 to index
    %c0_250 = arith.constant 0 : index
    %540 = vector.load %arg18[%539, %c0_250] : memref<32x512xf32, #tpu.memory_space<vmem>>, vector<8x512xf32>
    %cst_251 = arith.constant dense<0.000000e+00> : vector<8x512xf32>
    %541 = tpu.matmul %534, %532, %cst_251 {dimension_numbers = #tpu.dot_dimension_numbers<[1], [0], [0], [1], [0, 0, 1, 1], [], []>} : vector<8x128xf32>, vector<128x512xf32>, vector<8x512xf32> -> vector<8x512xf32>
    %542 = arith.addf %540, %541 : vector<8x512xf32>
    %543 = vector.extract_strided_slice %542 {offsets = [0, 0], sizes = [8, 128], strides = [1, 1]} : vector<8x512xf32> to vector<8x128xf32>
    %cst_252 = arith.constant 5.000000e-01 : f32
    %544 = vector.broadcast %cst_252 : f32 to vector<8x128xf32>
    %545 = arith.mulf %544, %543 : vector<8x128xf32>
    %546 = math.tanh %545 : vector<8x128xf32>
    %cst_253 = arith.constant 5.000000e-01 : f32
    %547 = vector.broadcast %cst_253 : f32 to vector<8x128xf32>
    %548 = arith.mulf %547, %546 : vector<8x128xf32>
    %cst_254 = arith.constant 5.000000e-01 : f32
    %549 = vector.broadcast %cst_254 : f32 to vector<8x128xf32>
    %550 = arith.addf %548, %549 : vector<8x128xf32>
    %551 = vector.extract_strided_slice %542 {offsets = [0, 128], sizes = [8, 128], strides = [1, 1]} : vector<8x512xf32> to vector<8x128xf32>
    %cst_255 = arith.constant 5.000000e-01 : f32
    %552 = vector.broadcast %cst_255 : f32 to vector<8x128xf32>
    %553 = arith.mulf %552, %551 : vector<8x128xf32>
    %554 = math.tanh %553 : vector<8x128xf32>
    %cst_256 = arith.constant 5.000000e-01 : f32
    %555 = vector.broadcast %cst_256 : f32 to vector<8x128xf32>
    %556 = arith.mulf %555, %554 : vector<8x128xf32>
    %cst_257 = arith.constant 5.000000e-01 : f32
    %557 = vector.broadcast %cst_257 : f32 to vector<8x128xf32>
    %558 = arith.addf %556, %557 : vector<8x128xf32>
    %559 = vector.extract_strided_slice %542 {offsets = [0, 256], sizes = [8, 128], strides = [1, 1]} : vector<8x512xf32> to vector<8x128xf32>
    %560 = math.tanh %559 : vector<8x128xf32>
    %561 = vector.extract_strided_slice %542 {offsets = [0, 384], sizes = [8, 128], strides = [1, 1]} : vector<8x512xf32> to vector<8x128xf32>
    %cst_258 = arith.constant 5.000000e-01 : f32
    %562 = vector.broadcast %cst_258 : f32 to vector<8x128xf32>
    %563 = arith.mulf %562, %561 : vector<8x128xf32>
    %564 = math.tanh %563 : vector<8x128xf32>
    %cst_259 = arith.constant 5.000000e-01 : f32
    %565 = vector.broadcast %cst_259 : f32 to vector<8x128xf32>
    %566 = arith.mulf %565, %564 : vector<8x128xf32>
    %cst_260 = arith.constant 5.000000e-01 : f32
    %567 = vector.broadcast %cst_260 : f32 to vector<8x128xf32>
    %568 = arith.addf %566, %567 : vector<8x128xf32>
    %569 = arith.mulf %558, %536 : vector<8x128xf32>
    %570 = arith.mulf %550, %560 : vector<8x128xf32>
    %571 = arith.addf %569, %570 : vector<8x128xf32>
    %572 = math.tanh %571 : vector<8x128xf32>
    %573 = arith.mulf %568, %572 : vector<8x128xf32>
    %574 = arith.index_cast %538 : i32 to index
    %c0_261 = arith.constant 0 : index
    %575 = vector.load %arg20[%574, %c0_261] : memref<32x128xf32, #tpu.memory_space<vmem>>, vector<8x128xf32>
    tpu.vector_store %arg20[%574, %c0_261], %573 {strides = array<i32>} : memref<32x128xf32, #tpu.memory_space<vmem>>, vector<8x128xf32>,
    %c1_i32_262 = arith.constant 1 : i32
    %c8_i32_263 = arith.constant 8 : i32
    %576 = arith.muli %c1_i32_262, %c8_i32_263 : i32
    %577 = tpu.assume_multiple %576, 8 : i32
    %578 = arith.index_cast %577 : i32 to index
    %c0_264 = arith.constant 0 : index
    %579 = vector.load %arg18[%578, %c0_264] : memref<32x512xf32, #tpu.memory_space<vmem>>, vector<8x512xf32>
    %cst_265 = arith.constant dense<0.000000e+00> : vector<8x512xf32>
    %580 = tpu.matmul %573, %532, %cst_265 {dimension_numbers = #tpu.dot_dimension_numbers<[1], [0], [0], [1], [0, 0, 1, 1], [], []>} : vector<8x128xf32>, vector<128x512xf32>, vector<8x512xf32> -> vector<8x512xf32>
    %581 = arith.addf %579, %580 : vector<8x512xf32>
    %582 = vector.extract_strided_slice %581 {offsets = [0, 0], sizes = [8, 128], strides = [1, 1]} : vector<8x512xf32> to vector<8x128xf32>
    %cst_266 = arith.constant 5.000000e-01 : f32
    %583 = vector.broadcast %cst_266 : f32 to vector<8x128xf32>
    %584 = arith.mulf %583, %582 : vector<8x128xf32>
    %585 = math.tanh %584 : vector<8x128xf32>
    %cst_267 = arith.constant 5.000000e-01 : f32
    %586 = vector.broadcast %cst_267 : f32 to vector<8x128xf32>
    %587 = arith.mulf %586, %585 : vector<8x128xf32>
    %cst_268 = arith.constant 5.000000e-01 : f32
    %588 = vector.broadcast %cst_268 : f32 to vector<8x128xf32>
    %589 = arith.addf %587, %588 : vector<8x128xf32>
    %590 = vector.extract_strided_slice %581 {offsets = [0, 128], sizes = [8, 128], strides = [1, 1]} : vector<8x512xf32> to vector<8x128xf32>
    %cst_269 = arith.constant 5.000000e-01 : f32
    %591 = vector.broadcast %cst_269 : f32 to vector<8x128xf32>
    %592 = arith.mulf %591, %590 : vector<8x128xf32>
    %593 = math.tanh %592 : vector<8x128xf32>
    %cst_270 = arith.constant 5.000000e-01 : f32
    %594 = vector.broadcast %cst_270 : f32 to vector<8x128xf32>
    %595 = arith.mulf %594, %593 : vector<8x128xf32>
    %cst_271 = arith.constant 5.000000e-01 : f32
    %596 = vector.broadcast %cst_271 : f32 to vector<8x128xf32>
    %597 = arith.addf %595, %596 : vector<8x128xf32>
    %598 = vector.extract_strided_slice %581 {offsets = [0, 256], sizes = [8, 128], strides = [1, 1]} : vector<8x512xf32> to vector<8x128xf32>
    %599 = math.tanh %598 : vector<8x128xf32>
    %600 = vector.extract_strided_slice %581 {offsets = [0, 384], sizes = [8, 128], strides = [1, 1]} : vector<8x512xf32> to vector<8x128xf32>
    %cst_272 = arith.constant 5.000000e-01 : f32
    %601 = vector.broadcast %cst_272 : f32 to vector<8x128xf32>
    %602 = arith.mulf %601, %600 : vector<8x128xf32>
    %603 = math.tanh %602 : vector<8x128xf32>
    %cst_273 = arith.constant 5.000000e-01 : f32
    %604 = vector.broadcast %cst_273 : f32 to vector<8x128xf32>
    %605 = arith.mulf %604, %603 : vector<8x128xf32>
    %cst_274 = arith.constant 5.000000e-01 : f32
    %606 = vector.broadcast %cst_274 : f32 to vector<8x128xf32>
    %607 = arith.addf %605, %606 : vector<8x128xf32>
    %608 = arith.mulf %597, %571 : vector<8x128xf32>
    %609 = arith.mulf %589, %599 : vector<8x128xf32>
    %610 = arith.addf %608, %609 : vector<8x128xf32>
    %611 = math.tanh %610 : vector<8x128xf32>
    %612 = arith.mulf %607, %611 : vector<8x128xf32>
    %613 = arith.index_cast %577 : i32 to index
    %c0_275 = arith.constant 0 : index
    %614 = vector.load %arg20[%613, %c0_275] : memref<32x128xf32, #tpu.memory_space<vmem>>, vector<8x128xf32>
    tpu.vector_store %arg20[%613, %c0_275], %612 {strides = array<i32>} : memref<32x128xf32, #tpu.memory_space<vmem>>, vector<8x128xf32>,
    %c2_i32_276 = arith.constant 2 : i32
    %c8_i32_277 = arith.constant 8 : i32
    %615 = arith.muli %c2_i32_276, %c8_i32_277 : i32
    %616 = tpu.assume_multiple %615, 8 : i32
    %617 = arith.index_cast %616 : i32 to index
    %c0_278 = arith.constant 0 : index
    %618 = vector.load %arg18[%617, %c0_278] : memref<32x512xf32, #tpu.memory_space<vmem>>, vector<8x512xf32>
    %cst_279 = arith.constant dense<0.000000e+00> : vector<8x512xf32>
    %619 = tpu.matmul %612, %532, %cst_279 {dimension_numbers = #tpu.dot_dimension_numbers<[1], [0], [0], [1], [0, 0, 1, 1], [], []>} : vector<8x128xf32>, vector<128x512xf32>, vector<8x512xf32> -> vector<8x512xf32>
    %620 = arith.addf %618, %619 : vector<8x512xf32>
    %621 = vector.extract_strided_slice %620 {offsets = [0, 0], sizes = [8, 128], strides = [1, 1]} : vector<8x512xf32> to vector<8x128xf32>
    %cst_280 = arith.constant 5.000000e-01 : f32
    %622 = vector.broadcast %cst_280 : f32 to vector<8x128xf32>
    %623 = arith.mulf %622, %621 : vector<8x128xf32>
    %624 = math.tanh %623 : vector<8x128xf32>
    %cst_281 = arith.constant 5.000000e-01 : f32
    %625 = vector.broadcast %cst_281 : f32 to vector<8x128xf32>
    %626 = arith.mulf %625, %624 : vector<8x128xf32>
    %cst_282 = arith.constant 5.000000e-01 : f32
    %627 = vector.broadcast %cst_282 : f32 to vector<8x128xf32>
    %628 = arith.addf %626, %627 : vector<8x128xf32>
    %629 = vector.extract_strided_slice %620 {offsets = [0, 128], sizes = [8, 128], strides = [1, 1]} : vector<8x512xf32> to vector<8x128xf32>
    %cst_283 = arith.constant 5.000000e-01 : f32
    %630 = vector.broadcast %cst_283 : f32 to vector<8x128xf32>
    %631 = arith.mulf %630, %629 : vector<8x128xf32>
    %632 = math.tanh %631 : vector<8x128xf32>
    %cst_284 = arith.constant 5.000000e-01 : f32
    %633 = vector.broadcast %cst_284 : f32 to vector<8x128xf32>
    %634 = arith.mulf %633, %632 : vector<8x128xf32>
    %cst_285 = arith.constant 5.000000e-01 : f32
    %635 = vector.broadcast %cst_285 : f32 to vector<8x128xf32>
    %636 = arith.addf %634, %635 : vector<8x128xf32>
    %637 = vector.extract_strided_slice %620 {offsets = [0, 256], sizes = [8, 128], strides = [1, 1]} : vector<8x512xf32> to vector<8x128xf32>
    %638 = math.tanh %637 : vector<8x128xf32>
    %639 = vector.extract_strided_slice %620 {offsets = [0, 384], sizes = [8, 128], strides = [1, 1]} : vector<8x512xf32> to vector<8x128xf32>
    %cst_286 = arith.constant 5.000000e-01 : f32
    %640 = vector.broadcast %cst_286 : f32 to vector<8x128xf32>
    %641 = arith.mulf %640, %639 : vector<8x128xf32>
    %642 = math.tanh %641 : vector<8x128xf32>
    %cst_287 = arith.constant 5.000000e-01 : f32
    %643 = vector.broadcast %cst_287 : f32 to vector<8x128xf32>
    %644 = arith.mulf %643, %642 : vector<8x128xf32>
    %cst_288 = arith.constant 5.000000e-01 : f32
    %645 = vector.broadcast %cst_288 : f32 to vector<8x128xf32>
    %646 = arith.addf %644, %645 : vector<8x128xf32>
    %647 = arith.mulf %636, %610 : vector<8x128xf32>
    %648 = arith.mulf %628, %638 : vector<8x128xf32>
    %649 = arith.addf %647, %648 : vector<8x128xf32>
    %650 = math.tanh %649 : vector<8x128xf32>
    %651 = arith.mulf %646, %650 : vector<8x128xf32>
    %652 = arith.index_cast %616 : i32 to index
    %c0_289 = arith.constant 0 : index
    %653 = vector.load %arg20[%652, %c0_289] : memref<32x128xf32, #tpu.memory_space<vmem>>, vector<8x128xf32>
    tpu.vector_store %arg20[%652, %c0_289], %651 {strides = array<i32>} : memref<32x128xf32, #tpu.memory_space<vmem>>, vector<8x128xf32>,
    %c3_i32_290 = arith.constant 3 : i32
    %c8_i32_291 = arith.constant 8 : i32
    %654 = arith.muli %c3_i32_290, %c8_i32_291 : i32
    %655 = tpu.assume_multiple %654, 8 : i32
    %656 = arith.index_cast %655 : i32 to index
    %c0_292 = arith.constant 0 : index
    %657 = vector.load %arg18[%656, %c0_292] : memref<32x512xf32, #tpu.memory_space<vmem>>, vector<8x512xf32>
    %cst_293 = arith.constant dense<0.000000e+00> : vector<8x512xf32>
    %658 = tpu.matmul %651, %532, %cst_293 {dimension_numbers = #tpu.dot_dimension_numbers<[1], [0], [0], [1], [0, 0, 1, 1], [], []>} : vector<8x128xf32>, vector<128x512xf32>, vector<8x512xf32> -> vector<8x512xf32>
    %659 = arith.addf %657, %658 : vector<8x512xf32>
    %660 = vector.extract_strided_slice %659 {offsets = [0, 0], sizes = [8, 128], strides = [1, 1]} : vector<8x512xf32> to vector<8x128xf32>
    %cst_294 = arith.constant 5.000000e-01 : f32
    %661 = vector.broadcast %cst_294 : f32 to vector<8x128xf32>
    %662 = arith.mulf %661, %660 : vector<8x128xf32>
    %663 = math.tanh %662 : vector<8x128xf32>
    %cst_295 = arith.constant 5.000000e-01 : f32
    %664 = vector.broadcast %cst_295 : f32 to vector<8x128xf32>
    %665 = arith.mulf %664, %663 : vector<8x128xf32>
    %cst_296 = arith.constant 5.000000e-01 : f32
    %666 = vector.broadcast %cst_296 : f32 to vector<8x128xf32>
    %667 = arith.addf %665, %666 : vector<8x128xf32>
    %668 = vector.extract_strided_slice %659 {offsets = [0, 128], sizes = [8, 128], strides = [1, 1]} : vector<8x512xf32> to vector<8x128xf32>
    %cst_297 = arith.constant 5.000000e-01 : f32
    %669 = vector.broadcast %cst_297 : f32 to vector<8x128xf32>
    %670 = arith.mulf %669, %668 : vector<8x128xf32>
    %671 = math.tanh %670 : vector<8x128xf32>
    %cst_298 = arith.constant 5.000000e-01 : f32
    %672 = vector.broadcast %cst_298 : f32 to vector<8x128xf32>
    %673 = arith.mulf %672, %671 : vector<8x128xf32>
    %cst_299 = arith.constant 5.000000e-01 : f32
    %674 = vector.broadcast %cst_299 : f32 to vector<8x128xf32>
    %675 = arith.addf %673, %674 : vector<8x128xf32>
    %676 = vector.extract_strided_slice %659 {offsets = [0, 256], sizes = [8, 128], strides = [1, 1]} : vector<8x512xf32> to vector<8x128xf32>
    %677 = math.tanh %676 : vector<8x128xf32>
    %678 = vector.extract_strided_slice %659 {offsets = [0, 384], sizes = [8, 128], strides = [1, 1]} : vector<8x512xf32> to vector<8x128xf32>
    %cst_300 = arith.constant 5.000000e-01 : f32
    %679 = vector.broadcast %cst_300 : f32 to vector<8x128xf32>
    %680 = arith.mulf %679, %678 : vector<8x128xf32>
    %681 = math.tanh %680 : vector<8x128xf32>
    %cst_301 = arith.constant 5.000000e-01 : f32
    %682 = vector.broadcast %cst_301 : f32 to vector<8x128xf32>
    %683 = arith.mulf %682, %681 : vector<8x128xf32>
    %cst_302 = arith.constant 5.000000e-01 : f32
    %684 = vector.broadcast %cst_302 : f32 to vector<8x128xf32>
    %685 = arith.addf %683, %684 : vector<8x128xf32>
    %686 = arith.mulf %675, %649 : vector<8x128xf32>
    %687 = arith.mulf %667, %677 : vector<8x128xf32>
    %688 = arith.addf %686, %687 : vector<8x128xf32>
    %689 = math.tanh %688 : vector<8x128xf32>
    %690 = arith.mulf %685, %689 : vector<8x128xf32>
    %691 = arith.index_cast %655 : i32 to index
    %c0_303 = arith.constant 0 : index
    %692 = vector.load %arg20[%691, %c0_303] : memref<32x128xf32, #tpu.memory_space<vmem>>, vector<8x128xf32>
    tpu.vector_store %arg20[%691, %c0_303], %690 {strides = array<i32>} : memref<32x128xf32, #tpu.memory_space<vmem>>, vector<8x128xf32>,
    %c4_i32_304 = arith.constant 4 : i32
    %c3_305 = arith.constant 3 : index
    %c0_306 = arith.constant 0 : index
    %c0_307 = arith.constant 0 : index
    %693 = vector.load %arg21[%c3_305, %c0_306, %c0_307] : memref<4x8x128xf32, #tpu.memory_space<vmem>>, vector<1x8x128xf32>
    %694 = vector.shape_cast %693 : vector<1x8x128xf32> to vector<8x128xf32>
    %695 = vector.shape_cast %690 : vector<8x128xf32> to vector<1x8x128xf32>
    tpu.vector_store %arg21[%c3_305, %c0_306, %c0_307], %695 {strides = array<i32>} : memref<4x8x128xf32, #tpu.memory_space<vmem>>, vector<1x8x128xf32>,
    %c3_308 = arith.constant 3 : index
    %c0_309 = arith.constant 0 : index
    %c0_310 = arith.constant 0 : index
    %696 = vector.load %arg22[%c3_308, %c0_309, %c0_310] : memref<4x8x128xf32, #tpu.memory_space<vmem>>, vector<1x8x128xf32>
    %697 = vector.shape_cast %696 : vector<1x8x128xf32> to vector<8x128xf32>
    %698 = vector.shape_cast %688 : vector<8x128xf32> to vector<1x8x128xf32>
    tpu.vector_store %arg22[%c3_308, %c0_309, %c0_310], %698 {strides = array<i32>} : memref<4x8x128xf32, #tpu.memory_space<vmem>>, vector<1x8x128xf32>,
    %c0_311 = arith.constant 0 : index
    %c0_312 = arith.constant 0 : index
    %699 = vector.load %arg20[%c0_311, %c0_312] : memref<32x128xf32, #tpu.memory_space<vmem>>, vector<32x128xf32>
    %c0_313 = arith.constant 0 : index
    %c0_314 = arith.constant 0 : index
    %700 = vector.load %arg15[%c0_313, %c0_314] : memref<128x128xf32, #tpu.memory_space<vmem>>, vector<128x128xf32>
    %cst_315 = arith.constant dense<0.000000e+00> : vector<32x128xf32>
    %701 = tpu.matmul %699, %700, %cst_315 {dimension_numbers = #tpu.dot_dimension_numbers<[1], [0], [0], [1], [0, 0, 1, 1], [], []>} : vector<32x128xf32>, vector<128x128xf32>, vector<32x128xf32> -> vector<32x128xf32>
    %c0_316 = arith.constant 0 : index
    %c0_317 = arith.constant 0 : index
    %702 = vector.load %arg16[%c0_316, %c0_317] : memref<1x128xf32, #tpu.memory_space<vmem>>, vector<1x128xf32>
    %703 = vector.broadcast %702 : vector<1x128xf32> to vector<32x128xf32>
    %704 = arith.addf %701, %703 : vector<32x128xf32>
    %c0_318 = arith.constant 0 : index
    %c0_319 = arith.constant 0 : index
    %705 = vector.load %arg17[%c0_318, %c0_319] : memref<32x128xf32, #tpu.memory_space<vmem>>, vector<32x128xf32>
    tpu.vector_store %arg17[%c0_318, %c0_319], %704 {strides = array<i32>} : memref<32x128xf32, #tpu.memory_space<vmem>>, vector<32x128xf32>,
    return
  }
  func.func @transform_0(%arg0: i32, %arg1: i32) -> (i32, i32) {
    %c2_i32 = arith.constant 2 : i32
    %0 = arith.muli %arg0, %c2_i32 : i32
    %1 = arith.addi %0, %arg1 : i32
    %c0_i32 = arith.constant 0 : i32
    %c0_i32_0 = arith.constant 0 : i32
    return %1, %c0_i32 : i32, i32
  }
  func.func @transform_1(%arg0: i32, %arg1: i32) -> (i32, i32) {
    %c0_i32 = arith.constant 0 : i32
    %c0_i32_0 = arith.constant 0 : i32
    %c0_i32_1 = arith.constant 0 : i32
    return %c0_i32, %c0_i32_0 : i32, i32
  }
  func.func @transform_2(%arg0: i32, %arg1: i32) -> (i32, i32) {
    %c0_i32 = arith.constant 0 : i32
    %c0_i32_0 = arith.constant 0 : i32
    %c0_i32_1 = arith.constant 0 : i32
    return %c0_i32, %c0_i32_0 : i32, i32
  }
  func.func @transform_3(%arg0: i32, %arg1: i32) -> (i32, i32) {
    %c0_i32 = arith.constant 0 : i32
    %c0_i32_0 = arith.constant 0 : i32
    %c0_i32_1 = arith.constant 0 : i32
    return %c0_i32, %c0_i32_0 : i32, i32
  }
  func.func @transform_4(%arg0: i32, %arg1: i32) -> (i32, i32) {
    %c0_i32 = arith.constant 0 : i32
    %c0_i32_0 = arith.constant 0 : i32
    %c0_i32_1 = arith.constant 0 : i32
    return %c0_i32, %c0_i32_0 : i32, i32
  }
  func.func @transform_5(%arg0: i32, %arg1: i32) -> (i32, i32) {
    %c0_i32 = arith.constant 0 : i32
    %c0_i32_0 = arith.constant 0 : i32
    %c0_i32_1 = arith.constant 0 : i32
    return %c0_i32, %c0_i32_0 : i32, i32
  }
  func.func @transform_6(%arg0: i32, %arg1: i32) -> (i32, i32) {
    %c0_i32 = arith.constant 0 : i32
    %c0_i32_0 = arith.constant 0 : i32
    %c0_i32_1 = arith.constant 0 : i32
    return %c0_i32, %c0_i32_0 : i32, i32
  }
  func.func @transform_7(%arg0: i32, %arg1: i32) -> (i32, i32) {
    %c0_i32 = arith.constant 0 : i32
    %c0_i32_0 = arith.constant 0 : i32
    %c0_i32_1 = arith.constant 0 : i32
    return %c0_i32, %c0_i32_0 : i32, i32
  }
  func.func @transform_8(%arg0: i32, %arg1: i32) -> (i32, i32) {
    %c0_i32 = arith.constant 0 : i32
    %c0_i32_0 = arith.constant 0 : i32
    %c0_i32_1 = arith.constant 0 : i32
    return %c0_i32, %c0_i32_0 : i32, i32
  }
  func.func @transform_9(%arg0: i32, %arg1: i32) -> (i32, i32) {
    %c0_i32 = arith.constant 0 : i32
    %c0_i32_0 = arith.constant 0 : i32
    %c0_i32_1 = arith.constant 0 : i32
    return %c0_i32, %c0_i32_0 : i32, i32
  }
  func.func @transform_10(%arg0: i32, %arg1: i32) -> (i32, i32) {
    %c0_i32 = arith.constant 0 : i32
    %c0_i32_0 = arith.constant 0 : i32
    %c0_i32_1 = arith.constant 0 : i32
    return %c0_i32, %c0_i32_0 : i32, i32
  }
  func.func @transform_11(%arg0: i32, %arg1: i32) -> (i32, i32) {
    %c0_i32 = arith.constant 0 : i32
    %c0_i32_0 = arith.constant 0 : i32
    %c0_i32_1 = arith.constant 0 : i32
    return %c0_i32, %c0_i32_0 : i32, i32
  }
  func.func @transform_12(%arg0: i32, %arg1: i32) -> (i32, i32) {
    %c0_i32 = arith.constant 0 : i32
    %c0_i32_0 = arith.constant 0 : i32
    %c0_i32_1 = arith.constant 0 : i32
    return %c0_i32, %c0_i32_0 : i32, i32
  }
  func.func @transform_13(%arg0: i32, %arg1: i32) -> (i32, i32) {
    %c0_i32 = arith.constant 0 : i32
    %c0_i32_0 = arith.constant 0 : i32
    %c0_i32_1 = arith.constant 0 : i32
    return %c0_i32, %c0_i32_0 : i32, i32
  }
  func.func @transform_14(%arg0: i32, %arg1: i32) -> (i32, i32) {
    %c0_i32 = arith.constant 0 : i32
    %c0_i32_0 = arith.constant 0 : i32
    %c0_i32_1 = arith.constant 0 : i32
    return %c0_i32, %c0_i32_0 : i32, i32
  }
  func.func @transform_15(%arg0: i32, %arg1: i32) -> (i32, i32) {
    %c2_i32 = arith.constant 2 : i32
    %0 = arith.muli %arg0, %c2_i32 : i32
    %1 = arith.addi %0, %arg1 : i32
    %c0_i32 = arith.constant 0 : i32
    %c0_i32_0 = arith.constant 0 : i32
    return %1, %c0_i32 : i32, i32
  }
}

</mosaic_0001>

<bundles_post_ra>
// kernel: rvc_forward_pallas.1
= control target key start
LH: loop header
LB: loop body
LE: loop exit
PB: predicated region body
PF: predicated region fallthrough
CT: control target
= control target key end

     0   :  { %s7902_s0 = inlined_call_operand.vmem [shape: f32[64,16], index: 0, kind: input, shape index: {}]   ;;  %s7903_s1 = inlined_call_operand.vmem [shape: f32[16,512], index: 1, kind: input, shape index: {}]   ;;  %s7904_s2 = inlined_call_operand.hbm [shape: f32[128,512], index: 2, kind: input, shape index: {}]   ;;  %s7905_s3 = inlined_call_operand.vmem [shape: f32[1,512], index: 3, kind: input, shape index: {}]   ;;  %s7906_s4 = inlined_call_operand.hbm [shape: f32[128,512], index: 4, kind: input, shape index: {}]   ;;  %s7907_s5 = inlined_call_operand.hbm [shape: f32[128,512], index: 5, kind: input, shape index: {}]   ;;  %s7908_s6 = inlined_call_operand.vmem [shape: f32[1,512], index: 6, kind: input, shape index: {}]   ;;  %s7909_s7 = inlined_call_operand.hbm [shape: f32[128,512], index: 7, kind: input, shape index: {}]   ;;  %s7910_s8 = inlined_call_operand.hbm [shape: f32[128,512], index: 8, kind: input, shape index: {}]   ;;  %s7911_s9 = inlined_call_operand.vmem [shape: f32[1,512], index: 9, kind: input, shape index: {}]   ;;  %s7912_s10 = inlined_call_operand.hbm [shape: f32[128,512], index: 10, kind: input, shape index: {}]   ;;  %s7913_s11 = inlined_call_operand.hbm [shape: f32[128,512], index: 11, kind: input, shape index: {}]   ;;  %s7914_s12 = inlined_call_operand.vmem [shape: f32[1,512], index: 12, kind: input, shape index: {}]   ;;  %s7915_s13 = inlined_call_operand.vmem [shape: f32[128,128], index: 13, kind: input, shape index: {}]   ;;  %s7916_s14 = inlined_call_operand.vmem [shape: f32[1,128], index: 14, kind: input, shape index: {}]   ;;  %s7917_s15 = inlined_call_operand.vmem [shape: f32[64,128], index: 15, kind: output, shape index: {}]  }
   0x1   :  { %8152 = sst [smem:[#allocation66_spill]] %s7906_s4 }
   0x2   :  { %8153 = sst [smem:[#allocation67_spill]] %s7909_s7 }
   0x3   :  { %8154 = sst [smem:[#allocation68_spill]] %s7912_s10 }
   0x4   :  { %20 = vsyncpa [#allocation8], 0 }
   0x5   :  { %21 = vsyncpa [#allocation10], 0 }
   0x6   :  { %22 = vsyncpa [#allocation13], 0 }
   0x7   :  { %23 = vsyncpa [#allocation16], 0  ;;  %s5665_s18 = smov 0   ;;  %s5667_s19 = smov 0  }
   0x8   :  { %s5669_s20 = smov 0  }
   0x9 LB: > { %8155 = sst [smem:[#allocation22_spill]] %s5572_s20  ;;  %s5000_s21 = sadd.s32 4294967295, %s5572_s20   ;;  %s5572_s20 = sphi %s5669_s20, %s29_s20   ;;  %s5568_s19 = sphi %s5667_s19, %s8649_s19   ;;  %s5564_s18 = sphi %s5665_s18, %s8648_s18  }
   0xa   : > { %p5002_p0 = scmp.ge.s32.totalorder %s5572_s20, 1  ;;  %p400_p1 = scmp.lt.s32.totalorder %s5572_s20, 3 }
   0xb   : > { %p5683_p2 = scmp.eq.s32.totalorder %s5000_s21, 0  ;;  %s5574_s24 = smov [#allocation9]  }
   0xc   : > { %p5687_p3 = pnand %p5002_p0, %p400_p1  ;;  %s431_s25 = sshll.u32 %s5574_s24, 4  ;;  %s432_s25 = int_to_ptr.vmem [resolvable:$true] %s431_s25 }
   0xd   : > { %s5575_s26 = smov [#allocation12]   ;;  %s5576_s29 = smov [#allocation15]  }
   0xe   : > { %p5121_p4 = pneg %p5687_p3  ;;  %s460_s27 = sshll.u32 %s5575_s26, 4  ;;  %s5693_s27 = int_to_ptr.vmem [resolvable:$true] %s460_s27 }
   0xf   : > { %s489_s30 = sshll.u32 %s5576_s29, 4  ;;  %s5363_s17 = scalar_lea.vmem %s432_s25, 8192  ;;  %s5701_s30 = int_to_ptr.vmem [resolvable:$true] %s489_s30 }
  0x10   : > { %p5697_p5 = pnand %p5683_p2, %p5121_p4  ;;  %p5364_p7 = scmp.ne.s32.totalorder %s432_s25, %s5363_s17 }
  0x11   : > { %p5371_p10 = scmp.lt.s32.totalorder %s432_s25, %s432_s25  ;;  %p5372_p11 = scmp.lt.s32.totalorder %s5363_s17, %s5363_s17 }
  0x12   : > { %p5705_p6 = pneg %p5697_p5 }
  0x13   : > { %p5373_p12 = por %p5372_p11, %p5371_p10 }
  0x14   : > { %p5366_p8 = pnand %p5364_p7, %p5705_p6 }
  0x16   : > { %p5367_p9 = pneg %p5366_p8 }
  0x18   : > { %p5374_p13 = pnand %p5373_p12, %p5367_p9 }
  0x1a   : > { %5377 = shalt.err (!%p5374_p13)
}
  0x1b   : > { %s5577_s21 = smov 512   ;;  %s5578_s24 = smov 32  }
  0x1c   : > { %s8160_s4 = sld [smem:[#allocation66_spill]]  ;;  %s5389_s20 = scalar_lea.vmem %s5693_s27, 8192 }
  0x1d   : > { %p5390_p0 = scmp.ne.s32.totalorder %s5693_s27, %s5389_s20  ;;  %p5397_p7 = scmp.lt.s32.totalorder %s5693_s27, %s5693_s27 }
  0x1e   : > { %p5398_p8 = scmp.lt.s32.totalorder %s5389_s20, %s5389_s20 }
  0x1f   : > { %p5392_p1 = pnand %p5390_p0, %p5705_p6 }
  0x20   : > { %p5399_p9 = por %p5398_p8, %p5397_p7 }
  0x21   : > { %p5393_p4 = pneg %p5392_p1 }
  0x22   : > { %5127 = dma.hbm_to_vmem [thread:$0]  (!%p5697_p5), %s8160_s4, 8192, %s432_s25, [#allocation10], %s5577_s21, %s5577_s21, %s5578_s24  }
  0x23   : > { %p5400_p10 = pnand %p5399_p9, %p5393_p4 }
  0x25   : > { %5403 = shalt.err (!%p5400_p10)
}
  0x26   : > { %s8161_s7 = sld [smem:[#allocation67_spill]]  ;;  %s5415_s25 = scalar_lea.vmem %s5701_s30, 8192 }
  0x27   : > { %p5416_p11 = scmp.ne.s32.totalorder %s5701_s30, %s5415_s25  ;;  %p5423_p0 = scmp.lt.s32.totalorder %s5701_s30, %s5701_s30 }
  0x28   : > { %p5424_p1 = scmp.lt.s32.totalorder %s5415_s25, %s5415_s25 }
  0x29   : > { %p5418_p12 = pnand %p5416_p11, %p5705_p6 }
  0x2a   : > { %p5425_p4 = por %p5424_p1, %p5423_p0 }
  0x2b   : > { %p5419_p13 = pneg %p5418_p12 }
  0x2c   : > { %5133 = dma.hbm_to_vmem [thread:$0]  (!%p5697_p5), %s8161_s7, 8192, %s5693_s27, [#allocation13], %s5577_s21, %s5577_s21, %s5578_s24  }
  0x2d   : > { %p5426_p7 = pnand %p5425_p4, %p5419_p13 }
  0x2f   : > { %5429 = shalt.err (!%p5426_p7)
}
  0x30   : > { %s8162_s10 = sld [smem:[#allocation68_spill]]  ;;  %s38_s27 = sadd.s32 1, %s5568_s19 }
  0x31   : > { %p39_p8 = scmp.ge.s32.totalorder %s38_s27, 2  ;;  %s5579_s17 = smov [#allocation7]  }
  0x32   : > { %s415_s26 = sshll.u32 %s5579_s17, 4  ;;  %s416_s26 = int_to_ptr.vmem [resolvable:$true] %s415_s26 }
  0x33   : > { %s8651_s27 = smov (%p39_p8, %s38_s27), 0  ;;  %s5441_s25 = scalar_lea.vmem %s416_s26, 8192 }
  0x34   : > { %p5442_p9 = scmp.ne.s32.totalorder %s416_s26, %s5441_s25  ;;  %p5449_p12 = scmp.lt.s32.totalorder %s416_s26, %s416_s26 }
  0x35   : > { %p5450_p13 = scmp.lt.s32.totalorder %s5441_s25, %s5441_s25 }
  0x36   : > { %5139 = dma.hbm_to_vmem [thread:$0]  (!%p5697_p5), %s8162_s10, 8192, %s5701_s30, [#allocation16], %s5577_s21, %s5577_s21, %s5578_s24  }
  0x37   : > { %p5444_p10 = pnand %p5442_p9, %p5705_p6  ;;  %p5451_p0 = por %p5450_p13, %p5449_p12 }
  0x39   : > { %p5445_p11 = pneg %p5444_p10 }
  0x3b   : > { %p5452_p1 = pnand %p5451_p0, %p5445_p11 }
  0x3d   : > { %5455 = shalt.err (!%p5452_p1)
}
  0x3e   : > { %5124 = dma.hbm_to_vmem [thread:$0]  (!%p5697_p5), %s7904_s2, 8192, %s416_s26, [#allocation8], %s5577_s21, %s5577_s21, %s5578_s24  }
  0x3f   : > { %s5580_s29 = smov [#allocation11]   ;;  %s5581_s4 = smov [#allocation14]  }
  0x40   : > { %s444_s17 = sshll.u32 %s5580_s29, 4  ;;  %s473_s7 = sshll.u32 %s5581_s4, 4  ;;  %s445_s17 = int_to_ptr.vmem [resolvable:$true] %s444_s17  ;;  %s474_s7 = int_to_ptr.vmem [resolvable:$true] %s473_s7 }
  0x41   : > { %s5467_s10 = scalar_lea.vmem %s445_s17, 8192  ;;  %p5475_p9 = scmp.lt.s32.totalorder %s445_s17, %s445_s17 }
  0x42   : > { %p5468_p4 = scmp.ne.s32.totalorder %s445_s17, %s5467_s10  ;;  %p5476_p10 = scmp.lt.s32.totalorder %s5467_s10, %s5467_s10 }
  0x44   : > { %p5470_p7 = pnand %p5468_p4, %p5705_p6  ;;  %p5477_p11 = por %p5476_p10, %p5475_p9 }
  0x46   : > { %p5471_p8 = pneg %p5470_p7 }
  0x48   : > { %p5478_p12 = pnand %p5477_p11, %p5471_p8 }
  0x4a   : > { %5481 = shalt.err (!%p5478_p12)
}
  0x4b   : > { %5130 = dma.hbm_to_vmem [thread:$0]  (!%p5697_p5), %s7907_s5, 8192, %s445_s17, [#allocation10], %s5577_s21, %s5577_s21, %s5578_s24  }
  0x4c   : > { %s5493_s4 = scalar_lea.vmem %s474_s7, 8192  ;;  %p5501_p4 = scmp.lt.s32.totalorder %s474_s7, %s474_s7 }
  0x4d   : > { %p5494_p13 = scmp.ne.s32.totalorder %s474_s7, %s5493_s4  ;;  %p5502_p7 = scmp.lt.s32.totalorder %s5493_s4, %s5493_s4 }
  0x4f   : > { %p5496_p0 = pnand %p5494_p13, %p5705_p6  ;;  %p5503_p8 = por %p5502_p7, %p5501_p4 }
  0x51   : > { %p5497_p1 = pneg %p5496_p0 }
  0x53   : > { %p5504_p9 = pnand %p5503_p8, %p5497_p1 }
  0x55   : > { %5507 = shalt.err (!%p5504_p9)
}
  0x56   : > { %5136 = dma.hbm_to_vmem [thread:$0]  (!%p5697_p5), %s7910_s8, 8192, %s474_s7, [#allocation13], %s5577_s21, %s5577_s21, %s5578_s24  }
  0x57   : > { %s5582_s20 = smov [#allocation17]  }
  0x58   : > { %s502_s29 = sshll.u32 %s5582_s20, 4  ;;  %s503_s29 = int_to_ptr.vmem [resolvable:$true] %s502_s29 }
  0x59   : > { %s5519_s17 = scalar_lea.vmem %s503_s29, 8192  ;;  %p5527_p13 = scmp.lt.s32.totalorder %s503_s29, %s503_s29 }
  0x5a   : > { %p5520_p10 = scmp.ne.s32.totalorder %s503_s29, %s5519_s17  ;;  %p5528_p0 = scmp.lt.s32.totalorder %s5519_s17, %s5519_s17 }
  0x5c   : > { %p5522_p11 = pnand %p5520_p10, %p5705_p6  ;;  %p5529_p1 = por %p5528_p0, %p5527_p13 }
  0x5e   : > { %p5523_p12 = pneg %p5522_p11 }
  0x60   : > { %p5530_p4 = pnand %p5529_p1, %p5523_p12 }
  0x62   : > { %5533 = shalt.err (!%p5530_p4)
}
  0x63   : > { %5142 = dma.hbm_to_vmem [thread:$0]  (!%p5697_p5), %s7913_s11, 8192, %s503_s29, [#allocation16], %s5577_s21, %s5577_s21, %s5578_s24  }
  0x64   : > { %540 = sbr.rel (%p5687_p3) target bundleno = 4171 (0x104b), region = 80 }
  0x69   : > { %5547 = dma.done.wait (%p5683_p2), [#allocation8], 8192  }
  0x6a   : > { %5549 = vsyncadd (%p5683_p2), [#allocation8], 4294959104 }
  0x6b   : > { %5551 = dma.done.wait (%p5683_p2), [#allocation10], 16384  }
  0x6c   : > { %5553 = vsyncadd (%p5683_p2), [#allocation10], 4294950912 }
  0x6d   : > { %5555 = dma.done.wait (%p5683_p2), [#allocation13], 16384  }
  0x6e   : > { %5557 = vsyncadd (%p5683_p2), [#allocation13], 4294950912 }
  0x6f   : > { %5559 = dma.done.wait (%p5683_p2), [#allocation16], 16384  }
  0x70   : > { %5561 = vsyncadd (%p5683_p2), [#allocation16], 4294950912  ;;  %s5019_s23 = sshll.u32 %s5564_s18, 2  ;;  %p5023_p5 = scmp.ne.s32.totalorder %s5564_s18, 0 }
  0x71   : > { %p619_p3 = scmp.lt.s32.totalorder %s5019_s23, 7 }
  0x72   : > { %639 = sbr.rel (%p5023_p5) target bundleno = 124 (0x7c), region = 112 }
  0x73   : > { %s8653_s23 = smov (!%p619_p3, %s5019_s23), 7 }
  0x74   : > { %s5020_s28 = sshll.u32 %s8653_s23, 3 }
  0x75   : > { %s5814_s24 = scalar_lea.vmem %s7902_s0, %s5020_s28  ;;  %s5819_s10 = scalar_lea.vmem %s7917_s15, %s5020_s28 }
  0x77   : > { %v5583_v0 = vmov 0.0  }
  0x78   : > { %640 = vst [vmem:[#allocation5 + $0x10] sm:$0xff] %v5583_v0  ;;  %641 = vst [vmem:[#allocation5] sm:$0xff] %v5583_v0 }
  0x79   : > { %642 = vst [vmem:[#allocation5 + $0x18] sm:$0xff] %v5583_v0  ;;  %643 = vst [vmem:[#allocation5 + $0x8] sm:$0xff] %v5583_v0 }
  0x7a   : > { %644 = vst [vmem:[#allocation6] sm:$0xff] %v5583_v0  ;;  %645 = vst [vmem:[#allocation6 + $0x18] sm:$0xff] %v5583_v0 }
  0x7b   : > { %646 = vst [vmem:[#allocation6 + $0x8] sm:$0xff] %v5583_v0  ;;  %647 = vst [vmem:[#allocation6 + $0x10] sm:$0xff] %v5583_v0 }
  0x7c PF: > { %v657_v1 = vld [vmem:[%s7903_s1 + $0x28] sm:$0xff]  ;;  %v656_v3 = vld [vmem:[%s7903_s1 + $0x20] sm:$0xff]  ;;  %vm682_vm0 = vcmask 130048   ;;  %v659_v10 = vld [vmem:[%s7903_s1 + $0x38] sm:$0xff]  ;;  %v7923_v12 = vmov 0.0  }
  0x7d   : > { %v5825_v2 = vld [vmem:[#allocation7 + $0x1e8] sm:$0xff]  ;;  %723 = vmatprep.subr.mxu1 %v657_v1  ;;  %v5831_v4 = vld [vmem:[#allocation7 + $0x1e0] sm:$0xff]  ;;  %759 = vmatprep.mubr.f32.mxu1 %v7923_v12  ;;  %v658_v13 = vld [vmem:[%s7903_s1 + $0x30] sm:$0xff] }
  0x7e   : > { %8163 = vst [vmem:[#allocation23_spill] sm:$0xff] %v5825_v2  ;;  %962 = vmatprep.subr.mxu0 %v5825_v2  ;;  %v653_v5 = vld [vmem:[%s7903_s1 + $0x8] sm:$0xff]  ;;  %724 = vmatpush1.msra.mxu1 %v656_v3  ;;  %v652_v7 = vld [vmem:[%s7903_s1] sm:$0xff]  ;;  %v655_v20 = vld [vmem:[%s7903_s1 + $0x18] sm:$0xff] }
  0x7f   : > { %v5836_v6 = vld [vmem:[#allocation7 + $0x1c8] sm:$0xff]  ;;  %963 = vmatpush1.msra.mxu0 %v5831_v4  ;;  %v5842_v8 = vld [vmem:[#allocation7 + $0x1c0] sm:$0xff]  ;;  %725 = vmatprep.subr.mxu1 %v653_v5  ;;  %v654_v22 = vld [vmem:[%s7903_s1 + $0x10] sm:$0xff] }
  0x80   : > { %8164 = vst [vmem:[#allocation24_spill] sm:$0xff] %v5842_v8  ;;  %v5845_v9 = vld [vmem:[%s5814_s24] sm:$0xff]  ;;  %964 = vmatprep.subr.mxu0 %v5836_v6  ;;  %v5851_v11 = vld [vmem:[#allocation7 + $0x1a8] sm:$0xff]  ;;  %726 = vmatpush1.msra.mxu1 %v652_v7  ;;  %v5893_v24 = vld [vmem:[%s5814_s24 + $0x10] sm:$0xff] }
  0x81   : > { %8165 = vst [vmem:[#allocation25_spill] sm:$0xff] %v5851_v11  ;;  %v5857_v14 = vld [vmem:[#allocation7 + $0x1a0] sm:$0xff]  ;;  %965 = vmatpush1.msra.mxu0 %v5842_v8  ;;  %5024 = vmatmul.mubr.msk.f32.vlgmr.msra.gmra.mxu1 %vm682_vm0, %v5845_v9  ;;  %v5862_v15 = vld [vmem:[#allocation7 + $0x188] sm:$0xff]  ;;  %v5901_v27 = vld [vmem:[#allocation7 + $0x1f8] sm:$0xff] }
  0x82   : > { %812 = vmatprep.subr.mxu1 %v659_v10  ;;  %966 = vmatprep.subr.mxu0 %v5851_v11  ;;  %v5865_v16 = vld [vmem:[#allocation7 + $0x180] sm:$0xff]  ;;  %v5868_v17 = vld [vmem:[%s5814_s24 + $0x8] sm:$0xff]  ;;  %8166 = vst [vmem:[#allocation26_spill] sm:$0xff] %v5901_v27  ;;  %v5913_v30 = vld [vmem:[%s5814_s24 + $0x18] sm:$0xff] }
  0x83   : > { %813 = vmatpush1.msra.mxu1 %v658_v13  ;;  %967 = vmatpush1.msra.mxu0 %v5857_v14  ;;  %v5871_v18 = vld [vmem:[#allocation7 + $0x168] sm:$0xff]  ;;  %v5875_v19 = vld [vmem:[#allocation7 + $0x160] sm:$0xff]  ;;  %v5935_v36 = vld [vmem:[#allocation7 + $0x1f0] sm:$0xff] }
  0x84   : > { %968 = vmatprep.subr.mxu0 %v5862_v15  ;;  %765 = vmatprep.mubr.f32.mxu1 %v7923_v12  ;;  %v5883_v21 = vld [vmem:[#allocation7 + $0x148] sm:$0xff]  ;;  %v5890_v23 = vld [vmem:[#allocation7 + $0x140] sm:$0xff]  ;;  %v5940_v38 = vld [vmem:[#allocation7 + $0x1d8] sm:$0xff] }
  0x85   : > { %969 = vmatpush1.msra.mxu0 %v5865_v16  ;;  %5025 = vmatmul.mubr.msk.f32.gmra.mxu1 %vm682_vm0, %v5868_v17  ;;  %v5896_v25 = vld [vmem:[#allocation7 + $0x128] sm:$0xff]  ;;  %v5899_v26 = vld [vmem:[#allocation7 + $0x120] sm:$0xff]  ;;  %v5947_v40 = vld [vmem:[#allocation7 + $0x1d0] sm:$0xff] }
  0x86   : > { %970 = vmatprep.subr.mxu0 %v5871_v18  ;;  %771 = vmatprep.mubr.f32.mxu1 %v7923_v12  ;;  %v5906_v28 = vld [vmem:[#allocation7 + $0x108] sm:$0xff]  ;;  %v5910_v29 = vld [vmem:[#allocation7 + $0x100] sm:$0xff]  ;;  %v5953_v42 = vld [vmem:[#allocation7 + $0x1b8] sm:$0xff] }
  0x87   : > { %971 = vmatpush1.msra.mxu0 %v5875_v19  ;;  %814 = vmatprep.subr.mxu1 %v655_v20  ;;  %v5916_v31 = vld [vmem:[#allocation7 + $0xe8] sm:$0xff]  ;;  %v5920_v32 = vld [vmem:[#allocation7 + $0xe0] sm:$0xff]  ;;  %v5959_v44 = vld [vmem:[#allocation7 + $0x1b0] sm:$0xff] }
  0x88   : > { %972 = vmatprep.subr.mxu0 %v5883_v21  ;;  %815 = vmatpush1.msra.mxu1 %v654_v22  ;;  %v5926_v33 = vld [vmem:[#allocation7 + $0xc8] sm:$0xff]  ;;  %v5930_v34 = vld [vmem:[#allocation7 + $0xc0] sm:$0xff]  ;;  %v5965_v46 = vld [vmem:[#allocation7 + $0x198] sm:$0xff] }
  0x89   : > { %973 = vmatpush1.msra.mxu0 %v5890_v23  ;;  %5026 = vmatmul.mubr.msk.f32.gmra.mxu1 %vm682_vm0, %v5893_v24  ;;  %v5933_v35 = vld [vmem:[#allocation7 + $0xa8] sm:$0xff]  ;;  %v5938_v37 = vld [vmem:[#allocation7 + $0xa0] sm:$0xff]  ;;  %v5971_v48 = vld [vmem:[#allocation7 + $0x190] sm:$0xff] }
  0x8a   : > { %974 = vmatprep.subr.mxu0 %v5896_v25  ;;  %777 = vmatprep.mubr.f32.mxu1 %v7923_v12  ;;  %v5945_v39 = vld [vmem:[#allocation7 + $0x88] sm:$0xff]  ;;  %v5951_v41 = vld [vmem:[#allocation7 + $0x80] sm:$0xff]  ;;  %v5977_v50 = vld [vmem:[#allocation7 + $0x178] sm:$0xff] }
  0x8b   : > { %975 = vmatpush1.msra.mxu0 %v5899_v26  ;;  %1033 = vmatprep.subr.mxu1 %v5901_v27  ;;  %8167 = vst [vmem:[#allocation27_spill] sm:$0xff] %v5945_v39  ;;  %8168 = vst [vmem:[#allocation28_spill] sm:$0xff] %v5951_v41  ;;  %v5957_v43 = vld [vmem:[#allocation7 + $0x68] sm:$0xff]  ;;  %v5963_v45 = vld [vmem:[#allocation7 + $0x60] sm:$0xff] }
  0x8c   : > { %976 = vmatprep.subr.mxu0 %v5906_v28  ;;  %1026 = vmatprep.mubr.f32.mxu0 %v7923_v12  ;;  %8169 = vst [vmem:[#allocation29_spill] sm:$0xff] %v5957_v43  ;;  %8170 = vst [vmem:[#allocation30_spill] sm:$0xff] %v5963_v45  ;;  %v5969_v47 = vld [vmem:[#allocation7 + $0x48] sm:$0xff]  ;;  %v5975_v49 = vld [vmem:[#allocation7 + $0x40] sm:$0xff] }
  0x8d   : > { %977 = vmatpush1.msra.mxu0 %v5910_v29  ;;  %5027 = vmatmul.mubr.msk.f32.gmra.mxu1 %vm682_vm0, %v5913_v30  ;;  %8171 = vst [vmem:[#allocation31_spill] sm:$0xff] %v5969_v47  ;;  %8172 = vst [vmem:[#allocation32_spill] sm:$0xff] %v5975_v49  ;;  %v5981_v51 = vld [vmem:[#allocation7 + $0x28] sm:$0xff]  ;;  %v5983_v52 = vld [vmem:[#allocation7 + $0x170] sm:$0xff] }
  0x8e   : > { %978 = vmatprep.subr.mxu0 %v5916_v31  ;;  %848 = vmatprep.mubr.f32.mxu1 %v7923_v12  ;;  %8173 = vst [vmem:[#allocation33_spill] sm:$0xff] %v5981_v51  ;;  %v5987_v53 = vld [vmem:[#allocation7 + $0x20] sm:$0xff]  ;;  %v5989_v54 = vld [vmem:[#allocation7 + $0x158] sm:$0xff]  ;;  %v5993_v55 = vld [vmem:[#allocation7 + $0x8] sm:$0xff] }
  0x8f   : > { %979 = vmatpush1.msra.mxu0 %v5920_v32  ;;  %8174 = vst [vmem:[#allocation34_spill] sm:$0xff] %v5987_v53  ;;  %8175 = vst [vmem:[#allocation35_spill] sm:$0xff] %v5993_v55  ;;  %v5995_v56 = vld [vmem:[#allocation7 + $0x150] sm:$0xff]  ;;  %v5999_v57 = vld [vmem:[#allocation7] sm:$0xff] }
  0x90   : > { %980 = vmatprep.subr.mxu0 %v5926_v33  ;;  %8176 = vst [vmem:[#allocation36_spill] sm:$0xff] %v5999_v57  ;;  %v6001_v58 = vld [vmem:[#allocation7 + $0x138] sm:$0xff]  ;;  %v953_v59 = vld [vmem:[#allocation5 + $0x10] sm:$0xff] }
  0x91   : > { %981 = vmatpush1.msra.mxu0 %v5930_v34  ;;  %5028 = vmatmul.mubr.msk.f32.vlgmr.msra.gmra.mxu1 %vm682_vm0, %v5845_v9  ;;  %v6005_v60 = vld [vmem:[#allocation7 + $0x130] sm:$0xff]  ;;  %v6009_v61 = vld [vmem:[#allocation7 + $0x118] sm:$0xff] }
  0x92   : > { %982 = vmatprep.subr.mxu0 %v5933_v35  ;;  %1034 = vmatpush1.msra.mxu1 %v5935_v36  ;;  %v6013_v62 = vld [vmem:[#allocation7 + $0x110] sm:$0xff]  ;;  %v6016_v63 = vld [vmem:[#allocation7 + $0xf8] sm:$0xff] }
  0x93   : > { %983 = vmatpush1.msra.mxu0 %v5938_v37  ;;  %1035 = vmatprep.subr.mxu1 %v5940_v38  ;;  %v6019_v0 = vld [vmem:[#allocation7 + $0xf0] sm:$0xff]  ;;  %v6023_v1 = vld [vmem:[#allocation7 + $0xd8] sm:$0xff] }
  0x94   : > { %984 = vmatprep.subr.mxu0 %v5945_v39  ;;  %1036 = vmatpush1.msra.mxu1 %v5947_v40  ;;  %v6029_v3 = vld [vmem:[#allocation7 + $0xd0] sm:$0xff]  ;;  %v6032_v5 = vld [vmem:[#allocation7 + $0xb8] sm:$0xff] }
  0x95   : > { %985 = vmatpush1.msra.mxu0 %v5951_v41  ;;  %1037 = vmatprep.subr.mxu1 %v5953_v42  ;;  %v6036_v7 = vld [vmem:[#allocation7 + $0xb0] sm:$0xff]  ;;  %v6040_v9 = vld [vmem:[#allocation7 + $0x98] sm:$0xff] }
  0x96   : > { %986 = vmatprep.subr.mxu0 %v5957_v43  ;;  %1038 = vmatpush1.msra.mxu1 %v5959_v44  ;;  %8177 = vst [vmem:[#allocation37_spill] sm:$0xff] %v6036_v7  ;;  %8178 = vst [vmem:[#allocation38_spill] sm:$0xff] %v6040_v9  ;;  %v6046_v10 = vld [vmem:[#allocation7 + $0x90] sm:$0xff]  ;;  %v6049_v13 = vld [vmem:[#allocation7 + $0x78] sm:$0xff] }
  0x97   : > { %987 = vmatpush1.msra.mxu0 %v5963_v45  ;;  %1039 = vmatprep.subr.mxu1 %v5965_v46  ;;  %8179 = vst [vmem:[#allocation39_spill] sm:$0xff] %v6046_v10  ;;  %8180 = vst [vmem:[#allocation40_spill] sm:$0xff] %v6049_v13  ;;  %v6057_v20 = vld [vmem:[#allocation7 + $0x58] sm:$0xff]  ;;  %v6063_v22 = vld [vmem:[#allocation7 + $0x50] sm:$0xff] }
  0x98   : > { %988 = vmatprep.subr.mxu0 %v5969_v47  ;;  %1040 = vmatpush1.msra.mxu1 %v5971_v48  ;;  %8182 = vst [vmem:[#allocation42_spill] sm:$0xff] %v6057_v20  ;;  %8183 = vst [vmem:[#allocation43_spill] sm:$0xff] %v6063_v22 }
  0x99   : > { %989 = vmatpush1.msra.mxu0 %v5975_v49  ;;  %1041 = vmatprep.subr.mxu1 %v5977_v50 }
  0x9a   : > { %990 = vmatprep.subr.mxu0 %v5981_v51  ;;  %1042 = vmatpush1.msra.mxu1 %v5983_v52 }
  0x9b   : > { %991 = vmatpush1.msra.mxu0 %v5987_v53  ;;  %1043 = vmatprep.subr.mxu1 %v5989_v54 }
  0x9c   : > { %992 = vmatprep.subr.mxu0 %v5993_v55  ;;  %1044 = vmatpush1.msra.mxu1 %v5995_v56 }
  0x9d   : > { %993 = vmatpush1.msra.mxu0 %v5999_v57  ;;  %1045 = vmatprep.subr.mxu1 %v6001_v58 }
  0x9e   : > { %1027 = vmatmul.mubr.f32.vlgmr.msra.gmra.mxu0 %v953_v59  ;;  %1046 = vmatpush1.msra.mxu1 %v6005_v60 }
  0x9f   : > { %1047 = vmatprep.subr.mxu1 %v6009_v61  ;;  %854 = vmatprep.mubr.f32.mxu1 %v7923_v12 }
  0xa0   : > { %1048 = vmatpush1.msra.mxu1 %v6013_v62  ;;  %1134 = vmatprep.subr.mxu0 %v5825_v2 }
  0xa1   : > { %1049 = vmatprep.subr.mxu1 %v6016_v63  ;;  %5029 = vmatmul.mubr.msk.f32.gmra.mxu1 %vm682_vm0, %v5868_v17  ;;  %v6053_v17 = vld [vmem:[#allocation7 + $0x70] sm:$0xff] }
  0xa2   : > { %1050 = vmatpush1.msra.mxu1 %v6019_v0  ;;  %860 = vmatprep.mubr.f32.mxu1 %v7923_v12  ;;  %8181 = vst [vmem:[#allocation41_spill] sm:$0xff] %v6053_v17 }
  0xa3   : > { %1051 = vmatprep.subr.mxu1 %v6023_v1  ;;  %1135 = vmatpush1.msra.mxu0 %v5831_v4 }
  0xa4   : > { %1052 = vmatpush1.msra.mxu1 %v6029_v3  ;;  %1136 = vmatprep.subr.mxu0 %v5836_v6 }
  0xa5   : > { %1053 = vmatprep.subr.mxu1 %v6032_v5  ;;  %5030 = vmatmul.mubr.msk.f32.gmra.mxu1 %vm682_vm0, %v5893_v24  ;;  %v6066_v24 = vld [vmem:[#allocation7 + $0x38] sm:$0xff] }
  0xa6   : > { %1054 = vmatpush1.msra.mxu1 %v6036_v7  ;;  %866 = vmatprep.mubr.f32.mxu1 %v7923_v12  ;;  %8184 = vst [vmem:[#allocation44_spill] sm:$0xff] %v6066_v24 }
  0xa7   : > { %1055 = vmatprep.subr.mxu1 %v6040_v9  ;;  %1137 = vmatpush1.msra.mxu0 %v5842_v8  ;;  %v6070_v8 = vld [vmem:[#allocation7 + $0x30] sm:$0xff] }
  0xa8   : > { %1056 = vmatpush1.msra.mxu1 %v6046_v10  ;;  %1138 = vmatprep.subr.mxu0 %v5851_v11  ;;  %8185 = vst [vmem:[#allocation45_spill] sm:$0xff] %v6070_v8  ;;  %v6074_v11 = vld [vmem:[#allocation7 + $0x18] sm:$0xff] }
  0xa9   : > { %1057 = vmatprep.subr.mxu1 %v6049_v13  ;;  %5031 = vmatmul.mubr.msk.f32.gmra.mxu1 %vm682_vm0, %v5913_v30  ;;  %8186 = vst [vmem:[#allocation46_spill] sm:$0xff] %v6074_v11  ;;  %v6078_v30 = vld [vmem:[#allocation7 + $0x10] sm:$0xff] }
  0xaa   : > { %1058 = vmatpush1.msra.mxu1 %v6053_v17  ;;  %1097 = vmatprep.mubr.f32.mxu1 %v7923_v12  ;;  %8187 = vst [vmem:[#allocation47_spill] sm:$0xff] %v6078_v30 }
  0xab   : > { %1059 = vmatprep.subr.mxu1 %v6057_v20  ;;  %1139 = vmatpush1.msra.mxu0 %v5857_v14 }
  0xac   : > { %1060 = vmatpush1.msra.mxu1 %v6063_v22  ;;  %1140 = vmatprep.subr.mxu0 %v5862_v15 }
  0xad   : > { %1061 = vmatprep.subr.mxu1 %v6066_v24  ;;  %1141 = vmatpush1.msra.mxu0 %v5865_v16 }
  0xae   : > { %1062 = vmatpush1.msra.mxu1 %v6070_v8  ;;  %1142 = vmatprep.subr.mxu0 %v5871_v18 }
  0xaf   : > { %1063 = vmatprep.subr.mxu1 %v6074_v11  ;;  %1143 = vmatpush1.msra.mxu0 %v5875_v19 }
  0xb0   : > { %1064 = vmatpush1.msra.mxu1 %v6078_v30  ;;  %1144 = vmatprep.subr.mxu0 %v5883_v21 }
  0xb1   : > { %1098 = vmatmul.mubr.f32.vlgmr.msra.gmra.mxu1 %v953_v59  ;;  %1205 = vmatprep.subr.mxu1 %v5901_v27  ;;  %v662_v59 = vlaneseq }
  0xb2   : > { %1206 = vmatpush1.msra.mxu1 %v5935_v36  ;;  %1145 = vmatpush1.msra.mxu0 %v5890_v23 }
  0xb3   : > { %1207 = vmatprep.subr.mxu1 %v5940_v38  ;;  %1146 = vmatprep.subr.mxu0 %v5896_v25 }
  0xb4   : > { %1208 = vmatpush1.msra.mxu1 %v5947_v40  ;;  %1147 = vmatpush1.msra.mxu0 %v5899_v26 }
  0xb5   : > { %1209 = vmatprep.subr.mxu1 %v5953_v42  ;;  %1148 = vmatprep.subr.mxu0 %v5906_v28 }
  0xb6   : > { %1210 = vmatpush1.msra.mxu1 %v5959_v44  ;;  %1149 = vmatpush1.msra.mxu0 %v5910_v29 }
  0xb7   : > { %1211 = vmatprep.subr.mxu1 %v5965_v46  ;;  %1150 = vmatprep.subr.mxu0 %v5916_v31 }
  0xb8   : > { %1212 = vmatpush1.msra.mxu1 %v5971_v48  ;;  %1151 = vmatpush1.msra.mxu0 %v5920_v32 }
  0xb9   : > { %1213 = vmatprep.subr.mxu1 %v5977_v50  ;;  %1152 = vmatprep.subr.mxu0 %v5926_v33 }
  0xba   : > { %1214 = vmatpush1.msra.mxu1 %v5983_v52  ;;  %1153 = vmatpush1.msra.mxu0 %v5930_v34 }
  0xbb   : > { %1215 = vmatprep.subr.mxu1 %v5989_v54  ;;  %1154 = vmatprep.subr.mxu0 %v5933_v35 }
  0xbc   : > { %1216 = vmatpush1.msra.mxu1 %v5995_v56  ;;  %1155 = vmatpush1.msra.mxu0 %v5938_v37 }
  0xbd   : > { %1217 = vmatprep.subr.mxu1 %v6001_v58  ;;  %1156 = vmatprep.subr.mxu0 %v5945_v39 }
  0xbe   : > { %1218 = vmatpush1.msra.mxu1 %v6005_v60  ;;  %1157 = vmatpush1.msra.mxu0 %v5951_v41 }
  0xbf   : > { %1219 = vmatprep.subr.mxu1 %v6009_v61  ;;  %1158 = vmatprep.subr.mxu0 %v5957_v43 }
  0xc0   : > { %1220 = vmatpush1.msra.mxu1 %v6013_v62  ;;  %1159 = vmatpush1.msra.mxu0 %v5963_v45 }
  0xc1   : > { %1221 = vmatprep.subr.mxu1 %v6016_v63  ;;  %1160 = vmatprep.subr.mxu0 %v5969_v47 }
  0xc2   : > { %1222 = vmatpush1.msra.mxu1 %v6019_v0  ;;  %1161 = vmatpush1.msra.mxu0 %v5975_v49 }
  0xc3   : > { %1223 = vmatprep.subr.mxu1 %v6023_v1  ;;  %1162 = vmatprep.subr.mxu0 %v5981_v51 }
  0xc4   : > { %1224 = vmatpush1.msra.mxu1 %v6029_v3  ;;  %1163 = vmatpush1.msra.mxu0 %v5987_v53 }
  0xc5   : > { %1225 = vmatprep.subr.mxu1 %v6032_v5  ;;  %1164 = vmatprep.subr.mxu0 %v5993_v55 }
  0xc6   : > { %1226 = vmatpush1.msra.mxu1 %v6036_v7  ;;  %1165 = vmatpush1.msra.mxu0 %v5999_v57 }
  0xc7   : > { %1227 = vmatprep.subr.mxu1 %v6040_v9  ;;  %1198 = vmatprep.mubr.f32.mxu0 %v7923_v12 }
  0xc8   : > { %1228 = vmatpush1.msra.mxu1 %v6046_v10  ;;  %1269 = vmatprep.mubr.f32.mxu1 %v7923_v12  ;;  %v663_v12 = vshrl.u32 %v662_v59, 7 }
  0xc9   : > { %1229 = vmatprep.subr.mxu1 %v6049_v13  ;;  %1307 = vmatprep.subr.mxu0 %v5825_v2  ;;  %v660_v2 = vld [vmem:[%s7905_s3] sm:$0xf] }
  0xca   : > { %1230 = vmatpush1.msra.mxu1 %v6053_v17  ;;  %v6144_v57 = vsub.s32 0, %v663_v12  ;;  %v6149_v53 = vsub.s32 1, %v663_v12  ;;  %v6165_v10 = vsub.s32 2, %v663_v12 }
  0xcb   : > { %1231 = vmatprep.subr.mxu1 %v6057_v20 }
  0xcc   : > { %1232 = vmatpush1.msra.mxu1 %v6063_v22  ;;  %8188 = vst [vmem:[#allocation48_spill] sm:$0xff] %v6144_v57  ;;  %8189 = vst [vmem:[#allocation49_spill] sm:$0xff] %v6149_v53 }
  0xcd   : > { %1233 = vmatprep.subr.mxu1 %v6066_v24  ;;  %8196 = vst [vmem:[#allocation56_spill] sm:$0xff] %v6165_v10 }
  0xce   : > { %1234 = vmatpush1.msra.mxu1 %v6070_v8  ;;  %v665_v8 = vrot.slane %v660_v2, %v6144_v57 }
  0xcf   : > { %1235 = vmatprep.subr.mxu1 %v6074_v11  ;;  %v669_v11 = vrot.slane %v660_v2, %v6149_v53 }
  0xd0   : > { %1236 = vmatpush1.msra.mxu1 %v6078_v30 }
  0xd1   : > { %1378 = vmatprep.subr.mxu1 %v5901_v27 }
 0x141   : > { %v761_v55 = vpop.f32.mrf.mxu1 }
 0x143   : > { %v763_v24 = vpop.f32.mrf.mxu1 }
 0x145   : > { %v767_v51 = vpop.f32.mrf.mxu1 }
 0x146   : > { %v6153_v30 = vadd.f32 %v767_v51, %v665_v8  ;;  %v6167_v51 = vsub.s32 3, %v663_v12 }
 0x147   : > { %v769_v27 = vpop.f32.mrf.mxu1 }
 0x148   : > { %8190 = vst [vmem:[#allocation50_spill] sm:$0xff] %v6153_v30  ;;  %v6155_v22 = vadd.f32 %v769_v27, %v669_v11  ;;  %8197 = vst [vmem:[#allocation57_spill] sm:$0xff] %v6167_v51 }
 0x149   : > { %v773_v59 = vpop.f32.mrf.mxu1 }
 0x14a   : > { %8191 = vst [vmem:[#allocation51_spill] sm:$0xff] %v6155_v22  ;;  %v6157_v49 = vadd.f32 %v773_v59, %v665_v8  ;;  %v764_v22 = vadd.f32 %v763_v24, %v669_v11  ;;  %v673_v59 = vrot.slane %v660_v2, %v6165_v10 }
 0x14b   : > { %v775_v20 = vpop.f32.mrf.mxu1 }
 0x14c   : > { %8192 = vst [vmem:[#allocation52_spill] sm:$0xff] %v6157_v49  ;;  %v6159_v47 = vadd.f32 %v775_v20, %v669_v11  ;;  %v762_v20 = vadd.f32 %v761_v55, %v665_v8 }
 0x14d   : > { %v779_v17 = vpop.f32.mrf.mxu1 }
 0x14e   : > { %8193 = vst [vmem:[#allocation53_spill] sm:$0xff] %v6159_v47  ;;  %v6161_v45 = vadd.f32 %v779_v17, %v665_v8  ;;  %v677_v47 = vrot.slane %v660_v2, %v6167_v51 }
 0x14f   : > { %v781_v13 = vpop.f32.mrf.mxu1 }
 0x150   : > { %8194 = vst [vmem:[#allocation54_spill] sm:$0xff] %v6161_v45  ;;  %v6163_v43 = vadd.f32 %v781_v13, %v669_v11 }
 0x151   : > { %v850_v57 = vpop.f32.mrf.mxu1 }
 0x152   : > { %8195 = vst [vmem:[#allocation55_spill] sm:$0xff] %v6163_v43  ;;  %v851_v55 = vadd.f32 %v850_v57, %v673_v59 }
 0x153   : > { %v852_v27 = vpop.f32.mrf.mxu1 }
 0x15e   : > { %v1028_v53 = vpop.f32.mrf.mxu0 }
 0x15f   : > { %v1104_v43 = vadd.f32 %v1028_v53, %v762_v20  ;;  %v853_v20 = vadd.f32 %v852_v27, %v677_v47 }
 0x160   : > { %v1030_v49 = vpop.f32.mrf.mxu0 }
 0x161   : > { %v856_v30 = vpop.f32.mrf.mxu1  ;;  %v1105_v17 = vadd.f32 %v1030_v49, %v764_v22  ;;  %v1108_v11 = vmul.f32 0.5, %v1104_v43 }
 0x162   : > { %v6171_v45 = vadd.f32 %v856_v30, %v673_v59 }
 0x163   : > { %v858_v13 = vpop.f32.mrf.mxu1  ;;  %v1112_v12 = vmul.f32 0.5, %v1105_v17 }
 0x164   : > { %v6173_v41 = vadd.f32 %v858_v13, %v677_v47 }
 0x165   : > { %v862_v9 = vpop.f32.mrf.mxu1  ;;  %5192 = vtanh.f32 %v1112_v12 }
 0x166   : > { %v6175_v39 = vadd.f32 %v862_v9, %v673_v59  ;;  %5194 = vtanh.f32 %v1108_v11 }
 0x167   : > { %v864_v7 = vpop.f32.mrf.mxu1 }
 0x168   : > { %8198 = vst [vmem:[#allocation58_spill] sm:$0xff] %v6175_v39  ;;  %v6177_v24 = vadd.f32 %v864_v7, %v677_v47  ;;  %v8224_v39 = vld [vmem:[#allocation36_spill] sm:$0xff] }
 0x169   : > { %v868_v10 = vpop.f32.mrf.mxu1 }
 0x16a   : > { %8199 = vst [vmem:[#allocation59_spill] sm:$0xff] %v6177_v24  ;;  %v6179_v8 = vadd.f32 %v868_v10, %v673_v59  ;;  %v954_v10 = vld [vmem:[#allocation6] sm:$0xff] }
 0x16b   : > { %v870_v2 = vpop.f32.mrf.mxu1 }
 0x16c   : > { %8200 = vst [vmem:[#allocation60_spill] sm:$0xff] %v6179_v8  ;;  %v6181_v49 = vadd.f32 %v870_v2, %v677_v47 }
 0x16e   : > { %8201 = vst [vmem:[#allocation61_spill] sm:$0xff] %v6181_v49 }
 0x171   : > { %v1099_v53 = vpop.f32.mrf.mxu1 }
 0x172   : > { %v1106_v22 = vadd.f32 %v1099_v53, %v851_v55  ;;  %v5193_v17 = vpop.eup %5192  ;;  %v8206_v53 = vld [vmem:[#allocation27_spill] sm:$0xff] }
 0x173   : > { %v1101_v30 = vpop.f32.mrf.mxu1  ;;  %v5195_v13 = vpop.eup %5194  ;;  %v1114_v43 = vmul.f32 0.5, %v5193_v17  ;;  %v8211_v17 = vld [vmem:[#allocation40_spill] sm:$0xff] }
 0x174   : > { %5196 = vtanh.f32 %v1106_v22  ;;  %v1107_v9 = vadd.f32 %v1101_v30, %v853_v20  ;;  %v1110_v51 = vmul.f32 0.5, %v5195_v13  ;;  %v8207_v22 = vld [vmem:[#allocation38_spill] sm:$0xff]  ;;  %v8208_v30 = vld [vmem:[#allocation28_spill] sm:$0xff]  ;;  %v8209_v20 = vld [vmem:[#allocation39_spill] sm:$0xff] }
 0x175   : > { %v1115_v24 = vadd.f32 0.5, %v1114_v43  ;;  %v8212_v13 = vld [vmem:[#allocation30_spill] sm:$0xff]  ;;  %v8213_v43 = vld [vmem:[#allocation41_spill] sm:$0xff] }
 0x176   : > { %v1117_v7 = vmul.f32 0.5, %v1107_v9  ;;  %v1111_v12 = vadd.f32 0.5, %v1110_v51  ;;  %v8203_v51 = vld [vmem:[#allocation24_spill] sm:$0xff]  ;;  %v8210_v9 = vld [vmem:[#allocation29_spill] sm:$0xff] }
 0x177   : > { %v1121_v11 = vmul.f32 %v1115_v24, %v954_v10  ;;  %v8204_v24 = vld [vmem:[#allocation25_spill] sm:$0xff]  ;;  %v8215_v10 = vld [vmem:[#allocation42_spill] sm:$0xff] }
 0x178   : > { %5198 = vtanh.f32 %v1117_v7  ;;  %v8214_v7 = vld [vmem:[#allocation31_spill] sm:$0xff] }
 0x181   : > { %v5197_v8 = vpop.eup %5196 }
 0x182   : > { %v1122_v2 = vmul.f32 %v5197_v8, %v1111_v12  ;;  %v8205_v8 = vld [vmem:[#allocation37_spill] sm:$0xff]  ;;  %v8216_v12 = vld [vmem:[#allocation32_spill] sm:$0xff] }
 0x184   : > { %v6183_v49 = vadd.f32 %v1122_v2, %v1121_v11  ;;  %v8217_v11 = vld [vmem:[#allocation43_spill] sm:$0xff]  ;;  %v8218_v2 = vld [vmem:[#allocation33_spill] sm:$0xff] }
 0x185   : > { %v5199_v57 = vpop.eup %5198 }
 0x186   : > { %5200 = vtanh.f32 %v6183_v49  ;;  %v1119_v47 = vmul.f32 0.5, %v5199_v57  ;;  %v8219_v57 = vld [vmem:[#allocation44_spill] sm:$0xff] }
 0x188   : > { %v1120_v27 = vadd.f32 0.5, %v1119_v47  ;;  %v8220_v47 = vld [vmem:[#allocation34_spill] sm:$0xff] }
 0x193   : > { %v5201_v59 = vpop.eup %5200 }
 0x194   : > { %v6186_v55 = vmul.f32 %v5201_v59, %v1120_v27  ;;  %v8221_v27 = vld [vmem:[#allocation45_spill] sm:$0xff]  ;;  %v8222_v59 = vld [vmem:[#allocation35_spill] sm:$0xff] }
 0x196   : > { %8202 = vst [vmem:[#allocation62_spill] sm:$0xff] %v6186_v55  ;;  %1199 = vmatmul.mubr.f32.vlgmr.msra.gmra.mxu0 %v6186_v55  ;;  %1270 = vmatmul.mubr.f32.vlgmr.msra.gmra.mxu1 %v6186_v55  ;;  %v8223_v55 = vld [vmem:[#allocation46_spill] sm:$0xff] }
 0x197   : > { %1308 = vmatpush1.msra.mxu0 %v5831_v4  ;;  %1379 = vmatpush1.msra.mxu1 %v5935_v36 }
 0x198   : > { %1309 = vmatprep.subr.mxu0 %v5836_v6  ;;  %1380 = vmatprep.subr.mxu1 %v5940_v38 }
 0x199   : > { %1310 = vmatpush1.msra.mxu0 %v8203_v51  ;;  %1381 = vmatpush1.msra.mxu1 %v5947_v40 }
 0x19a   : > { %1311 = vmatprep.subr.mxu0 %v8204_v24  ;;  %1382 = vmatprep.subr.mxu1 %v5953_v42 }
 0x19b   : > { %1312 = vmatpush1.msra.mxu0 %v5857_v14  ;;  %1383 = vmatpush1.msra.mxu1 %v5959_v44 }
 0x19c   : > { %1313 = vmatprep.subr.mxu0 %v5862_v15  ;;  %1384 = vmatprep.subr.mxu1 %v5965_v46 }
 0x19d   : > { %1314 = vmatpush1.msra.mxu0 %v5865_v16  ;;  %1385 = vmatpush1.msra.mxu1 %v5971_v48 }
 0x19e   : > { %1315 = vmatprep.subr.mxu0 %v5871_v18  ;;  %1386 = vmatprep.subr.mxu1 %v5977_v50 }
 0x19f   : > { %1316 = vmatpush1.msra.mxu0 %v5875_v19  ;;  %1387 = vmatpush1.msra.mxu1 %v5983_v52 }
 0x1a0   : > { %1317 = vmatprep.subr.mxu0 %v5883_v21  ;;  %1388 = vmatprep.subr.mxu1 %v5989_v54 }
 0x1a1   : > { %1318 = vmatpush1.msra.mxu0 %v5890_v23  ;;  %1389 = vmatpush1.msra.mxu1 %v5995_v56 }
 0x1a2   : > { %1319 = vmatprep.subr.mxu0 %v5896_v25  ;;  %1390 = vmatprep.subr.mxu1 %v6001_v58 }
 0x1a3   : > { %1320 = vmatpush1.msra.mxu0 %v5899_v26  ;;  %1391 = vmatpush1.msra.mxu1 %v6005_v60 }
 0x1a4   : > { %1321 = vmatprep.subr.mxu0 %v5906_v28  ;;  %1392 = vmatprep.subr.mxu1 %v6009_v61 }
 0x1a5   : > { %1322 = vmatpush1.msra.mxu0 %v5910_v29  ;;  %1393 = vmatpush1.msra.mxu1 %v6013_v62 }
 0x1a6   : > { %1323 = vmatprep.subr.mxu0 %v5916_v31  ;;  %1394 = vmatprep.subr.mxu1 %v6016_v63 }
 0x1a7   : > { %1324 = vmatpush1.msra.mxu0 %v5920_v32  ;;  %1395 = vmatpush1.msra.mxu1 %v6019_v0 }
 0x1a8   : > { %1325 = vmatprep.subr.mxu0 %v5926_v33  ;;  %1396 = vmatprep.subr.mxu1 %v6023_v1 }
 0x1a9   : > { %1326 = vmatpush1.msra.mxu0 %v5930_v34  ;;  %1397 = vmatpush1.msra.mxu1 %v6029_v3 }
 0x1aa   : > { %1327 = vmatprep.subr.mxu0 %v5933_v35  ;;  %1398 = vmatprep.subr.mxu1 %v6032_v5 }
 0x1ab   : > { %1328 = vmatpush1.msra.mxu0 %v5938_v37  ;;  %1399 = vmatpush1.msra.mxu1 %v8205_v8 }
 0x1ac   : > { %1329 = vmatprep.subr.mxu0 %v8206_v53  ;;  %1400 = vmatprep.subr.mxu1 %v8207_v22 }
 0x1ad   : > { %1330 = vmatpush1.msra.mxu0 %v8208_v30  ;;  %1401 = vmatpush1.msra.mxu1 %v8209_v20 }
 0x1ae   : > { %1331 = vmatprep.subr.mxu0 %v8210_v9  ;;  %1402 = vmatprep.subr.mxu1 %v8211_v17 }
 0x1af   : > { %1332 = vmatpush1.msra.mxu0 %v8212_v13  ;;  %1403 = vmatpush1.msra.mxu1 %v8213_v43  ;;  %v8230_v13 = vld [vmem:[#allocation51_spill] sm:$0xff] }
 0x1b0   : > { %1333 = vmatprep.subr.mxu0 %v8214_v7  ;;  %1404 = vmatprep.subr.mxu1 %v8215_v10  ;;  %v8225_v7 = vmov 0.0   ;;  %v8226_v10 = vld [vmem:[#allocation47_spill] sm:$0xff] }
 0x1b1   : > { %1334 = vmatpush1.msra.mxu0 %v8216_v12  ;;  %1405 = vmatpush1.msra.mxu1 %v8217_v11  ;;  %v8227_v11 = vld [vmem:[#allocation23_spill] sm:$0xff] }
 0x1b2   : > { %1335 = vmatprep.subr.mxu0 %v8218_v2  ;;  %1406 = vmatprep.subr.mxu1 %v8219_v57  ;;  %v8228_v2 = vld [vmem:[#allocation26_spill] sm:$0xff] }
 0x1b3   : > { %1336 = vmatpush1.msra.mxu0 %v8220_v47  ;;  %1407 = vmatpush1.msra.mxu1 %v8221_v27  ;;  %v8229_v47 = vld [vmem:[#allocation50_spill] sm:$0xff] }
 0x1b4   : > { %1337 = vmatprep.subr.mxu0 %v8222_v59  ;;  %1408 = vmatprep.subr.mxu1 %v8223_v55 }
 0x1b5   : > { %1338 = vmatpush1.msra.mxu0 %v8224_v39  ;;  %1371 = vmatprep.mubr.f32.mxu0 %v8225_v7 }
 0x1b6   : > { %1409 = vmatpush1.msra.mxu1 %v8226_v10  ;;  %1442 = vmatprep.mubr.f32.mxu1 %v8225_v7 }
 0x1b7   : > { %1480 = vmatprep.subr.mxu0 %v8227_v11  ;;  %1551 = vmatprep.subr.mxu1 %v8228_v2 }
 0x256   : > { %v1200_v57 = vpop.f32.mrf.mxu0  ;;  %v1271_v27 = vpop.f32.mrf.mxu1 }
 0x257   : > { %v1276_v12 = vadd.f32 %v1200_v57, %v8229_v47  ;;  %v1278_v39 = vadd.f32 %v1271_v27, %v6171_v45 }
 0x258   : > { %v1202_v43 = vpop.f32.mrf.mxu0  ;;  %v1273_v10 = vpop.f32.mrf.mxu1 }
 0x259   : > { %v1280_v59 = vmul.f32 0.5, %v1276_v12  ;;  %v1277_v55 = vadd.f32 %v1202_v43, %v8230_v13  ;;  %v1279_v7 = vadd.f32 %v1273_v10, %v6173_v41 }
 0x25b   : > { %5202 = vtanh.f32 %v1280_v59  ;;  %v1284_v17 = vmul.f32 0.5, %v1277_v55  ;;  %v1289_v11 = vmul.f32 0.5, %v1279_v7 }
 0x25d   : > { %5204 = vtanh.f32 %v1284_v17 }
 0x25e   : > { %5206 = vtanh.f32 %v1278_v39 }
 0x25f   : > { %5208 = vtanh.f32 %v1289_v11  ;;  %v1712_v11 = vld [vmem:[#allocation9 + $0x1e0] sm:$0xff] }
 0x268   : > { %v5203_v9 = vpop.eup %5202 }
 0x269   : > { %v1282_v2 = vmul.f32 0.5, %v5203_v9 }
 0x26a   : > { %v5205_v20 = vpop.eup %5204 }
 0x26b   : > { %v1283_v30 = vadd.f32 0.5, %v1282_v2  ;;  %v1286_v57 = vmul.f32 0.5, %v5205_v20  ;;  %v5207_v47 = vpop.eup %5206  ;;  %v1714_v2 = vld [vmem:[#allocation9 + $0x1f0] sm:$0xff] }
 0x26c   : > { %v5209_v39 = vpop.eup %5208 }
 0x26d   : > { %v1287_v12 = vadd.f32 0.5, %v1286_v57  ;;  %v1294_v22 = vmul.f32 %v5207_v47, %v1283_v30  ;;  %v1291_v45 = vmul.f32 0.5, %v5209_v39  ;;  %v1709_v57 = vld [vmem:[#allocation9 + $0x1c8] sm:$0xff]  ;;  %v1711_v47 = vld [vmem:[#allocation9 + $0x1d8] sm:$0xff] }
 0x26e   : > { %v1707_v39 = vld [vmem:[#allocation9 + $0x1b8] sm:$0xff] }
 0x26f   : > { %v1293_v13 = vmul.f32 %v1287_v12, %v6183_v49  ;;  %v1292_v55 = vadd.f32 0.5, %v1291_v45  ;;  %v1708_v12 = vld [vmem:[#allocation9 + $0x1c0] sm:$0xff] }
 0x270   : > { %v1704_v45 = vld [vmem:[#allocation9 + $0x1a0] sm:$0xff] }
 0x271   : > { %v6261_v43 = vadd.f32 %v1294_v22, %v1293_v13  ;;  %v1710_v13 = vld [vmem:[#allocation9 + $0x1d0] sm:$0xff] }
 0x273   : > { %5210 = vtanh.f32 %v6261_v43 }
 0x280   : > { %v5211_v41 = vpop.eup %5210 }
 0x281   : > { %v6264_v17 = vmul.f32 %v5211_v41, %v1292_v55  ;;  %v1706_v55 = vld [vmem:[#allocation9 + $0x1b0] sm:$0xff]  ;;  %v1701_v41 = vld [vmem:[#allocation9 + $0x188] sm:$0xff] }
 0x283   : > { %1372 = vmatmul.mubr.f32.vlgmr.msra.gmra.mxu0 %v6264_v17  ;;  %1443 = vmatmul.mubr.f32.vlgmr.msra.gmra.mxu1 %v6264_v17 }
 0x284   : > { %1481 = vmatpush1.msra.mxu0 %v5831_v4  ;;  %1552 = vmatpush1.msra.mxu1 %v5935_v36  ;;  %v8231_v4 = vld [vmem:[#allocation38_spill] sm:$0xff]  ;;  %v8249_v36 = vld [vmem:[#allocation47_spill] sm:$0xff] }
 0x285   : > { %1482 = vmatprep.subr.mxu0 %v5836_v6  ;;  %1553 = vmatprep.subr.mxu1 %v5940_v38  ;;  %v8232_v6 = vld [vmem:[#allocation28_spill] sm:$0xff] }
 0x286   : > { %1483 = vmatpush1.msra.mxu0 %v8203_v51  ;;  %1554 = vmatpush1.msra.mxu1 %v5947_v40  ;;  %v1713_v38 = vld [vmem:[#allocation9 + $0x1e8] sm:$0xff]  ;;  %v1715_v40 = vld [vmem:[#allocation9 + $0x1f8] sm:$0xff] }
 0x287   : > { %1484 = vmatprep.subr.mxu0 %v8204_v24  ;;  %1555 = vmatprep.subr.mxu1 %v5953_v42 }
 0x288   : > { %1485 = vmatpush1.msra.mxu0 %v5857_v14  ;;  %1556 = vmatpush1.msra.mxu1 %v5959_v44  ;;  %v8233_v14 = vld [vmem:[#allocation39_spill] sm:$0xff]  ;;  %v8251_v44 = vld [vmem:[#allocation52_spill] sm:$0xff] }
 0x289   : > { %1486 = vmatprep.subr.mxu0 %v5862_v15  ;;  %1557 = vmatprep.subr.mxu1 %v5965_v46  ;;  %v8234_v15 = vld [vmem:[#allocation29_spill] sm:$0xff] }
 0x28a   : > { %1487 = vmatpush1.msra.mxu0 %v5865_v16  ;;  %1558 = vmatpush1.msra.mxu1 %v5971_v48  ;;  %v8235_v16 = vld [vmem:[#allocation40_spill] sm:$0xff] }
 0x28b   : > { %1488 = vmatprep.subr.mxu0 %v5871_v18  ;;  %1559 = vmatprep.subr.mxu1 %v5977_v50  ;;  %v8236_v18 = vld [vmem:[#allocation30_spill] sm:$0xff] }
 0x28c   : > { %1489 = vmatpush1.msra.mxu0 %v5875_v19  ;;  %1560 = vmatpush1.msra.mxu1 %v5983_v52  ;;  %v8237_v19 = vld [vmem:[#allocation41_spill] sm:$0xff] }
 0x28d   : > { %1490 = vmatprep.subr.mxu0 %v5883_v21  ;;  %1561 = vmatprep.subr.mxu1 %v5989_v54  ;;  %v8238_v21 = vld [vmem:[#allocation31_spill] sm:$0xff]  ;;  %v8252_v54 = vld [vmem:[#allocation53_spill] sm:$0xff] }
 0x28e   : > { %1491 = vmatpush1.msra.mxu0 %v5890_v23  ;;  %1562 = vmatpush1.msra.mxu1 %v5995_v56  ;;  %v8239_v23 = vld [vmem:[#allocation42_spill] sm:$0xff] }
 0x28f   : > { %1492 = vmatprep.subr.mxu0 %v5896_v25  ;;  %1563 = vmatprep.subr.mxu1 %v6001_v58  ;;  %v8240_v25 = vld [vmem:[#allocation32_spill] sm:$0xff]  ;;  %v8253_v58 = vld [vmem:[#allocation58_spill] sm:$0xff] }
 0x290   : > { %1493 = vmatpush1.msra.mxu0 %v5899_v26  ;;  %1564 = vmatpush1.msra.mxu1 %v6005_v60  ;;  %v8241_v26 = vld [vmem:[#allocation43_spill] sm:$0xff] }
 0x291   : > { %1494 = vmatprep.subr.mxu0 %v5906_v28  ;;  %1565 = vmatprep.subr.mxu1 %v6009_v61  ;;  %v8242_v28 = vld [vmem:[#allocation33_spill] sm:$0xff] }
 0x292   : > { %1495 = vmatpush1.msra.mxu0 %v5910_v29  ;;  %1566 = vmatpush1.msra.mxu1 %v6013_v62  ;;  %v8243_v29 = vld [vmem:[#allocation44_spill] sm:$0xff] }
 0x293   : > { %1496 = vmatprep.subr.mxu0 %v5916_v31  ;;  %1567 = vmatprep.subr.mxu1 %v6016_v63  ;;  %v8244_v31 = vld [vmem:[#allocation34_spill] sm:$0xff]  ;;  %v8254_v63 = vld [vmem:[#allocation59_spill] sm:$0xff] }
 0x294   : > { %1497 = vmatpush1.msra.mxu0 %v5920_v32  ;;  %1568 = vmatpush1.msra.mxu1 %v6019_v0  ;;  %v8245_v32 = vld [vmem:[#allocation45_spill] sm:$0xff] }
 0x295   : > { %1498 = vmatprep.subr.mxu0 %v5926_v33  ;;  %1569 = vmatprep.subr.mxu1 %v6023_v1  ;;  %v8246_v33 = vld [vmem:[#allocation35_spill] sm:$0xff] }
 0x296   : > { %1499 = vmatpush1.msra.mxu0 %v5930_v34  ;;  %1570 = vmatpush1.msra.mxu1 %v6029_v3  ;;  %v8247_v34 = vld [vmem:[#allocation46_spill] sm:$0xff] }
 0x297   : > { %1500 = vmatprep.subr.mxu0 %v5933_v35  ;;  %1571 = vmatprep.subr.mxu1 %v6032_v5  ;;  %v8248_v35 = vld [vmem:[#allocation36_spill] sm:$0xff] }
 0x298   : > { %1501 = vmatpush1.msra.mxu0 %v5938_v37  ;;  %1572 = vmatpush1.msra.mxu1 %v8205_v8  ;;  %v8250_v37 = vmov 0.0  }
 0x299   : > { %1502 = vmatprep.subr.mxu0 %v8206_v53  ;;  %1573 = vmatprep.subr.mxu1 %v8231_v4  ;;  %v1703_v4 = vld [vmem:[#allocation9 + $0x198] sm:$0xff] }
 0x29a   : > { %1503 = vmatpush1.msra.mxu0 %v8232_v6  ;;  %1574 = vmatpush1.msra.mxu1 %v8233_v14  ;;  %v1700_v6 = vld [vmem:[#allocation9 + $0x180] sm:$0xff]  ;;  %v1702_v14 = vld [vmem:[#allocation9 + $0x190] sm:$0xff] }
 0x29b   : > { %1504 = vmatprep.subr.mxu0 %v8234_v15  ;;  %1575 = vmatprep.subr.mxu1 %v8235_v16  ;;  %v1697_v15 = vld [vmem:[#allocation9 + $0x168] sm:$0xff]  ;;  %v1699_v16 = vld [vmem:[#allocation9 + $0x178] sm:$0xff] }
 0x29c   : > { %1505 = vmatpush1.msra.mxu0 %v8236_v18  ;;  %1576 = vmatpush1.msra.mxu1 %v8237_v19  ;;  %v1696_v18 = vld [vmem:[#allocation9 + $0x160] sm:$0xff]  ;;  %v1698_v19 = vld [vmem:[#allocation9 + $0x170] sm:$0xff] }
 0x29d   : > { %1506 = vmatprep.subr.mxu0 %v8238_v21  ;;  %1577 = vmatprep.subr.mxu1 %v8239_v23  ;;  %v1693_v21 = vld [vmem:[#allocation9 + $0x148] sm:$0xff]  ;;  %v1695_v23 = vld [vmem:[#allocation9 + $0x158] sm:$0xff] }
 0x29e   : > { %1507 = vmatpush1.msra.mxu0 %v8240_v25  ;;  %1578 = vmatpush1.msra.mxu1 %v8241_v26  ;;  %v1692_v25 = vld [vmem:[#allocation9 + $0x140] sm:$0xff]  ;;  %v1694_v26 = vld [vmem:[#allocation9 + $0x150] sm:$0xff] }
 0x29f   : > { %1508 = vmatprep.subr.mxu0 %v8242_v28  ;;  %1579 = vmatprep.subr.mxu1 %v8243_v29  ;;  %v1689_v28 = vld [vmem:[#allocation9 + $0x128] sm:$0xff]  ;;  %v1691_v29 = vld [vmem:[#allocation9 + $0x138] sm:$0xff] }
 0x2a0   : > { %1509 = vmatpush1.msra.mxu0 %v8244_v31  ;;  %1580 = vmatpush1.msra.mxu1 %v8245_v32  ;;  %v1688_v31 = vld [vmem:[#allocation9 + $0x120] sm:$0xff]  ;;  %v1690_v32 = vld [vmem:[#allocation9 + $0x130] sm:$0xff] }
 0x2a1   : > { %1510 = vmatprep.subr.mxu0 %v8246_v33  ;;  %1581 = vmatprep.subr.mxu1 %v8247_v34  ;;  %v1685_v33 = vld [vmem:[#allocation9 + $0x108] sm:$0xff]  ;;  %v1687_v34 = vld [vmem:[#allocation9 + $0x118] sm:$0xff] }
 0x2a2   : > { %1511 = vmatpush1.msra.mxu0 %v8248_v35  ;;  %1582 = vmatpush1.msra.mxu1 %v8249_v36  ;;  %v1684_v35 = vld [vmem:[#allocation9 + $0x100] sm:$0xff]  ;;  %v1686_v36 = vld [vmem:[#allocation9 + $0x110] sm:$0xff] }
 0x2a3   : > { %1544 = vmatprep.mubr.f32.mxu0 %v8250_v37  ;;  %1615 = vmatprep.mubr.f32.mxu1 %v8250_v37 }
 0x2a4   : > { %1738 = vmatprep.subr.mxu0 %v1713_v38  ;;  %1827 = vmatprep.subr.mxu1 %v1715_v40  ;;  %v1681_v38 = vld [vmem:[#allocation9 + $0xe8] sm:$0xff]  ;;  %v1683_v40 = vld [vmem:[#allocation9 + $0xf8] sm:$0xff] }
 0x343   : > { %v1373_v42 = vpop.f32.mrf.mxu0  ;;  %v1444_v48 = vpop.f32.mrf.mxu1 }
 0x344   : > { %v1449_v46 = vadd.f32 %v1373_v42, %v8251_v44  ;;  %v1451_v60 = vadd.f32 %v1444_v48, %v8253_v58  ;;  %v1680_v42 = vld [vmem:[#allocation9 + $0xe0] sm:$0xff]  ;;  %v1682_v44 = vld [vmem:[#allocation9 + $0xf0] sm:$0xff]  ;;  %v1679_v48 = vld [vmem:[#allocation9 + $0xd8] sm:$0xff] }
 0x345   : > { %v1375_v50 = vpop.f32.mrf.mxu0  ;;  %v1446_v62 = vpop.f32.mrf.mxu1  ;;  %v1672_v58 = vld [vmem:[#allocation9 + $0xa0] sm:$0xff] }
 0x346   : > { %v1453_v52 = vmul.f32 0.5, %v1449_v46  ;;  %v1450_v56 = vadd.f32 %v1375_v50, %v8252_v54  ;;  %v1452_v0 = vadd.f32 %v1446_v62, %v8254_v63  ;;  %v1677_v46 = vld [vmem:[#allocation9 + $0xc8] sm:$0xff]  ;;  %v1676_v50 = vld [vmem:[#allocation9 + $0xc0] sm:$0xff]  ;;  %v1671_v62 = vld [vmem:[#allocation9 + $0x98] sm:$0xff] }
 0x347   : > { %v1673_v54 = vld [vmem:[#allocation9 + $0xa8] sm:$0xff]  ;;  %v1668_v63 = vld [vmem:[#allocation9 + $0x80] sm:$0xff] }
 0x348   : > { %5212 = vtanh.f32 %v1453_v52  ;;  %v1457_v61 = vmul.f32 0.5, %v1450_v56  ;;  %v1462_v1 = vmul.f32 0.5, %v1452_v0  ;;  %v1678_v52 = vld [vmem:[#allocation9 + $0xd0] sm:$0xff]  ;;  %v1675_v56 = vld [vmem:[#allocation9 + $0xb8] sm:$0xff] }
 0x349   : > { %v1670_v0 = vld [vmem:[#allocation9 + $0x90] sm:$0xff] }
 0x34a   : > { %5214 = vtanh.f32 %v1457_v61  ;;  %v1669_v61 = vld [vmem:[#allocation9 + $0x88] sm:$0xff] }
 0x34b   : > { %5216 = vtanh.f32 %v1451_v60  ;;  %v1674_v60 = vld [vmem:[#allocation9 + $0xb0] sm:$0xff] }
 0x34c   : > { %5218 = vtanh.f32 %v1462_v1  ;;  %v1665_v1 = vld [vmem:[#allocation9 + $0x68] sm:$0xff] }
 0x355   : > { %v5213_v3 = vpop.eup %5212 }
 0x356   : > { %v1455_v5 = vmul.f32 0.5, %v5213_v3  ;;  %v1667_v3 = vld [vmem:[#allocation9 + $0x78] sm:$0xff] }
 0x357   : > { %v5215_v49 = vpop.eup %5214 }
 0x358   : > { %v1456_v51 = vadd.f32 0.5, %v1455_v5  ;;  %v1459_v24 = vmul.f32 0.5, %v5215_v49  ;;  %v5217_v8 = vpop.eup %5216  ;;  %v1664_v5 = vld [vmem:[#allocation9 + $0x60] sm:$0xff]  ;;  %v1666_v49 = vld [vmem:[#allocation9 + $0x70] sm:$0xff] }
 0x359   : > { %v5219_v9 = vpop.eup %5218 }
 0x35a   : > { %v1460_v53 = vadd.f32 0.5, %v1459_v24  ;;  %v1467_v22 = vmul.f32 %v5217_v8, %v1456_v51  ;;  %v1464_v7 = vmul.f32 0.5, %v5219_v9  ;;  %v1661_v51 = vld [vmem:[#allocation9 + $0x48] sm:$0xff]  ;;  %v1663_v24 = vld [vmem:[#allocation9 + $0x58] sm:$0xff]  ;;  %v1660_v8 = vld [vmem:[#allocation9 + $0x40] sm:$0xff] }
 0x35b   : > { %v1656_v9 = vld [vmem:[#allocation9 + $0x20] sm:$0xff] }
 0x35c   : > { %v1466_v30 = vmul.f32 %v1460_v53, %v6261_v43  ;;  %v1465_v10 = vadd.f32 0.5, %v1464_v7  ;;  %v1705_v43 = vld [vmem:[#allocation9 + $0x1a8] sm:$0xff]  ;;  %v1662_v53 = vld [vmem:[#allocation9 + $0x50] sm:$0xff] }
 0x35d   : > { %v1658_v7 = vld [vmem:[#allocation9 + $0x30] sm:$0xff] }
 0x35e   : > { %v6337_v20 = vadd.f32 %v1467_v22, %v1466_v30  ;;  %v1657_v22 = vld [vmem:[#allocation9 + $0x28] sm:$0xff]  ;;  %v1659_v30 = vld [vmem:[#allocation9 + $0x38] sm:$0xff] }
 0x360   : > { %5220 = vtanh.f32 %v6337_v20 }
 0x36d   : > { %v5221_v27 = vpop.eup %5220 }
 0x36e   : > { %v6340_v59 = vmul.f32 %v5221_v27, %v1465_v10  ;;  %v1653_v10 = vld [vmem:[#allocation9 + $0x8] sm:$0xff]  ;;  %v1655_v27 = vld [vmem:[#allocation9 + $0x18] sm:$0xff] }
 0x370   : > { %1545 = vmatmul.mubr.f32.vlgmr.msra.gmra.mxu0 %v6340_v59  ;;  %1616 = vmatmul.mubr.f32.vlgmr.msra.gmra.mxu1 %v6340_v59 }
 0x371   : > { %1739 = vmatpush1.msra.mxu0 %v1712_v11  ;;  %1828 = vmatpush1.msra.mxu1 %v1714_v2  ;;  %v1652_v11 = vld [vmem:[#allocation9] sm:$0xff]  ;;  %v1654_v2 = vld [vmem:[#allocation9 + $0x10] sm:$0xff] }
 0x372   : > { %1740 = vmatprep.subr.mxu0 %v1709_v57  ;;  %1829 = vmatprep.subr.mxu1 %v1711_v47  ;;  %v8255_v57 = vld [vmem:[#allocation62_spill] sm:$0xff]  ;;  %v6358_v47 = vld [vmem:[#allocation11 + $0x1e8] sm:$0xff] }
 0x373   : > { %1741 = vmatpush1.msra.mxu0 %v1708_v12  ;;  %1830 = vmatpush1.msra.mxu1 %v1710_v13  ;;  %8256 = vst [vmem:[#allocation24_spill] sm:$0xff] %v6358_v47  ;;  %v6360_v12 = vld [vmem:[#allocation11 + $0x1f8] sm:$0xff]  ;;  %v6366_v13 = vld [vmem:[#allocation11 + $0x1f0] sm:$0xff] }
 0x374   : > { %1742 = vmatprep.subr.mxu0 %v1705_v43  ;;  %1831 = vmatprep.subr.mxu1 %v1707_v39  ;;  %8257 = vst [vmem:[#allocation25_spill] sm:$0xff] %v6360_v12  ;;  %v6372_v43 = vld [vmem:[#allocation11 + $0x1d8] sm:$0xff]  ;;  %v6376_v39 = vld [vmem:[#allocation11 + $0x1c0] sm:$0xff] }
 0x375   : > { %1743 = vmatpush1.msra.mxu0 %v1704_v45  ;;  %1832 = vmatpush1.msra.mxu1 %v1706_v55  ;;  %v6378_v45 = vld [vmem:[#allocation11 + $0x1d0] sm:$0xff]  ;;  %v6382_v55 = vld [vmem:[#allocation11 + $0x1a8] sm:$0xff] }
 0x376   : > { %1744 = vmatprep.subr.mxu0 %v1701_v41  ;;  %1833 = vmatprep.subr.mxu1 %v1703_v4  ;;  %v6384_v41 = vld [vmem:[#allocation11 + $0x1b8] sm:$0xff]  ;;  %v6388_v4 = vld [vmem:[#allocation11 + $0x1a0] sm:$0xff] }
 0x377   : > { %1745 = vmatpush1.msra.mxu0 %v1700_v6  ;;  %1834 = vmatpush1.msra.mxu1 %v1702_v14  ;;  %v6390_v6 = vld [vmem:[#allocation11 + $0x1b0] sm:$0xff]  ;;  %v6394_v14 = vld [vmem:[#allocation11 + $0x188] sm:$0xff] }
 0x378   : > { %1746 = vmatprep.subr.mxu0 %v1697_v15  ;;  %1835 = vmatprep.subr.mxu1 %v1699_v16  ;;  %v6396_v15 = vld [vmem:[#allocation11 + $0x198] sm:$0xff]  ;;  %v6400_v16 = vld [vmem:[#allocation11 + $0x180] sm:$0xff] }
 0x379   : > { %1747 = vmatpush1.msra.mxu0 %v1696_v18  ;;  %1836 = vmatpush1.msra.mxu1 %v1698_v19  ;;  %v6402_v18 = vld [vmem:[#allocation11 + $0x190] sm:$0xff]  ;;  %v6406_v19 = vld [vmem:[#allocation11 + $0x168] sm:$0xff] }
 0x37a   : > { %1748 = vmatprep.subr.mxu0 %v1693_v21  ;;  %1837 = vmatprep.subr.mxu1 %v1695_v23  ;;  %v6408_v21 = vld [vmem:[#allocation11 + $0x178] sm:$0xff]  ;;  %v6412_v23 = vld [vmem:[#allocation11 + $0x160] sm:$0xff] }
 0x37b   : > { %1749 = vmatpush1.msra.mxu0 %v1692_v25  ;;  %1838 = vmatpush1.msra.mxu1 %v1694_v26  ;;  %v6414_v25 = vld [vmem:[#allocation11 + $0x170] sm:$0xff]  ;;  %v6418_v26 = vld [vmem:[#allocation11 + $0x148] sm:$0xff] }
 0x37c   : > { %1750 = vmatprep.subr.mxu0 %v1689_v28  ;;  %1839 = vmatprep.subr.mxu1 %v1691_v29  ;;  %v6420_v28 = vld [vmem:[#allocation11 + $0x158] sm:$0xff]  ;;  %v6424_v29 = vld [vmem:[#allocation11 + $0x140] sm:$0xff] }
 0x37d   : > { %1751 = vmatpush1.msra.mxu0 %v1688_v31  ;;  %1840 = vmatpush1.msra.mxu1 %v1690_v32  ;;  %v6426_v31 = vld [vmem:[#allocation11 + $0x150] sm:$0xff]  ;;  %v6428_v32 = vld [vmem:[#allocation11 + $0x128] sm:$0xff] }
 0x37e   : > { %1752 = vmatprep.subr.mxu0 %v1685_v33  ;;  %1841 = vmatprep.subr.mxu1 %v1687_v34  ;;  %v6432_v33 = vld [vmem:[#allocation11 + $0x138] sm:$0xff]  ;;  %v6434_v34 = vld [vmem:[#allocation11 + $0x120] sm:$0xff] }
 0x37f   : > { %1753 = vmatpush1.msra.mxu0 %v1684_v35  ;;  %1842 = vmatpush1.msra.mxu1 %v1686_v36  ;;  %v6436_v35 = vld [vmem:[#allocation11 + $0x130] sm:$0xff]  ;;  %v6442_v36 = vld [vmem:[#allocation11 + $0x108] sm:$0xff] }
 0x380   : > { %1754 = vmatprep.subr.mxu0 %v1681_v38  ;;  %1843 = vmatprep.subr.mxu1 %v1683_v40  ;;  %v6444_v38 = vld [vmem:[#allocation11 + $0x118] sm:$0xff]  ;;  %v6448_v40 = vld [vmem:[#allocation11 + $0x100] sm:$0xff] }
 0x381   : > { %1755 = vmatpush1.msra.mxu0 %v1680_v42  ;;  %1844 = vmatpush1.msra.mxu1 %v1682_v44  ;;  %v6450_v42 = vld [vmem:[#allocation11 + $0x110] sm:$0xff]  ;;  %v6454_v44 = vld [vmem:[#allocation11 + $0xe8] sm:$0xff] }
 0x382   : > { %1756 = vmatprep.subr.mxu0 %v1677_v46  ;;  %1845 = vmatprep.subr.mxu1 %v1679_v48  ;;  %v6456_v46 = vld [vmem:[#allocation11 + $0xf8] sm:$0xff]  ;;  %v6460_v48 = vld [vmem:[#allocation11 + $0xe0] sm:$0xff] }
 0x383   : > { %1757 = vmatpush1.msra.mxu0 %v1676_v50  ;;  %1846 = vmatpush1.msra.mxu1 %v1678_v52  ;;  %v6462_v50 = vld [vmem:[#allocation11 + $0xf0] sm:$0xff]  ;;  %v6466_v52 = vld [vmem:[#allocation11 + $0xc8] sm:$0xff] }
 0x384   : > { %1758 = vmatprep.subr.mxu0 %v1673_v54  ;;  %1847 = vmatprep.subr.mxu1 %v1675_v56  ;;  %v6468_v54 = vld [vmem:[#allocation11 + $0xd8] sm:$0xff]  ;;  %v6472_v56 = vld [vmem:[#allocation11 + $0xc0] sm:$0xff] }
 0x385   : > { %1759 = vmatpush1.msra.mxu0 %v1672_v58  ;;  %1848 = vmatpush1.msra.mxu1 %v1674_v60  ;;  %v6474_v58 = vld [vmem:[#allocation11 + $0xd0] sm:$0xff]  ;;  %v6478_v60 = vld [vmem:[#allocation11 + $0xa8] sm:$0xff] }
 0x386   : > { %1760 = vmatprep.subr.mxu0 %v1669_v61  ;;  %1849 = vmatprep.subr.mxu1 %v1671_v62  ;;  %v6480_v61 = vld [vmem:[#allocation11 + $0xb8] sm:$0xff]  ;;  %v6484_v62 = vld [vmem:[#allocation11 + $0xa0] sm:$0xff] }
 0x387   : > { %1761 = vmatpush1.msra.mxu0 %v1668_v63  ;;  %1850 = vmatpush1.msra.mxu1 %v1670_v0  ;;  %v6486_v63 = vld [vmem:[#allocation11 + $0xb0] sm:$0xff]  ;;  %v6490_v0 = vld [vmem:[#allocation11 + $0x88] sm:$0xff] }
 0x388   : > { %1762 = vmatprep.subr.mxu0 %v1665_v1  ;;  %1851 = vmatprep.subr.mxu1 %v1667_v3  ;;  %8258 = vst [vmem:[#allocation37_spill] sm:$0xff] %v6486_v63  ;;  %8259 = vst [vmem:[#allocation27_spill] sm:$0xff] %v6490_v0  ;;  %v6492_v1 = vld [vmem:[#allocation11 + $0x98] sm:$0xff]  ;;  %v6496_v3 = vld [vmem:[#allocation11 + $0x80] sm:$0xff] }
 0x389   : > { %1763 = vmatpush1.msra.mxu0 %v1664_v5  ;;  %1852 = vmatpush1.msra.mxu1 %v1666_v49  ;;  %8260 = vst [vmem:[#allocation23_spill] sm:$0xff] %v6492_v1  ;;  %8261 = vst [vmem:[#allocation26_spill] sm:$0xff] %v6496_v3  ;;  %v6498_v5 = vld [vmem:[#allocation11 + $0x90] sm:$0xff]  ;;  %v6502_v49 = vld [vmem:[#allocation11 + $0x68] sm:$0xff] }
 0x38a   : > { %1764 = vmatprep.subr.mxu0 %v1661_v51  ;;  %1853 = vmatprep.subr.mxu1 %v1663_v24  ;;  %8262 = vst [vmem:[#allocation50_spill] sm:$0xff] %v6498_v5  ;;  %8263 = vst [vmem:[#allocation51_spill] sm:$0xff] %v6502_v49  ;;  %v6504_v51 = vld [vmem:[#allocation11 + $0x78] sm:$0xff]  ;;  %v6508_v24 = vld [vmem:[#allocation11 + $0x60] sm:$0xff] }
 0x38b   : > { %1765 = vmatpush1.msra.mxu0 %v1660_v8  ;;  %1854 = vmatpush1.msra.mxu1 %v1662_v53  ;;  %8264 = vst [vmem:[#allocation38_spill] sm:$0xff] %v6504_v51  ;;  %8265 = vst [vmem:[#allocation28_spill] sm:$0xff] %v6508_v24  ;;  %v6510_v8 = vld [vmem:[#allocation11 + $0x70] sm:$0xff]  ;;  %v6514_v53 = vld [vmem:[#allocation11 + $0x48] sm:$0xff] }
 0x38c   : > { %1766 = vmatprep.subr.mxu0 %v1657_v22  ;;  %1855 = vmatprep.subr.mxu1 %v1659_v30  ;;  %8266 = vst [vmem:[#allocation39_spill] sm:$0xff] %v6510_v8  ;;  %8267 = vst [vmem:[#allocation29_spill] sm:$0xff] %v6514_v53  ;;  %v6516_v22 = vld [vmem:[#allocation11 + $0x58] sm:$0xff]  ;;  %v6518_v30 = vld [vmem:[#allocation11 + $0x40] sm:$0xff] }
 0x38d   : > { %1767 = vmatpush1.msra.mxu0 %v1656_v9  ;;  %1856 = vmatpush1.msra.mxu1 %v1658_v7  ;;  %8268 = vst [vmem:[#allocation40_spill] sm:$0xff] %v6516_v22  ;;  %8269 = vst [vmem:[#allocation30_spill] sm:$0xff] %v6518_v30  ;;  %v6522_v9 = vld [vmem:[#allocation11 + $0x50] sm:$0xff]  ;;  %v6524_v7 = vld [vmem:[#allocation11 + $0x28] sm:$0xff] }
 0x38e   : > { %1768 = vmatprep.subr.mxu0 %v1653_v10  ;;  %1857 = vmatprep.subr.mxu1 %v1655_v27  ;;  %8270 = vst [vmem:[#allocation41_spill] sm:$0xff] %v6522_v9  ;;  %8271 = vst [vmem:[#allocation31_spill] sm:$0xff] %v6524_v7  ;;  %v6526_v10 = vld [vmem:[#allocation11 + $0x38] sm:$0xff]  ;;  %v6530_v27 = vld [vmem:[#allocation11 + $0x20] sm:$0xff] }
 0x38f   : > { %1769 = vmatpush1.msra.mxu0 %v1652_v11  ;;  %1802 = vmatprep.mubr.f32.mxu0 %v8250_v37  ;;  %8272 = vst [vmem:[#allocation42_spill] sm:$0xff] %v6526_v10  ;;  %8273 = vst [vmem:[#allocation32_spill] sm:$0xff] %v6530_v27  ;;  %v6532_v11 = vld [vmem:[#allocation11 + $0x30] sm:$0xff] }
 0x390   : > { %1858 = vmatpush1.msra.mxu1 %v1654_v2  ;;  %1891 = vmatprep.mubr.f32.mxu1 %v8250_v37  ;;  %8274 = vst [vmem:[#allocation43_spill] sm:$0xff] %v6532_v11  ;;  %v6534_v2 = vld [vmem:[#allocation11 + $0x8] sm:$0xff] }
 0x391   : > { %1803 = vmatmul.mubr.f32.vlgmr.msra.gmra.mxu0 %v8255_v57  ;;  %1892 = vmatmul.mubr.f32.vlgmr.msra.gmra.mxu1 %v8255_v57  ;;  %8275 = vst [vmem:[#allocation33_spill] sm:$0xff] %v6534_v2  ;;  %v6538_v57 = vld [vmem:[#allocation11 + $0x18] sm:$0xff] }
 0x392   : > { %1808 = vmatprep.mubr.f32.mxu0 %v8250_v37  ;;  %1897 = vmatprep.mubr.f32.mxu1 %v8250_v37  ;;  %8276 = vst [vmem:[#allocation44_spill] sm:$0xff] %v6538_v57 }
 0x393   : > { %2004 = vmatprep.subr.mxu0 %v6358_v47  ;;  %2075 = vmatprep.subr.mxu1 %v6360_v12 }
 0x394   : > { %2076 = vmatpush1.msra.mxu1 %v6366_v13 }
 0x395   : > { %1809 = vmatmul.mubr.f32.gmra.mxu0 %v6264_v17  ;;  %1898 = vmatmul.mubr.f32.gmra.mxu1 %v6264_v17  ;;  %v6364_v17 = vld [vmem:[#allocation11 + $0x1e0] sm:$0xff] }
 0x396   : > { %1814 = vmatprep.mubr.f32.mxu0 %v8250_v37  ;;  %1903 = vmatprep.mubr.f32.mxu1 %v8250_v37 }
 0x397   : > { %2005 = vmatpush1.msra.mxu0 %v6364_v17  ;;  %2077 = vmatprep.subr.mxu1 %v6372_v43 }
 0x398   : > { %2078 = vmatpush1.msra.mxu1 %v6378_v45 }
 0x399   : > { %1815 = vmatmul.mubr.f32.gmra.mxu0 %v6340_v59  ;;  %1904 = vmatmul.mubr.f32.gmra.mxu1 %v6340_v59  ;;  %v6370_v59 = vld [vmem:[#allocation11 + $0x1c8] sm:$0xff] }
 0x39a   : > { %1820 = vmatprep.mubr.f32.mxu0 %v8250_v37  ;;  %1909 = vmatprep.mubr.f32.mxu1 %v8250_v37 }
 0x39b   : > { %2006 = vmatprep.subr.mxu0 %v6370_v59  ;;  %2079 = vmatprep.subr.mxu1 %v6384_v41 }
 0x39c   : > { %2007 = vmatpush1.msra.mxu0 %v6376_v39  ;;  %2080 = vmatpush1.msra.mxu1 %v6390_v6 }
 0x39d   : > { %2008 = vmatprep.subr.mxu0 %v6382_v55  ;;  %2081 = vmatprep.subr.mxu1 %v6396_v15 }
 0x39e   : > { %2009 = vmatpush1.msra.mxu0 %v6388_v4  ;;  %2082 = vmatpush1.msra.mxu1 %v6402_v18 }
 0x39f   : > { %2010 = vmatprep.subr.mxu0 %v6394_v14  ;;  %2083 = vmatprep.subr.mxu1 %v6408_v21 }
 0x3a0   : > { %2011 = vmatpush1.msra.mxu0 %v6400_v16  ;;  %2084 = vmatpush1.msra.mxu1 %v6414_v25 }
 0x3a1   : > { %2012 = vmatprep.subr.mxu0 %v6406_v19  ;;  %2085 = vmatprep.subr.mxu1 %v6420_v28 }
 0x3a2   : > { %2013 = vmatpush1.msra.mxu0 %v6412_v23  ;;  %2086 = vmatpush1.msra.mxu1 %v6426_v31 }
 0x3a3   : > { %2014 = vmatprep.subr.mxu0 %v6418_v26  ;;  %2087 = vmatprep.subr.mxu1 %v6432_v33 }
 0x3a4   : > { %2015 = vmatpush1.msra.mxu0 %v6424_v29  ;;  %2088 = vmatpush1.msra.mxu1 %v6436_v35 }
 0x3a5   : > { %2016 = vmatprep.subr.mxu0 %v6428_v32  ;;  %2089 = vmatprep.subr.mxu1 %v6444_v38 }
 0x3a6   : > { %2017 = vmatpush1.msra.mxu0 %v6434_v34  ;;  %2090 = vmatpush1.msra.mxu1 %v6450_v42 }
 0x3a7   : > { %2018 = vmatprep.subr.mxu0 %v6442_v36  ;;  %2091 = vmatprep.subr.mxu1 %v6456_v46 }
 0x3a8   : > { %2019 = vmatpush1.msra.mxu0 %v6448_v40  ;;  %2092 = vmatpush1.msra.mxu1 %v6462_v50 }
 0x3a9   : > { %2020 = vmatprep.subr.mxu0 %v6454_v44  ;;  %2093 = vmatprep.subr.mxu1 %v6468_v54 }
 0x3aa   : > { %2021 = vmatpush1.msra.mxu0 %v6460_v48  ;;  %2094 = vmatpush1.msra.mxu1 %v6474_v58 }
 0x3ab   : > { %2022 = vmatprep.subr.mxu0 %v6466_v52  ;;  %2095 = vmatprep.subr.mxu1 %v6480_v61 }
 0x3ac   : > { %2023 = vmatpush1.msra.mxu0 %v6472_v56  ;;  %2096 = vmatpush1.msra.mxu1 %v6486_v63 }
 0x3ad   : > { %2024 = vmatprep.subr.mxu0 %v6478_v60  ;;  %2097 = vmatprep.subr.mxu1 %v6492_v1 }
 0x3ae   : > { %2025 = vmatpush1.msra.mxu0 %v6484_v62  ;;  %2098 = vmatpush1.msra.mxu1 %v6498_v5 }
 0x3af   : > { %2026 = vmatprep.subr.mxu0 %v6490_v0  ;;  %2099 = vmatprep.subr.mxu1 %v6504_v51 }
 0x3b0   : > { %2027 = vmatpush1.msra.mxu0 %v6496_v3  ;;  %2100 = vmatpush1.msra.mxu1 %v6510_v8 }
 0x3b1   : > { %2028 = vmatprep.subr.mxu0 %v6502_v49  ;;  %2101 = vmatprep.subr.mxu1 %v6516_v22  ;;  %v6540_v22 = vld [vmem:[#allocation11] sm:$0xff] }
 0x3b2   : > { %2029 = vmatpush1.msra.mxu0 %v6508_v24  ;;  %2102 = vmatpush1.msra.mxu1 %v6522_v9  ;;  %8277 = vst [vmem:[#allocation34_spill] sm:$0xff] %v6540_v22  ;;  %v8280_v24 = vld [vmem:[#allocation55_spill] sm:$0xff] }
 0x3b3   : > { %2030 = vmatprep.subr.mxu0 %v6514_v53  ;;  %2103 = vmatprep.subr.mxu1 %v6526_v10  ;;  %v6542_v53 = vld [vmem:[#allocation11 + $0x10] sm:$0xff] }
 0x3b4   : > { %2031 = vmatpush1.msra.mxu0 %v6518_v30  ;;  %8278 = vst [vmem:[#allocation45_spill] sm:$0xff] %v6542_v53  ;;  %2104 = vmatpush1.msra.mxu1 %v6532_v11 }
 0x3b5   : > { %2032 = vmatprep.subr.mxu0 %v6524_v7  ;;  %2105 = vmatprep.subr.mxu1 %v6538_v57  ;;  %v8279_v7 = vld [vmem:[#allocation54_spill] sm:$0xff] }
 0x3b6   : > { %2033 = vmatpush1.msra.mxu0 %v6530_v27  ;;  %2106 = vmatpush1.msra.mxu1 %v6542_v53  ;;  %v8282_v53 = vld [vmem:[#allocation61_spill] sm:$0xff] }
 0x3b7   : > { %2034 = vmatprep.subr.mxu0 %v6534_v2  ;;  %2244 = vmatprep.subr.mxu1 %v6360_v12  ;;  %v8281_v2 = vld [vmem:[#allocation60_spill] sm:$0xff] }
 0x3b8   : > { %2035 = vmatpush1.msra.mxu0 %v6540_v22 }
 0x3b9   : > { %2173 = vmatprep.subr.mxu0 %v6358_v47 }
 0x430   : > { %v1546_v10 = vpop.f32.mrf.mxu0  ;;  %v1617_v30 = vpop.f32.mrf.mxu1 }
 0x431   : > { %v1622_v9 = vadd.f32 %v1546_v10, %v8279_v7  ;;  %v1624_v51 = vadd.f32 %v1617_v30, %v8281_v2  ;;  %v8291_v2 = vld [vmem:[#allocation29_spill] sm:$0xff] }
 0x432   : > { %v1548_v8 = vpop.f32.mrf.mxu0  ;;  %v1619_v22 = vpop.f32.mrf.mxu1 }
 0x433   : > { %v1626_v27 = vmul.f32 0.5, %v1622_v9  ;;  %v1623_v11 = vadd.f32 %v1548_v8, %v8280_v24  ;;  %v1625_v49 = vadd.f32 %v1619_v22, %v8282_v53  ;;  %v8290_v22 = vld [vmem:[#allocation39_spill] sm:$0xff] }
 0x435   : > { %5222 = vtanh.f32 %v1626_v27  ;;  %v1630_v57 = vmul.f32 0.5, %v1623_v11  ;;  %v1635_v47 = vmul.f32 0.5, %v1625_v49  ;;  %v8289_v49 = vld [vmem:[#allocation28_spill] sm:$0xff] }
 0x437   : > { %5224 = vtanh.f32 %v1630_v57  ;;  %v8292_v57 = vld [vmem:[#allocation40_spill] sm:$0xff] }
 0x438   : > { %5226 = vtanh.f32 %v1624_v51 }
 0x439   : > { %5228 = vtanh.f32 %v1635_v47  ;;  %v1997_v47 = vld [vmem:[#allocation5] sm:$0xff] }
 0x442   : > { %v5223_v5 = vpop.eup %5222 }
 0x443   : > { %v1628_v12 = vmul.f32 0.5, %v5223_v5  ;;  %v8288_v5 = vld [vmem:[#allocation38_spill] sm:$0xff] }
 0x444   : > { %v5225_v3 = vpop.eup %5224 }
 0x445   : > { %v1629_v1 = vadd.f32 0.5, %v1628_v12  ;;  %v1632_v7 = vmul.f32 0.5, %v5225_v3  ;;  %v5227_v10 = vpop.eup %5226  ;;  %v8284_v12 = vld [vmem:[#allocation23_spill] sm:$0xff] }
 0x446   : > { %v5229_v30 = vpop.eup %5228  ;;  %v8287_v3 = vld [vmem:[#allocation51_spill] sm:$0xff] }
 0x447   : > { %v1633_v9 = vadd.f32 0.5, %v1632_v7  ;;  %v1640_v0 = vmul.f32 %v5227_v10, %v1629_v1  ;;  %v1637_v51 = vmul.f32 0.5, %v5229_v30  ;;  %v8286_v1 = vld [vmem:[#allocation50_spill] sm:$0xff]  ;;  %v8294_v10 = vld [vmem:[#allocation41_spill] sm:$0xff]  ;;  %v8298_v30 = vld [vmem:[#allocation43_spill] sm:$0xff] }
 0x448   : > { %v8293_v7 = vld [vmem:[#allocation30_spill] sm:$0xff] }
 0x449   : > { %v1639_v24 = vmul.f32 %v1633_v9, %v6337_v20  ;;  %v1638_v27 = vadd.f32 0.5, %v1637_v51  ;;  %v8283_v20 = vld [vmem:[#allocation27_spill] sm:$0xff]  ;;  %v8299_v51 = vld [vmem:[#allocation33_spill] sm:$0xff] }
 0x44a   : > { %v8295_v9 = vld [vmem:[#allocation31_spill] sm:$0xff] }
 0x44b   : > { %v1641_v8 = vadd.f32 %v1640_v0, %v1639_v24  ;;  %v8285_v0 = vld [vmem:[#allocation26_spill] sm:$0xff] }
 0x44c   : > { %v8296_v24 = vld [vmem:[#allocation42_spill] sm:$0xff] }
 0x44d   : > { %5230 = vtanh.f32 %v1641_v8  ;;  %1647 = vst [vmem:[#allocation6] sm:$0xff] %v1641_v8  ;;  %v8297_v8 = vld [vmem:[#allocation32_spill] sm:$0xff] }
 0x45a   : > { %v5231_v11 = vpop.eup %5230 }
 0x45b   : > { %v1643_v53 = vmul.f32 %v5231_v11, %v1638_v27  ;;  %v8300_v27 = vld [vmem:[#allocation44_spill] sm:$0xff]  ;;  %v8301_v11 = vld [vmem:[#allocation34_spill] sm:$0xff] }
 0x45d   : > { %1646 = vst [vmem:[#allocation5 + $0x10] sm:$0xff] %v1643_v53  ;;  %1821 = vmatmul.mubr.f32.gmra.mxu0 %v1643_v53  ;;  %1910 = vmatmul.mubr.f32.gmra.mxu1 %v1643_v53  ;;  %v8302_v53 = vld [vmem:[#allocation45_spill] sm:$0xff] }
 0x45e   : > { %2068 = vmatprep.mubr.f32.mxu0 %v8250_v37  ;;  %2139 = vmatprep.mubr.f32.mxu1 %v8250_v37 }
 0x461   : > { %2069 = vmatmul.mubr.f32.vlgmr.msra.gmra.mxu0 %v1997_v47  ;;  %2140 = vmatmul.mubr.f32.vlgmr.msra.gmra.mxu1 %v1997_v47  ;;  %v8303_v47 = vld [vmem:[#allocation24_spill] sm:$0xff] }
 0x462   : > { %2174 = vmatpush1.msra.mxu0 %v6364_v17  ;;  %2245 = vmatpush1.msra.mxu1 %v6366_v13 }
 0x463   : > { %2175 = vmatprep.subr.mxu0 %v6370_v59  ;;  %2246 = vmatprep.subr.mxu1 %v6372_v43 }
 0x464   : > { %2176 = vmatpush1.msra.mxu0 %v6376_v39  ;;  %2247 = vmatpush1.msra.mxu1 %v6378_v45 }
 0x465   : > { %2177 = vmatprep.subr.mxu0 %v6382_v55  ;;  %2248 = vmatprep.subr.mxu1 %v6384_v41 }
 0x466   : > { %2178 = vmatpush1.msra.mxu0 %v6388_v4  ;;  %2249 = vmatpush1.msra.mxu1 %v6390_v6 }
 0x467   : > { %2179 = vmatprep.subr.mxu0 %v6394_v14  ;;  %2250 = vmatprep.subr.mxu1 %v6396_v15 }
 0x468   : > { %2180 = vmatpush1.msra.mxu0 %v6400_v16  ;;  %2251 = vmatpush1.msra.mxu1 %v6402_v18 }
 0x469   : > { %2181 = vmatprep.subr.mxu0 %v6406_v19  ;;  %2252 = vmatprep.subr.mxu1 %v6408_v21 }
 0x46a   : > { %2182 = vmatpush1.msra.mxu0 %v6412_v23  ;;  %2253 = vmatpush1.msra.mxu1 %v6414_v25 }
 0x46b   : > { %2183 = vmatprep.subr.mxu0 %v6418_v26  ;;  %2254 = vmatprep.subr.mxu1 %v6420_v28 }
 0x46c   : > { %2184 = vmatpush1.msra.mxu0 %v6424_v29  ;;  %2255 = vmatpush1.msra.mxu1 %v6426_v31 }
 0x46d   : > { %2185 = vmatprep.subr.mxu0 %v6428_v32  ;;  %2256 = vmatprep.subr.mxu1 %v6432_v33 }
 0x46e   : > { %2186 = vmatpush1.msra.mxu0 %v6434_v34  ;;  %2257 = vmatpush1.msra.mxu1 %v6436_v35 }
 0x46f   : > { %2187 = vmatprep.subr.mxu0 %v6442_v36  ;;  %2258 = vmatprep.subr.mxu1 %v6444_v38 }
 0x470   : > { %2188 = vmatpush1.msra.mxu0 %v6448_v40  ;;  %2259 = vmatpush1.msra.mxu1 %v6450_v42 }
 0x471   : > { %2189 = vmatprep.subr.mxu0 %v6454_v44  ;;  %2260 = vmatprep.subr.mxu1 %v6456_v46 }
 0x472   : > { %2190 = vmatpush1.msra.mxu0 %v6460_v48  ;;  %2261 = vmatpush1.msra.mxu1 %v6462_v50 }
 0x473   : > { %2191 = vmatprep.subr.mxu0 %v6466_v52  ;;  %2262 = vmatprep.subr.mxu1 %v6468_v54 }
 0x474   : > { %2192 = vmatpush1.msra.mxu0 %v6472_v56  ;;  %2263 = vmatpush1.msra.mxu1 %v6474_v58 }
 0x475   : > { %2193 = vmatprep.subr.mxu0 %v6478_v60  ;;  %2264 = vmatprep.subr.mxu1 %v6480_v61 }
 0x476   : > { %2194 = vmatpush1.msra.mxu0 %v6484_v62  ;;  %2265 = vmatpush1.msra.mxu1 %v6486_v63 }
 0x477   : > { %2195 = vmatprep.subr.mxu0 %v8283_v20  ;;  %2266 = vmatprep.subr.mxu1 %v8284_v12 }
 0x478   : > { %2196 = vmatpush1.msra.mxu0 %v8285_v0  ;;  %2267 = vmatpush1.msra.mxu1 %v8286_v1 }
 0x479   : > { %2197 = vmatprep.subr.mxu0 %v8287_v3  ;;  %2268 = vmatprep.subr.mxu1 %v8288_v5 }
 0x47a   : > { %2198 = vmatpush1.msra.mxu0 %v8289_v49  ;;  %2269 = vmatpush1.msra.mxu1 %v8290_v22 }
 0x47b   : > { %2199 = vmatprep.subr.mxu0 %v8291_v2  ;;  %2270 = vmatprep.subr.mxu1 %v8292_v57  ;;  %v8313_v2 = vld [vmem:[#allocation48_spill] sm:$0xff] }
 0x47c   : > { %2200 = vmatpush1.msra.mxu0 %v8293_v7  ;;  %2271 = vmatpush1.msra.mxu1 %v8294_v10 }
 0x47d   : > { %2201 = vmatprep.subr.mxu0 %v8295_v9  ;;  %2272 = vmatprep.subr.mxu1 %v8296_v24  ;;  %v8304_v9 = vld [vmem:[#allocation25_spill] sm:$0xff]  ;;  %v1804_v24 = vpop.f32.mrf.mxu0 }
 0x47e   : > { %2202 = vmatpush1.msra.mxu0 %v8297_v8  ;;  %2273 = vmatpush1.msra.mxu1 %v8298_v30  ;;  %v1893_v8 = vpop.f32.mrf.mxu1 }
 0x47f   : > { %2203 = vmatprep.subr.mxu0 %v8299_v51  ;;  %2274 = vmatprep.subr.mxu1 %v8300_v27  ;;  %v1806_v10 = vpop.f32.mrf.mxu0 }
 0x480   : > { %2204 = vmatpush1.msra.mxu0 %v8301_v11  ;;  %2237 = vmatprep.mubr.f32.mxu0 %v8250_v37  ;;  %v1895_v30 = vpop.f32.mrf.mxu1 }
 0x481   : > { %2275 = vmatpush1.msra.mxu1 %v8302_v53  ;;  %2308 = vmatprep.mubr.f32.mxu1 %v8250_v37  ;;  %v6625_v7 = vpop.f32.mrf.mxu0 }
 0x482   : > { %2343 = vmatprep.subr.mxu0 %v8303_v47  ;;  %2414 = vmatprep.subr.mxu1 %v8304_v9  ;;  %8305 = vst [vmem:[#allocation35_spill] sm:$0xff] %v6625_v7  ;;  %v6627_v51 = vpop.f32.mrf.mxu1  ;;  %v1716_v9 = vld [vmem:[%s7908_s6] sm:$0xf] }
 0x483   : > { %8306 = vst [vmem:[#allocation46_spill] sm:$0xff] %v6627_v51  ;;  %v6629_v27 = vpop.f32.mrf.mxu0  ;;  %v6645_v7 = vrot.slane %v1716_v9, %v8313_v2 }
 0x484   : > { %8307 = vst [vmem:[#allocation36_spill] sm:$0xff] %v6629_v27  ;;  %v6631_v11 = vpop.f32.mrf.mxu1 }
 0x485   : > { %8308 = vst [vmem:[#allocation47_spill] sm:$0xff] %v6631_v11  ;;  %v6633_v57 = vpop.f32.mrf.mxu0  ;;  %8314 = vst [vmem:[#allocation62_spill] sm:$0xff] %v6645_v7  ;;  %v8317_v11 = vld [vmem:[#allocation49_spill] sm:$0xff] }
 0x486   : > { %8309 = vst [vmem:[#allocation52_spill] sm:$0xff] %v6633_v57  ;;  %v6635_v53 = vpop.f32.mrf.mxu1  ;;  %v6652_v22 = vrot.slane %v1716_v9, %v8317_v11 }
 0x487   : > { %8310 = vst [vmem:[#allocation53_spill] sm:$0xff] %v6635_v53  ;;  %v6640_v47 = vpop.f32.mrf.mxu0  ;;  %v1805_v53 = vadd.f32 %v1804_v24, %v6645_v7 }
 0x488   : > { %8311 = vst [vmem:[#allocation58_spill] sm:$0xff] %v6640_v47  ;;  %v6642_v37 = vpop.f32.mrf.mxu1  ;;  %8318 = vst [vmem:[#allocation60_spill] sm:$0xff] %v6652_v22  ;;  %v8321_v47 = vld [vmem:[#allocation56_spill] sm:$0xff]  ;;  %v1807_v2 = vadd.f32 %v1806_v10, %v6652_v22 }
 0x489   : > { %8312 = vst [vmem:[#allocation59_spill] sm:$0xff] %v6642_v37  ;;  %v6660_v3 = vrot.slane %v1716_v9, %v8321_v47 }
 0x48b   : > { %8322 = vst [vmem:[#allocation64_spill] sm:$0xff] %v6660_v3  ;;  %v1894_v11 = vadd.f32 %v1893_v8, %v6660_v3  ;;  %v1999_v8 = vld [vmem:[#allocation6 + $0x18] sm:$0xff] }
 0x51d   : > { %v6647_v51 = vpop.f32.mrf.mxu0  ;;  %v6649_v27 = vpop.f32.mrf.mxu1 }
 0x51e   : > { %8315 = vst [vmem:[#allocation54_spill] sm:$0xff] %v6647_v51  ;;  %8316 = vst [vmem:[#allocation55_spill] sm:$0xff] %v6649_v27 }
 0x51f   : > { %v6654_v57 = vpop.f32.mrf.mxu0  ;;  %v6657_v49 = vpop.f32.mrf.mxu1 }
 0x520   : > { %8319 = vst [vmem:[#allocation61_spill] sm:$0xff] %v6654_v57  ;;  %8320 = vst [vmem:[#allocation63_spill] sm:$0xff] %v6657_v49  ;;  %v8323_v57 = vld [vmem:[#allocation57_spill] sm:$0xff] }
 0x521   : > { %v2070_v5 = vpop.f32.mrf.mxu0  ;;  %v2141_v27 = vpop.f32.mrf.mxu1  ;;  %v6665_v20 = vrot.slane %v1716_v9, %v8323_v57 }
 0x522   : > { %v2146_v37 = vadd.f32 %v2070_v5, %v1805_v53  ;;  %v2148_v24 = vadd.f32 %v2141_v27, %v1894_v11  ;;  %v8326_v11 = vld [vmem:[#allocation23_spill] sm:$0xff] }
 0x523   : > { %v2072_v1 = vpop.f32.mrf.mxu0  ;;  %v2143_v49 = vpop.f32.mrf.mxu1  ;;  %v1896_v47 = vadd.f32 %v1895_v30, %v6665_v20 }
 0x524   : > { %v2150_v51 = vmul.f32 0.5, %v2146_v37  ;;  %v2147_v0 = vadd.f32 %v2072_v1, %v1807_v2 }
 0x525   : > { %v2149_v7 = vadd.f32 %v2143_v49, %v1896_v47  ;;  %v8327_v47 = vld [vmem:[#allocation26_spill] sm:$0xff] }
 0x526   : > { %5232 = vtanh.f32 %v2150_v51  ;;  %v2154_v12 = vmul.f32 0.5, %v2147_v0 }
 0x527   : > { %v2159_v10 = vmul.f32 0.5, %v2149_v7 }
 0x528   : > { %5234 = vtanh.f32 %v2154_v12 }
 0x529   : > { %5236 = vtanh.f32 %v2148_v24  ;;  %v8328_v24 = vld [vmem:[#allocation50_spill] sm:$0xff] }
 0x52a   : > { %5238 = vtanh.f32 %v2159_v10  ;;  %v8329_v10 = vld [vmem:[#allocation51_spill] sm:$0xff] }
 0x533   : > { %v5233_v5 = vpop.eup %5232 }
 0x534   : > { %v2152_v53 = vmul.f32 0.5, %v5233_v5  ;;  %v8330_v5 = vld [vmem:[#allocation38_spill] sm:$0xff] }
 0x535   : > { %v5235_v37 = vpop.eup %5234 }
 0x536   : > { %v2153_v1 = vadd.f32 0.5, %v2152_v53  ;;  %v2156_v2 = vmul.f32 0.5, %v5235_v37  ;;  %v5237_v0 = vpop.eup %5236  ;;  %v8331_v53 = vld [vmem:[#allocation28_spill] sm:$0xff]  ;;  %v8332_v37 = vld [vmem:[#allocation39_spill] sm:$0xff] }
 0x537   : > { %v5239_v12 = vpop.eup %5238 }
 0x538   : > { %v2157_v51 = vadd.f32 0.5, %v2156_v2  ;;  %v2164_v9 = vmul.f32 %v5237_v0, %v2153_v1  ;;  %v2161_v30 = vmul.f32 0.5, %v5239_v12  ;;  %v8333_v1 = vld [vmem:[#allocation29_spill] sm:$0xff]  ;;  %v8334_v2 = vld [vmem:[#allocation40_spill] sm:$0xff]  ;;  %v8337_v0 = vld [vmem:[#allocation31_spill] sm:$0xff] }
 0x539   : > { %v8339_v12 = vld [vmem:[#allocation32_spill] sm:$0xff] }
 0x53a   : > { %v2163_v3 = vmul.f32 %v2157_v51, %v1999_v8  ;;  %v2162_v27 = vadd.f32 0.5, %v2161_v30  ;;  %v8335_v8 = vld [vmem:[#allocation30_spill] sm:$0xff]  ;;  %v8336_v51 = vld [vmem:[#allocation41_spill] sm:$0xff]  ;;  %v8340_v30 = vld [vmem:[#allocation43_spill] sm:$0xff] }
 0x53c   : > { %v6668_v57 = vadd.f32 %v2164_v9, %v2163_v3  ;;  %v8325_v3 = vld [vmem:[#allocation27_spill] sm:$0xff]  ;;  %v8338_v9 = vld [vmem:[#allocation42_spill] sm:$0xff] }
 0x53e   : > { %5240 = vtanh.f32 %v6668_v57 }
 0x54b   : > { %v5241_v49 = vpop.eup %5240 }
 0x54c   : > { %v6671_v7 = vmul.f32 %v5241_v49, %v2162_v27  ;;  %v8341_v27 = vld [vmem:[#allocation33_spill] sm:$0xff]  ;;  %v8342_v49 = vld [vmem:[#allocation44_spill] sm:$0xff] }
 0x54e   : > { %8324 = vst [vmem:[#allocation65_spill] sm:$0xff] %v6671_v7  ;;  %2238 = vmatmul.mubr.f32.vlgmr.msra.gmra.mxu0 %v6671_v7  ;;  %2309 = vmatmul.mubr.f32.vlgmr.msra.gmra.mxu1 %v6671_v7  ;;  %v8343_v7 = vld [vmem:[#allocation34_spill] sm:$0xff] }
 0x54f   : > { %2344 = vmatpush1.msra.mxu0 %v6364_v17  ;;  %2415 = vmatpush1.msra.mxu1 %v6366_v13 }
 0x550   : > { %2345 = vmatprep.subr.mxu0 %v6370_v59  ;;  %2416 = vmatprep.subr.mxu1 %v6372_v43 }
 0x551   : > { %2346 = vmatpush1.msra.mxu0 %v6376_v39  ;;  %2417 = vmatpush1.msra.mxu1 %v6378_v45 }
 0x552   : > { %2347 = vmatprep.subr.mxu0 %v6382_v55  ;;  %2418 = vmatprep.subr.mxu1 %v6384_v41 }
 0x553   : > { %2348 = vmatpush1.msra.mxu0 %v6388_v4  ;;  %2419 = vmatpush1.msra.mxu1 %v6390_v6 }
 0x554   : > { %2349 = vmatprep.subr.mxu0 %v6394_v14  ;;  %2420 = vmatprep.subr.mxu1 %v6396_v15 }
 0x555   : > { %2350 = vmatpush1.msra.mxu0 %v6400_v16  ;;  %2421 = vmatpush1.msra.mxu1 %v6402_v18 }
 0x556   : > { %2351 = vmatprep.subr.mxu0 %v6406_v19  ;;  %2422 = vmatprep.subr.mxu1 %v6408_v21 }
 0x557   : > { %2352 = vmatpush1.msra.mxu0 %v6412_v23  ;;  %2423 = vmatpush1.msra.mxu1 %v6414_v25 }
 0x558   : > { %2353 = vmatprep.subr.mxu0 %v6418_v26  ;;  %2424 = vmatprep.subr.mxu1 %v6420_v28 }
 0x559   : > { %2354 = vmatpush1.msra.mxu0 %v6424_v29  ;;  %2425 = vmatpush1.msra.mxu1 %v6426_v31 }
 0x55a   : > { %2355 = vmatprep.subr.mxu0 %v6428_v32  ;;  %2426 = vmatprep.subr.mxu1 %v6432_v33 }
 0x55b   : > { %2356 = vmatpush1.msra.mxu0 %v6434_v34  ;;  %2427 = vmatpush1.msra.mxu1 %v6436_v35 }
 0x55c   : > { %2357 = vmatprep.subr.mxu0 %v6442_v36  ;;  %2428 = vmatprep.subr.mxu1 %v6444_v38 }
 0x55d   : > { %2358 = vmatpush1.msra.mxu0 %v6448_v40  ;;  %2429 = vmatpush1.msra.mxu1 %v6450_v42 }
 0x55e   : > { %2359 = vmatprep.subr.mxu0 %v6454_v44  ;;  %2430 = vmatprep.subr.mxu1 %v6456_v46 }
 0x55f   : > { %2360 = vmatpush1.msra.mxu0 %v6460_v48  ;;  %2431 = vmatpush1.msra.mxu1 %v6462_v50 }
 0x560   : > { %2361 = vmatprep.subr.mxu0 %v6466_v52  ;;  %2432 = vmatprep.subr.mxu1 %v6468_v54 }
 0x561   : > { %2362 = vmatpush1.msra.mxu0 %v6472_v56  ;;  %2433 = vmatpush1.msra.mxu1 %v6474_v58 }
 0x562   : > { %2363 = vmatprep.subr.mxu0 %v6478_v60  ;;  %2434 = vmatprep.subr.mxu1 %v6480_v61 }
 0x563   : > { %2364 = vmatpush1.msra.mxu0 %v6484_v62  ;;  %2435 = vmatpush1.msra.mxu1 %v6486_v63 }
 0x564   : > { %2365 = vmatprep.subr.mxu0 %v8325_v3  ;;  %2436 = vmatprep.subr.mxu1 %v8326_v11 }
 0x565   : > { %2366 = vmatpush1.msra.mxu0 %v8327_v47  ;;  %2437 = vmatpush1.msra.mxu1 %v8328_v24 }
 0x566   : > { %2367 = vmatprep.subr.mxu0 %v8329_v10  ;;  %2438 = vmatprep.subr.mxu1 %v8330_v5  ;;  %v8351_v5 = vld [vmem:[#allocation64_spill] sm:$0xff]  ;;  %v8352_v10 = vld [vmem:[#allocation46_spill] sm:$0xff] }
 0x567   : > { %2368 = vmatpush1.msra.mxu0 %v8331_v53  ;;  %2439 = vmatpush1.msra.mxu1 %v8332_v37  ;;  %v1900_v24 = vadd.f32 %v8352_v10, %v8351_v5 }
 0x568   : > { %2369 = vmatprep.subr.mxu0 %v8333_v1  ;;  %2440 = vmatprep.subr.mxu1 %v8334_v2  ;;  %v8344_v1 = vmov 0.0   ;;  %v8345_v2 = vld [vmem:[#allocation45_spill] sm:$0xff] }
 0x569   : > { %2370 = vmatpush1.msra.mxu0 %v8335_v8  ;;  %2441 = vmatpush1.msra.mxu1 %v8336_v51  ;;  %v8346_v51 = vld [vmem:[#allocation24_spill] sm:$0xff] }
 0x56a   : > { %2371 = vmatprep.subr.mxu0 %v8337_v0  ;;  %2442 = vmatprep.subr.mxu1 %v8338_v9  ;;  %v8347_v0 = vld [vmem:[#allocation25_spill] sm:$0xff]  ;;  %v8348_v9 = vld [vmem:[#allocation62_spill] sm:$0xff] }
 0x56b   : > { %2372 = vmatpush1.msra.mxu0 %v8339_v12  ;;  %2443 = vmatpush1.msra.mxu1 %v8340_v30  ;;  %v8349_v12 = vld [vmem:[#allocation35_spill] sm:$0xff] }
 0x56c   : > { %2373 = vmatprep.subr.mxu0 %v8341_v27  ;;  %2444 = vmatprep.subr.mxu1 %v8342_v49  ;;  %v1811_v8 = vadd.f32 %v8349_v12, %v8348_v9  ;;  %v8350_v27 = vld [vmem:[#allocation36_spill] sm:$0xff]  ;;  %v8353_v12 = vld [vmem:[#allocation47_spill] sm:$0xff] }
 0x56d   : > { %2374 = vmatpush1.msra.mxu0 %v8343_v7  ;;  %2407 = vmatprep.mubr.f32.mxu0 %v8344_v1  ;;  %v1813_v37 = vadd.f32 %v8350_v27, %v6652_v22  ;;  %v1902_v9 = vadd.f32 %v8353_v12, %v6665_v20 }
 0x56e   : > { %2445 = vmatpush1.msra.mxu1 %v8345_v2  ;;  %2478 = vmatprep.mubr.f32.mxu1 %v8344_v1 }
 0x56f   : > { %2513 = vmatprep.subr.mxu0 %v8346_v51  ;;  %2584 = vmatprep.subr.mxu1 %v8347_v0 }
 0x60e   : > { %v2239_v30 = vpop.f32.mrf.mxu0  ;;  %v2310_v53 = vpop.f32.mrf.mxu1 }
 0x60f   : > { %v2315_v49 = vadd.f32 %v2239_v30, %v1811_v8  ;;  %v2317_v1 = vadd.f32 %v2310_v53, %v1900_v24 }
 0x610   : > { %v2241_v7 = vpop.f32.mrf.mxu0  ;;  %v2312_v0 = vpop.f32.mrf.mxu1 }
 0x611   : > { %v2319_v2 = vmul.f32 0.5, %v2315_v49  ;;  %v2316_v47 = vadd.f32 %v2241_v7, %v1813_v37  ;;  %v2318_v11 = vadd.f32 %v2312_v0, %v1902_v9 }
 0x613   : > { %5242 = vtanh.f32 %v2319_v2  ;;  %v2323_v51 = vmul.f32 0.5, %v2316_v47  ;;  %v2328_v3 = vmul.f32 0.5, %v2318_v11 }
 0x615   : > { %5244 = vtanh.f32 %v2323_v51 }
 0x616   : > { %5246 = vtanh.f32 %v2317_v1 }
 0x617   : > { %5248 = vtanh.f32 %v2328_v3 }
 0x620   : > { %v5243_v27 = vpop.eup %5242 }
 0x621   : > { %v2321_v8 = vmul.f32 0.5, %v5243_v27 }
 0x622   : > { %v5245_v30 = vpop.eup %5244 }
 0x623   : > { %v2322_v22 = vadd.f32 0.5, %v2321_v8  ;;  %v2325_v63 = vmul.f32 0.5, %v5245_v30  ;;  %v5247_v10 = vpop.eup %5246 }
 0x624   : > { %v5249_v53 = vpop.eup %5248 }
 0x625   : > { %v2326_v49 = vadd.f32 0.5, %v2325_v63  ;;  %v2333_v7 = vmul.f32 %v5247_v10, %v2322_v22  ;;  %v2330_v37 = vmul.f32 0.5, %v5249_v53  ;;  %v8381_v63 = vld [vmem:[#allocation59_spill] sm:$0xff] }
 0x626   : > { %v1908_v22 = vadd.f32 %v8381_v63, %v6665_v20  ;;  %v2708_v63 = vld [vmem:[#allocation12 + $0xb8] sm:$0xff] }
 0x627   : > { %v2332_v24 = vmul.f32 %v2326_v49, %v6668_v57  ;;  %v2331_v1 = vadd.f32 0.5, %v2330_v37 }
 0x629   : > { %v6750_v47 = vadd.f32 %v2333_v7, %v2332_v24 }
 0x62b   : > { %5250 = vtanh.f32 %v6750_v47 }
 0x638   : > { %v5251_v2 = vpop.eup %5250 }
 0x639   : > { %v6753_v11 = vmul.f32 %v5251_v2, %v2331_v1 }
 0x63b   : > { %2408 = vmatmul.mubr.f32.vlgmr.msra.gmra.mxu0 %v6753_v11  ;;  %2479 = vmatmul.mubr.f32.vlgmr.msra.gmra.mxu1 %v6753_v11 }
 0x63c   : > { %2514 = vmatpush1.msra.mxu0 %v6364_v17  ;;  %2585 = vmatpush1.msra.mxu1 %v6366_v13  ;;  %v8354_v17 = vld [vmem:[#allocation37_spill] sm:$0xff]  ;;  %v8355_v13 = vld [vmem:[#allocation27_spill] sm:$0xff] }
 0x63d   : > { %2515 = vmatprep.subr.mxu0 %v6370_v59  ;;  %2586 = vmatprep.subr.mxu1 %v6372_v43  ;;  %v8356_v59 = vld [vmem:[#allocation23_spill] sm:$0xff]  ;;  %v8357_v43 = vld [vmem:[#allocation26_spill] sm:$0xff] }
 0x63e   : > { %2516 = vmatpush1.msra.mxu0 %v6376_v39  ;;  %2587 = vmatpush1.msra.mxu1 %v6378_v45  ;;  %v8358_v39 = vld [vmem:[#allocation50_spill] sm:$0xff]  ;;  %v8359_v45 = vld [vmem:[#allocation51_spill] sm:$0xff] }
 0x63f   : > { %2517 = vmatprep.subr.mxu0 %v6382_v55  ;;  %2588 = vmatprep.subr.mxu1 %v6384_v41  ;;  %v8360_v55 = vld [vmem:[#allocation38_spill] sm:$0xff]  ;;  %v8361_v41 = vld [vmem:[#allocation28_spill] sm:$0xff] }
 0x640   : > { %2518 = vmatpush1.msra.mxu0 %v6388_v4  ;;  %2589 = vmatpush1.msra.mxu1 %v6390_v6  ;;  %v8362_v4 = vld [vmem:[#allocation39_spill] sm:$0xff]  ;;  %v8363_v6 = vld [vmem:[#allocation29_spill] sm:$0xff] }
 0x641   : > { %2519 = vmatprep.subr.mxu0 %v6394_v14  ;;  %2590 = vmatprep.subr.mxu1 %v6396_v15  ;;  %v8364_v14 = vld [vmem:[#allocation40_spill] sm:$0xff]  ;;  %v8365_v15 = vld [vmem:[#allocation30_spill] sm:$0xff] }
 0x642   : > { %2520 = vmatpush1.msra.mxu0 %v6400_v16  ;;  %2591 = vmatpush1.msra.mxu1 %v6402_v18  ;;  %v8366_v16 = vld [vmem:[#allocation41_spill] sm:$0xff]  ;;  %v8367_v18 = vld [vmem:[#allocation31_spill] sm:$0xff] }
 0x643   : > { %2521 = vmatprep.subr.mxu0 %v6406_v19  ;;  %2592 = vmatprep.subr.mxu1 %v6408_v21  ;;  %v8368_v19 = vld [vmem:[#allocation42_spill] sm:$0xff]  ;;  %v8369_v21 = vld [vmem:[#allocation32_spill] sm:$0xff] }
 0x644   : > { %2522 = vmatpush1.msra.mxu0 %v6412_v23  ;;  %2593 = vmatpush1.msra.mxu1 %v6414_v25  ;;  %v8370_v23 = vld [vmem:[#allocation43_spill] sm:$0xff]  ;;  %v8371_v25 = vld [vmem:[#allocation33_spill] sm:$0xff] }
 0x645   : > { %2523 = vmatprep.subr.mxu0 %v6418_v26  ;;  %2594 = vmatprep.subr.mxu1 %v6420_v28  ;;  %v8372_v26 = vld [vmem:[#allocation44_spill] sm:$0xff]  ;;  %v8373_v28 = vld [vmem:[#allocation34_spill] sm:$0xff] }
 0x646   : > { %2524 = vmatpush1.msra.mxu0 %v6424_v29  ;;  %2595 = vmatpush1.msra.mxu1 %v6426_v31  ;;  %v8374_v29 = vld [vmem:[#allocation45_spill] sm:$0xff]  ;;  %v8375_v31 = vmov 0.0  }
 0x647   : > { %2525 = vmatprep.subr.mxu0 %v6428_v32  ;;  %2596 = vmatprep.subr.mxu1 %v6432_v33  ;;  %v2746_v32 = vld [vmem:[#allocation12 + $0x1e8] sm:$0xff]  ;;  %v2748_v33 = vld [vmem:[#allocation12 + $0x1f8] sm:$0xff] }
 0x648   : > { %2526 = vmatpush1.msra.mxu0 %v6434_v34  ;;  %2597 = vmatpush1.msra.mxu1 %v6436_v35  ;;  %v8376_v34 = vld [vmem:[#allocation62_spill] sm:$0xff]  ;;  %v8377_v35 = vld [vmem:[#allocation52_spill] sm:$0xff] }
 0x649   : > { %2527 = vmatprep.subr.mxu0 %v6442_v36  ;;  %2598 = vmatprep.subr.mxu1 %v6444_v38  ;;  %v1817_v36 = vadd.f32 %v8377_v35, %v8376_v34  ;;  %v2721_v35 = vld [vmem:[#allocation12 + $0x120] sm:$0xff] }
 0x64a   : > { %2528 = vmatpush1.msra.mxu0 %v6448_v40  ;;  %2599 = vmatpush1.msra.mxu1 %v6450_v42  ;;  %v8378_v40 = vld [vmem:[#allocation60_spill] sm:$0xff]  ;;  %v8379_v42 = vld [vmem:[#allocation58_spill] sm:$0xff] }
 0x64b   : > { %2529 = vmatprep.subr.mxu0 %v6454_v44  ;;  %2600 = vmatprep.subr.mxu1 %v6456_v46  ;;  %v1819_v44 = vadd.f32 %v8379_v42, %v8378_v40  ;;  %v2720_v42 = vld [vmem:[#allocation12 + $0x118] sm:$0xff] }
 0x64c   : > { %2530 = vmatpush1.msra.mxu0 %v6460_v48  ;;  %2601 = vmatpush1.msra.mxu1 %v6462_v50 }
 0x64d   : > { %2531 = vmatprep.subr.mxu0 %v6466_v52  ;;  %2602 = vmatprep.subr.mxu1 %v6468_v54  ;;  %v8380_v52 = vld [vmem:[#allocation53_spill] sm:$0xff] }
 0x64e   : > { %2532 = vmatpush1.msra.mxu0 %v6472_v56  ;;  %2603 = vmatpush1.msra.mxu1 %v6474_v58  ;;  %v1906_v54 = vadd.f32 %v8380_v52, %v8351_v5  ;;  %v2713_v52 = vld [vmem:[#allocation12 + $0xe0] sm:$0xff] }
 0x64f   : > { %2533 = vmatprep.subr.mxu0 %v6478_v60  ;;  %2604 = vmatprep.subr.mxu1 %v6480_v61 }
 0x650   : > { %2534 = vmatpush1.msra.mxu0 %v6484_v62  ;;  %2605 = vmatpush1.msra.mxu1 %v8354_v17  ;;  %v2745_v17 = vld [vmem:[#allocation12 + $0x1e0] sm:$0xff] }
 0x651   : > { %2535 = vmatprep.subr.mxu0 %v8355_v13  ;;  %2606 = vmatprep.subr.mxu1 %v8356_v59  ;;  %v2747_v13 = vld [vmem:[#allocation12 + $0x1f0] sm:$0xff]  ;;  %v2742_v59 = vld [vmem:[#allocation12 + $0x1c8] sm:$0xff] }
 0x652   : > { %2536 = vmatpush1.msra.mxu0 %v8357_v43  ;;  %2607 = vmatpush1.msra.mxu1 %v8358_v39  ;;  %v2744_v43 = vld [vmem:[#allocation12 + $0x1d8] sm:$0xff]  ;;  %v2741_v39 = vld [vmem:[#allocation12 + $0x1c0] sm:$0xff] }
 0x653   : > { %2537 = vmatprep.subr.mxu0 %v8359_v45  ;;  %2608 = vmatprep.subr.mxu1 %v8360_v55  ;;  %v2738_v45 = vld [vmem:[#allocation12 + $0x1a8] sm:$0xff]  ;;  %v2740_v55 = vld [vmem:[#allocation12 + $0x1b8] sm:$0xff] }
 0x654   : > { %2538 = vmatpush1.msra.mxu0 %v8361_v41  ;;  %2609 = vmatpush1.msra.mxu1 %v8362_v4  ;;  %v2737_v41 = vld [vmem:[#allocation12 + $0x1a0] sm:$0xff]  ;;  %v2739_v4 = vld [vmem:[#allocation12 + $0x1b0] sm:$0xff] }
 0x655   : > { %2539 = vmatprep.subr.mxu0 %v8363_v6  ;;  %2610 = vmatprep.subr.mxu1 %v8364_v14  ;;  %v2734_v6 = vld [vmem:[#allocation12 + $0x188] sm:$0xff]  ;;  %v2736_v14 = vld [vmem:[#allocation12 + $0x198] sm:$0xff] }
 0x656   : > { %2540 = vmatpush1.msra.mxu0 %v8365_v15  ;;  %2611 = vmatpush1.msra.mxu1 %v8366_v16  ;;  %v2733_v15 = vld [vmem:[#allocation12 + $0x180] sm:$0xff]  ;;  %v2735_v16 = vld [vmem:[#allocation12 + $0x190] sm:$0xff] }
 0x657   : > { %2541 = vmatprep.subr.mxu0 %v8367_v18  ;;  %2612 = vmatprep.subr.mxu1 %v8368_v19  ;;  %v2730_v18 = vld [vmem:[#allocation12 + $0x168] sm:$0xff]  ;;  %v2732_v19 = vld [vmem:[#allocation12 + $0x178] sm:$0xff] }
 0x658   : > { %2542 = vmatpush1.msra.mxu0 %v8369_v21  ;;  %2613 = vmatpush1.msra.mxu1 %v8370_v23  ;;  %v2729_v21 = vld [vmem:[#allocation12 + $0x160] sm:$0xff]  ;;  %v2731_v23 = vld [vmem:[#allocation12 + $0x170] sm:$0xff] }
 0x659   : > { %2543 = vmatprep.subr.mxu0 %v8371_v25  ;;  %2614 = vmatprep.subr.mxu1 %v8372_v26  ;;  %v2726_v25 = vld [vmem:[#allocation12 + $0x148] sm:$0xff]  ;;  %v2728_v26 = vld [vmem:[#allocation12 + $0x158] sm:$0xff] }
 0x65a   : > { %2544 = vmatpush1.msra.mxu0 %v8373_v28  ;;  %2615 = vmatpush1.msra.mxu1 %v8374_v29  ;;  %v2725_v28 = vld [vmem:[#allocation12 + $0x140] sm:$0xff]  ;;  %v2727_v29 = vld [vmem:[#allocation12 + $0x150] sm:$0xff] }
 0x65b   : > { %2577 = vmatprep.mubr.f32.mxu0 %v8375_v31  ;;  %2648 = vmatprep.mubr.f32.mxu1 %v8375_v31 }
 0x65c   : > { %2771 = vmatprep.subr.mxu0 %v2746_v32  ;;  %2860 = vmatprep.subr.mxu1 %v2748_v33  ;;  %v2722_v32 = vld [vmem:[#allocation12 + $0x128] sm:$0xff]  ;;  %v2724_v33 = vld [vmem:[#allocation12 + $0x138] sm:$0xff] }
 0x6fb   : > { %v2409_v38 = vpop.f32.mrf.mxu0  ;;  %v2480_v48 = vpop.f32.mrf.mxu1 }
 0x6fc   : > { %v2485_v46 = vadd.f32 %v2409_v38, %v1817_v36  ;;  %v2487_v60 = vadd.f32 %v2480_v48, %v1906_v54  ;;  %v2723_v36 = vld [vmem:[#allocation12 + $0x130] sm:$0xff]  ;;  %v2718_v38 = vld [vmem:[#allocation12 + $0x108] sm:$0xff] }
 0x6fd   : > { %v2411_v50 = vpop.f32.mrf.mxu0  ;;  %v2482_v62 = vpop.f32.mrf.mxu1  ;;  %v2714_v48 = vld [vmem:[#allocation12 + $0xe8] sm:$0xff]  ;;  %v2715_v54 = vld [vmem:[#allocation12 + $0xf0] sm:$0xff] }
 0x6fe   : > { %v2489_v56 = vmul.f32 0.5, %v2485_v46  ;;  %v2486_v58 = vadd.f32 %v2411_v50, %v1819_v44  ;;  %v2488_v57 = vadd.f32 %v2482_v62, %v1908_v22  ;;  %v2717_v44 = vld [vmem:[#allocation12 + $0x100] sm:$0xff]  ;;  %v2719_v46 = vld [vmem:[#allocation12 + $0x110] sm:$0xff]  ;;  %v2716_v50 = vld [vmem:[#allocation12 + $0xf8] sm:$0xff] }
 0x6ff   : > { %v2706_v62 = vld [vmem:[#allocation12 + $0xa8] sm:$0xff]  ;;  %v2705_v22 = vld [vmem:[#allocation12 + $0xa0] sm:$0xff] }
 0x700   : > { %5252 = vtanh.f32 %v2489_v56  ;;  %v2493_v61 = vmul.f32 0.5, %v2486_v58  ;;  %v2498_v3 = vmul.f32 0.5, %v2488_v57  ;;  %v2710_v56 = vld [vmem:[#allocation12 + $0xc8] sm:$0xff]  ;;  %v2712_v58 = vld [vmem:[#allocation12 + $0xd8] sm:$0xff]  ;;  %v2707_v57 = vld [vmem:[#allocation12 + $0xb0] sm:$0xff] }
 0x702   : > { %5254 = vtanh.f32 %v2493_v61  ;;  %v2711_v61 = vld [vmem:[#allocation12 + $0xd0] sm:$0xff] }
 0x703   : > { %5256 = vtanh.f32 %v2487_v60  ;;  %v2709_v60 = vld [vmem:[#allocation12 + $0xc0] sm:$0xff] }
 0x704   : > { %5258 = vtanh.f32 %v2498_v3  ;;  %v2702_v3 = vld [vmem:[#allocation12 + $0x88] sm:$0xff] }
 0x70d   : > { %v5253_v9 = vpop.eup %5252 }
 0x70e   : > { %v2491_v51 = vmul.f32 0.5, %v5253_v9  ;;  %v2704_v9 = vld [vmem:[#allocation12 + $0x98] sm:$0xff] }
 0x70f   : > { %v5255_v0 = vpop.eup %5254 }
 0x710   : > { %v2492_v12 = vadd.f32 0.5, %v2491_v51  ;;  %v2495_v27 = vmul.f32 0.5, %v5255_v0  ;;  %v5257_v8 = vpop.eup %5256  ;;  %v2701_v51 = vld [vmem:[#allocation12 + $0x80] sm:$0xff]  ;;  %v2703_v0 = vld [vmem:[#allocation12 + $0x90] sm:$0xff] }
 0x711   : > { %v5259_v24 = vpop.eup %5258 }
 0x712   : > { %v2496_v30 = vadd.f32 0.5, %v2495_v27  ;;  %v2503_v10 = vmul.f32 %v5257_v8, %v2492_v12  ;;  %v2500_v53 = vmul.f32 0.5, %v5259_v24  ;;  %v2698_v12 = vld [vmem:[#allocation12 + $0x68] sm:$0xff]  ;;  %v2700_v27 = vld [vmem:[#allocation12 + $0x78] sm:$0xff]  ;;  %v2697_v8 = vld [vmem:[#allocation12 + $0x60] sm:$0xff] }
 0x713   : > { %v2693_v24 = vld [vmem:[#allocation12 + $0x40] sm:$0xff] }
 0x714   : > { %v2502_v49 = vmul.f32 %v2496_v30, %v6750_v47  ;;  %v2501_v37 = vadd.f32 0.5, %v2500_v53  ;;  %v2743_v47 = vld [vmem:[#allocation12 + $0x1d0] sm:$0xff] }
 0x715   : > { %v2699_v30 = vld [vmem:[#allocation12 + $0x70] sm:$0xff] }
 0x716   : > { %v6830_v7 = vadd.f32 %v2503_v10, %v2502_v49  ;;  %v2694_v10 = vld [vmem:[#allocation12 + $0x48] sm:$0xff]  ;;  %v2696_v49 = vld [vmem:[#allocation12 + $0x58] sm:$0xff]  ;;  %v2695_v53 = vld [vmem:[#allocation12 + $0x50] sm:$0xff] }
 0x718   : > { %5260 = vtanh.f32 %v6830_v7 }
 0x725   : > { %v5261_v1 = vpop.eup %5260 }
 0x726   : > { %v6833_v2 = vmul.f32 %v5261_v1, %v2501_v37  ;;  %v2690_v37 = vld [vmem:[#allocation12 + $0x28] sm:$0xff]  ;;  %v2692_v1 = vld [vmem:[#allocation12 + $0x38] sm:$0xff] }
 0x728   : > { %2578 = vmatmul.mubr.f32.vlgmr.msra.gmra.mxu0 %v6833_v2  ;;  %2649 = vmatmul.mubr.f32.vlgmr.msra.gmra.mxu1 %v6833_v2 }
 0x729   : > { %2772 = vmatpush1.msra.mxu0 %v2745_v17  ;;  %2861 = vmatpush1.msra.mxu1 %v2747_v13  ;;  %v2689_v17 = vld [vmem:[#allocation12 + $0x20] sm:$0xff]  ;;  %v2691_v13 = vld [vmem:[#allocation12 + $0x30] sm:$0xff] }
 0x72a   : > { %2773 = vmatprep.subr.mxu0 %v2742_v59  ;;  %2862 = vmatprep.subr.mxu1 %v2744_v43  ;;  %v2686_v59 = vld [vmem:[#allocation12 + $0x8] sm:$0xff]  ;;  %v2688_v43 = vld [vmem:[#allocation12 + $0x18] sm:$0xff] }
 0x72b   : > { %2774 = vmatpush1.msra.mxu0 %v2741_v39  ;;  %2863 = vmatpush1.msra.mxu1 %v2743_v47  ;;  %v2685_v39 = vld [vmem:[#allocation12] sm:$0xff]  ;;  %v2687_v47 = vld [vmem:[#allocation12 + $0x10] sm:$0xff] }
 0x72c   : > { %2775 = vmatprep.subr.mxu0 %v2738_v45  ;;  %2864 = vmatprep.subr.mxu1 %v2740_v55  ;;  %v8382_v45 = vld [vmem:[#allocation65_spill] sm:$0xff]  ;;  %v6851_v55 = vld [vmem:[#allocation14 + $0x1e8] sm:$0xff] }
 0x72d   : > { %2776 = vmatpush1.msra.mxu0 %v2737_v41  ;;  %2865 = vmatpush1.msra.mxu1 %v2739_v4  ;;  %8383 = vst [vmem:[#allocation24_spill] sm:$0xff] %v6851_v55  ;;  %v6853_v41 = vld [vmem:[#allocation14 + $0x1f8] sm:$0xff]  ;;  %v6859_v4 = vld [vmem:[#allocation14 + $0x1f0] sm:$0xff] }
 0x72e   : > { %2777 = vmatprep.subr.mxu0 %v2734_v6  ;;  %2866 = vmatprep.subr.mxu1 %v2736_v14  ;;  %8384 = vst [vmem:[#allocation25_spill] sm:$0xff] %v6853_v41  ;;  %v6865_v6 = vld [vmem:[#allocation14 + $0x1d8] sm:$0xff]  ;;  %v6869_v14 = vld [vmem:[#allocation14 + $0x1c0] sm:$0xff] }
 0x72f   : > { %2778 = vmatpush1.msra.mxu0 %v2733_v15  ;;  %2867 = vmatpush1.msra.mxu1 %v2735_v16  ;;  %v6871_v15 = vld [vmem:[#allocation14 + $0x1d0] sm:$0xff]  ;;  %v6875_v16 = vld [vmem:[#allocation14 + $0x1a8] sm:$0xff] }
 0x730   : > { %2779 = vmatprep.subr.mxu0 %v2730_v18  ;;  %2868 = vmatprep.subr.mxu1 %v2732_v19  ;;  %v6877_v18 = vld [vmem:[#allocation14 + $0x1b8] sm:$0xff]  ;;  %v6881_v19 = vld [vmem:[#allocation14 + $0x1a0] sm:$0xff] }
 0x731   : > { %2780 = vmatpush1.msra.mxu0 %v2729_v21  ;;  %2869 = vmatpush1.msra.mxu1 %v2731_v23  ;;  %v6883_v21 = vld [vmem:[#allocation14 + $0x1b0] sm:$0xff]  ;;  %v6887_v23 = vld [vmem:[#allocation14 + $0x188] sm:$0xff] }
 0x732   : > { %2781 = vmatprep.subr.mxu0 %v2726_v25  ;;  %2870 = vmatprep.subr.mxu1 %v2728_v26  ;;  %v6889_v25 = vld [vmem:[#allocation14 + $0x198] sm:$0xff]  ;;  %v6893_v26 = vld [vmem:[#allocation14 + $0x180] sm:$0xff] }
 0x733   : > { %2782 = vmatpush1.msra.mxu0 %v2725_v28  ;;  %2871 = vmatpush1.msra.mxu1 %v2727_v29  ;;  %v6895_v28 = vld [vmem:[#allocation14 + $0x190] sm:$0xff]  ;;  %v6899_v29 = vld [vmem:[#allocation14 + $0x168] sm:$0xff] }
 0x734   : > { %2783 = vmatprep.subr.mxu0 %v2722_v32  ;;  %2872 = vmatprep.subr.mxu1 %v2724_v33  ;;  %v6901_v32 = vld [vmem:[#allocation14 + $0x178] sm:$0xff]  ;;  %v6905_v33 = vld [vmem:[#allocation14 + $0x160] sm:$0xff] }
 0x735   : > { %2784 = vmatpush1.msra.mxu0 %v2721_v35  ;;  %2873 = vmatpush1.msra.mxu1 %v2723_v36  ;;  %v6907_v35 = vld [vmem:[#allocation14 + $0x170] sm:$0xff]  ;;  %v6911_v36 = vld [vmem:[#allocation14 + $0x148] sm:$0xff] }
 0x736   : > { %2785 = vmatprep.subr.mxu0 %v2718_v38  ;;  %2874 = vmatprep.subr.mxu1 %v2720_v42  ;;  %v6913_v38 = vld [vmem:[#allocation14 + $0x158] sm:$0xff]  ;;  %v6917_v42 = vld [vmem:[#allocation14 + $0x140] sm:$0xff] }
 0x737   : > { %2786 = vmatpush1.msra.mxu0 %v2717_v44  ;;  %2875 = vmatpush1.msra.mxu1 %v2719_v46  ;;  %v6919_v44 = vld [vmem:[#allocation14 + $0x150] sm:$0xff]  ;;  %v6921_v46 = vld [vmem:[#allocation14 + $0x128] sm:$0xff] }
 0x738   : > { %2787 = vmatprep.subr.mxu0 %v2714_v48  ;;  %2876 = vmatprep.subr.mxu1 %v2716_v50  ;;  %v6925_v48 = vld [vmem:[#allocation14 + $0x138] sm:$0xff]  ;;  %v6927_v50 = vld [vmem:[#allocation14 + $0x120] sm:$0xff] }
 0x739   : > { %2788 = vmatpush1.msra.mxu0 %v2713_v52  ;;  %2877 = vmatpush1.msra.mxu1 %v2715_v54  ;;  %v6929_v52 = vld [vmem:[#allocation14 + $0x130] sm:$0xff]  ;;  %v6935_v54 = vld [vmem:[#allocation14 + $0x108] sm:$0xff] }
 0x73a   : > { %2789 = vmatprep.subr.mxu0 %v2710_v56  ;;  %2878 = vmatprep.subr.mxu1 %v2712_v58  ;;  %v6937_v56 = vld [vmem:[#allocation14 + $0x118] sm:$0xff]  ;;  %v6941_v58 = vld [vmem:[#allocation14 + $0x100] sm:$0xff] }
 0x73b   : > { %2790 = vmatpush1.msra.mxu0 %v2709_v60  ;;  %2879 = vmatpush1.msra.mxu1 %v2711_v61  ;;  %v6943_v60 = vld [vmem:[#allocation14 + $0x110] sm:$0xff]  ;;  %v6947_v61 = vld [vmem:[#allocation14 + $0xe8] sm:$0xff] }
 0x73c   : > { %2791 = vmatprep.subr.mxu0 %v2706_v62  ;;  %2880 = vmatprep.subr.mxu1 %v2708_v63  ;;  %v6949_v62 = vld [vmem:[#allocation14 + $0xf8] sm:$0xff]  ;;  %v6953_v63 = vld [vmem:[#allocation14 + $0xe0] sm:$0xff] }
 0x73d   : > { %2792 = vmatpush1.msra.mxu0 %v2705_v22  ;;  %2881 = vmatpush1.msra.mxu1 %v2707_v57  ;;  %v6955_v22 = vld [vmem:[#allocation14 + $0xf0] sm:$0xff]  ;;  %v6959_v57 = vld [vmem:[#allocation14 + $0xc8] sm:$0xff] }
 0x73e   : > { %2793 = vmatprep.subr.mxu0 %v2702_v3  ;;  %2882 = vmatprep.subr.mxu1 %v2704_v9  ;;  %v6961_v3 = vld [vmem:[#allocation14 + $0xd8] sm:$0xff]  ;;  %v6965_v9 = vld [vmem:[#allocation14 + $0xc0] sm:$0xff] }
 0x73f   : > { %2794 = vmatpush1.msra.mxu0 %v2701_v51  ;;  %2883 = vmatpush1.msra.mxu1 %v2703_v0  ;;  %v6967_v51 = vld [vmem:[#allocation14 + $0xd0] sm:$0xff]  ;;  %v6971_v0 = vld [vmem:[#allocation14 + $0xa8] sm:$0xff] }
 0x740   : > { %2795 = vmatprep.subr.mxu0 %v2698_v12  ;;  %2884 = vmatprep.subr.mxu1 %v2700_v27  ;;  %v6973_v12 = vld [vmem:[#allocation14 + $0xb8] sm:$0xff]  ;;  %v6977_v27 = vld [vmem:[#allocation14 + $0xa0] sm:$0xff] }
 0x741   : > { %2796 = vmatpush1.msra.mxu0 %v2697_v8  ;;  %2885 = vmatpush1.msra.mxu1 %v2699_v30  ;;  %8385 = vst [vmem:[#allocation35_spill] sm:$0xff] %v6977_v27  ;;  %v6979_v8 = vld [vmem:[#allocation14 + $0xb0] sm:$0xff]  ;;  %v6983_v30 = vld [vmem:[#allocation14 + $0x88] sm:$0xff] }
 0x742   : > { %2797 = vmatprep.subr.mxu0 %v2694_v10  ;;  %2886 = vmatprep.subr.mxu1 %v2696_v49  ;;  %8386 = vst [vmem:[#allocation36_spill] sm:$0xff] %v6979_v8  ;;  %8387 = vst [vmem:[#allocation64_spill] sm:$0xff] %v6983_v30  ;;  %v6985_v10 = vld [vmem:[#allocation14 + $0x98] sm:$0xff]  ;;  %v6989_v49 = vld [vmem:[#allocation14 + $0x80] sm:$0xff] }
 0x743   : > { %2798 = vmatpush1.msra.mxu0 %v2693_v24  ;;  %2887 = vmatpush1.msra.mxu1 %v2695_v53  ;;  %8388 = vst [vmem:[#allocation46_spill] sm:$0xff] %v6985_v10  ;;  %8389 = vst [vmem:[#allocation47_spill] sm:$0xff] %v6989_v49  ;;  %v6991_v24 = vld [vmem:[#allocation14 + $0x90] sm:$0xff]  ;;  %v6995_v53 = vld [vmem:[#allocation14 + $0x68] sm:$0xff] }
 0x744   : > { %2799 = vmatprep.subr.mxu0 %v2690_v37  ;;  %2888 = vmatprep.subr.mxu1 %v2692_v1  ;;  %8390 = vst [vmem:[#allocation37_spill] sm:$0xff] %v6991_v24  ;;  %8391 = vst [vmem:[#allocation27_spill] sm:$0xff] %v6995_v53  ;;  %v6997_v37 = vld [vmem:[#allocation14 + $0x78] sm:$0xff]  ;;  %v7001_v1 = vld [vmem:[#allocation14 + $0x60] sm:$0xff] }
 0x745   : > { %2800 = vmatpush1.msra.mxu0 %v2689_v17  ;;  %2889 = vmatpush1.msra.mxu1 %v2691_v13  ;;  %8392 = vst [vmem:[#allocation23_spill] sm:$0xff] %v6997_v37  ;;  %8393 = vst [vmem:[#allocation26_spill] sm:$0xff] %v7001_v1  ;;  %v7003_v17 = vld [vmem:[#allocation14 + $0x70] sm:$0xff]  ;;  %v7007_v13 = vld [vmem:[#allocation14 + $0x48] sm:$0xff] }
 0x746   : > { %2801 = vmatprep.subr.mxu0 %v2686_v59  ;;  %2890 = vmatprep.subr.mxu1 %v2688_v43  ;;  %8394 = vst [vmem:[#allocation50_spill] sm:$0xff] %v7003_v17  ;;  %8395 = vst [vmem:[#allocation51_spill] sm:$0xff] %v7007_v13  ;;  %v7009_v59 = vld [vmem:[#allocation14 + $0x58] sm:$0xff]  ;;  %v7011_v43 = vld [vmem:[#allocation14 + $0x40] sm:$0xff] }
 0x747   : > { %2802 = vmatpush1.msra.mxu0 %v2685_v39  ;;  %2835 = vmatprep.mubr.f32.mxu0 %v8375_v31  ;;  %8396 = vst [vmem:[#allocation38_spill] sm:$0xff] %v7009_v59  ;;  %8397 = vst [vmem:[#allocation28_spill] sm:$0xff] %v7011_v43  ;;  %v7015_v39 = vld [vmem:[#allocation14 + $0x50] sm:$0xff] }
 0x748   : > { %2891 = vmatpush1.msra.mxu1 %v2687_v47  ;;  %2924 = vmatprep.mubr.f32.mxu1 %v8375_v31  ;;  %8398 = vst [vmem:[#allocation39_spill] sm:$0xff] %v7015_v39  ;;  %v7017_v47 = vld [vmem:[#allocation14 + $0x28] sm:$0xff] }
 0x749   : > { %2836 = vmatmul.mubr.f32.vlgmr.msra.gmra.mxu0 %v8382_v45  ;;  %2925 = vmatmul.mubr.f32.vlgmr.msra.gmra.mxu1 %v8382_v45  ;;  %8399 = vst [vmem:[#allocation29_spill] sm:$0xff] %v7017_v47  ;;  %v7019_v45 = vld [vmem:[#allocation14 + $0x38] sm:$0xff] }
 0x74a   : > { %2841 = vmatprep.mubr.f32.mxu0 %v8375_v31  ;;  %2930 = vmatprep.mubr.f32.mxu1 %v8375_v31  ;;  %8400 = vst [vmem:[#allocation40_spill] sm:$0xff] %v7019_v45 }
 0x74b   : > { %3037 = vmatprep.subr.mxu0 %v6851_v55  ;;  %3108 = vmatprep.subr.mxu1 %v6853_v41 }
 0x74c   : > { %3109 = vmatpush1.msra.mxu1 %v6859_v4 }
 0x74d   : > { %2842 = vmatmul.mubr.f32.gmra.mxu0 %v6753_v11  ;;  %2931 = vmatmul.mubr.f32.gmra.mxu1 %v6753_v11  ;;  %v6857_v11 = vld [vmem:[#allocation14 + $0x1e0] sm:$0xff] }
 0x74e   : > { %2847 = vmatprep.mubr.f32.mxu0 %v8375_v31  ;;  %2936 = vmatprep.mubr.f32.mxu1 %v8375_v31 }
 0x74f   : > { %3038 = vmatpush1.msra.mxu0 %v6857_v11  ;;  %3110 = vmatprep.subr.mxu1 %v6865_v6 }
 0x750   : > { %3111 = vmatpush1.msra.mxu1 %v6871_v15 }
 0x751   : > { %2848 = vmatmul.mubr.f32.gmra.mxu0 %v6833_v2  ;;  %2937 = vmatmul.mubr.f32.gmra.mxu1 %v6833_v2  ;;  %v6863_v2 = vld [vmem:[#allocation14 + $0x1c8] sm:$0xff] }
 0x752   : > { %2853 = vmatprep.mubr.f32.mxu0 %v8375_v31  ;;  %2942 = vmatprep.mubr.f32.mxu1 %v8375_v31 }
 0x753   : > { %3039 = vmatprep.subr.mxu0 %v6863_v2  ;;  %3112 = vmatprep.subr.mxu1 %v6877_v18 }
 0x754   : > { %3040 = vmatpush1.msra.mxu0 %v6869_v14  ;;  %3113 = vmatpush1.msra.mxu1 %v6883_v21 }
 0x755   : > { %3041 = vmatprep.subr.mxu0 %v6875_v16  ;;  %3114 = vmatprep.subr.mxu1 %v6889_v25 }
 0x756   : > { %3042 = vmatpush1.msra.mxu0 %v6881_v19  ;;  %3115 = vmatpush1.msra.mxu1 %v6895_v28 }
 0x757   : > { %3043 = vmatprep.subr.mxu0 %v6887_v23  ;;  %3116 = vmatprep.subr.mxu1 %v6901_v32 }
 0x758   : > { %3044 = vmatpush1.msra.mxu0 %v6893_v26  ;;  %3117 = vmatpush1.msra.mxu1 %v6907_v35 }
 0x759   : > { %3045 = vmatprep.subr.mxu0 %v6899_v29  ;;  %3118 = vmatprep.subr.mxu1 %v6913_v38 }
 0x75a   : > { %3046 = vmatpush1.msra.mxu0 %v6905_v33  ;;  %3119 = vmatpush1.msra.mxu1 %v6919_v44 }
 0x75b   : > { %3047 = vmatprep.subr.mxu0 %v6911_v36  ;;  %3120 = vmatprep.subr.mxu1 %v6925_v48 }
 0x75c   : > { %3048 = vmatpush1.msra.mxu0 %v6917_v42  ;;  %3121 = vmatpush1.msra.mxu1 %v6929_v52 }
 0x75d   : > { %3049 = vmatprep.subr.mxu0 %v6921_v46  ;;  %3122 = vmatprep.subr.mxu1 %v6937_v56 }
 0x75e   : > { %3050 = vmatpush1.msra.mxu0 %v6927_v50  ;;  %3123 = vmatpush1.msra.mxu1 %v6943_v60 }
 0x75f   : > { %3051 = vmatprep.subr.mxu0 %v6935_v54  ;;  %3124 = vmatprep.subr.mxu1 %v6949_v62 }
 0x760   : > { %3052 = vmatpush1.msra.mxu0 %v6941_v58  ;;  %3125 = vmatpush1.msra.mxu1 %v6955_v22 }
 0x761   : > { %3053 = vmatprep.subr.mxu0 %v6947_v61  ;;  %3126 = vmatprep.subr.mxu1 %v6961_v3 }
 0x762   : > { %3054 = vmatpush1.msra.mxu0 %v6953_v63  ;;  %3127 = vmatpush1.msra.mxu1 %v6967_v51 }
 0x763   : > { %3055 = vmatprep.subr.mxu0 %v6959_v57  ;;  %3128 = vmatprep.subr.mxu1 %v6973_v12 }
 0x764   : > { %3056 = vmatpush1.msra.mxu0 %v6965_v9  ;;  %3129 = vmatpush1.msra.mxu1 %v6979_v8 }
 0x765   : > { %3057 = vmatprep.subr.mxu0 %v6971_v0  ;;  %3130 = vmatprep.subr.mxu1 %v6985_v10 }
 0x766   : > { %3058 = vmatpush1.msra.mxu0 %v6977_v27  ;;  %3131 = vmatpush1.msra.mxu1 %v6991_v24 }
 0x767   : > { %3059 = vmatprep.subr.mxu0 %v6983_v30  ;;  %3132 = vmatprep.subr.mxu1 %v6997_v37  ;;  %v7027_v37 = vld [vmem:[#allocation14 + $0x8] sm:$0xff] }
 0x768   : > { %3060 = vmatpush1.msra.mxu0 %v6989_v49  ;;  %3133 = vmatpush1.msra.mxu1 %v7003_v17  ;;  %v7023_v17 = vld [vmem:[#allocation14 + $0x20] sm:$0xff]  ;;  %8403 = vst [vmem:[#allocation31_spill] sm:$0xff] %v7027_v37 }
 0x769   : > { %3061 = vmatprep.subr.mxu0 %v6995_v53  ;;  %3134 = vmatprep.subr.mxu1 %v7009_v59  ;;  %8401 = vst [vmem:[#allocation30_spill] sm:$0xff] %v7023_v17  ;;  %v7031_v59 = vld [vmem:[#allocation14 + $0x18] sm:$0xff]  ;;  %v7035_v53 = vld [vmem:[#allocation14 + $0x10] sm:$0xff] }
 0x76a   : > { %3062 = vmatpush1.msra.mxu0 %v7001_v1  ;;  %3135 = vmatpush1.msra.mxu1 %v7015_v39  ;;  %v7025_v1 = vld [vmem:[#allocation14 + $0x30] sm:$0xff]  ;;  %8404 = vst [vmem:[#allocation42_spill] sm:$0xff] %v7031_v59  ;;  %8406 = vst [vmem:[#allocation43_spill] sm:$0xff] %v7035_v53 }
 0x76b   : > { %3063 = vmatprep.subr.mxu0 %v7007_v13  ;;  %8402 = vst [vmem:[#allocation41_spill] sm:$0xff] %v7025_v1  ;;  %3136 = vmatprep.subr.mxu1 %v7019_v45  ;;  %v7033_v13 = vld [vmem:[#allocation14] sm:$0xff]  ;;  %v8407_v45 = vld [vmem:[#allocation54_spill] sm:$0xff] }
 0x76c   : > { %3064 = vmatpush1.msra.mxu0 %v7011_v43  ;;  %8405 = vst [vmem:[#allocation32_spill] sm:$0xff] %v7033_v13  ;;  %3137 = vmatpush1.msra.mxu1 %v7025_v1 }
 0x76d   : > { %3065 = vmatprep.subr.mxu0 %v7017_v47  ;;  %3138 = vmatprep.subr.mxu1 %v7031_v59  ;;  %v1823_v47 = vadd.f32 %v8407_v45, %v8376_v34  ;;  %v8409_v59 = vld [vmem:[#allocation55_spill] sm:$0xff] }
 0x76e   : > { %3066 = vmatpush1.msra.mxu0 %v7023_v17  ;;  %3139 = vmatpush1.msra.mxu1 %v7035_v53  ;;  %v8408_v17 = vld [vmem:[#allocation61_spill] sm:$0xff]  ;;  %v1912_v49 = vadd.f32 %v8409_v59, %v8351_v5  ;;  %v8410_v34 = vld [vmem:[#allocation63_spill] sm:$0xff] }
 0x76f   : > { %3067 = vmatprep.subr.mxu0 %v7027_v37  ;;  %3277 = vmatprep.subr.mxu1 %v6853_v41  ;;  %v1825_v43 = vadd.f32 %v8408_v17, %v8378_v40  ;;  %v1914_v45 = vadd.f32 %v8410_v34, %v6665_v20  ;;  %v8415_v59 = vld [vmem:[#allocation47_spill] sm:$0xff] }
 0x770   : > { %3068 = vmatpush1.msra.mxu0 %v7033_v13  ;;  %v8417_v34 = vld [vmem:[#allocation27_spill] sm:$0xff] }
 0x771   : > { %3206 = vmatprep.subr.mxu0 %v6851_v55 }
 0x7e8   : > { %v2579_v39 = vpop.f32.mrf.mxu0  ;;  %v2650_v24 = vpop.f32.mrf.mxu1 }
 0x7e9   : > { %v2655_v1 = vadd.f32 %v2579_v39, %v1823_v47  ;;  %v2657_v53 = vadd.f32 %v2650_v24, %v1912_v49 }
 0x7ea   : > { %v2581_v37 = vpop.f32.mrf.mxu0  ;;  %v2652_v41 = vpop.f32.mrf.mxu1 }
 0x7eb   : > { %v2659_v13 = vmul.f32 0.5, %v2655_v1  ;;  %v2656_v10 = vadd.f32 %v2581_v37, %v1825_v43  ;;  %v2658_v30 = vadd.f32 %v2652_v41, %v1914_v45  ;;  %v8416_v43 = vld [vmem:[#allocation37_spill] sm:$0xff]  ;;  %v8418_v45 = vld [vmem:[#allocation23_spill] sm:$0xff] }
 0x7ed   : > { %5262 = vtanh.f32 %v2659_v13  ;;  %v2663_v55 = vmul.f32 0.5, %v2656_v10  ;;  %v2668_v8 = vmul.f32 0.5, %v2658_v30  ;;  %v8413_v30 = vld [vmem:[#allocation64_spill] sm:$0xff]  ;;  %v8414_v13 = vld [vmem:[#allocation46_spill] sm:$0xff] }
 0x7ef   : > { %5264 = vtanh.f32 %v2663_v55 }
 0x7f0   : > { %5266 = vtanh.f32 %v2657_v53 }
 0x7f1   : > { %5268 = vtanh.f32 %v2668_v8  ;;  %v3030_v8 = vld [vmem:[#allocation5 + $0x18] sm:$0xff] }
 0x7fa   : > { %v5263_v40 = vpop.eup %5262 }
 0x7fb   : > { %v2661_v17 = vmul.f32 0.5, %v5263_v40  ;;  %v8419_v40 = vld [vmem:[#allocation26_spill] sm:$0xff] }
 0x7fc   : > { %v5265_v39 = vpop.eup %5264 }
 0x7fd   : > { %v2662_v47 = vadd.f32 0.5, %v2661_v17  ;;  %v2665_v27 = vmul.f32 0.5, %v5265_v39  ;;  %v5267_v5 = vpop.eup %5266  ;;  %v8420_v17 = vld [vmem:[#allocation50_spill] sm:$0xff]  ;;  %v8421_v39 = vld [vmem:[#allocation51_spill] sm:$0xff] }
 0x7fe   : > { %v5269_v55 = vpop.eup %5268 }
 0x7ff   : > { %v2666_v1 = vadd.f32 0.5, %v2665_v27  ;;  %v2673_v37 = vmul.f32 %v5267_v5, %v2662_v47  ;;  %v2670_v24 = vmul.f32 0.5, %v5269_v55  ;;  %v8412_v27 = vld [vmem:[#allocation36_spill] sm:$0xff]  ;;  %v8422_v47 = vld [vmem:[#allocation38_spill] sm:$0xff]  ;;  %v8428_v55 = vld [vmem:[#allocation41_spill] sm:$0xff] }
 0x800   : > { %v8423_v5 = vld [vmem:[#allocation28_spill] sm:$0xff] }
 0x801   : > { %v2672_v49 = vmul.f32 %v2666_v1, %v6830_v7  ;;  %v2671_v53 = vadd.f32 0.5, %v2670_v24  ;;  %v8411_v7 = vld [vmem:[#allocation35_spill] sm:$0xff] }
 0x802   : > { %v8424_v1 = vld [vmem:[#allocation39_spill] sm:$0xff] }
 0x803   : > { %v2674_v10 = vadd.f32 %v2673_v37, %v2672_v49  ;;  %v8425_v37 = vld [vmem:[#allocation29_spill] sm:$0xff]  ;;  %v8426_v49 = vld [vmem:[#allocation40_spill] sm:$0xff]  ;;  %v8429_v24 = vld [vmem:[#allocation31_spill] sm:$0xff] }
 0x805   : > { %5270 = vtanh.f32 %v2674_v10  ;;  %2680 = vst [vmem:[#allocation6 + $0x18] sm:$0xff] %v2674_v10  ;;  %v8427_v10 = vld [vmem:[#allocation30_spill] sm:$0xff] }
 0x812   : > { %v5271_v20 = vpop.eup %5270 }
 0x813   : > { %v2676_v41 = vmul.f32 %v5271_v20, %v2671_v53  ;;  %v8430_v53 = vld [vmem:[#allocation42_spill] sm:$0xff]  ;;  %v8431_v20 = vld [vmem:[#allocation32_spill] sm:$0xff] }
 0x815   : > { %2679 = vst [vmem:[#allocation5] sm:$0xff] %v2676_v41  ;;  %2854 = vmatmul.mubr.f32.gmra.mxu0 %v2676_v41  ;;  %2943 = vmatmul.mubr.f32.gmra.mxu1 %v2676_v41  ;;  %v8432_v41 = vld [vmem:[#allocation43_spill] sm:$0xff] }
 0x816   : > { %3101 = vmatprep.mubr.f32.mxu0 %v8375_v31  ;;  %3172 = vmatprep.mubr.f32.mxu1 %v8375_v31 }
 0x819   : > { %3102 = vmatmul.mubr.f32.vlgmr.msra.gmra.mxu0 %v3030_v8  ;;  %3173 = vmatmul.mubr.f32.vlgmr.msra.gmra.mxu1 %v3030_v8  ;;  %v8433_v8 = vld [vmem:[#allocation24_spill] sm:$0xff] }
 0x81a   : > { %3207 = vmatpush1.msra.mxu0 %v6857_v11  ;;  %3278 = vmatpush1.msra.mxu1 %v6859_v4 }
 0x81b   : > { %3208 = vmatprep.subr.mxu0 %v6863_v2  ;;  %3279 = vmatprep.subr.mxu1 %v6865_v6 }
 0x81c   : > { %3209 = vmatpush1.msra.mxu0 %v6869_v14  ;;  %3280 = vmatpush1.msra.mxu1 %v6871_v15 }
 0x81d   : > { %3210 = vmatprep.subr.mxu0 %v6875_v16  ;;  %3281 = vmatprep.subr.mxu1 %v6877_v18 }
 0x81e   : > { %3211 = vmatpush1.msra.mxu0 %v6881_v19  ;;  %3282 = vmatpush1.msra.mxu1 %v6883_v21 }
 0x81f   : > { %3212 = vmatprep.subr.mxu0 %v6887_v23  ;;  %3283 = vmatprep.subr.mxu1 %v6889_v25 }
 0x820   : > { %3213 = vmatpush1.msra.mxu0 %v6893_v26  ;;  %3284 = vmatpush1.msra.mxu1 %v6895_v28 }
 0x821   : > { %3214 = vmatprep.subr.mxu0 %v6899_v29  ;;  %3285 = vmatprep.subr.mxu1 %v6901_v32 }
 0x822   : > { %3215 = vmatpush1.msra.mxu0 %v6905_v33  ;;  %3286 = vmatpush1.msra.mxu1 %v6907_v35 }
 0x823   : > { %3216 = vmatprep.subr.mxu0 %v6911_v36  ;;  %3287 = vmatprep.subr.mxu1 %v6913_v38 }
 0x824   : > { %3217 = vmatpush1.msra.mxu0 %v6917_v42  ;;  %3288 = vmatpush1.msra.mxu1 %v6919_v44 }
 0x825   : > { %3218 = vmatprep.subr.mxu0 %v6921_v46  ;;  %3289 = vmatprep.subr.mxu1 %v6925_v48 }
 0x826   : > { %3219 = vmatpush1.msra.mxu0 %v6927_v50  ;;  %3290 = vmatpush1.msra.mxu1 %v6929_v52 }
 0x827   : > { %3220 = vmatprep.subr.mxu0 %v6935_v54  ;;  %3291 = vmatprep.subr.mxu1 %v6937_v56 }
 0x828   : > { %3221 = vmatpush1.msra.mxu0 %v6941_v58  ;;  %3292 = vmatpush1.msra.mxu1 %v6943_v60 }
 0x829   : > { %3222 = vmatprep.subr.mxu0 %v6947_v61  ;;  %3293 = vmatprep.subr.mxu1 %v6949_v62 }
 0x82a   : > { %3223 = vmatpush1.msra.mxu0 %v6953_v63  ;;  %3294 = vmatpush1.msra.mxu1 %v6955_v22 }
 0x82b   : > { %3224 = vmatprep.subr.mxu0 %v6959_v57  ;;  %3295 = vmatprep.subr.mxu1 %v6961_v3 }
 0x82c   : > { %3225 = vmatpush1.msra.mxu0 %v6965_v9  ;;  %3296 = vmatpush1.msra.mxu1 %v6967_v51 }
 0x82d   : > { %3226 = vmatprep.subr.mxu0 %v6971_v0  ;;  %3297 = vmatprep.subr.mxu1 %v6973_v12 }
 0x82e   : > { %3227 = vmatpush1.msra.mxu0 %v8411_v7  ;;  %3298 = vmatpush1.msra.mxu1 %v8412_v27 }
 0x82f   : > { %3228 = vmatprep.subr.mxu0 %v8413_v30  ;;  %3299 = vmatprep.subr.mxu1 %v8414_v13 }
 0x830   : > { %3229 = vmatpush1.msra.mxu0 %v8415_v59  ;;  %3300 = vmatpush1.msra.mxu1 %v8416_v43 }
 0x831   : > { %3230 = vmatprep.subr.mxu0 %v8417_v34  ;;  %3301 = vmatprep.subr.mxu1 %v8418_v45 }
 0x832   : > { %3231 = vmatpush1.msra.mxu0 %v8419_v40  ;;  %3302 = vmatpush1.msra.mxu1 %v8420_v17 }
 0x833   : > { %3232 = vmatprep.subr.mxu0 %v8421_v39  ;;  %3303 = vmatprep.subr.mxu1 %v8422_v47  ;;  %v8443_v39 = vld [vmem:[#allocation48_spill] sm:$0xff] }
 0x834   : > { %3233 = vmatpush1.msra.mxu0 %v8423_v5  ;;  %3304 = vmatpush1.msra.mxu1 %v8424_v1 }
 0x835   : > { %3234 = vmatprep.subr.mxu0 %v8425_v37  ;;  %3305 = vmatprep.subr.mxu1 %v8426_v49  ;;  %v8434_v37 = vld [vmem:[#allocation25_spill] sm:$0xff]  ;;  %v2837_v49 = vpop.f32.mrf.mxu0 }
 0x836   : > { %3235 = vmatpush1.msra.mxu0 %v8427_v10  ;;  %3306 = vmatpush1.msra.mxu1 %v8428_v55  ;;  %v2926_v10 = vpop.f32.mrf.mxu1 }
 0x837   : > { %3236 = vmatprep.subr.mxu0 %v8429_v24  ;;  %3307 = vmatprep.subr.mxu1 %v8430_v53  ;;  %v2839_v1 = vpop.f32.mrf.mxu0 }
 0x838   : > { %3237 = vmatpush1.msra.mxu0 %v8431_v20  ;;  %3270 = vmatprep.mubr.f32.mxu0 %v8375_v31  ;;  %v2928_v55 = vpop.f32.mrf.mxu1 }
 0x839   : > { %3308 = vmatpush1.msra.mxu1 %v8432_v41  ;;  %3341 = vmatprep.mubr.f32.mxu1 %v8375_v31  ;;  %v7122_v5 = vpop.f32.mrf.mxu0 }
 0x83a   : > { %3375 = vmatprep.subr.mxu0 %v8433_v8  ;;  %3446 = vmatprep.subr.mxu1 %v8434_v37  ;;  %8435 = vst [vmem:[#allocation33_spill] sm:$0xff] %v7122_v5  ;;  %v7124_v24 = vpop.f32.mrf.mxu1  ;;  %v2749_v37 = vld [vmem:[%s7911_s9] sm:$0xf] }
 0x83b   : > { %8436 = vst [vmem:[#allocation44_spill] sm:$0xff] %v7124_v24  ;;  %v7126_v53 = vpop.f32.mrf.mxu0  ;;  %v7142_v5 = vrot.slane %v2749_v37, %v8443_v39 }
 0x83c   : > { %8437 = vst [vmem:[#allocation34_spill] sm:$0xff] %v7126_v53  ;;  %v7128_v20 = vpop.f32.mrf.mxu1 }
 0x83d   : > { %8438 = vst [vmem:[#allocation45_spill] sm:$0xff] %v7128_v20  ;;  %v7130_v47 = vpop.f32.mrf.mxu0  ;;  %8444 = vst [vmem:[#allocation53_spill] sm:$0xff] %v7142_v5  ;;  %v8447_v20 = vld [vmem:[#allocation49_spill] sm:$0xff] }
 0x83e   : > { %8439 = vst [vmem:[#allocation62_spill] sm:$0xff] %v7130_v47  ;;  %v7132_v41 = vpop.f32.mrf.mxu1  ;;  %v7149_v17 = vrot.slane %v2749_v37, %v8447_v20 }
 0x83f   : > { %8440 = vst [vmem:[#allocation52_spill] sm:$0xff] %v7132_v41  ;;  %v7137_v8 = vpop.f32.mrf.mxu0  ;;  %v2838_v41 = vadd.f32 %v2837_v49, %v7142_v5 }
 0x840   : > { %8441 = vst [vmem:[#allocation60_spill] sm:$0xff] %v7137_v8  ;;  %v7139_v31 = vpop.f32.mrf.mxu1  ;;  %8448 = vst [vmem:[#allocation54_spill] sm:$0xff] %v7149_v17  ;;  %v8451_v8 = vld [vmem:[#allocation56_spill] sm:$0xff]  ;;  %v2840_v39 = vadd.f32 %v2839_v1, %v7149_v17 }
 0x841   : > { %8442 = vst [vmem:[#allocation58_spill] sm:$0xff] %v7139_v31  ;;  %v7157_v34 = vrot.slane %v2749_v37, %v8451_v8 }
 0x843   : > { %8452 = vst [vmem:[#allocation63_spill] sm:$0xff] %v7157_v34  ;;  %v2927_v20 = vadd.f32 %v2926_v10, %v7157_v34  ;;  %v3032_v10 = vld [vmem:[#allocation6 + $0x8] sm:$0xff] }
 0x8d5   : > { %v7144_v24 = vpop.f32.mrf.mxu0  ;;  %v7146_v53 = vpop.f32.mrf.mxu1 }
 0x8d6   : > { %8445 = vst [vmem:[#allocation59_spill] sm:$0xff] %v7144_v24  ;;  %8446 = vst [vmem:[#allocation65_spill] sm:$0xff] %v7146_v53 }
 0x8d7   : > { %v7151_v47 = vpop.f32.mrf.mxu0  ;;  %v7154_v40 = vpop.f32.mrf.mxu1 }
 0x8d8   : > { %8449 = vst [vmem:[#allocation61_spill] sm:$0xff] %v7151_v47  ;;  %8450 = vst [vmem:[#allocation55_spill] sm:$0xff] %v7154_v40  ;;  %v8453_v47 = vld [vmem:[#allocation57_spill] sm:$0xff] }
 0x8d9   : > { %v3103_v45 = vpop.f32.mrf.mxu0  ;;  %v3174_v53 = vpop.f32.mrf.mxu1  ;;  %v7162_v30 = vrot.slane %v2749_v37, %v8453_v47 }
 0x8da   : > { %v3179_v31 = vadd.f32 %v3103_v45, %v2838_v41  ;;  %v3181_v49 = vadd.f32 %v3174_v53, %v2927_v20  ;;  %v8456_v20 = vld [vmem:[#allocation46_spill] sm:$0xff] }
 0x8db   : > { %v3105_v43 = vpop.f32.mrf.mxu0  ;;  %v3176_v40 = vpop.f32.mrf.mxu1  ;;  %v2929_v8 = vadd.f32 %v2928_v55, %v7162_v30 }
 0x8dc   : > { %v3183_v24 = vmul.f32 0.5, %v3179_v31  ;;  %v3180_v59 = vadd.f32 %v3105_v43, %v2840_v39 }
 0x8dd   : > { %v3182_v5 = vadd.f32 %v3176_v40, %v2929_v8  ;;  %v8457_v8 = vld [vmem:[#allocation47_spill] sm:$0xff] }
 0x8de   : > { %5272 = vtanh.f32 %v3183_v24  ;;  %v3187_v13 = vmul.f32 0.5, %v3180_v59 }
 0x8df   : > { %v3192_v1 = vmul.f32 0.5, %v3182_v5 }
 0x8e0   : > { %5274 = vtanh.f32 %v3187_v13 }
 0x8e1   : > { %5276 = vtanh.f32 %v3181_v49  ;;  %v8458_v49 = vld [vmem:[#allocation37_spill] sm:$0xff] }
 0x8e2   : > { %5278 = vtanh.f32 %v3192_v1  ;;  %v8459_v1 = vld [vmem:[#allocation27_spill] sm:$0xff] }
 0x8eb   : > { %v5273_v45 = vpop.eup %5272 }
 0x8ec   : > { %v3185_v41 = vmul.f32 0.5, %v5273_v45  ;;  %v8460_v45 = vld [vmem:[#allocation23_spill] sm:$0xff] }
 0x8ed   : > { %v5275_v31 = vpop.eup %5274 }
 0x8ee   : > { %v3186_v43 = vadd.f32 0.5, %v3185_v41  ;;  %v3189_v39 = vmul.f32 0.5, %v5275_v31  ;;  %v5277_v59 = vpop.eup %5276  ;;  %v8461_v41 = vld [vmem:[#allocation26_spill] sm:$0xff] }
 0x8ef   : > { %v5279_v13 = vpop.eup %5278  ;;  %v8462_v31 = vld [vmem:[#allocation50_spill] sm:$0xff] }
 0x8f0   : > { %v3190_v24 = vadd.f32 0.5, %v3189_v39  ;;  %v3197_v37 = vmul.f32 %v5277_v59, %v3186_v43  ;;  %v3194_v55 = vmul.f32 0.5, %v5279_v13  ;;  %v8463_v43 = vld [vmem:[#allocation51_spill] sm:$0xff]  ;;  %v8464_v39 = vld [vmem:[#allocation38_spill] sm:$0xff]  ;;  %v8467_v59 = vld [vmem:[#allocation29_spill] sm:$0xff] }
 0x8f1   : > { %v8469_v13 = vld [vmem:[#allocation30_spill] sm:$0xff] }
 0x8f2   : > { %v3196_v34 = vmul.f32 %v3190_v24, %v3032_v10  ;;  %v3195_v53 = vadd.f32 0.5, %v3194_v55  ;;  %v8465_v10 = vld [vmem:[#allocation28_spill] sm:$0xff]  ;;  %v8466_v24 = vld [vmem:[#allocation39_spill] sm:$0xff]  ;;  %v8470_v55 = vld [vmem:[#allocation41_spill] sm:$0xff] }
 0x8f4   : > { %v7165_v47 = vadd.f32 %v3197_v37, %v3196_v34  ;;  %v8455_v34 = vld [vmem:[#allocation64_spill] sm:$0xff] }
 0x8f5   : > { %v8468_v37 = vld [vmem:[#allocation40_spill] sm:$0xff] }
 0x8f6   : > { %5280 = vtanh.f32 %v7165_v47 }
 0x903   : > { %v5281_v40 = vpop.eup %5280 }
 0x904   : > { %v7168_v5 = vmul.f32 %v5281_v40, %v3195_v53  ;;  %v8471_v53 = vld [vmem:[#allocation31_spill] sm:$0xff]  ;;  %v8472_v40 = vld [vmem:[#allocation42_spill] sm:$0xff] }
 0x906   : > { %8454 = vst [vmem:[#allocation35_spill] sm:$0xff] %v7168_v5  ;;  %3271 = vmatmul.mubr.f32.vlgmr.msra.gmra.mxu0 %v7168_v5  ;;  %3342 = vmatmul.mubr.f32.vlgmr.msra.gmra.mxu1 %v7168_v5  ;;  %v8473_v5 = vld [vmem:[#allocation32_spill] sm:$0xff] }
 0x907   : > { %3376 = vmatpush1.msra.mxu0 %v6857_v11  ;;  %3447 = vmatpush1.msra.mxu1 %v6859_v4 }
 0x908   : > { %3377 = vmatprep.subr.mxu0 %v6863_v2  ;;  %3448 = vmatprep.subr.mxu1 %v6865_v6 }
 0x909   : > { %3378 = vmatpush1.msra.mxu0 %v6869_v14  ;;  %3449 = vmatpush1.msra.mxu1 %v6871_v15 }
 0x90a   : > { %3379 = vmatprep.subr.mxu0 %v6875_v16  ;;  %3450 = vmatprep.subr.mxu1 %v6877_v18 }
 0x90b   : > { %3380 = vmatpush1.msra.mxu0 %v6881_v19  ;;  %3451 = vmatpush1.msra.mxu1 %v6883_v21 }
 0x90c   : > { %3381 = vmatprep.subr.mxu0 %v6887_v23  ;;  %3452 = vmatprep.subr.mxu1 %v6889_v25 }
 0x90d   : > { %3382 = vmatpush1.msra.mxu0 %v6893_v26  ;;  %3453 = vmatpush1.msra.mxu1 %v6895_v28 }
 0x90e   : > { %3383 = vmatprep.subr.mxu0 %v6899_v29  ;;  %3454 = vmatprep.subr.mxu1 %v6901_v32 }
 0x90f   : > { %3384 = vmatpush1.msra.mxu0 %v6905_v33  ;;  %3455 = vmatpush1.msra.mxu1 %v6907_v35 }
 0x910   : > { %3385 = vmatprep.subr.mxu0 %v6911_v36  ;;  %3456 = vmatprep.subr.mxu1 %v6913_v38 }
 0x911   : > { %3386 = vmatpush1.msra.mxu0 %v6917_v42  ;;  %3457 = vmatpush1.msra.mxu1 %v6919_v44 }
 0x912   : > { %3387 = vmatprep.subr.mxu0 %v6921_v46  ;;  %3458 = vmatprep.subr.mxu1 %v6925_v48 }
 0x913   : > { %3388 = vmatpush1.msra.mxu0 %v6927_v50  ;;  %3459 = vmatpush1.msra.mxu1 %v6929_v52 }
 0x914   : > { %3389 = vmatprep.subr.mxu0 %v6935_v54  ;;  %3460 = vmatprep.subr.mxu1 %v6937_v56 }
 0x915   : > { %3390 = vmatpush1.msra.mxu0 %v6941_v58  ;;  %3461 = vmatpush1.msra.mxu1 %v6943_v60 }
 0x916   : > { %3391 = vmatprep.subr.mxu0 %v6947_v61  ;;  %3462 = vmatprep.subr.mxu1 %v6949_v62 }
 0x917   : > { %3392 = vmatpush1.msra.mxu0 %v6953_v63  ;;  %3463 = vmatpush1.msra.mxu1 %v6955_v22 }
 0x918   : > { %3393 = vmatprep.subr.mxu0 %v6959_v57  ;;  %3464 = vmatprep.subr.mxu1 %v6961_v3 }
 0x919   : > { %3394 = vmatpush1.msra.mxu0 %v6965_v9  ;;  %3465 = vmatpush1.msra.mxu1 %v6967_v51 }
 0x91a   : > { %3395 = vmatprep.subr.mxu0 %v6971_v0  ;;  %3466 = vmatprep.subr.mxu1 %v6973_v12 }
 0x91b   : > { %3396 = vmatpush1.msra.mxu0 %v8411_v7  ;;  %3467 = vmatpush1.msra.mxu1 %v8412_v27 }
 0x91c   : > { %3397 = vmatprep.subr.mxu0 %v8455_v34  ;;  %3468 = vmatprep.subr.mxu1 %v8456_v20 }
 0x91d   : > { %3398 = vmatpush1.msra.mxu0 %v8457_v8  ;;  %3469 = vmatpush1.msra.mxu1 %v8458_v49 }
 0x91e   : > { %3399 = vmatprep.subr.mxu0 %v8459_v1  ;;  %3470 = vmatprep.subr.mxu1 %v8460_v45  ;;  %v8481_v45 = vld [vmem:[#allocation63_spill] sm:$0xff]  ;;  %v8482_v1 = vld [vmem:[#allocation44_spill] sm:$0xff] }
 0x91f   : > { %3400 = vmatpush1.msra.mxu0 %v8461_v41  ;;  %3471 = vmatpush1.msra.mxu1 %v8462_v31  ;;  %v2933_v49 = vadd.f32 %v8482_v1, %v8481_v45 }
 0x920   : > { %3401 = vmatprep.subr.mxu0 %v8463_v43  ;;  %3472 = vmatprep.subr.mxu1 %v8464_v39  ;;  %v8474_v43 = vmov 0.0   ;;  %v8475_v39 = vld [vmem:[#allocation43_spill] sm:$0xff] }
 0x921   : > { %3402 = vmatpush1.msra.mxu0 %v8465_v10  ;;  %3473 = vmatpush1.msra.mxu1 %v8466_v24  ;;  %v8476_v24 = vld [vmem:[#allocation24_spill] sm:$0xff] }
 0x922   : > { %3403 = vmatprep.subr.mxu0 %v8467_v59  ;;  %3474 = vmatprep.subr.mxu1 %v8468_v37  ;;  %v8477_v59 = vld [vmem:[#allocation25_spill] sm:$0xff] }
 0x923   : > { %3404 = vmatpush1.msra.mxu0 %v8469_v13  ;;  %3475 = vmatpush1.msra.mxu1 %v8470_v55  ;;  %v8478_v37 = vld [vmem:[#allocation53_spill] sm:$0xff] }
 0x924   : > { %3405 = vmatprep.subr.mxu0 %v8471_v53  ;;  %3476 = vmatprep.subr.mxu1 %v8472_v40  ;;  %v8479_v13 = vld [vmem:[#allocation33_spill] sm:$0xff]  ;;  %v8480_v53 = vld [vmem:[#allocation34_spill] sm:$0xff] }
 0x925   : > { %3406 = vmatpush1.msra.mxu0 %v8473_v5  ;;  %3439 = vmatprep.mubr.f32.mxu0 %v8474_v43  ;;  %v2844_v10 = vadd.f32 %v8479_v13, %v8478_v37  ;;  %v2846_v31 = vadd.f32 %v8480_v53, %v7149_v17  ;;  %v8483_v13 = vld [vmem:[#allocation45_spill] sm:$0xff] }
 0x926   : > { %3477 = vmatpush1.msra.mxu1 %v8475_v39  ;;  %3510 = vmatprep.mubr.f32.mxu1 %v8474_v43  ;;  %v2935_v37 = vadd.f32 %v8483_v13, %v7162_v30 }
 0x927   : > { %3544 = vmatprep.subr.mxu0 %v8476_v24  ;;  %3615 = vmatprep.subr.mxu1 %v8477_v59 }
 0x9c6   : > { %v3272_v55 = vpop.f32.mrf.mxu0  ;;  %v3343_v41 = vpop.f32.mrf.mxu1 }
 0x9c7   : > { %v3348_v40 = vadd.f32 %v3272_v55, %v2844_v10  ;;  %v3350_v43 = vadd.f32 %v3343_v41, %v2933_v49 }
 0x9c8   : > { %v3274_v5 = vpop.f32.mrf.mxu0  ;;  %v3345_v59 = vpop.f32.mrf.mxu1 }
 0x9c9   : > { %v3352_v39 = vmul.f32 0.5, %v3348_v40  ;;  %v3349_v8 = vadd.f32 %v3274_v5, %v2846_v31  ;;  %v3351_v20 = vadd.f32 %v3345_v59, %v2935_v37 }
 0x9cb   : > { %5282 = vtanh.f32 %v3352_v39  ;;  %v3356_v24 = vmul.f32 0.5, %v3349_v8  ;;  %v3361_v34 = vmul.f32 0.5, %v3351_v20 }
 0x9cd   : > { %5284 = vtanh.f32 %v3356_v24 }
 0x9ce   : > { %5286 = vtanh.f32 %v3350_v43 }
 0x9cf   : > { %5288 = vtanh.f32 %v3361_v34 }
 0x9d8   : > { %v5283_v53 = vpop.eup %5282 }
 0x9d9   : > { %v3354_v10 = vmul.f32 0.5, %v5283_v53 }
 0x9da   : > { %v5285_v55 = vpop.eup %5284 }
 0x9db   : > { %v3355_v17 = vadd.f32 0.5, %v3354_v10  ;;  %v3358_v27 = vmul.f32 0.5, %v5285_v55  ;;  %v5287_v1 = vpop.eup %5286 }
 0x9dc   : > { %v5289_v41 = vpop.eup %5288 }
 0x9dd   : > { %v3359_v40 = vadd.f32 0.5, %v3358_v27  ;;  %v3366_v5 = vmul.f32 %v5287_v1, %v3355_v17  ;;  %v3363_v31 = vmul.f32 0.5, %v5289_v41  ;;  %v8511_v27 = vld [vmem:[#allocation58_spill] sm:$0xff] }
 0x9de   : > { %v2941_v17 = vadd.f32 %v8511_v27, %v7162_v30  ;;  %v3738_v27 = vld [vmem:[#allocation15 + $0xb8] sm:$0xff] }
 0x9df   : > { %v3365_v49 = vmul.f32 %v3359_v40, %v7165_v47  ;;  %v3364_v43 = vadd.f32 0.5, %v3363_v31 }
 0x9e1   : > { %v7247_v8 = vadd.f32 %v3366_v5, %v3365_v49 }
 0x9e3   : > { %5290 = vtanh.f32 %v7247_v8 }
 0x9f0   : > { %v5291_v39 = vpop.eup %5290 }
 0x9f1   : > { %v7250_v20 = vmul.f32 %v5291_v39, %v3364_v43 }
 0x9f3   : > { %3440 = vmatmul.mubr.f32.vlgmr.msra.gmra.mxu0 %v7250_v20  ;;  %3511 = vmatmul.mubr.f32.vlgmr.msra.gmra.mxu1 %v7250_v20 }
 0x9f4   : > { %3545 = vmatpush1.msra.mxu0 %v6857_v11  ;;  %3616 = vmatpush1.msra.mxu1 %v6859_v4  ;;  %v8484_v11 = vld [vmem:[#allocation36_spill] sm:$0xff] }
 0x9f5   : > { %3546 = vmatprep.subr.mxu0 %v6863_v2  ;;  %3617 = vmatprep.subr.mxu1 %v6865_v6  ;;  %v8485_v4 = vld [vmem:[#allocation64_spill] sm:$0xff]  ;;  %v8486_v2 = vld [vmem:[#allocation46_spill] sm:$0xff]  ;;  %v8487_v6 = vld [vmem:[#allocation47_spill] sm:$0xff] }
 0x9f6   : > { %3547 = vmatpush1.msra.mxu0 %v6869_v14  ;;  %3618 = vmatpush1.msra.mxu1 %v6871_v15  ;;  %v8488_v14 = vld [vmem:[#allocation37_spill] sm:$0xff]  ;;  %v8489_v15 = vld [vmem:[#allocation27_spill] sm:$0xff] }
 0x9f7   : > { %3548 = vmatprep.subr.mxu0 %v6875_v16  ;;  %3619 = vmatprep.subr.mxu1 %v6877_v18  ;;  %v8490_v16 = vld [vmem:[#allocation23_spill] sm:$0xff]  ;;  %v8491_v18 = vld [vmem:[#allocation26_spill] sm:$0xff] }
 0x9f8   : > { %3549 = vmatpush1.msra.mxu0 %v6881_v19  ;;  %3620 = vmatpush1.msra.mxu1 %v6883_v21  ;;  %v8492_v19 = vld [vmem:[#allocation50_spill] sm:$0xff]  ;;  %v8493_v21 = vld [vmem:[#allocation51_spill] sm:$0xff] }
 0x9f9   : > { %3550 = vmatprep.subr.mxu0 %v6887_v23  ;;  %3621 = vmatprep.subr.mxu1 %v6889_v25  ;;  %v8494_v23 = vld [vmem:[#allocation38_spill] sm:$0xff]  ;;  %v8495_v25 = vld [vmem:[#allocation28_spill] sm:$0xff] }
 0x9fa   : > { %3551 = vmatpush1.msra.mxu0 %v6893_v26  ;;  %3622 = vmatpush1.msra.mxu1 %v6895_v28  ;;  %v8496_v26 = vld [vmem:[#allocation39_spill] sm:$0xff]  ;;  %v8497_v28 = vld [vmem:[#allocation29_spill] sm:$0xff] }
 0x9fb   : > { %3552 = vmatprep.subr.mxu0 %v6899_v29  ;;  %3623 = vmatprep.subr.mxu1 %v6901_v32  ;;  %v8498_v29 = vld [vmem:[#allocation40_spill] sm:$0xff]  ;;  %v8499_v32 = vld [vmem:[#allocation30_spill] sm:$0xff] }
 0x9fc   : > { %3553 = vmatpush1.msra.mxu0 %v6905_v33  ;;  %3624 = vmatpush1.msra.mxu1 %v6907_v35  ;;  %v8500_v33 = vld [vmem:[#allocation41_spill] sm:$0xff]  ;;  %v8501_v35 = vld [vmem:[#allocation31_spill] sm:$0xff] }
 0x9fd   : > { %3554 = vmatprep.subr.mxu0 %v6911_v36  ;;  %3625 = vmatprep.subr.mxu1 %v6913_v38  ;;  %v8502_v36 = vld [vmem:[#allocation42_spill] sm:$0xff]  ;;  %v8503_v38 = vld [vmem:[#allocation32_spill] sm:$0xff] }
 0x9fe   : > { %3555 = vmatpush1.msra.mxu0 %v6917_v42  ;;  %3626 = vmatpush1.msra.mxu1 %v6919_v44  ;;  %v8504_v42 = vld [vmem:[#allocation43_spill] sm:$0xff]  ;;  %v8505_v44 = vmov 0.0  }
 0x9ff   : > { %3556 = vmatprep.subr.mxu0 %v6921_v46  ;;  %3627 = vmatprep.subr.mxu1 %v6925_v48  ;;  %v3776_v46 = vld [vmem:[#allocation15 + $0x1e8] sm:$0xff]  ;;  %v3778_v48 = vld [vmem:[#allocation15 + $0x1f8] sm:$0xff] }
 0xa00   : > { %3557 = vmatpush1.msra.mxu0 %v6927_v50  ;;  %3628 = vmatpush1.msra.mxu1 %v6929_v52  ;;  %v8506_v50 = vld [vmem:[#allocation53_spill] sm:$0xff]  ;;  %v8507_v52 = vld [vmem:[#allocation62_spill] sm:$0xff] }
 0xa01   : > { %3558 = vmatprep.subr.mxu0 %v6935_v54  ;;  %3629 = vmatprep.subr.mxu1 %v6937_v56  ;;  %v2850_v54 = vadd.f32 %v8507_v52, %v8506_v50  ;;  %v3751_v52 = vld [vmem:[#allocation15 + $0x120] sm:$0xff] }
 0xa02   : > { %3559 = vmatpush1.msra.mxu0 %v6941_v58  ;;  %3630 = vmatpush1.msra.mxu1 %v6943_v60  ;;  %v8508_v58 = vld [vmem:[#allocation54_spill] sm:$0xff]  ;;  %v8509_v60 = vld [vmem:[#allocation60_spill] sm:$0xff] }
 0xa03   : > { %3560 = vmatprep.subr.mxu0 %v6947_v61  ;;  %3631 = vmatprep.subr.mxu1 %v6949_v62  ;;  %v2852_v61 = vadd.f32 %v8509_v60, %v8508_v58  ;;  %v3750_v60 = vld [vmem:[#allocation15 + $0x118] sm:$0xff] }
 0xa04   : > { %3561 = vmatpush1.msra.mxu0 %v6953_v63  ;;  %3632 = vmatpush1.msra.mxu1 %v6955_v22 }
 0xa05   : > { %3562 = vmatprep.subr.mxu0 %v6959_v57  ;;  %3633 = vmatprep.subr.mxu1 %v6961_v3  ;;  %v8510_v57 = vld [vmem:[#allocation52_spill] sm:$0xff] }
 0xa06   : > { %3563 = vmatpush1.msra.mxu0 %v6965_v9  ;;  %3634 = vmatpush1.msra.mxu1 %v6967_v51  ;;  %v2939_v3 = vadd.f32 %v8510_v57, %v8481_v45  ;;  %v3743_v57 = vld [vmem:[#allocation15 + $0xe0] sm:$0xff] }
 0xa07   : > { %3564 = vmatprep.subr.mxu0 %v6971_v0  ;;  %3635 = vmatprep.subr.mxu1 %v6973_v12 }
 0xa08   : > { %3565 = vmatpush1.msra.mxu0 %v8411_v7  ;;  %3636 = vmatpush1.msra.mxu1 %v8484_v11  ;;  %v3775_v11 = vld [vmem:[#allocation15 + $0x1e0] sm:$0xff] }
 0xa09   : > { %3566 = vmatprep.subr.mxu0 %v8485_v4  ;;  %3637 = vmatprep.subr.mxu1 %v8486_v2  ;;  %v3777_v4 = vld [vmem:[#allocation15 + $0x1f0] sm:$0xff]  ;;  %v3772_v2 = vld [vmem:[#allocation15 + $0x1c8] sm:$0xff] }
 0xa0a   : > { %3567 = vmatpush1.msra.mxu0 %v8487_v6  ;;  %3638 = vmatpush1.msra.mxu1 %v8488_v14  ;;  %v3774_v6 = vld [vmem:[#allocation15 + $0x1d8] sm:$0xff]  ;;  %v3771_v14 = vld [vmem:[#allocation15 + $0x1c0] sm:$0xff] }
 0xa0b   : > { %3568 = vmatprep.subr.mxu0 %v8489_v15  ;;  %3639 = vmatprep.subr.mxu1 %v8490_v16  ;;  %v3768_v15 = vld [vmem:[#allocation15 + $0x1a8] sm:$0xff]  ;;  %v3770_v16 = vld [vmem:[#allocation15 + $0x1b8] sm:$0xff] }
 0xa0c   : > { %3569 = vmatpush1.msra.mxu0 %v8491_v18  ;;  %3640 = vmatpush1.msra.mxu1 %v8492_v19  ;;  %v3767_v18 = vld [vmem:[#allocation15 + $0x1a0] sm:$0xff]  ;;  %v3769_v19 = vld [vmem:[#allocation15 + $0x1b0] sm:$0xff] }
 0xa0d   : > { %3570 = vmatprep.subr.mxu0 %v8493_v21  ;;  %3641 = vmatprep.subr.mxu1 %v8494_v23  ;;  %v3764_v21 = vld [vmem:[#allocation15 + $0x188] sm:$0xff]  ;;  %v3766_v23 = vld [vmem:[#allocation15 + $0x198] sm:$0xff] }
 0xa0e   : > { %3571 = vmatpush1.msra.mxu0 %v8495_v25  ;;  %3642 = vmatpush1.msra.mxu1 %v8496_v26  ;;  %v3763_v25 = vld [vmem:[#allocation15 + $0x180] sm:$0xff]  ;;  %v3765_v26 = vld [vmem:[#allocation15 + $0x190] sm:$0xff] }
 0xa0f   : > { %3572 = vmatprep.subr.mxu0 %v8497_v28  ;;  %3643 = vmatprep.subr.mxu1 %v8498_v29  ;;  %v3760_v28 = vld [vmem:[#allocation15 + $0x168] sm:$0xff]  ;;  %v3762_v29 = vld [vmem:[#allocation15 + $0x178] sm:$0xff] }
 0xa10   : > { %3573 = vmatpush1.msra.mxu0 %v8499_v32  ;;  %3644 = vmatpush1.msra.mxu1 %v8500_v33  ;;  %v3759_v32 = vld [vmem:[#allocation15 + $0x160] sm:$0xff]  ;;  %v3761_v33 = vld [vmem:[#allocation15 + $0x170] sm:$0xff] }
 0xa11   : > { %3574 = vmatprep.subr.mxu0 %v8501_v35  ;;  %3645 = vmatprep.subr.mxu1 %v8502_v36  ;;  %v3756_v35 = vld [vmem:[#allocation15 + $0x148] sm:$0xff]  ;;  %v3758_v36 = vld [vmem:[#allocation15 + $0x158] sm:$0xff] }
 0xa12   : > { %3575 = vmatpush1.msra.mxu0 %v8503_v38  ;;  %3646 = vmatpush1.msra.mxu1 %v8504_v42  ;;  %v3755_v38 = vld [vmem:[#allocation15 + $0x140] sm:$0xff]  ;;  %v3757_v42 = vld [vmem:[#allocation15 + $0x150] sm:$0xff] }
 0xa13   : > { %3608 = vmatprep.mubr.f32.mxu0 %v8505_v44  ;;  %3679 = vmatprep.mubr.f32.mxu1 %v8505_v44 }
 0xa14   : > { %3801 = vmatprep.subr.mxu0 %v3776_v46  ;;  %3890 = vmatprep.subr.mxu1 %v3778_v48  ;;  %v3752_v46 = vld [vmem:[#allocation15 + $0x128] sm:$0xff]  ;;  %v3754_v48 = vld [vmem:[#allocation15 + $0x138] sm:$0xff] }
 0xab3   : > { %v3441_v56 = vpop.f32.mrf.mxu0  ;;  %v3512_v63 = vpop.f32.mrf.mxu1 }
 0xab4   : > { %v3517_v62 = vadd.f32 %v3441_v56, %v2850_v54  ;;  %v3519_v0 = vadd.f32 %v3512_v63, %v2939_v3  ;;  %v3753_v54 = vld [vmem:[#allocation15 + $0x130] sm:$0xff]  ;;  %v3748_v56 = vld [vmem:[#allocation15 + $0x108] sm:$0xff] }
 0xab5   : > { %v3443_v22 = vpop.f32.mrf.mxu0  ;;  %v3514_v7 = vpop.f32.mrf.mxu1  ;;  %v3744_v63 = vld [vmem:[#allocation15 + $0xe8] sm:$0xff]  ;;  %v3745_v3 = vld [vmem:[#allocation15 + $0xf0] sm:$0xff] }
 0xab6   : > { %v3521_v9 = vmul.f32 0.5, %v3517_v62  ;;  %v3518_v51 = vadd.f32 %v3443_v22, %v2852_v61  ;;  %v3520_v47 = vadd.f32 %v3514_v7, %v2941_v17  ;;  %v3747_v61 = vld [vmem:[#allocation15 + $0x100] sm:$0xff]  ;;  %v3749_v62 = vld [vmem:[#allocation15 + $0x110] sm:$0xff]  ;;  %v3746_v22 = vld [vmem:[#allocation15 + $0xf8] sm:$0xff] }
 0xab7   : > { %v3736_v7 = vld [vmem:[#allocation15 + $0xa8] sm:$0xff]  ;;  %v3735_v17 = vld [vmem:[#allocation15 + $0xa0] sm:$0xff] }
 0xab8   : > { %5292 = vtanh.f32 %v3521_v9  ;;  %v3525_v12 = vmul.f32 0.5, %v3518_v51  ;;  %v3530_v34 = vmul.f32 0.5, %v3520_v47  ;;  %v3740_v9 = vld [vmem:[#allocation15 + $0xc8] sm:$0xff]  ;;  %v3742_v51 = vld [vmem:[#allocation15 + $0xd8] sm:$0xff]  ;;  %v3737_v47 = vld [vmem:[#allocation15 + $0xb0] sm:$0xff] }
 0xaba   : > { %5294 = vtanh.f32 %v3525_v12  ;;  %v3741_v12 = vld [vmem:[#allocation15 + $0xd0] sm:$0xff] }
 0xabb   : > { %5296 = vtanh.f32 %v3519_v0  ;;  %v3739_v0 = vld [vmem:[#allocation15 + $0xc0] sm:$0xff] }
 0xabc   : > { %5298 = vtanh.f32 %v3530_v34  ;;  %v3732_v34 = vld [vmem:[#allocation15 + $0x88] sm:$0xff] }
 0xac5   : > { %v5293_v37 = vpop.eup %5292 }
 0xac6   : > { %v3523_v24 = vmul.f32 0.5, %v5293_v37  ;;  %v3734_v37 = vld [vmem:[#allocation15 + $0x98] sm:$0xff] }
 0xac7   : > { %v5295_v59 = vpop.eup %5294 }
 0xac8   : > { %v3524_v13 = vadd.f32 0.5, %v3523_v24  ;;  %v3527_v53 = vmul.f32 0.5, %v5295_v59  ;;  %v5297_v10 = vpop.eup %5296  ;;  %v3731_v24 = vld [vmem:[#allocation15 + $0x80] sm:$0xff]  ;;  %v3733_v59 = vld [vmem:[#allocation15 + $0x90] sm:$0xff] }
 0xac9   : > { %v5299_v49 = vpop.eup %5298 }
 0xaca   : > { %v3528_v55 = vadd.f32 0.5, %v3527_v53  ;;  %v3535_v1 = vmul.f32 %v5297_v10, %v3524_v13  ;;  %v3532_v41 = vmul.f32 0.5, %v5299_v49  ;;  %v3728_v13 = vld [vmem:[#allocation15 + $0x68] sm:$0xff]  ;;  %v3730_v53 = vld [vmem:[#allocation15 + $0x78] sm:$0xff]  ;;  %v3727_v10 = vld [vmem:[#allocation15 + $0x60] sm:$0xff] }
 0xacb   : > { %v3723_v49 = vld [vmem:[#allocation15 + $0x40] sm:$0xff] }
 0xacc   : > { %v3534_v40 = vmul.f32 %v3528_v55, %v7247_v8  ;;  %v3533_v31 = vadd.f32 0.5, %v3532_v41  ;;  %v3773_v8 = vld [vmem:[#allocation15 + $0x1d0] sm:$0xff] }
 0xacd   : > { %v3729_v55 = vld [vmem:[#allocation15 + $0x70] sm:$0xff] }
 0xace   : > { %v7327_v5 = vadd.f32 %v3535_v1, %v3534_v40  ;;  %v3724_v1 = vld [vmem:[#allocation15 + $0x48] sm:$0xff]  ;;  %v3726_v40 = vld [vmem:[#allocation15 + $0x58] sm:$0xff]  ;;  %v3725_v41 = vld [vmem:[#allocation15 + $0x50] sm:$0xff] }
 0xad0   : > { %5300 = vtanh.f32 %v7327_v5 }
 0xadd   : > { %v5301_v43 = vpop.eup %5300 }
 0xade   : > { %v7330_v39 = vmul.f32 %v5301_v43, %v3533_v31  ;;  %v3720_v31 = vld [vmem:[#allocation15 + $0x28] sm:$0xff]  ;;  %v3722_v43 = vld [vmem:[#allocation15 + $0x38] sm:$0xff] }
 0xae0   : > { %3609 = vmatmul.mubr.f32.vlgmr.msra.gmra.mxu0 %v7330_v39  ;;  %3680 = vmatmul.mubr.f32.vlgmr.msra.gmra.mxu1 %v7330_v39 }
 0xae1   : > { %3802 = vmatpush1.msra.mxu0 %v3775_v11  ;;  %3891 = vmatpush1.msra.mxu1 %v3777_v4  ;;  %v3719_v11 = vld [vmem:[#allocation15 + $0x20] sm:$0xff]  ;;  %v3721_v4 = vld [vmem:[#allocation15 + $0x30] sm:$0xff] }
 0xae2   : > { %3803 = vmatprep.subr.mxu0 %v3772_v2  ;;  %3892 = vmatprep.subr.mxu1 %v3774_v6  ;;  %v3716_v2 = vld [vmem:[#allocation15 + $0x8] sm:$0xff]  ;;  %v3718_v6 = vld [vmem:[#allocation15 + $0x18] sm:$0xff] }
 0xae3   : > { %3804 = vmatpush1.msra.mxu0 %v3771_v14  ;;  %3893 = vmatpush1.msra.mxu1 %v3773_v8  ;;  %v3715_v14 = vld [vmem:[#allocation15] sm:$0xff]  ;;  %v3717_v8 = vld [vmem:[#allocation15 + $0x10] sm:$0xff] }
 0xae4   : > { %3805 = vmatprep.subr.mxu0 %v3768_v15  ;;  %3894 = vmatprep.subr.mxu1 %v3770_v16  ;;  %v8512_v15 = vld [vmem:[#allocation35_spill] sm:$0xff]  ;;  %v7348_v16 = vld [vmem:[#allocation17 + $0x1e8] sm:$0xff] }
 0xae5   : > { %3806 = vmatpush1.msra.mxu0 %v3767_v18  ;;  %3895 = vmatpush1.msra.mxu1 %v3769_v19  ;;  %8513 = vst [vmem:[#allocation24_spill] sm:$0xff] %v7348_v16  ;;  %v7350_v18 = vld [vmem:[#allocation17 + $0x1f8] sm:$0xff]  ;;  %v7356_v19 = vld [vmem:[#allocation17 + $0x1f0] sm:$0xff] }
 0xae6   : > { %3807 = vmatprep.subr.mxu0 %v3764_v21  ;;  %3896 = vmatprep.subr.mxu1 %v3766_v23  ;;  %8514 = vst [vmem:[#allocation25_spill] sm:$0xff] %v7350_v18  ;;  %v7362_v21 = vld [vmem:[#allocation17 + $0x1d8] sm:$0xff]  ;;  %v7366_v23 = vld [vmem:[#allocation17 + $0x1c0] sm:$0xff] }
 0xae7   : > { %3808 = vmatpush1.msra.mxu0 %v3763_v25  ;;  %3897 = vmatpush1.msra.mxu1 %v3765_v26  ;;  %v7368_v25 = vld [vmem:[#allocation17 + $0x1d0] sm:$0xff]  ;;  %v7372_v26 = vld [vmem:[#allocation17 + $0x1a8] sm:$0xff] }
 0xae8   : > { %3809 = vmatprep.subr.mxu0 %v3760_v28  ;;  %3898 = vmatprep.subr.mxu1 %v3762_v29  ;;  %v7374_v28 = vld [vmem:[#allocation17 + $0x1b8] sm:$0xff]  ;;  %v7378_v29 = vld [vmem:[#allocation17 + $0x1a0] sm:$0xff] }
 0xae9   : > { %3810 = vmatpush1.msra.mxu0 %v3759_v32  ;;  %3899 = vmatpush1.msra.mxu1 %v3761_v33  ;;  %v7380_v32 = vld [vmem:[#allocation17 + $0x1b0] sm:$0xff]  ;;  %v7384_v33 = vld [vmem:[#allocation17 + $0x188] sm:$0xff] }
 0xaea   : > { %3811 = vmatprep.subr.mxu0 %v3756_v35  ;;  %3900 = vmatprep.subr.mxu1 %v3758_v36  ;;  %v7386_v35 = vld [vmem:[#allocation17 + $0x198] sm:$0xff]  ;;  %v7390_v36 = vld [vmem:[#allocation17 + $0x180] sm:$0xff] }
 0xaeb   : > { %3812 = vmatpush1.msra.mxu0 %v3755_v38  ;;  %3901 = vmatpush1.msra.mxu1 %v3757_v42  ;;  %v7392_v38 = vld [vmem:[#allocation17 + $0x190] sm:$0xff]  ;;  %v7396_v42 = vld [vmem:[#allocation17 + $0x168] sm:$0xff] }
 0xaec   : > { %3813 = vmatprep.subr.mxu0 %v3752_v46  ;;  %3902 = vmatprep.subr.mxu1 %v3754_v48  ;;  %v7398_v46 = vld [vmem:[#allocation17 + $0x178] sm:$0xff]  ;;  %v7402_v48 = vld [vmem:[#allocation17 + $0x160] sm:$0xff] }
 0xaed   : > { %3814 = vmatpush1.msra.mxu0 %v3751_v52  ;;  %3903 = vmatpush1.msra.mxu1 %v3753_v54  ;;  %v7404_v52 = vld [vmem:[#allocation17 + $0x170] sm:$0xff]  ;;  %v7408_v54 = vld [vmem:[#allocation17 + $0x148] sm:$0xff] }
 0xaee   : > { %3815 = vmatprep.subr.mxu0 %v3748_v56  ;;  %3904 = vmatprep.subr.mxu1 %v3750_v60  ;;  %v7410_v56 = vld [vmem:[#allocation17 + $0x158] sm:$0xff]  ;;  %v7414_v60 = vld [vmem:[#allocation17 + $0x140] sm:$0xff] }
 0xaef   : > { %3816 = vmatpush1.msra.mxu0 %v3747_v61  ;;  %3905 = vmatpush1.msra.mxu1 %v3749_v62  ;;  %v7416_v61 = vld [vmem:[#allocation17 + $0x150] sm:$0xff]  ;;  %v7418_v62 = vld [vmem:[#allocation17 + $0x128] sm:$0xff] }
 0xaf0   : > { %3817 = vmatprep.subr.mxu0 %v3744_v63  ;;  %3906 = vmatprep.subr.mxu1 %v3746_v22  ;;  %v7422_v63 = vld [vmem:[#allocation17 + $0x138] sm:$0xff]  ;;  %v7424_v22 = vld [vmem:[#allocation17 + $0x120] sm:$0xff] }
 0xaf1   : > { %3818 = vmatpush1.msra.mxu0 %v3743_v57  ;;  %3907 = vmatpush1.msra.mxu1 %v3745_v3  ;;  %v7426_v57 = vld [vmem:[#allocation17 + $0x130] sm:$0xff]  ;;  %v7432_v3 = vld [vmem:[#allocation17 + $0x108] sm:$0xff] }
 0xaf2   : > { %3819 = vmatprep.subr.mxu0 %v3740_v9  ;;  %3908 = vmatprep.subr.mxu1 %v3742_v51  ;;  %v7434_v9 = vld [vmem:[#allocation17 + $0x118] sm:$0xff]  ;;  %v7438_v51 = vld [vmem:[#allocation17 + $0x100] sm:$0xff] }
 0xaf3   : > { %3820 = vmatpush1.msra.mxu0 %v3739_v0  ;;  %3909 = vmatpush1.msra.mxu1 %v3741_v12  ;;  %v7440_v0 = vld [vmem:[#allocation17 + $0x110] sm:$0xff]  ;;  %v7444_v12 = vld [vmem:[#allocation17 + $0xe8] sm:$0xff] }
 0xaf4   : > { %3821 = vmatprep.subr.mxu0 %v3736_v7  ;;  %3910 = vmatprep.subr.mxu1 %v3738_v27  ;;  %v7446_v7 = vld [vmem:[#allocation17 + $0xf8] sm:$0xff]  ;;  %v7450_v27 = vld [vmem:[#allocation17 + $0xe0] sm:$0xff] }
 0xaf5   : > { %3822 = vmatpush1.msra.mxu0 %v3735_v17  ;;  %3911 = vmatpush1.msra.mxu1 %v3737_v47  ;;  %v7452_v17 = vld [vmem:[#allocation17 + $0xf0] sm:$0xff]  ;;  %v7456_v47 = vld [vmem:[#allocation17 + $0xc8] sm:$0xff] }
 0xaf6   : > { %3823 = vmatprep.subr.mxu0 %v3732_v34  ;;  %3912 = vmatprep.subr.mxu1 %v3734_v37  ;;  %v7458_v34 = vld [vmem:[#allocation17 + $0xd8] sm:$0xff]  ;;  %v7462_v37 = vld [vmem:[#allocation17 + $0xc0] sm:$0xff] }
 0xaf7   : > { %3824 = vmatpush1.msra.mxu0 %v3731_v24  ;;  %3913 = vmatpush1.msra.mxu1 %v3733_v59  ;;  %v7464_v24 = vld [vmem:[#allocation17 + $0xd0] sm:$0xff]  ;;  %v7468_v59 = vld [vmem:[#allocation17 + $0xa8] sm:$0xff] }
 0xaf8   : > { %3825 = vmatprep.subr.mxu0 %v3728_v13  ;;  %3914 = vmatprep.subr.mxu1 %v3730_v53  ;;  %v7470_v13 = vld [vmem:[#allocation17 + $0xb8] sm:$0xff]  ;;  %v7474_v53 = vld [vmem:[#allocation17 + $0xa0] sm:$0xff] }
 0xaf9   : > { %3826 = vmatpush1.msra.mxu0 %v3727_v10  ;;  %3915 = vmatpush1.msra.mxu1 %v3729_v55  ;;  %8515 = vst [vmem:[#allocation33_spill] sm:$0xff] %v7474_v53  ;;  %v7476_v10 = vld [vmem:[#allocation17 + $0xb0] sm:$0xff]  ;;  %v7480_v55 = vld [vmem:[#allocation17 + $0x88] sm:$0xff] }
 0xafa   : > { %3827 = vmatprep.subr.mxu0 %v3724_v1  ;;  %3916 = vmatprep.subr.mxu1 %v3726_v40  ;;  %8516 = vst [vmem:[#allocation34_spill] sm:$0xff] %v7476_v10  ;;  %8517 = vst [vmem:[#allocation63_spill] sm:$0xff] %v7480_v55  ;;  %v7482_v1 = vld [vmem:[#allocation17 + $0x98] sm:$0xff]  ;;  %v7486_v40 = vld [vmem:[#allocation17 + $0x80] sm:$0xff] }
 0xafb   : > { %3828 = vmatpush1.msra.mxu0 %v3723_v49  ;;  %3917 = vmatpush1.msra.mxu1 %v3725_v41  ;;  %8518 = vst [vmem:[#allocation44_spill] sm:$0xff] %v7482_v1  ;;  %8519 = vst [vmem:[#allocation45_spill] sm:$0xff] %v7486_v40  ;;  %v7488_v49 = vld [vmem:[#allocation17 + $0x90] sm:$0xff]  ;;  %v7492_v41 = vld [vmem:[#allocation17 + $0x68] sm:$0xff] }
 0xafc   : > { %3829 = vmatprep.subr.mxu0 %v3720_v31  ;;  %3918 = vmatprep.subr.mxu1 %v3722_v43  ;;  %8520 = vst [vmem:[#allocation36_spill] sm:$0xff] %v7488_v49  ;;  %8521 = vst [vmem:[#allocation64_spill] sm:$0xff] %v7492_v41  ;;  %v7494_v31 = vld [vmem:[#allocation17 + $0x78] sm:$0xff]  ;;  %v7498_v43 = vld [vmem:[#allocation17 + $0x60] sm:$0xff] }
 0xafd   : > { %3830 = vmatpush1.msra.mxu0 %v3719_v11  ;;  %3919 = vmatpush1.msra.mxu1 %v3721_v4  ;;  %8522 = vst [vmem:[#allocation46_spill] sm:$0xff] %v7494_v31  ;;  %8523 = vst [vmem:[#allocation47_spill] sm:$0xff] %v7498_v43  ;;  %v7500_v11 = vld [vmem:[#allocation17 + $0x70] sm:$0xff]  ;;  %v7504_v4 = vld [vmem:[#allocation17 + $0x48] sm:$0xff] }
 0xafe   : > { %3831 = vmatprep.subr.mxu0 %v3716_v2  ;;  %3920 = vmatprep.subr.mxu1 %v3718_v6  ;;  %8524 = vst [vmem:[#allocation37_spill] sm:$0xff] %v7500_v11  ;;  %8525 = vst [vmem:[#allocation27_spill] sm:$0xff] %v7504_v4  ;;  %v7506_v2 = vld [vmem:[#allocation17 + $0x58] sm:$0xff]  ;;  %v7508_v6 = vld [vmem:[#allocation17 + $0x40] sm:$0xff] }
 0xaff   : > { %3832 = vmatpush1.msra.mxu0 %v3715_v14  ;;  %3865 = vmatprep.mubr.f32.mxu0 %v8505_v44  ;;  %8526 = vst [vmem:[#allocation23_spill] sm:$0xff] %v7506_v2  ;;  %8527 = vst [vmem:[#allocation26_spill] sm:$0xff] %v7508_v6  ;;  %v7512_v14 = vld [vmem:[#allocation17 + $0x50] sm:$0xff] }
 0xb00   : > { %3921 = vmatpush1.msra.mxu1 %v3717_v8  ;;  %3954 = vmatprep.mubr.f32.mxu1 %v8505_v44  ;;  %8528 = vst [vmem:[#allocation50_spill] sm:$0xff] %v7512_v14  ;;  %v7514_v8 = vld [vmem:[#allocation17 + $0x28] sm:$0xff] }
 0xb01   : > { %3866 = vmatmul.mubr.f32.vlgmr.msra.gmra.mxu0 %v8512_v15  ;;  %3955 = vmatmul.mubr.f32.vlgmr.msra.gmra.mxu1 %v8512_v15  ;;  %8529 = vst [vmem:[#allocation51_spill] sm:$0xff] %v7514_v8  ;;  %v7516_v15 = vld [vmem:[#allocation17 + $0x38] sm:$0xff] }
 0xb02   : > { %3871 = vmatprep.mubr.f32.mxu0 %v8505_v44  ;;  %3960 = vmatprep.mubr.f32.mxu1 %v8505_v44  ;;  %8530 = vst [vmem:[#allocation38_spill] sm:$0xff] %v7516_v15 }
 0xb03   : > { %4067 = vmatprep.subr.mxu0 %v7348_v16  ;;  %4138 = vmatprep.subr.mxu1 %v7350_v18 }
 0xb04   : > { %4139 = vmatpush1.msra.mxu1 %v7356_v19 }
 0xb05   : > { %3872 = vmatmul.mubr.f32.gmra.mxu0 %v7250_v20  ;;  %3961 = vmatmul.mubr.f32.gmra.mxu1 %v7250_v20  ;;  %v7354_v20 = vld [vmem:[#allocation17 + $0x1e0] sm:$0xff] }
 0xb06   : > { %3877 = vmatprep.mubr.f32.mxu0 %v8505_v44  ;;  %3966 = vmatprep.mubr.f32.mxu1 %v8505_v44 }
 0xb07   : > { %4068 = vmatpush1.msra.mxu0 %v7354_v20  ;;  %4140 = vmatprep.subr.mxu1 %v7362_v21 }
 0xb08   : > { %4141 = vmatpush1.msra.mxu1 %v7368_v25 }
 0xb09   : > { %3878 = vmatmul.mubr.f32.gmra.mxu0 %v7330_v39  ;;  %3967 = vmatmul.mubr.f32.gmra.mxu1 %v7330_v39  ;;  %v7360_v39 = vld [vmem:[#allocation17 + $0x1c8] sm:$0xff] }
 0xb0a   : > { %3883 = vmatprep.mubr.f32.mxu0 %v8505_v44  ;;  %3972 = vmatprep.mubr.f32.mxu1 %v8505_v44 }
 0xb0b   : > { %4069 = vmatprep.subr.mxu0 %v7360_v39  ;;  %4142 = vmatprep.subr.mxu1 %v7374_v28 }
 0xb0c   : > { %4070 = vmatpush1.msra.mxu0 %v7366_v23  ;;  %4143 = vmatpush1.msra.mxu1 %v7380_v32 }
 0xb0d   : > { %4071 = vmatprep.subr.mxu0 %v7372_v26  ;;  %4144 = vmatprep.subr.mxu1 %v7386_v35 }
 0xb0e   : > { %4072 = vmatpush1.msra.mxu0 %v7378_v29  ;;  %4145 = vmatpush1.msra.mxu1 %v7392_v38 }
 0xb0f   : > { %4073 = vmatprep.subr.mxu0 %v7384_v33  ;;  %4146 = vmatprep.subr.mxu1 %v7398_v46 }
 0xb10   : > { %4074 = vmatpush1.msra.mxu0 %v7390_v36  ;;  %4147 = vmatpush1.msra.mxu1 %v7404_v52 }
 0xb11   : > { %4075 = vmatprep.subr.mxu0 %v7396_v42  ;;  %4148 = vmatprep.subr.mxu1 %v7410_v56 }
 0xb12   : > { %4076 = vmatpush1.msra.mxu0 %v7402_v48  ;;  %4149 = vmatpush1.msra.mxu1 %v7416_v61 }
 0xb13   : > { %4077 = vmatprep.subr.mxu0 %v7408_v54  ;;  %4150 = vmatprep.subr.mxu1 %v7422_v63 }
 0xb14   : > { %4078 = vmatpush1.msra.mxu0 %v7414_v60  ;;  %4151 = vmatpush1.msra.mxu1 %v7426_v57 }
 0xb15   : > { %4079 = vmatprep.subr.mxu0 %v7418_v62  ;;  %4152 = vmatprep.subr.mxu1 %v7434_v9 }
 0xb16   : > { %4080 = vmatpush1.msra.mxu0 %v7424_v22  ;;  %4153 = vmatpush1.msra.mxu1 %v7440_v0 }
 0xb17   : > { %4081 = vmatprep.subr.mxu0 %v7432_v3  ;;  %4154 = vmatprep.subr.mxu1 %v7446_v7 }
 0xb18   : > { %4082 = vmatpush1.msra.mxu0 %v7438_v51  ;;  %4155 = vmatpush1.msra.mxu1 %v7452_v17 }
 0xb19   : > { %4083 = vmatprep.subr.mxu0 %v7444_v12  ;;  %4156 = vmatprep.subr.mxu1 %v7458_v34 }
 0xb1a   : > { %4084 = vmatpush1.msra.mxu0 %v7450_v27  ;;  %4157 = vmatpush1.msra.mxu1 %v7464_v24 }
 0xb1b   : > { %4085 = vmatprep.subr.mxu0 %v7456_v47  ;;  %4158 = vmatprep.subr.mxu1 %v7470_v13 }
 0xb1c   : > { %4086 = vmatpush1.msra.mxu0 %v7462_v37  ;;  %4159 = vmatpush1.msra.mxu1 %v7476_v10 }
 0xb1d   : > { %4087 = vmatprep.subr.mxu0 %v7468_v59  ;;  %4160 = vmatprep.subr.mxu1 %v7482_v1 }
 0xb1e   : > { %4088 = vmatpush1.msra.mxu0 %v7474_v53  ;;  %4161 = vmatpush1.msra.mxu1 %v7488_v49 }
 0xb1f   : > { %4089 = vmatprep.subr.mxu0 %v7480_v55  ;;  %4162 = vmatprep.subr.mxu1 %v7494_v31  ;;  %v7524_v31 = vld [vmem:[#allocation17 + $0x8] sm:$0xff] }
 0xb20   : > { %4090 = vmatpush1.msra.mxu0 %v7486_v40  ;;  %4163 = vmatpush1.msra.mxu1 %v7500_v11  ;;  %v7520_v11 = vld [vmem:[#allocation17 + $0x20] sm:$0xff]  ;;  %8533 = vst [vmem:[#allocation29_spill] sm:$0xff] %v7524_v31 }
 0xb21   : > { %4091 = vmatprep.subr.mxu0 %v7492_v41  ;;  %4164 = vmatprep.subr.mxu1 %v7506_v2  ;;  %8531 = vst [vmem:[#allocation28_spill] sm:$0xff] %v7520_v11  ;;  %v7528_v2 = vld [vmem:[#allocation17 + $0x18] sm:$0xff]  ;;  %v7532_v41 = vld [vmem:[#allocation17 + $0x10] sm:$0xff] }
 0xb22   : > { %4092 = vmatpush1.msra.mxu0 %v7498_v43  ;;  %4165 = vmatpush1.msra.mxu1 %v7512_v14  ;;  %v7522_v43 = vld [vmem:[#allocation17 + $0x30] sm:$0xff]  ;;  %8534 = vst [vmem:[#allocation40_spill] sm:$0xff] %v7528_v2  ;;  %8536 = vst [vmem:[#allocation41_spill] sm:$0xff] %v7532_v41 }
 0xb23   : > { %4093 = vmatprep.subr.mxu0 %v7504_v4  ;;  %8532 = vst [vmem:[#allocation39_spill] sm:$0xff] %v7522_v43  ;;  %4166 = vmatprep.subr.mxu1 %v7516_v15  ;;  %v7530_v4 = vld [vmem:[#allocation17] sm:$0xff] }
 0xb24   : > { %4094 = vmatpush1.msra.mxu0 %v7508_v6  ;;  %8535 = vst [vmem:[#allocation30_spill] sm:$0xff] %v7530_v4  ;;  %4167 = vmatpush1.msra.mxu1 %v7522_v43  ;;  %v8537_v15 = vld [vmem:[#allocation59_spill] sm:$0xff] }
 0xb25   : > { %4095 = vmatprep.subr.mxu0 %v7514_v8  ;;  %4168 = vmatprep.subr.mxu1 %v7528_v2  ;;  %v2856_v8 = vadd.f32 %v8537_v15, %v8506_v50  ;;  %v8539_v2 = vld [vmem:[#allocation65_spill] sm:$0xff]  ;;  %v8540_v50 = vld [vmem:[#allocation55_spill] sm:$0xff] }
 0xb26   : > { %4096 = vmatpush1.msra.mxu0 %v7520_v11  ;;  %4169 = vmatpush1.msra.mxu1 %v7532_v41  ;;  %v8538_v11 = vld [vmem:[#allocation61_spill] sm:$0xff]  ;;  %v2945_v40 = vadd.f32 %v8539_v2, %v8481_v45  ;;  %v2947_v15 = vadd.f32 %v8540_v50, %v7162_v30  ;;  %v8547_v50 = vld [vmem:[#allocation64_spill] sm:$0xff] }
 0xb27   : > { %4097 = vmatprep.subr.mxu0 %v7524_v31  ;;  %4307 = vmatprep.subr.mxu1 %v7350_v18  ;;  %v2858_v6 = vadd.f32 %v8538_v11, %v8508_v58  ;;  %v8545_v2 = vld [vmem:[#allocation45_spill] sm:$0xff] }
 0xb28   : > { %4098 = vmatpush1.msra.mxu0 %v7530_v4 }
 0xb29   : > { %4236 = vmatprep.subr.mxu0 %v7348_v16 }
 0xba0   : > { %v3610_v14 = vpop.f32.mrf.mxu0  ;;  %v3681_v49 = vpop.f32.mrf.mxu1 }
 0xba1   : > { %v3686_v43 = vadd.f32 %v3610_v14, %v2856_v8  ;;  %v3688_v41 = vadd.f32 %v3681_v49, %v2945_v40 }
 0xba2   : > { %v3612_v31 = vpop.f32.mrf.mxu0  ;;  %v3683_v18 = vpop.f32.mrf.mxu1 }
 0xba3   : > { %v3690_v4 = vmul.f32 0.5, %v3686_v43  ;;  %v3687_v1 = vadd.f32 %v3612_v31, %v2858_v6  ;;  %v3689_v55 = vadd.f32 %v3683_v18, %v2947_v15  ;;  %v8546_v6 = vld [vmem:[#allocation36_spill] sm:$0xff]  ;;  %v8548_v15 = vld [vmem:[#allocation46_spill] sm:$0xff] }
 0xba5   : > { %5302 = vtanh.f32 %v3690_v4  ;;  %v3694_v16 = vmul.f32 0.5, %v3687_v1  ;;  %v3699_v10 = vmul.f32 0.5, %v3689_v55  ;;  %v8543_v55 = vld [vmem:[#allocation63_spill] sm:$0xff]  ;;  %v8544_v4 = vld [vmem:[#allocation44_spill] sm:$0xff] }
 0xba7   : > { %5304 = vtanh.f32 %v3694_v16 }
 0xba8   : > { %5306 = vtanh.f32 %v3688_v41 }
 0xba9   : > { %5308 = vtanh.f32 %v3699_v10  ;;  %v4060_v10 = vld [vmem:[#allocation5 + $0x8] sm:$0xff] }
 0xbb2   : > { %v5303_v58 = vpop.eup %5302 }
 0xbb3   : > { %v3692_v11 = vmul.f32 0.5, %v5303_v58  ;;  %v8549_v58 = vld [vmem:[#allocation47_spill] sm:$0xff] }
 0xbb4   : > { %v5305_v14 = vpop.eup %5304 }
 0xbb5   : > { %v3693_v8 = vadd.f32 0.5, %v3692_v11  ;;  %v3696_v53 = vmul.f32 0.5, %v5305_v14  ;;  %v5307_v45 = vpop.eup %5306  ;;  %v8550_v11 = vld [vmem:[#allocation37_spill] sm:$0xff]  ;;  %v8551_v14 = vld [vmem:[#allocation27_spill] sm:$0xff] }
 0xbb6   : > { %v5309_v16 = vpop.eup %5308 }
 0xbb7   : > { %v3697_v43 = vadd.f32 0.5, %v3696_v53  ;;  %v3704_v31 = vmul.f32 %v5307_v45, %v3693_v8  ;;  %v3701_v49 = vmul.f32 0.5, %v5309_v16  ;;  %v8542_v53 = vld [vmem:[#allocation34_spill] sm:$0xff]  ;;  %v8552_v8 = vld [vmem:[#allocation23_spill] sm:$0xff] }
 0xbb8   : > { %v8553_v45 = vld [vmem:[#allocation26_spill] sm:$0xff]  ;;  %v8558_v16 = vld [vmem:[#allocation39_spill] sm:$0xff] }
 0xbb9   : > { %v3703_v40 = vmul.f32 %v3697_v43, %v7327_v5  ;;  %v3702_v41 = vadd.f32 0.5, %v3701_v49  ;;  %v8541_v5 = vld [vmem:[#allocation33_spill] sm:$0xff]  ;;  %v8554_v43 = vld [vmem:[#allocation50_spill] sm:$0xff] }
 0xbba   : > { %v8559_v49 = vld [vmem:[#allocation29_spill] sm:$0xff] }
 0xbbb   : > { %v3705_v1 = vadd.f32 %v3704_v31, %v3703_v40  ;;  %v8555_v31 = vld [vmem:[#allocation51_spill] sm:$0xff]  ;;  %v8556_v40 = vld [vmem:[#allocation38_spill] sm:$0xff] }
 0xbbd   : > { %5310 = vtanh.f32 %v3705_v1  ;;  %3710 = vst [vmem:[#allocation6 + $0x8] sm:$0xff] %v3705_v1  ;;  %v8557_v1 = vld [vmem:[#allocation28_spill] sm:$0xff] }
 0xbca   : > { %v5311_v30 = vpop.eup %5310 }
 0xbcb   : > { %v3707_v18 = vmul.f32 %v5311_v30, %v3702_v41  ;;  %v8560_v41 = vld [vmem:[#allocation40_spill] sm:$0xff]  ;;  %v8561_v30 = vld [vmem:[#allocation30_spill] sm:$0xff] }
 0xbcd   : > { %3709 = vst [vmem:[#allocation5 + $0x18] sm:$0xff] %v3707_v18  ;;  %3884 = vmatmul.mubr.f32.gmra.mxu0 %v3707_v18  ;;  %3973 = vmatmul.mubr.f32.gmra.mxu1 %v3707_v18  ;;  %v8562_v18 = vld [vmem:[#allocation41_spill] sm:$0xff] }
 0xbce   : > { %4131 = vmatprep.mubr.f32.mxu0 %v8505_v44  ;;  %4202 = vmatprep.mubr.f32.mxu1 %v8505_v44 }
 0xbd1   : > { %4132 = vmatmul.mubr.f32.vlgmr.msra.gmra.mxu0 %v4060_v10  ;;  %4203 = vmatmul.mubr.f32.vlgmr.msra.gmra.mxu1 %v4060_v10  ;;  %v8563_v10 = vld [vmem:[#allocation24_spill] sm:$0xff] }
 0xbd2   : > { %4237 = vmatpush1.msra.mxu0 %v7354_v20  ;;  %4308 = vmatpush1.msra.mxu1 %v7356_v19 }
 0xbd3   : > { %4238 = vmatprep.subr.mxu0 %v7360_v39  ;;  %4309 = vmatprep.subr.mxu1 %v7362_v21 }
 0xbd4   : > { %4239 = vmatpush1.msra.mxu0 %v7366_v23  ;;  %4310 = vmatpush1.msra.mxu1 %v7368_v25 }
 0xbd5   : > { %4240 = vmatprep.subr.mxu0 %v7372_v26  ;;  %4311 = vmatprep.subr.mxu1 %v7374_v28 }
 0xbd6   : > { %4241 = vmatpush1.msra.mxu0 %v7378_v29  ;;  %4312 = vmatpush1.msra.mxu1 %v7380_v32 }
 0xbd7   : > { %4242 = vmatprep.subr.mxu0 %v7384_v33  ;;  %4313 = vmatprep.subr.mxu1 %v7386_v35 }
 0xbd8   : > { %4243 = vmatpush1.msra.mxu0 %v7390_v36  ;;  %4314 = vmatpush1.msra.mxu1 %v7392_v38 }
 0xbd9   : > { %4244 = vmatprep.subr.mxu0 %v7396_v42  ;;  %4315 = vmatprep.subr.mxu1 %v7398_v46 }
 0xbda   : > { %4245 = vmatpush1.msra.mxu0 %v7402_v48  ;;  %4316 = vmatpush1.msra.mxu1 %v7404_v52 }
 0xbdb   : > { %4246 = vmatprep.subr.mxu0 %v7408_v54  ;;  %4317 = vmatprep.subr.mxu1 %v7410_v56 }
 0xbdc   : > { %4247 = vmatpush1.msra.mxu0 %v7414_v60  ;;  %4318 = vmatpush1.msra.mxu1 %v7416_v61 }
 0xbdd   : > { %4248 = vmatprep.subr.mxu0 %v7418_v62  ;;  %4319 = vmatprep.subr.mxu1 %v7422_v63 }
 0xbde   : > { %4249 = vmatpush1.msra.mxu0 %v7424_v22  ;;  %4320 = vmatpush1.msra.mxu1 %v7426_v57 }
 0xbdf   : > { %4250 = vmatprep.subr.mxu0 %v7432_v3  ;;  %4321 = vmatprep.subr.mxu1 %v7434_v9 }
 0xbe0   : > { %4251 = vmatpush1.msra.mxu0 %v7438_v51  ;;  %4322 = vmatpush1.msra.mxu1 %v7440_v0 }
 0xbe1   : > { %4252 = vmatprep.subr.mxu0 %v7444_v12  ;;  %4323 = vmatprep.subr.mxu1 %v7446_v7 }
 0xbe2   : > { %4253 = vmatpush1.msra.mxu0 %v7450_v27  ;;  %4324 = vmatpush1.msra.mxu1 %v7452_v17 }
 0xbe3   : > { %4254 = vmatprep.subr.mxu0 %v7456_v47  ;;  %4325 = vmatprep.subr.mxu1 %v7458_v34 }
 0xbe4   : > { %4255 = vmatpush1.msra.mxu0 %v7462_v37  ;;  %4326 = vmatpush1.msra.mxu1 %v7464_v24 }
 0xbe5   : > { %4256 = vmatprep.subr.mxu0 %v7468_v59  ;;  %4327 = vmatprep.subr.mxu1 %v7470_v13 }
 0xbe6   : > { %4257 = vmatpush1.msra.mxu0 %v8541_v5  ;;  %4328 = vmatpush1.msra.mxu1 %v8542_v53 }
 0xbe7   : > { %4258 = vmatprep.subr.mxu0 %v8543_v55  ;;  %4329 = vmatprep.subr.mxu1 %v8544_v4 }
 0xbe8   : > { %4259 = vmatpush1.msra.mxu0 %v8545_v2  ;;  %4330 = vmatpush1.msra.mxu1 %v8546_v6 }
 0xbe9   : > { %4260 = vmatprep.subr.mxu0 %v8547_v50  ;;  %4331 = vmatprep.subr.mxu1 %v8548_v15 }
 0xbea   : > { %4261 = vmatpush1.msra.mxu0 %v8549_v58  ;;  %4332 = vmatpush1.msra.mxu1 %v8550_v11 }
 0xbeb   : > { %4262 = vmatprep.subr.mxu0 %v8551_v14  ;;  %4333 = vmatprep.subr.mxu1 %v8552_v8  ;;  %v8573_v14 = vld [vmem:[#allocation48_spill] sm:$0xff] }
 0xbec   : > { %4263 = vmatpush1.msra.mxu0 %v8553_v45  ;;  %4334 = vmatpush1.msra.mxu1 %v8554_v43 }
 0xbed   : > { %4264 = vmatprep.subr.mxu0 %v8555_v31  ;;  %4335 = vmatprep.subr.mxu1 %v8556_v40  ;;  %v8564_v31 = vld [vmem:[#allocation25_spill] sm:$0xff]  ;;  %v3867_v40 = vpop.f32.mrf.mxu0 }
 0xbee   : > { %4265 = vmatpush1.msra.mxu0 %v8557_v1  ;;  %4336 = vmatpush1.msra.mxu1 %v8558_v16  ;;  %v3956_v1 = vpop.f32.mrf.mxu1 }
 0xbef   : > { %4266 = vmatprep.subr.mxu0 %v8559_v49  ;;  %4337 = vmatprep.subr.mxu1 %v8560_v41  ;;  %v3869_v43 = vpop.f32.mrf.mxu0 }
 0xbf0   : > { %4267 = vmatpush1.msra.mxu0 %v8561_v30  ;;  %4300 = vmatprep.mubr.f32.mxu0 %v8505_v44  ;;  %v3958_v16 = vpop.f32.mrf.mxu1 }
 0xbf1   : > { %4338 = vmatpush1.msra.mxu1 %v8562_v18  ;;  %4371 = vmatprep.mubr.f32.mxu1 %v8505_v44  ;;  %v7619_v45 = vpop.f32.mrf.mxu0 }
 0xbf2   : > { %4405 = vmatprep.subr.mxu0 %v8563_v10  ;;  %4476 = vmatprep.subr.mxu1 %v8564_v31  ;;  %8565 = vst [vmem:[#allocation31_spill] sm:$0xff] %v7619_v45  ;;  %v7621_v49 = vpop.f32.mrf.mxu1  ;;  %v3779_v31 = vld [vmem:[%s7914_s12] sm:$0xf] }
 0xbf3   : > { %8566 = vst [vmem:[#allocation42_spill] sm:$0xff] %v7621_v49  ;;  %v7623_v41 = vpop.f32.mrf.mxu0  ;;  %v7639_v45 = vrot.slane %v3779_v31, %v8573_v14 }
 0xbf4   : > { %8567 = vst [vmem:[#allocation32_spill] sm:$0xff] %v7623_v41  ;;  %v7625_v30 = vpop.f32.mrf.mxu1 }
 0xbf5   : > { %8568 = vst [vmem:[#allocation43_spill] sm:$0xff] %v7625_v30  ;;  %v7627_v8 = vpop.f32.mrf.mxu0  ;;  %8574 = vst [vmem:[#allocation52_spill] sm:$0xff] %v7639_v45  ;;  %v8577_v30 = vld [vmem:[#allocation49_spill] sm:$0xff] }
 0xbf6   : > { %8569 = vst [vmem:[#allocation53_spill] sm:$0xff] %v7627_v8  ;;  %v7629_v18 = vpop.f32.mrf.mxu1  ;;  %v7646_v11 = vrot.slane %v3779_v31, %v8577_v30 }
 0xbf7   : > { %8570 = vst [vmem:[#allocation62_spill] sm:$0xff] %v7629_v18  ;;  %v7634_v10 = vpop.f32.mrf.mxu0  ;;  %v3868_v18 = vadd.f32 %v3867_v40, %v7639_v45 }
 0xbf8   : > { %8571 = vst [vmem:[#allocation54_spill] sm:$0xff] %v7634_v10  ;;  %v7636_v44 = vpop.f32.mrf.mxu1  ;;  %8578 = vst [vmem:[#allocation59_spill] sm:$0xff] %v7646_v11  ;;  %v8581_v10 = vld [vmem:[#allocation56_spill] sm:$0xff]  ;;  %v3870_v14 = vadd.f32 %v3869_v43, %v7646_v11 }
 0xbf9   : > { %8572 = vst [vmem:[#allocation60_spill] sm:$0xff] %v7636_v44  ;;  %v7654_v50 = vrot.slane %v3779_v31, %v8581_v10 }
 0xbfb   : > { %8582 = vst [vmem:[#allocation55_spill] sm:$0xff] %v7654_v50  ;;  %v3957_v30 = vadd.f32 %v3956_v1, %v7654_v50  ;;  %v4062_v1 = vld [vmem:[#allocation6 + $0x10] sm:$0xff] }
 0xc8d   : > { %v7641_v49 = vpop.f32.mrf.mxu0  ;;  %v7643_v41 = vpop.f32.mrf.mxu1 }
 0xc8e   : > { %8575 = vst [vmem:[#allocation58_spill] sm:$0xff] %v7641_v49  ;;  %8576 = vst [vmem:[#allocation35_spill] sm:$0xff] %v7643_v41 }
 0xc8f   : > { %v7648_v8 = vpop.f32.mrf.mxu0  ;;  %v7651_v58 = vpop.f32.mrf.mxu1 }
 0xc90   : > { %8579 = vst [vmem:[#allocation61_spill] sm:$0xff] %v7648_v8  ;;  %8580 = vst [vmem:[#allocation65_spill] sm:$0xff] %v7651_v58  ;;  %v8583_v8 = vld [vmem:[#allocation57_spill] sm:$0xff] }
 0xc91   : > { %v4133_v15 = vpop.f32.mrf.mxu0  ;;  %v4204_v41 = vpop.f32.mrf.mxu1  ;;  %v7659_v55 = vrot.slane %v3779_v31, %v8583_v8 }
 0xc92   : > { %v4209_v44 = vadd.f32 %v4133_v15, %v3868_v18  ;;  %v4211_v40 = vadd.f32 %v4204_v41, %v3957_v30  ;;  %v8586_v30 = vld [vmem:[#allocation44_spill] sm:$0xff] }
 0xc93   : > { %v4135_v6 = vpop.f32.mrf.mxu0  ;;  %v4206_v58 = vpop.f32.mrf.mxu1  ;;  %v3959_v10 = vadd.f32 %v3958_v16, %v7659_v55 }
 0xc94   : > { %v4213_v49 = vmul.f32 0.5, %v4209_v44  ;;  %v4210_v2 = vadd.f32 %v4135_v6, %v3870_v14 }
 0xc95   : > { %v4212_v45 = vadd.f32 %v4206_v58, %v3959_v10  ;;  %v8588_v10 = vld [vmem:[#allocation36_spill] sm:$0xff] }
 0xc96   : > { %5312 = vtanh.f32 %v4213_v49  ;;  %v4217_v4 = vmul.f32 0.5, %v4210_v2 }
 0xc97   : > { %v4222_v43 = vmul.f32 0.5, %v4212_v45 }
 0xc98   : > { %5314 = vtanh.f32 %v4217_v4 }
 0xc99   : > { %5316 = vtanh.f32 %v4211_v40  ;;  %v8587_v40 = vld [vmem:[#allocation45_spill] sm:$0xff] }
 0xc9a   : > { %5318 = vtanh.f32 %v4222_v43  ;;  %v8589_v43 = vld [vmem:[#allocation64_spill] sm:$0xff] }
 0xca3   : > { %v5313_v15 = vpop.eup %5312 }
 0xca4   : > { %v4215_v18 = vmul.f32 0.5, %v5313_v15  ;;  %v8590_v15 = vld [vmem:[#allocation46_spill] sm:$0xff] }
 0xca5   : > { %v5315_v44 = vpop.eup %5314 }
 0xca6   : > { %v4216_v6 = vadd.f32 0.5, %v4215_v18  ;;  %v4219_v14 = vmul.f32 0.5, %v5315_v44  ;;  %v5317_v2 = vpop.eup %5316  ;;  %v8591_v18 = vld [vmem:[#allocation47_spill] sm:$0xff]  ;;  %v8592_v44 = vld [vmem:[#allocation37_spill] sm:$0xff] }
 0xca7   : > { %v5319_v4 = vpop.eup %5318 }
 0xca8   : > { %v4220_v49 = vadd.f32 0.5, %v4219_v14  ;;  %v4227_v8 = vmul.f32 %v5317_v2, %v4216_v6  ;;  %v4224_v16 = vmul.f32 0.5, %v5319_v4  ;;  %v8593_v6 = vld [vmem:[#allocation27_spill] sm:$0xff]  ;;  %v8599_v4 = vld [vmem:[#allocation28_spill] sm:$0xff] }
 0xca9   : > { %v8594_v14 = vld [vmem:[#allocation23_spill] sm:$0xff] }
 0xcaa   : > { %v4226_v50 = vmul.f32 %v4220_v49, %v4062_v1  ;;  %v4225_v41 = vadd.f32 0.5, %v4224_v16  ;;  %v8595_v1 = vld [vmem:[#allocation26_spill] sm:$0xff]  ;;  %v8597_v2 = vld [vmem:[#allocation51_spill] sm:$0xff] }
 0xcab   : > { %v8596_v49 = vld [vmem:[#allocation50_spill] sm:$0xff]  ;;  %v8600_v16 = vld [vmem:[#allocation39_spill] sm:$0xff] }
 0xcac   : > { %v7662_v31 = vadd.f32 %v4227_v8, %v4226_v50  ;;  %v8585_v50 = vld [vmem:[#allocation63_spill] sm:$0xff]  ;;  %v8598_v8 = vld [vmem:[#allocation38_spill] sm:$0xff] }
 0xcae   : > { %5320 = vtanh.f32 %v7662_v31 }
 0xcbb   : > { %v5321_v58 = vpop.eup %5320 }
 0xcbc   : > { %v7665_v45 = vmul.f32 %v5321_v58, %v4225_v41  ;;  %v8601_v41 = vld [vmem:[#allocation29_spill] sm:$0xff]  ;;  %v8602_v58 = vld [vmem:[#allocation40_spill] sm:$0xff] }
 0xcbe   : > { %8584 = vst [vmem:[#allocation33_spill] sm:$0xff] %v7665_v45  ;;  %4301 = vmatmul.mubr.f32.vlgmr.msra.gmra.mxu0 %v7665_v45  ;;  %4372 = vmatmul.mubr.f32.vlgmr.msra.gmra.mxu1 %v7665_v45  ;;  %v8603_v45 = vld [vmem:[#allocation30_spill] sm:$0xff] }
 0xcbf   : > { %4406 = vmatpush1.msra.mxu0 %v7354_v20  ;;  %4477 = vmatpush1.msra.mxu1 %v7356_v19 }
 0xcc0   : > { %4407 = vmatprep.subr.mxu0 %v7360_v39  ;;  %4478 = vmatprep.subr.mxu1 %v7362_v21 }
 0xcc1   : > { %4408 = vmatpush1.msra.mxu0 %v7366_v23  ;;  %4479 = vmatpush1.msra.mxu1 %v7368_v25 }
 0xcc2   : > { %4409 = vmatprep.subr.mxu0 %v7372_v26  ;;  %4480 = vmatprep.subr.mxu1 %v7374_v28 }
 0xcc3   : > { %4410 = vmatpush1.msra.mxu0 %v7378_v29  ;;  %4481 = vmatpush1.msra.mxu1 %v7380_v32 }
 0xcc4   : > { %4411 = vmatprep.subr.mxu0 %v7384_v33  ;;  %4482 = vmatprep.subr.mxu1 %v7386_v35 }
 0xcc5   : > { %4412 = vmatpush1.msra.mxu0 %v7390_v36  ;;  %4483 = vmatpush1.msra.mxu1 %v7392_v38 }
 0xcc6   : > { %4413 = vmatprep.subr.mxu0 %v7396_v42  ;;  %4484 = vmatprep.subr.mxu1 %v7398_v46 }
 0xcc7   : > { %4414 = vmatpush1.msra.mxu0 %v7402_v48  ;;  %4485 = vmatpush1.msra.mxu1 %v7404_v52 }
 0xcc8   : > { %4415 = vmatprep.subr.mxu0 %v7408_v54  ;;  %4486 = vmatprep.subr.mxu1 %v7410_v56 }
 0xcc9   : > { %4416 = vmatpush1.msra.mxu0 %v7414_v60  ;;  %4487 = vmatpush1.msra.mxu1 %v7416_v61 }
 0xcca   : > { %4417 = vmatprep.subr.mxu0 %v7418_v62  ;;  %4488 = vmatprep.subr.mxu1 %v7422_v63 }
 0xccb   : > { %4418 = vmatpush1.msra.mxu0 %v7424_v22  ;;  %4489 = vmatpush1.msra.mxu1 %v7426_v57 }
 0xccc   : > { %4419 = vmatprep.subr.mxu0 %v7432_v3  ;;  %4490 = vmatprep.subr.mxu1 %v7434_v9 }
 0xccd   : > { %4420 = vmatpush1.msra.mxu0 %v7438_v51  ;;  %4491 = vmatpush1.msra.mxu1 %v7440_v0 }
 0xcce   : > { %4421 = vmatprep.subr.mxu0 %v7444_v12  ;;  %4492 = vmatprep.subr.mxu1 %v7446_v7 }
 0xccf   : > { %4422 = vmatpush1.msra.mxu0 %v7450_v27  ;;  %4493 = vmatpush1.msra.mxu1 %v7452_v17 }
 0xcd0   : > { %4423 = vmatprep.subr.mxu0 %v7456_v47  ;;  %4494 = vmatprep.subr.mxu1 %v7458_v34 }
 0xcd1   : > { %4424 = vmatpush1.msra.mxu0 %v7462_v37  ;;  %4495 = vmatpush1.msra.mxu1 %v7464_v24 }
 0xcd2   : > { %4425 = vmatprep.subr.mxu0 %v7468_v59  ;;  %4496 = vmatprep.subr.mxu1 %v7470_v13 }
 0xcd3   : > { %4426 = vmatpush1.msra.mxu0 %v8541_v5  ;;  %4497 = vmatpush1.msra.mxu1 %v8542_v53 }
 0xcd4   : > { %4427 = vmatprep.subr.mxu0 %v8585_v50  ;;  %4498 = vmatprep.subr.mxu1 %v8586_v30 }
 0xcd5   : > { %4428 = vmatpush1.msra.mxu0 %v8587_v40  ;;  %4499 = vmatpush1.msra.mxu1 %v8588_v10 }
 0xcd6   : > { %4429 = vmatprep.subr.mxu0 %v8589_v43  ;;  %4500 = vmatprep.subr.mxu1 %v8590_v15  ;;  %v8611_v15 = vld [vmem:[#allocation55_spill] sm:$0xff]  ;;  %v8612_v43 = vld [vmem:[#allocation42_spill] sm:$0xff] }
 0xcd7   : > { %4430 = vmatpush1.msra.mxu0 %v8591_v18  ;;  %4501 = vmatpush1.msra.mxu1 %v8592_v44  ;;  %v3963_v10 = vadd.f32 %v8612_v43, %v8611_v15 }
 0xcd8   : > { %4431 = vmatprep.subr.mxu0 %v8593_v6  ;;  %4502 = vmatprep.subr.mxu1 %v8594_v14  ;;  %v8604_v6 = vmov 0.0   ;;  %v8605_v14 = vld [vmem:[#allocation41_spill] sm:$0xff] }
 0xcd9   : > { %4432 = vmatpush1.msra.mxu0 %v8595_v1  ;;  %4503 = vmatpush1.msra.mxu1 %v8596_v49  ;;  %v8606_v49 = vld [vmem:[#allocation24_spill] sm:$0xff] }
 0xcda   : > { %4433 = vmatprep.subr.mxu0 %v8597_v2  ;;  %4504 = vmatprep.subr.mxu1 %v8598_v8  ;;  %v8607_v2 = vld [vmem:[#allocation25_spill] sm:$0xff]  ;;  %v8608_v8 = vld [vmem:[#allocation52_spill] sm:$0xff] }
 0xcdb   : > { %4434 = vmatpush1.msra.mxu0 %v8599_v4  ;;  %4505 = vmatpush1.msra.mxu1 %v8600_v16  ;;  %v8609_v4 = vld [vmem:[#allocation31_spill] sm:$0xff] }
 0xcdc   : > { %4435 = vmatprep.subr.mxu0 %v8601_v41  ;;  %4506 = vmatprep.subr.mxu1 %v8602_v58  ;;  %v3874_v1 = vadd.f32 %v8609_v4, %v8608_v8  ;;  %v8610_v41 = vld [vmem:[#allocation32_spill] sm:$0xff]  ;;  %v8613_v4 = vld [vmem:[#allocation43_spill] sm:$0xff] }
 0xcdd   : > { %4436 = vmatpush1.msra.mxu0 %v8603_v45  ;;  %4469 = vmatprep.mubr.f32.mxu0 %v8604_v6  ;;  %v3876_v44 = vadd.f32 %v8610_v41, %v7646_v11  ;;  %v3965_v8 = vadd.f32 %v8613_v4, %v7659_v55 }
 0xcde   : > { %4507 = vmatpush1.msra.mxu1 %v8605_v14  ;;  %4540 = vmatprep.mubr.f32.mxu1 %v8604_v6 }
 0xcdf   : > { %4574 = vmatprep.subr.mxu0 %v8606_v49  ;;  %4645 = vmatprep.subr.mxu1 %v8607_v2 }
 0xd7e   : > { %v4302_v16 = vpop.f32.mrf.mxu0  ;;  %v4373_v18 = vpop.f32.mrf.mxu1 }
 0xd7f   : > { %v4378_v58 = vadd.f32 %v4302_v16, %v3874_v1  ;;  %v4380_v6 = vadd.f32 %v4373_v18, %v3963_v10 }
 0xd80   : > { %v4304_v45 = vpop.f32.mrf.mxu0  ;;  %v4375_v2 = vpop.f32.mrf.mxu1 }
 0xd81   : > { %v4382_v14 = vmul.f32 0.5, %v4378_v58  ;;  %v4379_v40 = vadd.f32 %v4304_v45, %v3876_v44  ;;  %v4381_v30 = vadd.f32 %v4375_v2, %v3965_v8 }
 0xd83   : > { %5322 = vtanh.f32 %v4382_v14  ;;  %v4386_v49 = vmul.f32 0.5, %v4379_v40  ;;  %v4391_v50 = vmul.f32 0.5, %v4381_v30 }
 0xd85   : > { %5324 = vtanh.f32 %v4386_v49 }
 0xd86   : > { %5326 = vtanh.f32 %v4380_v6 }
 0xd87   : > { %5328 = vtanh.f32 %v4391_v50 }
 0xd90   : > { %v5323_v41 = vpop.eup %5322 }
 0xd91   : > { %v4384_v1 = vmul.f32 0.5, %v5323_v41 }
 0xd92   : > { %v5325_v16 = vpop.eup %5324 }
 0xd93   : > { %v4385_v11 = vadd.f32 0.5, %v4384_v1  ;;  %v4388_v53 = vmul.f32 0.5, %v5325_v16  ;;  %v5327_v43 = vpop.eup %5326 }
 0xd94   : > { %v5329_v18 = vpop.eup %5328 }
 0xd95   : > { %v4389_v58 = vadd.f32 0.5, %v4388_v53  ;;  %v4396_v45 = vmul.f32 %v5327_v43, %v4385_v11  ;;  %v4393_v44 = vmul.f32 0.5, %v5329_v18 }
 0xd97   : > { %v4395_v10 = vmul.f32 %v4389_v58, %v7662_v31  ;;  %v4394_v6 = vadd.f32 0.5, %v4393_v44 }
 0xd99   : > { %v7744_v40 = vadd.f32 %v4396_v45, %v4395_v10 }
 0xd9b   : > { %5330 = vtanh.f32 %v7744_v40 }
 0xda8   : > { %v5331_v14 = vpop.eup %5330 }
 0xda9   : > { %v7747_v30 = vmul.f32 %v5331_v14, %v4394_v6  ;;  %v4759_v14 = vld [vmem:[%s7915_s13 + $0x70] sm:$0xff] }
 0xdab   : > { %4470 = vmatmul.mubr.f32.vlgmr.msra.gmra.mxu0 %v7747_v30  ;;  %4541 = vmatmul.mubr.f32.vlgmr.msra.gmra.mxu1 %v7747_v30 }
 0xdac   : > { %4575 = vmatpush1.msra.mxu0 %v7354_v20  ;;  %4646 = vmatpush1.msra.mxu1 %v7356_v19  ;;  %v8614_v20 = vld [vmem:[#allocation34_spill] sm:$0xff]  ;;  %v8615_v19 = vld [vmem:[#allocation63_spill] sm:$0xff] }
 0xdad   : > { %4576 = vmatprep.subr.mxu0 %v7360_v39  ;;  %4647 = vmatprep.subr.mxu1 %v7362_v21  ;;  %v8616_v39 = vld [vmem:[#allocation44_spill] sm:$0xff]  ;;  %v8617_v21 = vld [vmem:[#allocation45_spill] sm:$0xff] }
 0xdae   : > { %4577 = vmatpush1.msra.mxu0 %v7366_v23  ;;  %4648 = vmatpush1.msra.mxu1 %v7368_v25  ;;  %v8618_v23 = vld [vmem:[#allocation36_spill] sm:$0xff] }
 0xdaf   : > { %4578 = vmatprep.subr.mxu0 %v7372_v26  ;;  %4649 = vmatprep.subr.mxu1 %v7374_v28  ;;  %v8619_v25 = vld [vmem:[#allocation64_spill] sm:$0xff]  ;;  %v8620_v26 = vld [vmem:[#allocation46_spill] sm:$0xff]  ;;  %v8621_v28 = vld [vmem:[#allocation47_spill] sm:$0xff] }
 0xdb0   : > { %4579 = vmatpush1.msra.mxu0 %v7378_v29  ;;  %4650 = vmatpush1.msra.mxu1 %v7380_v32  ;;  %v8622_v29 = vld [vmem:[#allocation37_spill] sm:$0xff]  ;;  %v8623_v32 = vld [vmem:[#allocation27_spill] sm:$0xff] }
 0xdb1   : > { %4580 = vmatprep.subr.mxu0 %v7384_v33  ;;  %4651 = vmatprep.subr.mxu1 %v7386_v35  ;;  %v8624_v33 = vld [vmem:[#allocation23_spill] sm:$0xff]  ;;  %v8625_v35 = vld [vmem:[#allocation26_spill] sm:$0xff] }
 0xdb2   : > { %4581 = vmatpush1.msra.mxu0 %v7390_v36  ;;  %4652 = vmatpush1.msra.mxu1 %v7392_v38  ;;  %v8626_v36 = vld [vmem:[#allocation50_spill] sm:$0xff]  ;;  %v8627_v38 = vld [vmem:[#allocation51_spill] sm:$0xff] }
 0xdb3   : > { %4582 = vmatprep.subr.mxu0 %v7396_v42  ;;  %4653 = vmatprep.subr.mxu1 %v7398_v46  ;;  %v8628_v42 = vld [vmem:[#allocation38_spill] sm:$0xff]  ;;  %v8629_v46 = vld [vmem:[#allocation28_spill] sm:$0xff] }
 0xdb4   : > { %4583 = vmatpush1.msra.mxu0 %v7402_v48  ;;  %4654 = vmatpush1.msra.mxu1 %v7404_v52  ;;  %v8630_v48 = vld [vmem:[#allocation39_spill] sm:$0xff]  ;;  %v8631_v52 = vld [vmem:[#allocation29_spill] sm:$0xff] }
 0xdb5   : > { %4584 = vmatprep.subr.mxu0 %v7408_v54  ;;  %4655 = vmatprep.subr.mxu1 %v7410_v56  ;;  %v8632_v54 = vld [vmem:[#allocation40_spill] sm:$0xff]  ;;  %v8633_v56 = vld [vmem:[#allocation30_spill] sm:$0xff] }
 0xdb6   : > { %4585 = vmatpush1.msra.mxu0 %v7414_v60  ;;  %4656 = vmatpush1.msra.mxu1 %v7416_v61  ;;  %v8634_v60 = vmov 0.0   ;;  %v8635_v61 = vld [vmem:[#allocation41_spill] sm:$0xff] }
 0xdb7   : > { %4586 = vmatprep.subr.mxu0 %v7418_v62  ;;  %4657 = vmatprep.subr.mxu1 %v7422_v63  ;;  %v4760_v62 = vld [vmem:[%s7915_s13 + $0x78] sm:$0xff]  ;;  %v8636_v63 = vld [vmem:[#allocation52_spill] sm:$0xff] }
 0xdb8   : > { %4587 = vmatpush1.msra.mxu0 %v7424_v22  ;;  %4658 = vmatpush1.msra.mxu1 %v7426_v57  ;;  %v8637_v22 = vld [vmem:[#allocation53_spill] sm:$0xff] }
 0xdb9   : > { %4588 = vmatprep.subr.mxu0 %v7432_v3  ;;  %4659 = vmatprep.subr.mxu1 %v7434_v9  ;;  %v3880_v57 = vadd.f32 %v8637_v22, %v8636_v63  ;;  %v8638_v9 = vld [vmem:[#allocation59_spill] sm:$0xff] }
 0xdba   : > { %4589 = vmatpush1.msra.mxu0 %v7438_v51  ;;  %4660 = vmatpush1.msra.mxu1 %v7440_v0  ;;  %v8639_v51 = vld [vmem:[#allocation54_spill] sm:$0xff] }
 0xdbb   : > { %4590 = vmatprep.subr.mxu0 %v7444_v12  ;;  %4661 = vmatprep.subr.mxu1 %v7446_v7  ;;  %v3882_v0 = vadd.f32 %v8639_v51, %v8638_v9 }
 0xdbc   : > { %4591 = vmatpush1.msra.mxu0 %v7450_v27  ;;  %4662 = vmatpush1.msra.mxu1 %v7452_v17  ;;  %v8640_v17 = vld [vmem:[#allocation62_spill] sm:$0xff] }
 0xdbd   : > { %4592 = vmatprep.subr.mxu0 %v7456_v47  ;;  %4663 = vmatprep.subr.mxu1 %v7458_v34  ;;  %v3969_v47 = vadd.f32 %v8640_v17, %v8611_v15 }
 0xdbe   : > { %4593 = vmatpush1.msra.mxu0 %v7462_v37  ;;  %4664 = vmatpush1.msra.mxu1 %v7464_v24 }
 0xdbf   : > { %4594 = vmatprep.subr.mxu0 %v7468_v59  ;;  %4665 = vmatprep.subr.mxu1 %v7470_v13 }
 0xdc0   : > { %4595 = vmatpush1.msra.mxu0 %v8541_v5  ;;  %4666 = vmatpush1.msra.mxu1 %v8614_v20  ;;  %v8641_v5 = vld [vmem:[#allocation60_spill] sm:$0xff]  ;;  %v8642_v20 = vld [vmem:[#allocation33_spill] sm:$0xff] }
 0xdc1   : > { %4596 = vmatprep.subr.mxu0 %v8615_v19  ;;  %4667 = vmatprep.subr.mxu1 %v8616_v39  ;;  %v3971_v53 = vadd.f32 %v8641_v5, %v7659_v55  ;;  %v4757_v19 = vld [vmem:[%s7915_s13 + $0x60] sm:$0xff]  ;;  %v4756_v39 = vld [vmem:[%s7915_s13 + $0x58] sm:$0xff] }
 0xdc2   : > { %4597 = vmatpush1.msra.mxu0 %v8617_v21  ;;  %4668 = vmatpush1.msra.mxu1 %v8618_v23  ;;  %v4755_v21 = vld [vmem:[%s7915_s13 + $0x50] sm:$0xff]  ;;  %v4754_v23 = vld [vmem:[%s7915_s13 + $0x48] sm:$0xff] }
 0xdc3   : > { %4598 = vmatprep.subr.mxu0 %v8619_v25  ;;  %4669 = vmatprep.subr.mxu1 %v8620_v26  ;;  %v4753_v25 = vld [vmem:[%s7915_s13 + $0x40] sm:$0xff]  ;;  %v4752_v26 = vld [vmem:[%s7915_s13 + $0x38] sm:$0xff] }
 0xdc4   : > { %4599 = vmatpush1.msra.mxu0 %v8621_v28  ;;  %4670 = vmatpush1.msra.mxu1 %v8622_v29  ;;  %v4751_v28 = vld [vmem:[%s7915_s13 + $0x30] sm:$0xff]  ;;  %v4750_v29 = vld [vmem:[%s7915_s13 + $0x28] sm:$0xff] }
 0xdc5   : > { %4600 = vmatprep.subr.mxu0 %v8623_v32  ;;  %4671 = vmatprep.subr.mxu1 %v8624_v33  ;;  %v4749_v32 = vld [vmem:[%s7915_s13 + $0x20] sm:$0xff]  ;;  %v4748_v33 = vld [vmem:[%s7915_s13 + $0x18] sm:$0xff] }
 0xdc6   : > { %4601 = vmatpush1.msra.mxu0 %v8625_v35  ;;  %4672 = vmatpush1.msra.mxu1 %v8626_v36  ;;  %v4747_v35 = vld [vmem:[%s7915_s13 + $0x10] sm:$0xff]  ;;  %v4746_v36 = vld [vmem:[%s7915_s13 + $0x8] sm:$0xff] }
 0xdc7   : > { %4602 = vmatprep.subr.mxu0 %v8627_v38  ;;  %4673 = vmatprep.subr.mxu1 %v8628_v42  ;;  %v4745_v38 = vld [vmem:[%s7915_s13] sm:$0xff]  ;;  %v8643_v42 = vld [vmem:[#allocation58_spill] sm:$0xff] }
 0xdc8   : > { %4603 = vmatpush1.msra.mxu0 %v8629_v46  ;;  %4674 = vmatpush1.msra.mxu1 %v8630_v48  ;;  %v3886_v46 = vadd.f32 %v8643_v42, %v8636_v63  ;;  %v8646_v63 = vld [vmem:[#allocation65_spill] sm:$0xff] }
 0xdc9   : > { %4604 = vmatprep.subr.mxu0 %v8631_v52  ;;  %4675 = vmatprep.subr.mxu1 %v8632_v54  ;;  %v8644_v52 = vld [vmem:[#allocation61_spill] sm:$0xff] }
 0xdca   : > { %4605 = vmatpush1.msra.mxu0 %v8633_v56  ;;  %4638 = vmatprep.mubr.f32.mxu0 %v8634_v60  ;;  %v3888_v54 = vadd.f32 %v8644_v52, %v8638_v9 }
 0xdcb   : > { %4676 = vmatpush1.msra.mxu1 %v8635_v61  ;;  %4709 = vmatprep.mubr.f32.mxu1 %v8634_v60 }
 0xdcc   : > { %5055 = vmatprep.subr.mxu0 %v4760_v62 }
 0xe6b   : > { %v4471_v3 = vpop.f32.mrf.mxu0  ;;  %v4542_v7 = vpop.f32.mrf.mxu1 }
 0xe6c   : > { %v4547_v12 = vadd.f32 %v4471_v3, %v3880_v57  ;;  %v4549_v24 = vadd.f32 %v4542_v7, %v3969_v47 }
 0xe6d   : > { %v4473_v27 = vpop.f32.mrf.mxu0  ;;  %v4544_v13 = vpop.f32.mrf.mxu1 }
 0xe6e   : > { %v4551_v34 = vmul.f32 0.5, %v4547_v12  ;;  %v4548_v37 = vadd.f32 %v4473_v27, %v3882_v0  ;;  %v4550_v11 = vadd.f32 %v4544_v13, %v3971_v53  ;;  %v3977_v12 = vadd.f32 %v8646_v63, %v7659_v55  ;;  %v5032_v55 = vld [vmem:[%s7916_s14] ss:$0 sm:$0xff] }
 0xe70   : > { %5332 = vtanh.f32 %v4551_v34  ;;  %v4555_v59 = vmul.f32 0.5, %v4548_v37  ;;  %v4560_v31 = vmul.f32 0.5, %v4550_v11 }
 0xe72   : > { %5334 = vtanh.f32 %v4555_v59 }
 0xe73   : > { %5336 = vtanh.f32 %v4549_v24 }
 0xe74   : > { %5338 = vtanh.f32 %v4560_v31 }
 0xe7d   : > { %v5333_v50 = vpop.eup %5332 }
 0xe7e   : > { %v4553_v8 = vmul.f32 0.5, %v5333_v50 }
 0xe7f   : > { %v5335_v49 = vpop.eup %5334 }
 0xe80   : > { %v4554_v2 = vadd.f32 0.5, %v4553_v8  ;;  %v4557_v4 = vmul.f32 0.5, %v5335_v49  ;;  %v5337_v41 = vpop.eup %5336 }
 0xe81   : > { %v5339_v45 = vpop.eup %5338 }
 0xe82   : > { %v4558_v1 = vadd.f32 0.5, %v4557_v4  ;;  %v4565_v16 = vmul.f32 %v5337_v41, %v4554_v2  ;;  %v4562_v10 = vmul.f32 0.5, %v5339_v45 }
 0xe84   : > { %v4564_v43 = vmul.f32 %v4558_v1, %v7744_v40  ;;  %v4563_v18 = vadd.f32 0.5, %v4562_v10  ;;  %v4758_v40 = vld [vmem:[%s7915_s13 + $0x68] sm:$0xff] }
 0xe86   : > { %v7827_v58 = vadd.f32 %v4565_v16, %v4564_v43 }
 0xe88   : > { %5340 = vtanh.f32 %v7827_v58 }
 0xe95   : > { %v5341_v44 = vpop.eup %5340 }
 0xe96   : > { %v4568_v6 = vmul.f32 %v5341_v44, %v4563_v18 }
 0xe98   : > { %4639 = vmatmul.mubr.f32.vlgmr.msra.gmra.mxu0 %v4568_v6  ;;  %4710 = vmatmul.mubr.f32.vlgmr.msra.gmra.mxu1 %v4568_v6 }
 0xe99   : > { %5056 = vmatpush3.msra.mxu0 %v4760_v62  ;;  %5087 = vmatprep.mubr.f32.mxu0 %v8642_v20  ;;  %v8645_v62 = vld [vmem:[#allocation35_spill] sm:$0xff] }
 0xe9a   : > { %5057 = vmatprep.subr.mxu0 %v4759_v14  ;;  %v3975_v22 = vadd.f32 %v8645_v62, %v8611_v15 }
 0xe9b   : > { %5058 = vmatpush3.msra.mxu0 %v4759_v14 }
 0xe9c   : > { %5059 = vmatprep.subr.mxu0 %v4758_v40 }
 0xe9d   : > { %5060 = vmatpush3.msra.mxu0 %v4758_v40 }
 0xe9e   : > { %5061 = vmatprep.subr.mxu0 %v4757_v19 }
 0xe9f   : > { %5062 = vmatpush3.msra.mxu0 %v4757_v19 }
 0xea0   : > { %5063 = vmatprep.subr.mxu0 %v4756_v39 }
 0xea1   : > { %5064 = vmatpush3.msra.mxu0 %v4756_v39 }
 0xea2   : > { %5065 = vmatprep.subr.mxu0 %v4755_v21 }
 0xea3   : > { %5066 = vmatpush3.msra.mxu0 %v4755_v21 }
 0xea4   : > { %5067 = vmatprep.subr.mxu0 %v4754_v23 }
 0xea5   : > { %5068 = vmatpush3.msra.mxu0 %v4754_v23 }
 0xea6   : > { %5069 = vmatprep.subr.mxu0 %v4753_v25 }
 0xea7   : > { %5070 = vmatpush3.msra.mxu0 %v4753_v25 }
 0xea8   : > { %5071 = vmatprep.subr.mxu0 %v4752_v26 }
 0xea9   : > { %5072 = vmatpush3.msra.mxu0 %v4752_v26 }
 0xeaa   : > { %5073 = vmatprep.subr.mxu0 %v4751_v28 }
 0xeab   : > { %5074 = vmatpush3.msra.mxu0 %v4751_v28 }
 0xeac   : > { %5075 = vmatprep.subr.mxu0 %v4750_v29 }
 0xead   : > { %5076 = vmatpush3.msra.mxu0 %v4750_v29 }
 0xeae   : > { %5077 = vmatprep.subr.mxu0 %v4749_v32 }
 0xeaf   : > { %5078 = vmatpush3.msra.mxu0 %v4749_v32 }
 0xeb0   : > { %5079 = vmatprep.subr.mxu0 %v4748_v33 }
 0xeb1   : > { %5080 = vmatpush3.msra.mxu0 %v4748_v33 }
 0xeb2   : > { %5081 = vmatprep.subr.mxu0 %v4747_v35 }
 0xeb3   : > { %5082 = vmatpush3.msra.mxu0 %v4747_v35 }
 0xeb4   : > { %5083 = vmatprep.subr.mxu0 %v4746_v36 }
 0xeb5   : > { %5084 = vmatpush3.msra.mxu0 %v4746_v36 }
 0xeb6   : > { %5085 = vmatprep.subr.mxu0 %v4745_v38 }
 0xeb7   : > { %5086 = vmatpush3.msra.mxu0 %v4745_v38 }
 0xeb8   : > { %5088 = vmatmul.mubr.f32.vlgmr.msra.gmra.mxu0 %v7747_v30 }
 0xeb9   : > { %5090 = vmatprep.mubr.f32.mxu0 %v4568_v6 }
 0xf58   : > { %v4640_v48 = vpop.f32.mrf.mxu0  ;;  %v4711_v60 = vpop.f32.mrf.mxu1 }
 0xf59   : > { %v4716_v56 = vadd.f32 %v4640_v48, %v3886_v46  ;;  %v4718_v51 = vadd.f32 %v4711_v60, %v3975_v22 }
 0xf5a   : > { %v4642_v61 = vpop.f32.mrf.mxu0  ;;  %v4713_v30 = vpop.f32.mrf.mxu1 }
 0xf5b   : > { %v4720_v57 = vmul.f32 0.5, %v4716_v56  ;;  %v4717_v3 = vadd.f32 %v4642_v61, %v3888_v54  ;;  %v4719_v7 = vadd.f32 %v4713_v30, %v3977_v12 }
 0xf5d   : > { %5342 = vtanh.f32 %v4720_v57  ;;  %v4724_v0 = vmul.f32 0.5, %v4717_v3  ;;  %v4729_v27 = vmul.f32 0.5, %v4719_v7 }
 0xf5f   : > { %5344 = vtanh.f32 %v4724_v0 }
 0xf60   : > { %5346 = vtanh.f32 %v4718_v51 }
 0xf61   : > { %5348 = vtanh.f32 %v4729_v27 }
 0xf6a   : > { %v5343_v9 = vpop.eup %5342 }
 0xf6b   : > { %v4722_v17 = vmul.f32 0.5, %v5343_v9 }
 0xf6c   : > { %v5345_v47 = vpop.eup %5344 }
 0xf6d   : > { %v4723_v34 = vadd.f32 0.5, %v4722_v17  ;;  %v4726_v37 = vmul.f32 0.5, %v5345_v47  ;;  %v5347_v15 = vpop.eup %5346 }
 0xf6e   : > { %v5349_v11 = vpop.eup %5348 }
 0xf6f   : > { %v4727_v24 = vadd.f32 0.5, %v4726_v37  ;;  %v4734_v59 = vmul.f32 %v5347_v15, %v4723_v34  ;;  %v4731_v49 = vmul.f32 0.5, %v5349_v11 }
 0xf71   : > { %v4733_v13 = vmul.f32 %v4727_v24, %v7827_v58  ;;  %v4732_v2 = vadd.f32 0.5, %v4731_v49 }
 0xf73   : > { %v4735_v5 = vadd.f32 %v4734_v59, %v4733_v13 }
 0xf75   : > { %5350 = vtanh.f32 %v4735_v5  ;;  %4740 = vst [vmem:[#allocation6 + $0x10] sm:$0xff] %v4735_v5 }
 0xf78   : > { %v5089_v53 = vpop.f32.mrf.mxu0 }
 0xf79   : > { %v4840_v8 = vadd.f32 %v5089_v53, %v5032_v55 }
 0xf7a   : > { %v4834_v31 = vpop.f32.mrf.mxu0 }
 0xf7b   : > { %v4835_v50 = vadd.f32 %v5032_v55, %v4834_v31  ;;  %4854 = vst [vmem:[%s5819_s10 + $0x8] sm:$0xff] %v4840_v8 }
 0xf7d   : > { %4853 = vst [vmem:[%s5819_s10] sm:$0xff] %v4835_v50 }
 0xf82   : > { %v5351_v4 = vpop.eup %5350 }
 0xf83   : > { %v4737_v41 = vmul.f32 %v5351_v4, %v4732_v2 }
 0xf85   : > { %4739 = vst [vmem:[#allocation5 + $0x8] sm:$0xff] %v4737_v41  ;;  %5091 = vmatmul.mubr.f32.gmra.mxu0 %v4737_v41 }
0x1045   : > { %v5092_v1 = vpop.f32.mrf.mxu0 }
0x1046   : > { %v4850_v58 = vadd.f32 %v5092_v1, %v5032_v55 }
0x1047   : > { %v4844_v16 = vpop.f32.mrf.mxu0 }
0x1048   : > { %v4845_v43 = vadd.f32 %v5032_v55, %v4844_v16  ;;  %4856 = vst [vmem:[%s5819_s10 + $0x18] sm:$0xff] %v4850_v58 }
0x104a   : > { %4855 = vst [vmem:[%s5819_s10 + $0x10] sm:$0xff] %v4845_v43 }
0x104b PF: > { %s8647_s4 = sld [smem:[#allocation22_spill]]  ;;  %s8648_s18 = smov %s5568_s19 }
0x104c   : > { %s8649_s19 = smov %s8651_s27 }
0x1051   : > { %s29_s20 = sadd.s32 1, %s8647_s4  }
0x1052   : > { %p26_p2 = scmp.ge.s32.totalorder %s29_s20, 4  }
0x1054   :  { %28 = sbr.rel (!%p26_p2) target bundleno = 9 (0x9), region = 159 }
0x1059   :  { %4885 = vsyncpa [#allocation8], 1 }
0x105a   :  { %4887 = vsyncpa [#allocation8 + $0x1], 1 }
0x105b   :  { %4888 = vsyncpa [#allocation10], 1 }
0x105c   :  { %4889 = vsyncpa [#allocation13], 1 }
0x105d   :  { %4890 = vsyncpa [#allocation16], 1 }

</bundles_post_ra>
